<compile_context>
chip_gen: v6e
topology: v6e:2x2x1
jax: 0.10.0
libtpu: 0.0.40
codegen_flags: <defaults>
</compile_context>

<pallas_src>
import jax
import jax.numpy as jnp
from jax.experimental import pallas as pl
from jax.experimental.pallas import tpu as pltpu

_LANE = 128
_SUBLANE = 8


def _round_up(x, m):
    return -(-x // m) * m


class _LayerCfg:
    """Static per-layer geometry (drives kernel codegen)."""

    def __init__(self, c_in, c_out, k, stride, padding, l_in, lrelu):
        self.c_in, self.c_out, self.k = c_in, c_out, k
        self.stride, self.padding, self.l_in = stride, padding, l_in
        self.lrelu = lrelu
        self.l_out = (l_in + 2 * padding - k) // stride + 1
        self.n_q = -(-k // stride)             # taps per lane-offset group
        self.kp = self.n_q * stride            # K zero-padded to a stride multiple
        self.c_in_p = _round_up(c_in, _SUBLANE)
        self.c_out_p = _round_up(c_out, _SUBLANE)
        # left zero-pad rounded up to a 128-lane multiple -> aligned scratch store
        self.pad_l = padding + ((-padding) % _LANE)
        if stride > 1 and (self.pad_l - padding) % stride:
            self.pad_l = padding               # rare fallback: keep phase alignment
        self.d = self.pad_l - padding          # constant extra left shift of reads
        # width of the (phase-split) activation the im2col slices index into
        self.mp = self.l_out + self.n_q - 1
        need = max(self.d + stride * self.mp + (stride - 1), self.pad_l + l_in)
        self.l_pad = _round_up(need, _LANE)    # padded scratch width


def _prep_layer_params(cfg, w, b, cdtype):
    """Conv1d weights -> im2col weight slab (+ bias column, + phase selector)."""
    w_p = jnp.pad(w.astype(jnp.float32),
                  ((0, cfg.c_out_p - cfg.c_out),
                   (0, cfg.c_in_p - cfg.c_in),
                   (0, cfg.kp - cfg.k)))
    # slab[co, k*C_in_p + c] = w[co, c, k]   with k = q*stride + r
    w_slab = w_p.transpose(0, 2, 1).reshape(cfg.c_out_p, cfg.kp * cfg.c_in_p)
    b_col = jnp.pad(b.astype(jnp.float32),
                    (0, cfg.c_out_p - cfg.c_out)).reshape(cfg.c_out_p, 1)
    sel = None
    if cfg.stride > 1:
        # sel[m, j] = 1 iff m == stride*j : x_phase_r = x_pad[:, d+r : ...] @ sel
        m = jnp.arange(cfg.stride * cfg.mp)[:, None]
        j = jnp.arange(cfg.mp)[None, :]
        sel = (m == cfg.stride * j).astype(cdtype)       # exact in bf16 (0/1)
    return w_slab.astype(cdtype), b_col, sel


def _make_fused_kernel(cfgs):
    n_layers = len(cfgs)
    n_param = sum(3 if c.stride > 1 else 2 for c in cfgs)

    def kernel(*refs):
        x_ref = refs[0]
        param_refs = refs[1:1 + n_param]
        out_ref = refs[1 + n_param]
        pad_bufs = refs[2 + n_param:]

        act = x_ref[0]                                   # (C0_p, L0) compute dtype
        cdtype = act.dtype
        y = None
        p = 0
        for i, cfg in enumerate(cfgs):
            w_slab = param_refs[p][...]
            b_col = param_refs[p + 1][...]
            p += 2
            sel_ref = None
            if cfg.stride > 1:
                sel_ref = param_refs[p]
                p += 1

            # ---- zero-padded activation in a VMEM scratch buffer ----------
            buf = pad_bufs[i]
            buf[...] = jnp.zeros(buf.shape, buf.dtype)   # keep halo zero
            buf[:, pl.ds(cfg.pad_l, cfg.l_in)] = act     # 128-aligned interior
            x_pad = buf[...]                             # (C_in_p, L_pad)

            # ---- phase split for strided layers: exact selection matmul ---
            if cfg.stride == 1:
                x_ph, base = x_pad, cfg.d
            else:
                sel = sel_ref[...]
                phases = [
                    jnp.dot(x_pad[:, cfg.d + r:cfg.d + r + cfg.stride * cfg.mp],
                            sel, preferred_element_type=jnp.float32
                            ).astype(cdtype)
                    for r in range(cfg.stride)
                ]
                x_ph, base = jnp.concatenate(phases, axis=0), 0  # (S*C_in_p, Mp)

            # ---- im2col (taps on sublanes) -> ONE deep MXU matmul ----------
            rhs = jnp.concatenate(
                [x_ph[:, base + q:base + q + cfg.l_out] for q in range(cfg.n_q)],
                axis=0)                                   # (Kp*C_in_p, L_out)
            y = jnp.dot(w_slab, rhs,
                        preferred_element_type=jnp.float32) + b_col
            if cfg.lrelu:
                y = jnp.maximum(y, 0.1 * y)               # LeakyReLU(0.1), 2 ops
            if i + 1 < n_layers:
                act = y.astype(cdtype)

        out_ref[0] = y.astype(out_ref.dtype)

    return kernel


def discriminator_forward(params, x, *, compute_dtype=jnp.bfloat16,
                          out_dtype=jnp.float32):
    """Fused forward pass of the Discriminator (single pallas_call)."""
    B, c0, L = x.shape
    layer_list = list(params["layers"]) + list(params["to_logits"])
    n = len(layer_list)
    cdtype = jnp.dtype(compute_dtype)

    cfgs = []
    c_in, l_in = c0, L
    for i, lp in enumerate(layer_list):
        c_out, c_in_w, k = lp["w"].shape
        assert c_in_w == c_in
        cfg = _LayerCfg(c_in, c_out, k, lp["stride"], lp["padding"], l_in,
                        lrelu=(i + 1 < n))
        cfgs.append(cfg)
        c_in, l_in = cfg.c_out, cfg.l_out
    last = cfgs[-1]

    # ---- inputs: channel-padded activation + per-layer resident params ----
    c0_p = cfgs[0].c_in_p
    x_in = jnp.pad(x, ((0, 0), (0, c0_p - c0), (0, 0))).astype(cdtype)

    inputs = [x_in]
    in_specs = [pl.BlockSpec((1, c0_p, L), lambda b: (b, 0, 0))]
    for cfg, lp in zip(cfgs, layer_list):
        w_slab, b_col, sel = _prep_layer_params(cfg, lp["w"], lp["b"], cdtype)
        inputs += [w_slab, b_col]
        in_specs += [pl.BlockSpec(w_slab.shape, lambda b: (0, 0)),
                     pl.BlockSpec(b_col.shape, lambda b: (0, 0))]
        if sel is not None:
            inputs.append(sel)
            in_specs.append(pl.BlockSpec(sel.shape, lambda b: (0, 0)))

    out_shape = jax.ShapeDtypeStruct((B, last.c_out_p, last.l_out), out_dtype)
    out_spec = pl.BlockSpec((1, last.c_out_p, last.l_out), lambda b: (b, 0, 0))
    scratch = [pltpu.VMEM((cfg.c_in_p, cfg.l_pad), cdtype) for cfg in cfgs]

    # ---- VMEM budget derived from the real footprint (v7x-safe) -----------
    itm = cdtype.itemsize
    resident = 2 * c0_p * L * itm                                   # input block x2
    resident += sum(2 * a.size * a.dtype.itemsize for a in inputs[1:])
    resident += 2 * last.c_out_p * last.l_out * jnp.dtype(out_dtype).itemsize
    resident += sum(cfg.c_in_p * cfg.l_pad * itm for cfg in cfgs)   # pad scratch
    tmp = 0
    for cfg in cfgs:
        t = cfg.kp * cfg.c_in_p * cfg.l_out * itm                   # im2col RHS
        t += 2 * cfg.c_out_p * cfg.l_out * 4                        # f32 result/act
        if cfg.stride > 1:
            t += cfg.stride * cfg.c_in_p * cfg.mp * (itm + 4)       # phase slabs
        tmp = max(tmp, t)
    footprint = resident + tmp
    assert footprint < 24 * 1024 * 1024, (
        "fused kernel keeps whole per-batch activations in VMEM; "
        "sequence too long for this variant")
    # TODO(synk): add an L-tiled (halo) variant for sequences that overflow VMEM.
    vmem_limit = int(min(max(4 * footprint, 16 * 1024 * 1024), 32 * 1024 * 1024))

    out = pl.pallas_call(
        _make_fused_kernel(tuple(cfgs)),
        out_shape=out_shape,
        grid=(B,),
        in_specs=in_specs,
        out_specs=out_spec,
        scratch_shapes=scratch,
        compiler_params=pltpu.CompilerParams(
            dimension_semantics=("parallel",),       # batch across cores (v7x 2 TC)
            vmem_limit_bytes=vmem_limit),
    )(*inputs)

    return out[:, :last.c_out, :]


# ----------------------------------------------------------------------------
# Discriminator: parameter construction (PyTorch-shaped) + pure-JAX reference
# ----------------------------------------------------------------------------
def init_discriminator_params(key, dim_in, h_dims):
    def conv_param(key, c_out, c_in, k):
        kw, kb = jax.random.split(key)
        bound = 1.0 / jnp.sqrt(c_in * k)
        w = jax.random.uniform(kw, (c_out, c_in, k), jnp.float32, -bound, bound)
        b = jax.random.uniform(kb, (c_out,), jnp.float32, -bound, bound)
        return w, b

    params = {"layers": [], "to_logits": []}
    keys = jax.random.split(key, 2 + len(h_dims))

    params["layers"].append(
        dict(zip(("w", "b"), conv_param(keys[0], h_dims[0], dim_in, 15)),
             stride=1, padding=7))
    for i, (cin, cout) in enumerate(zip(h_dims[:-1], h_dims[1:])):
        params["layers"].append(
            dict(zip(("w", "b"), conv_param(keys[1 + i], cout, cin, 41)),
                 stride=4, padding=20))
    dim = h_dims[-1]
    params["to_logits"].append(
        dict(zip(("w", "b"), conv_param(keys[-2], dim, dim, 5)),
             stride=1, padding=2))
    params["to_logits"].append(
        dict(zip(("w", "b"), conv_param(keys[-1], 1, dim, 3)),
             stride=1, padding=1))
    return params


def _conv1d_ref(x, w, b, stride, padding):
    y = jax.lax.conv_general_dilated(
        x, w, window_strides=(stride,), padding=[(padding, padding)],
        dimension_numbers=("NCH", "OIH", "NCH"),
        precision=jax.lax.Precision.HIGHEST)
    return y + b[None, :, None]


def discriminator_ref(params, x):
    for lp in params["layers"]:
        x = _conv1d_ref(x, lp["w"], lp["b"], lp["stride"], lp["padding"])
        x = jnp.where(x >= 0, x, 0.1 * x)
    lp = params["to_logits"][0]
    x = _conv1d_ref(x, lp["w"], lp["b"], lp["stride"], lp["padding"])
    x = jnp.where(x >= 0, x, 0.1 * x)
    lp = params["to_logits"][1]
    x = _conv1d_ref(x, lp["w"], lp["b"], lp["stride"], lp["padding"])
    return x


if __name__ == "__main__":
    key = jax.random.PRNGKey(0)
    k_params, k_x = jax.random.split(key)

    dim_in = 4
    h_dims = (8, 16)
    B, L = 2, 1024

    params = init_discriminator_params(k_params, dim_in, h_dims)
    x = jax.random.normal(k_x, (B, dim_in, L), dtype=jnp.float32)

    ref = jax.block_until_ready(discriminator_ref(params, x))
    assert ref.shape == (B, 1, 256), ref.shape

    # f32 compute path: tight tolerance
    fwd_f32 = jax.jit(lambda v: discriminator_forward(
        params, v, compute_dtype=jnp.float32))
    out_f32 = jax.block_until_ready(fwd_f32(x))
    assert out_f32.shape == ref.shape, (out_f32.shape, ref.shape)
    assert jnp.allclose(out_f32, ref, rtol=2e-3, atol=2e-3), \
        float(jnp.max(jnp.abs(out_f32 - ref)))

    # bf16 compute path (halved HBM traffic, native MXU rate): looser tolerance
    fwd_bf16 = jax.jit(lambda v: discriminator_forward(
        params, v, compute_dtype=jnp.bfloat16))
    out_bf16 = jax.block_until_ready(fwd_bf16(x))
    assert out_bf16.shape == ref.shape, (out_bf16.shape, ref.shape)
    assert jnp.allclose(out_bf16, ref, rtol=2e-2, atol=2e-2), \
        float(jnp.max(jnp.abs(out_bf16 - ref)))

    print("KERNEL_OK")
</pallas_src>

<mosaic_0001>
module attributes {stable_mosaic.version = 11 : i64} {
  func.func @kernel(%arg0: i32, %arg1: memref<1x8x1024xf32, #tpu.memory_space<vmem>>, %arg2: memref<8x120xf32, #tpu.memory_space<vmem>>, %arg3: memref<8x1xf32, #tpu.memory_space<vmem>>, %arg4: memref<16x352xf32, #tpu.memory_space<vmem>>, %arg5: memref<16x1xf32, #tpu.memory_space<vmem>>, %arg6: memref<1064x266xf32, #tpu.memory_space<vmem>>, %arg7: memref<16x80xf32, #tpu.memory_space<vmem>>, %arg8: memref<16x1xf32, #tpu.memory_space<vmem>>, %arg9: memref<8x48xf32, #tpu.memory_space<vmem>>, %arg10: memref<8x1xf32, #tpu.memory_space<vmem>>, %arg11: memref<1x8x256xf32, #tpu.memory_space<vmem>>, %arg12: memref<8x1280xf32, #tpu.memory_space<vmem>>, %arg13: memref<8x1280xf32, #tpu.memory_space<vmem>>, %arg14: memref<16x512xf32, #tpu.memory_space<vmem>>, %arg15: memref<16x512xf32, #tpu.memory_space<vmem>>) attributes {dimension_semantics = [#tpu.dimension_semantics<parallel>], iteration_bounds = array<i64: 2>, scalar_prefetch = 0 : i64, scratch_operands = 4 : i64, tpu.core_type = #tpu.core_type<tc>, window_params = [{transform_indices = @transform_0, window_bounds = array<i64: 1, 8, 1024>}, {pipeline_mode = #tpu.pipeline_mode<synchronous>, transform_indices = @transform_1, window_bounds = array<i64: 8, 120>}, {pipeline_mode = #tpu.pipeline_mode<synchronous>, transform_indices = @transform_2, window_bounds = array<i64: 8, 1>}, {pipeline_mode = #tpu.pipeline_mode<synchronous>, transform_indices = @transform_3, window_bounds = array<i64: 16, 352>}, {pipeline_mode = #tpu.pipeline_mode<synchronous>, transform_indices = @transform_4, window_bounds = array<i64: 16, 1>}, {pipeline_mode = #tpu.pipeline_mode<synchronous>, transform_indices = @transform_5, window_bounds = array<i64: 1064, 266>}, {pipeline_mode = #tpu.pipeline_mode<synchronous>, transform_indices = @transform_6, window_bounds = array<i64: 16, 80>}, {pipeline_mode = #tpu.pipeline_mode<synchronous>, transform_indices = @transform_7, window_bounds = array<i64: 16, 1>}, {pipeline_mode = #tpu.pipeline_mode<synchronous>, transform_indices = @transform_8, window_bounds = array<i64: 8, 48>}, {pipeline_mode = #tpu.pipeline_mode<synchronous>, transform_indices = @transform_9, window_bounds = array<i64: 8, 1>}, {transform_indices = @transform_10, window_bounds = array<i64: 1, 8, 256>}]} {
    %c0 = arith.constant 0 : index
    %c0_0 = arith.constant 0 : index
    %c0_1 = arith.constant 0 : index
    %0 = vector.load %arg1[%c0, %c0_0, %c0_1] : memref<1x8x1024xf32, #tpu.memory_space<vmem>>, vector<1x8x1024xf32>
    %1 = vector.shape_cast %0 : vector<1x8x1024xf32> to vector<8x1024xf32>
    %c0_2 = arith.constant 0 : index
    %c0_3 = arith.constant 0 : index
    %2 = vector.load %arg2[%c0_2, %c0_3] : memref<8x120xf32, #tpu.memory_space<vmem>>, vector<8x120xf32>
    %c0_4 = arith.constant 0 : index
    %c0_5 = arith.constant 0 : index
    %3 = vector.load %arg3[%c0_4, %c0_5] : memref<8x1xf32, #tpu.memory_space<vmem>>, vector<8x1xf32>
    %cst = arith.constant 0.000000e+00 : f32
    %4 = vector.broadcast %cst : f32 to vector<8x1280xf32>
    %c0_6 = arith.constant 0 : index
    %c0_7 = arith.constant 0 : index
    %5 = vector.load %arg12[%c0_6, %c0_7] : memref<8x1280xf32, #tpu.memory_space<vmem>>, vector<8x1280xf32>
    tpu.vector_store %arg12[%c0_6, %c0_7], %4 {strides = array<i32>} : memref<8x1280xf32, #tpu.memory_space<vmem>>, vector<8x1280xf32>,
    %c0_8 = arith.constant 0 : index
    %c128 = arith.constant 128 : index
    %6 = vector.load %arg12[%c0_8, %c128] : memref<8x1280xf32, #tpu.memory_space<vmem>>, vector<8x1024xf32>
    tpu.vector_store %arg12[%c0_8, %c128], %1 {strides = array<i32>} : memref<8x1280xf32, #tpu.memory_space<vmem>>, vector<8x1024xf32>,
    %c0_9 = arith.constant 0 : index
    %c0_10 = arith.constant 0 : index
    %7 = vector.load %arg12[%c0_9, %c0_10] : memref<8x1280xf32, #tpu.memory_space<vmem>>, vector<8x1280xf32>
    %8 = vector.extract_strided_slice %7 {offsets = [0, 121], sizes = [8, 1024], strides = [1, 1]} : vector<8x1280xf32> to vector<8x1024xf32>
    %9 = vector.extract_strided_slice %7 {offsets = [0, 122], sizes = [8, 1024], strides = [1, 1]} : vector<8x1280xf32> to vector<8x1024xf32>
    %10 = vector.extract_strided_slice %7 {offsets = [0, 123], sizes = [8, 1024], strides = [1, 1]} : vector<8x1280xf32> to vector<8x1024xf32>
    %11 = vector.extract_strided_slice %7 {offsets = [0, 124], sizes = [8, 1024], strides = [1, 1]} : vector<8x1280xf32> to vector<8x1024xf32>
    %12 = vector.extract_strided_slice %7 {offsets = [0, 125], sizes = [8, 1024], strides = [1, 1]} : vector<8x1280xf32> to vector<8x1024xf32>
    %13 = vector.extract_strided_slice %7 {offsets = [0, 126], sizes = [8, 1024], strides = [1, 1]} : vector<8x1280xf32> to vector<8x1024xf32>
    %14 = vector.extract_strided_slice %7 {offsets = [0, 127], sizes = [8, 1024], strides = [1, 1]} : vector<8x1280xf32> to vector<8x1024xf32>
    %15 = vector.extract_strided_slice %7 {offsets = [0, 128], sizes = [8, 1024], strides = [1, 1]} : vector<8x1280xf32> to vector<8x1024xf32>
    %16 = vector.extract_strided_slice %7 {offsets = [0, 129], sizes = [8, 1024], strides = [1, 1]} : vector<8x1280xf32> to vector<8x1024xf32>
    %17 = vector.extract_strided_slice %7 {offsets = [0, 130], sizes = [8, 1024], strides = [1, 1]} : vector<8x1280xf32> to vector<8x1024xf32>
    %18 = vector.extract_strided_slice %7 {offsets = [0, 131], sizes = [8, 1024], strides = [1, 1]} : vector<8x1280xf32> to vector<8x1024xf32>
    %19 = vector.extract_strided_slice %7 {offsets = [0, 132], sizes = [8, 1024], strides = [1, 1]} : vector<8x1280xf32> to vector<8x1024xf32>
    %20 = vector.extract_strided_slice %7 {offsets = [0, 133], sizes = [8, 1024], strides = [1, 1]} : vector<8x1280xf32> to vector<8x1024xf32>
    %21 = vector.extract_strided_slice %7 {offsets = [0, 134], sizes = [8, 1024], strides = [1, 1]} : vector<8x1280xf32> to vector<8x1024xf32>
    %22 = vector.extract_strided_slice %7 {offsets = [0, 135], sizes = [8, 1024], strides = [1, 1]} : vector<8x1280xf32> to vector<8x1024xf32>
    %23 = tpu.concatenate %8, %9, %10, %11, %12, %13, %14, %15, %16, %17, %18, %19, %20, %21, %22 in 0 : vector<8x1024xf32>, vector<8x1024xf32>, vector<8x1024xf32>, vector<8x1024xf32>, vector<8x1024xf32>, vector<8x1024xf32>, vector<8x1024xf32>, vector<8x1024xf32>, vector<8x1024xf32>, vector<8x1024xf32>, vector<8x1024xf32>, vector<8x1024xf32>, vector<8x1024xf32>, vector<8x1024xf32>, vector<8x1024xf32> -> vector<120x1024xf32>
    %cst_11 = arith.constant dense<0.000000e+00> : vector<8x1024xf32>
    %24 = tpu.matmul %2, %23, %cst_11 {dimension_numbers = #tpu.dot_dimension_numbers<[1], [0], [0], [1], [0, 0, 1, 1], [], []>} : vector<8x120xf32>, vector<120x1024xf32>, vector<8x1024xf32> -> vector<8x1024xf32>
    %25 = vector.broadcast %3 : vector<8x1xf32> to vector<8x1024xf32>
    %26 = arith.addf %24, %25 : vector<8x1024xf32>
    %cst_12 = arith.constant 1.000000e-01 : f32
    %27 = vector.broadcast %cst_12 : f32 to vector<8x1024xf32>
    %28 = arith.mulf %27, %26 : vector<8x1024xf32>
    %29 = arith.maximumf %26, %28 : vector<8x1024xf32>
    %c0_13 = arith.constant 0 : index
    %c0_14 = arith.constant 0 : index
    %30 = vector.load %arg4[%c0_13, %c0_14] : memref<16x352xf32, #tpu.memory_space<vmem>>, vector<16x352xf32>
    %c0_15 = arith.constant 0 : index
    %c0_16 = arith.constant 0 : index
    %31 = vector.load %arg5[%c0_15, %c0_16] : memref<16x1xf32, #tpu.memory_space<vmem>>, vector<16x1xf32>
    %cst_17 = arith.constant 0.000000e+00 : f32
    %32 = vector.broadcast %cst_17 : f32 to vector<8x1280xf32>
    %c0_18 = arith.constant 0 : index
    %c0_19 = arith.constant 0 : index
    %33 = vector.load %arg13[%c0_18, %c0_19] : memref<8x1280xf32, #tpu.memory_space<vmem>>, vector<8x1280xf32>
    tpu.vector_store %arg13[%c0_18, %c0_19], %32 {strides = array<i32>} : memref<8x1280xf32, #tpu.memory_space<vmem>>, vector<8x1280xf32>,
    %c0_20 = arith.constant 0 : index
    %c128_21 = arith.constant 128 : index
    %34 = vector.load %arg13[%c0_20, %c128_21] : memref<8x1280xf32, #tpu.memory_space<vmem>>, vector<8x1024xf32>
    tpu.vector_store %arg13[%c0_20, %c128_21], %29 {strides = array<i32>} : memref<8x1280xf32, #tpu.memory_space<vmem>>, vector<8x1024xf32>,
    %c0_22 = arith.constant 0 : index
    %c0_23 = arith.constant 0 : index
    %35 = vector.load %arg13[%c0_22, %c0_23] : memref<8x1280xf32, #tpu.memory_space<vmem>>, vector<8x1280xf32>
    %c0_24 = arith.constant 0 : index
    %c0_25 = arith.constant 0 : index
    %36 = vector.load %arg6[%c0_24, %c0_25] : memref<1064x266xf32, #tpu.memory_space<vmem>>, vector<1064x266xf32>
    %37 = vector.extract_strided_slice %35 {offsets = [0, 108], sizes = [8, 1064], strides = [1, 1]} : vector<8x1280xf32> to vector<8x1064xf32>
    %cst_26 = arith.constant dense<0.000000e+00> : vector<8x266xf32>
    %38 = tpu.matmul %37, %36, %cst_26 {dimension_numbers = #tpu.dot_dimension_numbers<[1], [0], [0], [1], [0, 0, 1, 1], [], []>} : vector<8x1064xf32>, vector<1064x266xf32>, vector<8x266xf32> -> vector<8x266xf32>
    %39 = vector.extract_strided_slice %35 {offsets = [0, 109], sizes = [8, 1064], strides = [1, 1]} : vector<8x1280xf32> to vector<8x1064xf32>
    %cst_27 = arith.constant dense<0.000000e+00> : vector<8x266xf32>
    %40 = tpu.matmul %39, %36, %cst_27 {dimension_numbers = #tpu.dot_dimension_numbers<[1], [0], [0], [1], [0, 0, 1, 1], [], []>} : vector<8x1064xf32>, vector<1064x266xf32>, vector<8x266xf32> -> vector<8x266xf32>
    %41 = vector.extract_strided_slice %35 {offsets = [0, 110], sizes = [8, 1064], strides = [1, 1]} : vector<8x1280xf32> to vector<8x1064xf32>
    %cst_28 = arith.constant dense<0.000000e+00> : vector<8x266xf32>
    %42 = tpu.matmul %41, %36, %cst_28 {dimension_numbers = #tpu.dot_dimension_numbers<[1], [0], [0], [1], [0, 0, 1, 1], [], []>} : vector<8x1064xf32>, vector<1064x266xf32>, vector<8x266xf32> -> vector<8x266xf32>
    %43 = vector.extract_strided_slice %35 {offsets = [0, 111], sizes = [8, 1064], strides = [1, 1]} : vector<8x1280xf32> to vector<8x1064xf32>
    %cst_29 = arith.constant dense<0.000000e+00> : vector<8x266xf32>
    %44 = tpu.matmul %43, %36, %cst_29 {dimension_numbers = #tpu.dot_dimension_numbers<[1], [0], [0], [1], [0, 0, 1, 1], [], []>} : vector<8x1064xf32>, vector<1064x266xf32>, vector<8x266xf32> -> vector<8x266xf32>
    %45 = tpu.concatenate %38, %40, %42, %44 in 0 : vector<8x266xf32>, vector<8x266xf32>, vector<8x266xf32>, vector<8x266xf32> -> vector<32x266xf32>
    %46 = vector.extract_strided_slice %45 {offsets = [0, 0], sizes = [32, 256], strides = [1, 1]} : vector<32x266xf32> to vector<32x256xf32>
    %47 = vector.extract_strided_slice %45 {offsets = [0, 1], sizes = [32, 256], strides = [1, 1]} : vector<32x266xf32> to vector<32x256xf32>
    %48 = vector.extract_strided_slice %45 {offsets = [0, 2], sizes = [32, 256], strides = [1, 1]} : vector<32x266xf32> to vector<32x256xf32>
    %49 = vector.extract_strided_slice %45 {offsets = [0, 3], sizes = [32, 256], strides = [1, 1]} : vector<32x266xf32> to vector<32x256xf32>
    %50 = vector.extract_strided_slice %45 {offsets = [0, 4], sizes = [32, 256], strides = [1, 1]} : vector<32x266xf32> to vector<32x256xf32>
    %51 = vector.extract_strided_slice %45 {offsets = [0, 5], sizes = [32, 256], strides = [1, 1]} : vector<32x266xf32> to vector<32x256xf32>
    %52 = vector.extract_strided_slice %45 {offsets = [0, 6], sizes = [32, 256], strides = [1, 1]} : vector<32x266xf32> to vector<32x256xf32>
    %53 = vector.extract_strided_slice %45 {offsets = [0, 7], sizes = [32, 256], strides = [1, 1]} : vector<32x266xf32> to vector<32x256xf32>
    %54 = vector.extract_strided_slice %45 {offsets = [0, 8], sizes = [32, 256], strides = [1, 1]} : vector<32x266xf32> to vector<32x256xf32>
    %55 = vector.extract_strided_slice %45 {offsets = [0, 9], sizes = [32, 256], strides = [1, 1]} : vector<32x266xf32> to vector<32x256xf32>
    %56 = vector.extract_strided_slice %45 {offsets = [0, 10], sizes = [32, 256], strides = [1, 1]} : vector<32x266xf32> to vector<32x256xf32>
    %57 = tpu.concatenate %46, %47, %48, %49, %50, %51, %52, %53, %54, %55, %56 in 0 : vector<32x256xf32>, vector<32x256xf32>, vector<32x256xf32>, vector<32x256xf32>, vector<32x256xf32>, vector<32x256xf32>, vector<32x256xf32>, vector<32x256xf32>, vector<32x256xf32>, vector<32x256xf32>, vector<32x256xf32> -> vector<352x256xf32>
    %cst_30 = arith.constant dense<0.000000e+00> : vector<16x256xf32>
    %58 = tpu.matmul %30, %57, %cst_30 {dimension_numbers = #tpu.dot_dimension_numbers<[1], [0], [0], [1], [0, 0, 1, 1], [], []>} : vector<16x352xf32>, vector<352x256xf32>, vector<16x256xf32> -> vector<16x256xf32>
    %59 = vector.broadcast %31 : vector<16x1xf32> to vector<16x256xf32>
    %60 = arith.addf %58, %59 : vector<16x256xf32>
    %cst_31 = arith.constant 1.000000e-01 : f32
    %61 = vector.broadcast %cst_31 : f32 to vector<16x256xf32>
    %62 = arith.mulf %61, %60 : vector<16x256xf32>
    %63 = arith.maximumf %60, %62 : vector<16x256xf32>
    %c0_32 = arith.constant 0 : index
    %c0_33 = arith.constant 0 : index
    %64 = vector.load %arg7[%c0_32, %c0_33] : memref<16x80xf32, #tpu.memory_space<vmem>>, vector<16x80xf32>
    %c0_34 = arith.constant 0 : index
    %c0_35 = arith.constant 0 : index
    %65 = vector.load %arg8[%c0_34, %c0_35] : memref<16x1xf32, #tpu.memory_space<vmem>>, vector<16x1xf32>
    %cst_36 = arith.constant 0.000000e+00 : f32
    %66 = vector.broadcast %cst_36 : f32 to vector<16x512xf32>
    %c0_37 = arith.constant 0 : index
    %c0_38 = arith.constant 0 : index
    %67 = vector.load %arg14[%c0_37, %c0_38] : memref<16x512xf32, #tpu.memory_space<vmem>>, vector<16x512xf32>
    tpu.vector_store %arg14[%c0_37, %c0_38], %66 {strides = array<i32>} : memref<16x512xf32, #tpu.memory_space<vmem>>, vector<16x512xf32>,
    %c0_39 = arith.constant 0 : index
    %c128_40 = arith.constant 128 : index
    %68 = vector.load %arg14[%c0_39, %c128_40] : memref<16x512xf32, #tpu.memory_space<vmem>>, vector<16x256xf32>
    tpu.vector_store %arg14[%c0_39, %c128_40], %63 {strides = array<i32>} : memref<16x512xf32, #tpu.memory_space<vmem>>, vector<16x256xf32>,
    %c0_41 = arith.constant 0 : index
    %c0_42 = arith.constant 0 : index
    %69 = vector.load %arg14[%c0_41, %c0_42] : memref<16x512xf32, #tpu.memory_space<vmem>>, vector<16x512xf32>
    %70 = vector.extract_strided_slice %69 {offsets = [0, 126], sizes = [16, 256], strides = [1, 1]} : vector<16x512xf32> to vector<16x256xf32>
    %71 = vector.extract_strided_slice %69 {offsets = [0, 127], sizes = [16, 256], strides = [1, 1]} : vector<16x512xf32> to vector<16x256xf32>
    %72 = vector.extract_strided_slice %69 {offsets = [0, 128], sizes = [16, 256], strides = [1, 1]} : vector<16x512xf32> to vector<16x256xf32>
    %73 = vector.extract_strided_slice %69 {offsets = [0, 129], sizes = [16, 256], strides = [1, 1]} : vector<16x512xf32> to vector<16x256xf32>
    %74 = vector.extract_strided_slice %69 {offsets = [0, 130], sizes = [16, 256], strides = [1, 1]} : vector<16x512xf32> to vector<16x256xf32>
    %75 = tpu.concatenate %70, %71, %72, %73, %74 in 0 : vector<16x256xf32>, vector<16x256xf32>, vector<16x256xf32>, vector<16x256xf32>, vector<16x256xf32> -> vector<80x256xf32>
    %cst_43 = arith.constant dense<0.000000e+00> : vector<16x256xf32>
    %76 = tpu.matmul %64, %75, %cst_43 {dimension_numbers = #tpu.dot_dimension_numbers<[1], [0], [0], [1], [0, 0, 1, 1], [], []>} : vector<16x80xf32>, vector<80x256xf32>, vector<16x256xf32> -> vector<16x256xf32>
    %77 = vector.broadcast %65 : vector<16x1xf32> to vector<16x256xf32>
    %78 = arith.addf %76, %77 : vector<16x256xf32>
    %cst_44 = arith.constant 1.000000e-01 : f32
    %79 = vector.broadcast %cst_44 : f32 to vector<16x256xf32>
    %80 = arith.mulf %79, %78 : vector<16x256xf32>
    %81 = arith.maximumf %78, %80 : vector<16x256xf32>
    %c0_45 = arith.constant 0 : index
    %c0_46 = arith.constant 0 : index
    %82 = vector.load %arg9[%c0_45, %c0_46] : memref<8x48xf32, #tpu.memory_space<vmem>>, vector<8x48xf32>
    %c0_47 = arith.constant 0 : index
    %c0_48 = arith.constant 0 : index
    %83 = vector.load %arg10[%c0_47, %c0_48] : memref<8x1xf32, #tpu.memory_space<vmem>>, vector<8x1xf32>
    %cst_49 = arith.constant 0.000000e+00 : f32
    %84 = vector.broadcast %cst_49 : f32 to vector<16x512xf32>
    %c0_50 = arith.constant 0 : index
    %c0_51 = arith.constant 0 : index
    %85 = vector.load %arg15[%c0_50, %c0_51] : memref<16x512xf32, #tpu.memory_space<vmem>>, vector<16x512xf32>
    tpu.vector_store %arg15[%c0_50, %c0_51], %84 {strides = array<i32>} : memref<16x512xf32, #tpu.memory_space<vmem>>, vector<16x512xf32>,
    %c0_52 = arith.constant 0 : index
    %c128_53 = arith.constant 128 : index
    %86 = vector.load %arg15[%c0_52, %c128_53] : memref<16x512xf32, #tpu.memory_space<vmem>>, vector<16x256xf32>
    tpu.vector_store %arg15[%c0_52, %c128_53], %81 {strides = array<i32>} : memref<16x512xf32, #tpu.memory_space<vmem>>, vector<16x256xf32>,
    %c0_54 = arith.constant 0 : index
    %c0_55 = arith.constant 0 : index
    %87 = vector.load %arg15[%c0_54, %c0_55] : memref<16x512xf32, #tpu.memory_space<vmem>>, vector<16x512xf32>
    %88 = vector.extract_strided_slice %87 {offsets = [0, 127], sizes = [16, 256], strides = [1, 1]} : vector<16x512xf32> to vector<16x256xf32>
    %89 = vector.extract_strided_slice %87 {offsets = [0, 128], sizes = [16, 256], strides = [1, 1]} : vector<16x512xf32> to vector<16x256xf32>
    %90 = vector.extract_strided_slice %87 {offsets = [0, 129], sizes = [16, 256], strides = [1, 1]} : vector<16x512xf32> to vector<16x256xf32>
    %91 = tpu.concatenate %88, %89, %90 in 0 : vector<16x256xf32>, vector<16x256xf32>, vector<16x256xf32> -> vector<48x256xf32>
    %cst_56 = arith.constant dense<0.000000e+00> : vector<8x256xf32>
    %92 = tpu.matmul %82, %91, %cst_56 {dimension_numbers = #tpu.dot_dimension_numbers<[1], [0], [0], [1], [0, 0, 1, 1], [], []>} : vector<8x48xf32>, vector<48x256xf32>, vector<8x256xf32> -> vector<8x256xf32>
    %93 = vector.broadcast %83 : vector<8x1xf32> to vector<8x256xf32>
    %94 = arith.addf %92, %93 : vector<8x256xf32>
    %c0_57 = arith.constant 0 : index
    %c0_58 = arith.constant 0 : index
    %c0_59 = arith.constant 0 : index
    %95 = vector.load %arg11[%c0_57, %c0_58, %c0_59] : memref<1x8x256xf32, #tpu.memory_space<vmem>>, vector<1x8x256xf32>
    %96 = vector.shape_cast %95 : vector<1x8x256xf32> to vector<8x256xf32>
    %97 = vector.shape_cast %94 : vector<8x256xf32> to vector<1x8x256xf32>
    tpu.vector_store %arg11[%c0_57, %c0_58, %c0_59], %97 {strides = array<i32>} : memref<1x8x256xf32, #tpu.memory_space<vmem>>, vector<1x8x256xf32>,
    return
  }
  func.func @transform_0(%arg0: i32) -> (i32, i32, i32) {
    %c0_i32 = arith.constant 0 : i32
    %c0_i32_0 = arith.constant 0 : i32
    %c0_i32_1 = arith.constant 0 : i32
    return %arg0, %c0_i32, %c0_i32_0 : i32, i32, i32
  }
  func.func @transform_1(%arg0: i32) -> (i32, i32) {
    %c0_i32 = arith.constant 0 : i32
    %c0_i32_0 = arith.constant 0 : i32
    %c0_i32_1 = arith.constant 0 : i32
    return %c0_i32, %c0_i32_0 : i32, i32
  }
  func.func @transform_2(%arg0: i32) -> (i32, i32) {
    %c0_i32 = arith.constant 0 : i32
    %c0_i32_0 = arith.constant 0 : i32
    %c0_i32_1 = arith.constant 0 : i32
    return %c0_i32, %c0_i32_0 : i32, i32
  }
  func.func @transform_3(%arg0: i32) -> (i32, i32) {
    %c0_i32 = arith.constant 0 : i32
    %c0_i32_0 = arith.constant 0 : i32
    %c0_i32_1 = arith.constant 0 : i32
    return %c0_i32, %c0_i32_0 : i32, i32
  }
  func.func @transform_4(%arg0: i32) -> (i32, i32) {
    %c0_i32 = arith.constant 0 : i32
    %c0_i32_0 = arith.constant 0 : i32
    %c0_i32_1 = arith.constant 0 : i32
    return %c0_i32, %c0_i32_0 : i32, i32
  }
  func.func @transform_5(%arg0: i32) -> (i32, i32) {
    %c0_i32 = arith.constant 0 : i32
    %c0_i32_0 = arith.constant 0 : i32
    %c0_i32_1 = arith.constant 0 : i32
    return %c0_i32, %c0_i32_0 : i32, i32
  }
  func.func @transform_6(%arg0: i32) -> (i32, i32) {
    %c0_i32 = arith.constant 0 : i32
    %c0_i32_0 = arith.constant 0 : i32
    %c0_i32_1 = arith.constant 0 : i32
    return %c0_i32, %c0_i32_0 : i32, i32
  }
  func.func @transform_7(%arg0: i32) -> (i32, i32) {
    %c0_i32 = arith.constant 0 : i32
    %c0_i32_0 = arith.constant 0 : i32
    %c0_i32_1 = arith.constant 0 : i32
    return %c0_i32, %c0_i32_0 : i32, i32
  }
  func.func @transform_8(%arg0: i32) -> (i32, i32) {
    %c0_i32 = arith.constant 0 : i32
    %c0_i32_0 = arith.constant 0 : i32
    %c0_i32_1 = arith.constant 0 : i32
    return %c0_i32, %c0_i32_0 : i32, i32
  }
  func.func @transform_9(%arg0: i32) -> (i32, i32) {
    %c0_i32 = arith.constant 0 : i32
    %c0_i32_0 = arith.constant 0 : i32
    %c0_i32_1 = arith.constant 0 : i32
    return %c0_i32, %c0_i32_0 : i32, i32
  }
  func.func @transform_10(%arg0: i32) -> (i32, i32, i32) {
    %c0_i32 = arith.constant 0 : i32
    %c0_i32_0 = arith.constant 0 : i32
    %c0_i32_1 = arith.constant 0 : i32
    return %arg0, %c0_i32, %c0_i32_0 : i32, i32, i32
  }
}

</mosaic_0001>

<bundles_post_ra>
// kernel: _lambda_.1
= control target key start
LH: loop header
LB: loop body
LE: loop exit
PB: predicated region body
PF: predicated region fallthrough
CT: control target
= control target key end

     0   :  { %s7785_s13 = smov 0   ;;  %s15486_s0 = inlined_call_operand.vmem [shape: f32[2,8,1024], index: 0, kind: input, shape index: {}]   ;;  %s15487_s1 = inlined_call_operand.vmem [shape: f32[8,120], index: 1, kind: input, shape index: {}]   ;;  %s15488_s2 = inlined_call_operand.vmem [shape: f32[8,1], index: 2, kind: input, shape index: {}]   ;;  %s15489_s3 = inlined_call_operand.vmem [shape: f32[16,352], index: 3, kind: input, shape index: {}]   ;;  %s15490_s4 = inlined_call_operand.vmem [shape: f32[16,1], index: 4, kind: input, shape index: {}]   ;;  %s15491_s5 = inlined_call_operand.vmem [shape: f32[1064,266], index: 5, kind: input, shape index: {}]   ;;  %s15492_s6 = inlined_call_operand.vmem [shape: f32[16,80], index: 6, kind: input, shape index: {}]   ;;  %s15493_s7 = inlined_call_operand.vmem [shape: f32[16,1], index: 7, kind: input, shape index: {}]   ;;  %s15494_s8 = inlined_call_operand.vmem [shape: f32[8,48], index: 8, kind: input, shape index: {}]   ;;  %s15495_s9 = inlined_call_operand.vmem [shape: f32[8,1], index: 9, kind: input, shape index: {}]   ;;  %s15496_s10 = inlined_call_operand.vmem [shape: f32[2,8,256], index: 10, kind: output, shape index: {}]  }
   0x1 LB: > { %s6166_s14 = sadd.s32 4294967295, %s7704_s13   ;;  %p6170_p0 = scmp.ge.s32.totalorder %s7704_s13, 1  ;;  %s7704_s13 = sphi %s7785_s13, %s20_s13  }
   0x2   : > { %p312_p1 = scmp.lt.s32.totalorder %s7704_s13, 3 }
   0x4   : > { %p313_p2 = pnand %p6170_p0, %p312_p1 }
   0x6   : > { %316 = sbr.rel (%p313_p2) target bundleno = 3303 (0xce7), region = 60 }
   0xb   : > { %p350_p3 = scmp.lt.s32.totalorder %s6166_s14, 1  ;;  %v15497_v0 = vmov 0.0   ;;  %s7707_s19 = smov 114   ;;  %vm774_vm0 = vcmask 932864   ;;  %vm747_vm1 = vcmask 941056   ;;  %vm720_vm2 = vcmask 949248  }
   0xc   : > { %1437 = vmatprep.mubr.f32.mxu1 %v15497_v0  ;;  %1366 = vmatprep.mubr.f32.mxu0 %v15497_v0  ;;  %s7708_s20 = smov 115   ;;  %s7709_s21 = smov 116   ;;  %vm693_vm3 = vcmask 957440   ;;  %vm666_vm4 = vcmask 965632   ;;  %vm639_vm5 = vcmask 973824   ;;  %vm612_vm6 = vcmask 982016  }
   0xd   : > { %s16775_s14 = smov (!%p350_p3, %s6166_s14), 1  ;;  %s7710_s22 = smov 117   ;;  %vm585_vm7 = vcmask 990208   ;;  %vm1058_vm8 = vcmask 56320   ;;  %vm560_vm9 = vcmask 998400   ;;  %vm533_vm10 = vcmask 1006592  }
   0xe   : > { %s6194_s15 = sshll.u32 %s16775_s14, 6  ;;  %s7711_s23 = smov 118   ;;  %vm506_vm11 = vcmask 1014784   ;;  %vm479_vm12 = vcmask 1022976   ;;  %vm452_vm13 = vcmask 1031168   ;;  %vm425_vm14 = vcmask 1039360  }
   0xf   : > { %s7801_s18 = scalar_lea.vmem %s15486_s0, %s6194_s15  ;;  %s15504_s24 = smov 119   ;;  %vm2067_vm15 = vcmask 162816  }
  0x10   : > { %v7804_v1 = vld [vmem:[%s7801_s18 + $0x20] sm:$0xff]  ;;  %v7807_v2 = vld [vmem:[%s7801_s18 + $0x10] sm:$0xff]  ;;  %v7814_v3 = vld [vmem:[%s7801_s18 + $0x18] sm:$0xff]  ;;  %s15500_s25 = smov 120   ;;  %s7714_s26 = smov 121  }
  0x11   : > { %764 = vrot.lane.b32.xlu1 %v7804_v1, %s7707_s19  ;;  %760 = vrot.lane.b32.xlu0 %v7807_v2, %s7707_s19  ;;  %v7817_v4 = vld [vmem:[%s7801_s18] sm:$0xff]  ;;  %v7824_v5 = vld [vmem:[%s7801_s18 + $0x8] sm:$0xff]  ;;  %s7715_s27 = smov 122   ;;  %s7716_s28 = smov 123  }
  0x12   : > { %s15502_s29 = smov 124   ;;  %s7718_s30 = smov 125   ;;  %v8037_v46 = vld [vmem:[%s7801_s18 + $0x30] sm:$0xff]  ;;  %v8040_v47 = vld [vmem:[%s7801_s18 + $0x38] sm:$0xff]  ;;  %v8060_v53 = vld [vmem:[%s7801_s18 + $0x28] sm:$0xff] }
  0x13   : > { %s7719_s11 = smov 126   ;;  %s7720_s12 = smov 127  }
  0x14   : > { %s7721_s15 = smov 7   ;;  %s7725_s16 = smov 18  }
  0x15   : > { %762 = vrot.lane.b32.xlu0 %v7814_v3, %s7707_s19  ;;  %756 = vrot.lane.b32.xlu1 %v7817_v4, %s7707_s19 }
  0x19   : > { %758 = vrot.lane.b32.xlu0 %v7824_v5, %s7707_s19  ;;  %733 = vrot.lane.b32.xlu1 %v7807_v2, %s7708_s20 }
  0x1d   : > { %735 = vrot.lane.b32.xlu0 %v7814_v3, %s7708_s20  ;;  %737 = vrot.lane.b32.xlu1 %v7804_v1, %s7708_s20 }
  0x21   : > { %729 = vrot.lane.b32.xlu0 %v7817_v4, %s7708_s20  ;;  %731 = vrot.lane.b32.xlu1 %v7824_v5, %s7708_s20 }
  0x25   : > { %706 = vrot.lane.b32.xlu0 %v7807_v2, %s7709_s21  ;;  %708 = vrot.lane.b32.xlu1 %v7814_v3, %s7709_s21 }
  0x29   : > { %710 = vrot.lane.b32.xlu0 %v7804_v1, %s7709_s21  ;;  %702 = vrot.lane.b32.xlu1 %v7817_v4, %s7709_s21 }
  0x2d   : > { %704 = vrot.lane.b32.xlu0 %v7824_v5, %s7709_s21  ;;  %679 = vrot.lane.b32.xlu1 %v7807_v2, %s7710_s22 }
  0x31   : > { %681 = vrot.lane.b32.xlu0 %v7814_v3, %s7710_s22  ;;  %683 = vrot.lane.b32.xlu1 %v7804_v1, %s7710_s22 }
  0x35   : > { %675 = vrot.lane.b32.xlu0 %v7817_v4, %s7710_s22  ;;  %677 = vrot.lane.b32.xlu1 %v7824_v5, %s7710_s22 }
  0x39   : > { %652 = vrot.lane.b32.xlu0 %v7807_v2, %s7711_s23  ;;  %654 = vrot.lane.b32.xlu1 %v7814_v3, %s7711_s23 }
  0x3d   : > { %656 = vrot.lane.b32.xlu0 %v7804_v1, %s7711_s23  ;;  %648 = vrot.lane.b32.xlu1 %v7817_v4, %s7711_s23 }
  0x41   : > { %650 = vrot.lane.b32.xlu0 %v7824_v5, %s7711_s23  ;;  %625 = vrot.lane.b32.xlu1 %v7807_v2, %s15504_s24 }
  0x45   : > { %627 = vrot.lane.b32.xlu0 %v7814_v3, %s15504_s24  ;;  %629 = vrot.lane.b32.xlu1 %v7804_v1, %s15504_s24 }
  0x49   : > { %621 = vrot.lane.b32.xlu0 %v7817_v4, %s15504_s24  ;;  %623 = vrot.lane.b32.xlu1 %v7824_v5, %s15504_s24 }
  0x4d   : > { %598 = vrot.lane.b32.xlu0 %v7807_v2, %s15500_s25  ;;  %600 = vrot.lane.b32.xlu1 %v7814_v3, %s15500_s25 }
  0x51   : > { %602 = vrot.lane.b32.xlu0 %v7804_v1, %s15500_s25  ;;  %594 = vrot.lane.b32.xlu1 %v7817_v4, %s15500_s25 }
  0x55   : > { %596 = vrot.lane.b32.xlu0 %v7824_v5, %s15500_s25  ;;  %573 = vrot.lane.b32.xlu1 %v7807_v2, %s7714_s26 }
  0x59   : > { %575 = vrot.lane.b32.xlu0 %v7814_v3, %s7714_s26  ;;  %577 = vrot.lane.b32.xlu1 %v7804_v1, %s7714_s26 }
  0x5d   : > { %569 = vrot.lane.b32.xlu0 %v7817_v4, %s7714_s26  ;;  %571 = vrot.lane.b32.xlu1 %v7824_v5, %s7714_s26 }
  0x61   : > { %548 = vrot.lane.b32.xlu0 %v7807_v2, %s7715_s27  ;;  %550 = vrot.lane.b32.xlu1 %v7814_v3, %s7715_s27 }
  0x65   : > { %552 = vrot.lane.b32.xlu0 %v7804_v1, %s7715_s27  ;;  %544 = vrot.lane.b32.xlu1 %v7817_v4, %s7715_s27 }
  0x69   : > { %546 = vrot.lane.b32.xlu0 %v7824_v5, %s7715_s27  ;;  %521 = vrot.lane.b32.xlu1 %v7807_v2, %s7716_s28 }
  0x6d   : > { %523 = vrot.lane.b32.xlu0 %v7814_v3, %s7716_s28  ;;  %525 = vrot.lane.b32.xlu1 %v7804_v1, %s7716_s28 }
  0x71   : > { %542 = vrot.lane.b32.xlu0 %v15497_v0, %s7715_s27  ;;  %517 = vrot.lane.b32.xlu1 %v7817_v4, %s7716_s28 }
  0x75   : > { %519 = vrot.lane.b32.xlu0 %v7824_v5, %s7716_s28  ;;  %494 = vrot.lane.b32.xlu1 %v7807_v2, %s15502_s29 }
  0x79   : > { %496 = vrot.lane.b32.xlu0 %v7814_v3, %s15502_s29  ;;  %498 = vrot.lane.b32.xlu1 %v7804_v1, %s15502_s29 }
  0x7d   : > { %515 = vrot.lane.b32.xlu0 %v15497_v0, %s7716_s28  ;;  %490 = vrot.lane.b32.xlu1 %v7817_v4, %s15502_s29 }
  0x81   : > { %492 = vrot.lane.b32.xlu0 %v7824_v5, %s15502_s29  ;;  %467 = vrot.lane.b32.xlu1 %v7807_v2, %s7718_s30 }
  0x83   : > { %v7934_v6 = vpop.permute.xlu1 %764  ;;  %v761_v7 = vpop.permute.xlu0 %760 }
  0x85   : > { %469 = vrot.lane.b32.xlu0 %v7814_v3, %s7718_s30  ;;  %471 = vrot.lane.b32.xlu1 %v7804_v1, %s7718_s30 }
  0x87   : > { %v763_v8 = vpop.permute.xlu0 %762  ;;  %v757_v9 = vpop.permute.xlu1 %756 }
  0x88   : > { %v777_v26 = vsel %vm774_vm0, %v761_v7, %v763_v8  ;;  %v778_v27 = vsel %vm774_vm0, %v763_v8, %v7934_v6 }
  0x89   : > { %488 = vrot.lane.b32.xlu0 %v15497_v0, %s15502_s29  ;;  %463 = vrot.lane.b32.xlu1 %v7817_v4, %s7718_s30 }
  0x8b   : > { %v759_v10 = vpop.permute.xlu0 %758  ;;  %v734_v11 = vpop.permute.xlu1 %733 }
  0x8c   : > { %v776_v30 = vsel %vm774_vm0, %v759_v10, %v761_v7  ;;  %v775_v31 = vsel %vm774_vm0, %v757_v9, %v759_v10 }
  0x8d   : > { %465 = vrot.lane.b32.xlu0 %v7824_v5, %s7718_s30  ;;  %440 = vrot.lane.b32.xlu1 %v7807_v2, %s7719_s11 }
  0x8f   : > { %v736_v12 = vpop.permute.xlu0 %735  ;;  %v7948_v13 = vpop.permute.xlu1 %737 }
  0x90   : > { %v750_v34 = vsel %vm747_vm1, %v734_v11, %v736_v12  ;;  %v751_v35 = vsel %vm747_vm1, %v736_v12, %v7948_v13 }
  0x91   : > { %442 = vrot.lane.b32.xlu0 %v7814_v3, %s7719_s11  ;;  %444 = vrot.lane.b32.xlu1 %v7804_v1, %s7719_s11 }
  0x93   : > { %v730_v14 = vpop.permute.xlu0 %729  ;;  %v732_v15 = vpop.permute.xlu1 %731 }
  0x94   : > { %v748_v38 = vsel %vm747_vm1, %v730_v14, %v732_v15  ;;  %v749_v41 = vsel %vm747_vm1, %v732_v15, %v734_v11 }
  0x95   : > { %461 = vrot.lane.b32.xlu0 %v15497_v0, %s7718_s30  ;;  %436 = vrot.lane.b32.xlu1 %v7817_v4, %s7719_s11 }
  0x97   : > { %v7958_v16 = vpop.permute.xlu0 %706  ;;  %v709_v17 = vpop.permute.xlu1 %708 }
  0x98   : > { %v723_v42 = vsel %vm720_vm2, %v7958_v16, %v709_v17 }
  0x99   : > { %438 = vrot.lane.b32.xlu0 %v7824_v5, %s7719_s11  ;;  %413 = vrot.lane.b32.xlu1 %v7807_v2, %s7720_s12 }
  0x9b   : > { %v7964_v18 = vpop.permute.xlu0 %710  ;;  %v7966_v19 = vpop.permute.xlu1 %702 }
  0x9c   : > { %v724_v45 = vsel %vm720_vm2, %v709_v17, %v7964_v18 }
  0x9d   : > { %415 = vrot.lane.b32.xlu0 %v7814_v3, %s7720_s12  ;;  %417 = vrot.lane.b32.xlu1 %v7804_v1, %s7720_s12 }
  0x9f   : > { %v705_v20 = vpop.permute.xlu0 %704  ;;  %v7972_v21 = vpop.permute.xlu1 %679 }
  0xa0   : > { %v721_v52 = vsel %vm720_vm2, %v7966_v19, %v705_v20  ;;  %v722_v56 = vsel %vm720_vm2, %v705_v20, %v7958_v16 }
  0xa1   : > { %434 = vrot.lane.b32.xlu0 %v15497_v0, %s7719_s11  ;;  %409 = vrot.lane.b32.xlu1 %v7817_v4, %s7720_s12 }
  0xa3   : > { %v7978_v22 = vpop.permute.xlu0 %681  ;;  %v7980_v23 = vpop.permute.xlu1 %683 }
  0xa4   : > { %v696_v59 = vsel %vm693_vm3, %v7972_v21, %v7978_v22  ;;  %v697_v60 = vsel %vm693_vm3, %v7978_v22, %v7980_v23 }
  0xa5   : > { %411 = vrot.lane.b32.xlu0 %v7824_v5, %s7720_s12  ;;  %407 = vrot.lane.b32.xlu1 %v15497_v0, %s7720_s12 }
  0xa7   : > { %v7986_v24 = vpop.permute.xlu0 %675  ;;  %v7988_v25 = vpop.permute.xlu1 %677 }
  0xa8   : > { %v694_v10 = vsel %vm693_vm3, %v7986_v24, %v7988_v25 }
  0xa9   : > { %1046 = vrot.lane.b32.xlu0 %v777_v26, %s7721_s15  ;;  %1048 = vrot.lane.b32.xlu1 %v778_v27, %s7721_s15 }
  0xab   : > { %v7995_v28 = vpop.permute.xlu0 %652  ;;  %v7997_v29 = vpop.permute.xlu1 %654 }
  0xad   : > { %1044 = vrot.lane.b32.xlu1 %v776_v30, %s7721_s15  ;;  %1042 = vrot.lane.b32.xlu0 %v775_v31, %s7721_s15 }
  0xaf   : > { %v8003_v32 = vpop.permute.xlu0 %656  ;;  %v8005_v33 = vpop.permute.xlu1 %648 }
  0xb0   : > { %v670_v17 = vsel %vm666_vm4, %v7997_v29, %v8003_v32 }
  0xb1   : > { %1028 = vrot.lane.b32.xlu0 %v750_v34, %s7721_s15  ;;  %1030 = vrot.lane.b32.xlu1 %v751_v35, %s7721_s15 }
  0xb3   : > { %v8012_v36 = vpop.permute.xlu0 %650  ;;  %v8014_v37 = vpop.permute.xlu1 %625 }
  0xb4   : > { %v668_v27 = vsel %vm666_vm4, %v8012_v36, %v7995_v28 }
  0xb5   : > { %1040 = vrot.lane.b32.xlu0 %v757_v9, %s7721_s15  ;;  %1024 = vrot.lane.b32.xlu1 %v748_v38, %s7721_s15  ;;  %v695_v9 = vsel %vm693_vm3, %v7988_v25, %v7972_v21  ;;  %v667_v25 = vsel %vm666_vm4, %v8005_v33, %v8012_v36 }
  0xb7   : > { %v8019_v39 = vpop.permute.xlu0 %627  ;;  %v8021_v40 = vpop.permute.xlu1 %629 }
  0xb8   : > { %v642_v31 = vsel %vm639_vm5, %v8014_v37, %v8019_v39  ;;  %v643_v34 = vsel %vm639_vm5, %v8019_v39, %v8021_v40 }
  0xb9   : > { %1026 = vrot.lane.b32.xlu0 %v749_v41, %s7721_s15  ;;  %1010 = vrot.lane.b32.xlu1 %v723_v42, %s7721_s15 }
  0xbb   : > { %v8028_v43 = vpop.permute.xlu0 %621  ;;  %v8030_v44 = vpop.permute.xlu1 %623 }
  0xbc   : > { %v640_v42 = vsel %vm639_vm5, %v8028_v43, %v8030_v44 }
  0xbd   : > { %1012 = vrot.lane.b32.xlu0 %v724_v45, %s7721_s15  ;;  %1022 = vrot.lane.b32.xlu1 %v730_v14, %s7721_s15  ;;  %v669_v14 = vsel %vm666_vm4, %v7995_v28, %v7997_v29 }
  0xbf   : > { %v8042_v48 = vpop.permute.xlu0 %598  ;;  %v8044_v49 = vpop.permute.xlu1 %600 }
  0xc1   : > { %768 = vrot.lane.b32.xlu0 %v8037_v46, %s7707_s19  ;;  %770 = vrot.lane.b32.xlu1 %v8040_v47, %s7707_s19 }
  0xc3   : > { %v8050_v50 = vpop.permute.xlu0 %602  ;;  %v8052_v51 = vpop.permute.xlu1 %594 }
  0xc5   : > { %772 = vrot.lane.b32.xlu0 %v15497_v0, %s7707_s19  ;;  %1006 = vrot.lane.b32.xlu1 %v721_v52, %s7721_s15 }
  0xc7   : > { %v8062_v54 = vpop.permute.xlu0 %596  ;;  %v8064_v55 = vpop.permute.xlu1 %573 }
  0xc9   : > { %1008 = vrot.lane.b32.xlu0 %v722_v56, %s7721_s15  ;;  %766 = vrot.lane.b32.xlu1 %v8060_v53, %s7707_s19  ;;  %v615_v56 = vsel %vm612_vm6, %v8042_v48, %v8044_v49  ;;  %s16686_s19 = smov 124  }
  0xcb   : > { %v8071_v57 = vpop.permute.xlu0 %575  ;;  %v8073_v58 = vpop.permute.xlu1 %577 }
  0xcd   : > { %992 = vrot.lane.b32.xlu0 %v696_v59, %s7721_s15  ;;  %994 = vrot.lane.b32.xlu1 %v697_v60, %s7721_s15  ;;  %v616_v59 = vsel %vm612_vm6, %v8044_v49, %v8050_v50  ;;  %v613_v49 = vsel %vm612_vm6, %v8052_v51, %v8062_v54 }
  0xcf   : > { %v8083_v61 = vpop.permute.xlu0 %569  ;;  %v8085_v62 = vpop.permute.xlu1 %571 }
  0xd1   : > { %1004 = vrot.lane.b32.xlu0 %v7966_v19, %s7721_s15  ;;  %741 = vrot.lane.b32.xlu1 %v8037_v46, %s7708_s20 }
  0xd3   : > { %v8091_v63 = vpop.permute.xlu0 %548  ;;  %v8093_v1 = vpop.permute.xlu1 %550 }
  0xd5   : > { %743 = vrot.lane.b32.xlu0 %v8040_v47, %s7708_s20  ;;  %745 = vrot.lane.b32.xlu1 %v15497_v0, %s7708_s20 }
  0xd7   : > { %v8099_v7 = vpop.permute.xlu0 %552  ;;  %v8101_v8 = vpop.permute.xlu1 %544 }
  0xd9   : > { %990 = vrot.lane.b32.xlu1 %v695_v9, %s7721_s15  ;;  %988 = vrot.lane.b32.xlu0 %v694_v10, %s7721_s15 }
  0xdb   : > { %v8111_v11 = vpop.permute.xlu0 %546  ;;  %v8113_v12 = vpop.permute.xlu1 %521 }
  0xdd   : > { %739 = vrot.lane.b32.xlu0 %v8060_v53, %s7708_s20  ;;  %974 = vrot.lane.b32.xlu1 %v669_v14, %s7721_s15  ;;  %s16697_s20 = smov 120  }
  0xdf   : > { %v8121_v15 = vpop.permute.xlu0 %523  ;;  %v8123_v16 = vpop.permute.xlu1 %525 }
  0xe1   : > { %976 = vrot.lane.b32.xlu0 %v670_v17, %s7721_s15  ;;  %986 = vrot.lane.b32.xlu1 %v7986_v24, %s7721_s15 }
  0xe3   : > { %v8131_v19 = vpop.permute.xlu0 %542  ;;  %v8133_v20 = vpop.permute.xlu1 %517 }
  0xe5   : > { %714 = vrot.lane.b32.xlu0 %v8037_v46, %s7709_s21  ;;  %716 = vrot.lane.b32.xlu1 %v8040_v47, %s7709_s21 }
  0xe7   : > { %v8139_v21 = vpop.permute.xlu0 %519  ;;  %v8141_v22 = vpop.permute.xlu1 %494 }
  0xe9   : > { %718 = vrot.lane.b32.xlu0 %v15497_v0, %s7709_s21  ;;  %970 = vrot.lane.b32.xlu1 %v667_v25, %s7721_s15  ;;  %v614_v25 = vsel %vm612_vm6, %v8062_v54, %v8042_v48 }
  0xeb   : > { %v8149_v24 = vpop.permute.xlu0 %496  ;;  %v8151_v26 = vpop.permute.xlu1 %498 }
  0xed   : > { %972 = vrot.lane.b32.xlu0 %v668_v27, %s7721_s15  ;;  %712 = vrot.lane.b32.xlu1 %v8060_v53, %s7709_s21 }
  0xef   : > { %v8159_v29 = vpop.permute.xlu0 %515  ;;  %v8161_v30 = vpop.permute.xlu1 %490 }
  0xf1   : > { %956 = vrot.lane.b32.xlu0 %v642_v31, %s7721_s15  ;;  %958 = vrot.lane.b32.xlu1 %v643_v34, %s7721_s15  ;;  %v588_v34 = vsel %vm585_vm7, %v8064_v55, %v8071_v57 }
  0xf3   : > { %v8171_v28 = vpop.permute.xlu0 %492  ;;  %v8173_v35 = vpop.permute.xlu1 %467 }
  0xf5   : > { %968 = vrot.lane.b32.xlu0 %v8005_v33, %s7721_s15  ;;  %687 = vrot.lane.b32.xlu1 %v8037_v46, %s7710_s22  ;;  %v641_v33 = vsel %vm639_vm5, %v8030_v44, %v8014_v37 }
  0xf7   : > { %v8179_v36 = vpop.permute.xlu0 %469  ;;  %v8181_v38 = vpop.permute.xlu1 %471 }
  0xf9   : > { %689 = vrot.lane.b32.xlu0 %v8040_v47, %s7710_s22  ;;  %691 = vrot.lane.b32.xlu1 %v15497_v0, %s7710_s22 }
  0xfb   : > { %v8187_v39 = vpop.permute.xlu0 %488  ;;  %v8189_v41 = vpop.permute.xlu1 %463 }
  0xfd   : > { %954 = vrot.lane.b32.xlu1 %v641_v33, %s7721_s15  ;;  %952 = vrot.lane.b32.xlu0 %v640_v42, %s7721_s15  ;;  %v589_v33 = vsel %vm585_vm7, %v8071_v57, %v8073_v58 }
  0xff   : > { %v8199_v45 = vpop.permute.xlu0 %465  ;;  %v8201_v52 = vpop.permute.xlu1 %440 }
 0x101   : > { %685 = vrot.lane.b32.xlu0 %v8060_v53, %s7710_s22  ;;  %938 = vrot.lane.b32.xlu1 %v615_v56, %s7721_s15 }
 0x103   : > { %v8209_v37 = vpop.permute.xlu0 %442  ;;  %v8211_v44 = vpop.permute.xlu1 %444 }
 0x105   : > { %940 = vrot.lane.b32.xlu0 %v616_v59, %s7721_s15  ;;  %950 = vrot.lane.b32.xlu1 %v8028_v43, %s7721_s15 }
 0x107   : > { %v8219_v60 = vpop.permute.xlu0 %461  ;;  %v8221_v9 = vpop.permute.xlu1 %436 }
 0x109   : > { %660 = vrot.lane.b32.xlu0 %v8037_v46, %s7711_s23  ;;  %662 = vrot.lane.b32.xlu1 %v8040_v47, %s7711_s23 }
 0x10b   : > { %v8227_v10 = vpop.permute.xlu0 %438  ;;  %v8229_v14 = vpop.permute.xlu1 %413 }
 0x10d   : > { %664 = vrot.lane.b32.xlu0 %v15497_v0, %s7711_s23  ;;  %934 = vrot.lane.b32.xlu1 %v613_v49, %s7721_s15 }
 0x10f   : > { %v8237_v43 = vpop.permute.xlu0 %415  ;;  %v8239_v17 = vpop.permute.xlu1 %417 }
 0x111   : > { %936 = vrot.lane.b32.xlu0 %v614_v25, %s7721_s15  ;;  %658 = vrot.lane.b32.xlu1 %v8060_v53, %s7711_s23  ;;  %v586_v25 = vsel %vm585_vm7, %v8083_v61, %v8085_v62 }
 0x113   : > { %v8247_v27 = vpop.permute.xlu0 %434  ;;  %v8249_v31 = vpop.permute.xlu1 %409 }
 0x115   : > { %920 = vrot.lane.b32.xlu0 %v588_v34, %s7721_s15  ;;  %922 = vrot.lane.b32.xlu1 %v589_v33, %s7721_s15 }
 0x117   : > { %v8259_v48 = vpop.permute.xlu0 %411  ;;  %v8261_v54 = vpop.permute.xlu1 %407 }
 0x119   : > { %932 = vrot.lane.b32.xlu0 %v8052_v51, %s7721_s15  ;;  %633 = vrot.lane.b32.xlu1 %v8037_v46, %s15504_s24  ;;  %v587_v51 = vsel %vm585_vm7, %v8085_v62, %v8064_v55  ;;  %v564_v55 = vsel %vm560_vm9, %v8091_v63, %v8093_v1 }
 0x11b   : > { %v1047_v42 = vpop.permute.xlu0 %1046  ;;  %v8267_v56 = vpop.permute.xlu1 %1048 }
 0x11c   : > { %v1174_v57 = vsel %vm1058_vm8, %v1047_v42, %v8267_v56 }
 0x11d   : > { %635 = vrot.lane.b32.xlu0 %v8040_v47, %s15504_s24  ;;  %637 = vrot.lane.b32.xlu1 %v15497_v0, %s15504_s24 }
 0x11e   : > { %1375 = vmatprep.subr.mxu1 %v1174_v57 }
 0x11f   : > { %v1043_v59 = vpop.permute.xlu0 %1042  ;;  %v1045_v49 = vpop.permute.xlu1 %1044 }
 0x120   : > { %v1172_v34 = vsel %vm1058_vm8, %v1043_v59, %v1045_v49  ;;  %v1173_v33 = vsel %vm1058_vm8, %v1045_v49, %v1047_v42 }
 0x121   : > { %918 = vrot.lane.b32.xlu1 %v587_v51, %s7721_s15  ;;  %916 = vrot.lane.b32.xlu0 %v586_v25, %s7721_s15  ;;  %v565_v51 = vsel %vm560_vm9, %v8093_v1, %v8099_v7 }
 0x122   : > { %1304 = vmatprep.subr.mxu0 %v1172_v34  ;;  %1376 = vmatpush1.msra.mxu1 %v1173_v33 }
 0x123   : > { %v1029_v57 = vpop.permute.xlu0 %1028  ;;  %v8285_v0 = vpop.permute.xlu1 %1030 }
 0x124   : > { %15923 = vst [vmem:[#allocation6_spill] sm:$0xff] %v8285_v0  ;;  %v1166_v62 = vsel %vm1058_vm8, %v1029_v57, %v8285_v0 }
 0x125   : > { %631 = vrot.lane.b32.xlu0 %v8060_v53, %s15504_s24  ;;  %902 = vrot.lane.b32.xlu1 %v564_v55, %s7721_s15  ;;  %s7724_s24 = smov 19  }
 0x126   : > { %1377 = vmatprep.subr.mxu1 %v1166_v62 }
 0x127   : > { %v1041_v42 = vpop.permute.xlu0 %1040  ;;  %v1025_v49 = vpop.permute.xlu1 %1024 }
 0x128   : > { %v1171_v25 = vsel %vm1058_vm8, %v1041_v42, %v1043_v59  ;;  %v15924_v42 = vmov 0.0  }
 0x129   : > { %904 = vrot.lane.b32.xlu0 %v565_v51, %s7721_s15  ;;  %914 = vrot.lane.b32.xlu1 %v8083_v61, %s7721_s15  ;;  %v562_v61 = vsel %vm560_vm9, %v8101_v8, %v8111_v11 }
 0x12a   : > { %1305 = vmatpush1.msra.mxu0 %v1171_v25  ;;  %v563_v25 = vsel %vm560_vm9, %v8111_v11, %v8091_v63 }
 0x12b   : > { %v1027_v34 = vpop.permute.xlu0 %1026  ;;  %v1011_v33 = vpop.permute.xlu1 %1010 }
 0x12c   : > { %v1164_v0 = vsel %vm1058_vm8, %v1025_v49, %v1027_v34  ;;  %v1165_v55 = vsel %vm1058_vm8, %v1027_v34, %v1029_v57 }
 0x12d   : > { %606 = vrot.lane.b32.xlu0 %v8037_v46, %s15500_s25  ;;  %608 = vrot.lane.b32.xlu1 %v8040_v47, %s15500_s25 }
 0x12e   : > { %1306 = vmatprep.subr.mxu0 %v1164_v0  ;;  %1378 = vmatpush1.msra.mxu1 %v1165_v55  ;;  %v537_v55 = vsel %vm533_vm10, %v8113_v12, %v8121_v15 }
 0x12f   : > { %v8308_v1 = vpop.permute.xlu0 %1012  ;;  %v1023_v59 = vpop.permute.xlu1 %1022 }
 0x130   : > { %v1163_v62 = vsel %vm1058_vm8, %v1023_v59, %v1025_v49  ;;  %v1158_v57 = vsel %vm1058_vm8, %v1011_v33, %v8308_v1  ;;  %v538_v59 = vsel %vm533_vm10, %v8121_v15, %v8123_v16 }
 0x131   : > { %610 = vrot.lane.b32.xlu0 %v15924_v42, %s15500_s25  ;;  %898 = vrot.lane.b32.xlu1 %v562_v61, %s7721_s15  ;;  %v561_v61 = vsel %vm560_vm9, %v8131_v19, %v8101_v8 }
 0x132   : > { %1307 = vmatpush1.msra.mxu0 %v1163_v62  ;;  %1379 = vmatprep.subr.mxu1 %v1158_v57 }
 0x133   : > { %v8319_v0 = vpop.permute.xlu0 %768  ;;  %v8321_v51 = vpop.permute.xlu1 %770 }
 0x135   : > { %900 = vrot.lane.b32.xlu0 %v563_v25, %s7721_s15  ;;  %604 = vrot.lane.b32.xlu1 %v8060_v53, %s15500_s25  ;;  %s7723_s25 = smov 20  }
 0x137   : > { %v8329_v49 = vpop.permute.xlu0 %772  ;;  %v1007_v34 = vpop.permute.xlu1 %1006 }
 0x139   : > { %884 = vrot.lane.b32.xlu0 %v537_v55, %s7721_s15  ;;  %886 = vrot.lane.b32.xlu1 %v538_v59, %s7721_s15  ;;  %v535_v55 = vsel %vm533_vm10, %v8133_v20, %v8139_v21  ;;  %v536_v59 = vsel %vm533_vm10, %v8139_v21, %v8113_v12  ;;  %v511_v12 = vsel %vm506_vm11, %v8149_v24, %v8151_v26 }
 0x13b   : > { %v1009_v63 = vpop.permute.xlu0 %1008  ;;  %v8339_v11 = vpop.permute.xlu1 %766 }
 0x13c   : > { %v1156_v62 = vsel %vm1058_vm8, %v1007_v34, %v1009_v63  ;;  %v1157_v57 = vsel %vm1058_vm8, %v1009_v63, %v1011_v33 }
 0x13d   : > { %896 = vrot.lane.b32.xlu0 %v561_v61, %s7721_s15  ;;  %581 = vrot.lane.b32.xlu1 %v8037_v46, %s7714_s26 }
 0x13e   : > { %1308 = vmatprep.subr.mxu0 %v1156_v62  ;;  %1380 = vmatpush1.msra.mxu1 %v1157_v57  ;;  %v510_v57 = vsel %vm506_vm11, %v8141_v22, %v8149_v24 }
 0x13f   : > { %v993_v15 = vpop.permute.xlu0 %992  ;;  %v8349_v25 = vpop.permute.xlu1 %994 }
 0x140   : > { %v1150_v8 = vsel %vm1058_vm8, %v993_v15, %v8349_v25 }
 0x141   : > { %583 = vrot.lane.b32.xlu0 %v8040_v47, %s7714_s26  ;;  %880 = vrot.lane.b32.xlu1 %v535_v55, %s7721_s15  ;;  %v534_v55 = vsel %vm533_vm10, %v8159_v29, %v8133_v20 }
 0x142   : > { %1381 = vmatprep.subr.mxu1 %v1150_v8 }
 0x143   : > { %v1005_v19 = vpop.permute.xlu0 %1004  ;;  %v8359_v33 = vpop.permute.xlu1 %741 }
 0x144   : > { %v1155_v63 = vsel %vm1058_vm8, %v1005_v19, %v1007_v34 }
 0x145   : > { %882 = vrot.lane.b32.xlu0 %v536_v59, %s7721_s15  ;;  %579 = vrot.lane.b32.xlu1 %v8060_v53, %s7714_s26 }
 0x146   : > { %1309 = vmatpush1.msra.mxu0 %v1155_v63  ;;  %v508_v63 = vsel %vm506_vm11, %v8161_v30, %v8171_v28 }
 0x147   : > { %v8368_v61 = vpop.permute.xlu0 %743  ;;  %v8370_v62 = vpop.permute.xlu1 %745 }
 0x149   : > { %866 = vrot.lane.b32.xlu0 %v510_v57, %s7721_s15  ;;  %868 = vrot.lane.b32.xlu1 %v511_v12, %s7721_s15 }
 0x14b   : > { %v989_v21 = vpop.permute.xlu0 %988  ;;  %v991_v34 = vpop.permute.xlu1 %990 }
 0x14c   : > { %v1148_v8 = vsel %vm1058_vm8, %v989_v21, %v991_v34  ;;  %v1149_v19 = vsel %vm1058_vm8, %v991_v34, %v993_v15  ;;  %v509_v15 = vsel %vm506_vm11, %v8171_v28, %v8141_v22  ;;  %v483_v22 = vsel %vm479_vm12, %v8173_v35, %v8179_v36 }
 0x14d   : > { %878 = vrot.lane.b32.xlu0 %v534_v55, %s7721_s15  ;;  %556 = vrot.lane.b32.xlu1 %v8037_v46, %s7715_s27  ;;  %v484_v28 = vsel %vm479_vm12, %v8179_v36, %v8181_v38  ;;  %v481_v36 = vsel %vm479_vm12, %v8189_v41, %v8199_v45 }
 0x14e   : > { %1310 = vmatprep.subr.mxu0 %v1148_v8  ;;  %1382 = vmatpush1.msra.mxu1 %v1149_v19  ;;  %v507_v19 = vsel %vm506_vm11, %v8187_v39, %v8161_v30 }
 0x14f   : > { %v8388_v24 = vpop.permute.xlu0 %739  ;;  %v975_v59 = vpop.permute.xlu1 %974 }
 0x151   : > { %558 = vrot.lane.b32.xlu0 %v8040_v47, %s7715_s27  ;;  %862 = vrot.lane.b32.xlu1 %v508_v63, %s7721_s15 }
 0x153   : > { %v8396_v20 = vpop.permute.xlu0 %976  ;;  %v987_v29 = vpop.permute.xlu1 %986 }
 0x154   : > { %v1147_v57 = vsel %vm1058_vm8, %v987_v29, %v989_v21  ;;  %v1142_v12 = vsel %vm1058_vm8, %v975_v59, %v8396_v20 }
 0x155   : > { %864 = vrot.lane.b32.xlu0 %v509_v15, %s7721_s15  ;;  %554 = vrot.lane.b32.xlu1 %v8060_v53, %s7715_s27 }
 0x156   : > { %1311 = vmatpush1.msra.mxu0 %v1147_v57  ;;  %1383 = vmatprep.subr.mxu1 %v1142_v12  ;;  %v482_v12 = vsel %vm479_vm12, %v8199_v45, %v8173_v35  ;;  %v457_v35 = vsel %vm452_vm13, %v8209_v37, %v8211_v44 }
 0x157   : > { %v8407_v34 = vpop.permute.xlu0 %714  ;;  %v8409_v55 = vpop.permute.xlu1 %716 }
 0x159   : > { %848 = vrot.lane.b32.xlu0 %v483_v22, %s7721_s15  ;;  %850 = vrot.lane.b32.xlu1 %v484_v28, %s7721_s15 }
 0x15b   : > { %v8419_v21 = vpop.permute.xlu0 %718  ;;  %v971_v8 = vpop.permute.xlu1 %970 }
 0x15d   : > { %860 = vrot.lane.b32.xlu0 %v507_v19, %s7721_s15  ;;  %529 = vrot.lane.b32.xlu1 %v8037_v46, %s7716_s28  ;;  %v456_v19 = vsel %vm452_vm13, %v8201_v52, %v8209_v37 }
 0x15f   : > { %v973_v63 = vpop.permute.xlu0 %972  ;;  %v8427_v29 = vpop.permute.xlu1 %712 }
 0x160   : > { %v1140_v15 = vsel %vm1058_vm8, %v971_v8, %v973_v63  ;;  %v1141_v57 = vsel %vm1058_vm8, %v973_v63, %v975_v59 }
 0x161   : > { %531 = vrot.lane.b32.xlu0 %v8040_v47, %s7716_s28  ;;  %844 = vrot.lane.b32.xlu1 %v481_v36, %s7721_s15 }
 0x162   : > { %1312 = vmatprep.subr.mxu0 %v1140_v15  ;;  %1384 = vmatpush1.msra.mxu1 %v1141_v57  ;;  %v480_v15 = vsel %vm479_vm12, %v8219_v60, %v8189_v41  ;;  %v454_v57 = vsel %vm452_vm13, %v8221_v9, %v8227_v10 }
 0x163   : > { %v957_v30 = vpop.permute.xlu0 %956  ;;  %v8437_v39 = vpop.permute.xlu1 %958 }
 0x164   : > { %v1134_v22 = vsel %vm1058_vm8, %v957_v30, %v8437_v39 }
 0x165   : > { %846 = vrot.lane.b32.xlu0 %v482_v12, %s7721_s15  ;;  %527 = vrot.lane.b32.xlu1 %v8060_v53, %s7716_s28 }
 0x166   : > { %1385 = vmatprep.subr.mxu1 %v1134_v22 }
 0x167   : > { %v969_v59 = vpop.permute.xlu0 %968  ;;  %v8447_v28 = vpop.permute.xlu1 %687 }
 0x168   : > { %v1139_v45 = vsel %vm1058_vm8, %v969_v59, %v971_v8  ;;  %v455_v59 = vsel %vm452_vm13, %v8227_v10, %v8201_v52 }
 0x169   : > { %830 = vrot.lane.b32.xlu0 %v456_v19, %s7721_s15  ;;  %832 = vrot.lane.b32.xlu1 %v457_v35, %s7721_s15  ;;  %v429_v35 = vsel %vm425_vm14, %v8229_v14, %v8237_v43 }
 0x16a   : > { %1313 = vmatpush1.msra.mxu0 %v1139_v45  ;;  %v430_v45 = vsel %vm425_vm14, %v8237_v43, %v8239_v17 }
 0x16b   : > { %v8458_v63 = vpop.permute.xlu0 %689  ;;  %v8460_v36 = vpop.permute.xlu1 %691 }
 0x16d   : > { %842 = vrot.lane.b32.xlu0 %v480_v15, %s7721_s15  ;;  %502 = vrot.lane.b32.xlu1 %v8037_v46, %s15502_s29 }
 0x16f   : > { %v953_v37 = vpop.permute.xlu0 %952  ;;  %v955_v8 = vpop.permute.xlu1 %954 }
 0x170   : > { %v1132_v12 = vsel %vm1058_vm8, %v953_v37, %v955_v8  ;;  %v1133_v22 = vsel %vm1058_vm8, %v955_v8, %v957_v30 }
 0x171   : > { %504 = vrot.lane.b32.xlu0 %v8040_v47, %s15502_s29  ;;  %826 = vrot.lane.b32.xlu1 %v454_v57, %s7721_s15  ;;  %v453_v57 = vsel %vm452_vm13, %v8247_v27, %v8221_v9  ;;  %v428_v9 = vsel %vm425_vm14, %v8259_v48, %v8229_v14 }
 0x172   : > { %1314 = vmatprep.subr.mxu0 %v1132_v12  ;;  %1386 = vmatpush1.msra.mxu1 %v1133_v22  ;;  %v427_v12 = vsel %vm425_vm14, %v8249_v31, %v8259_v48 }
 0x173   : > { %v8476_v41 = vpop.permute.xlu0 %685  ;;  %v939_v60 = vpop.permute.xlu1 %938 }
 0x175   : > { %828 = vrot.lane.b32.xlu0 %v455_v59, %s7721_s15  ;;  %500 = vrot.lane.b32.xlu1 %v8060_v53, %s15502_s29  ;;  %s6195_s29 = sshll.u32 %s16775_s14, 4 }
 0x177   : > { %v8484_v30 = vpop.permute.xlu0 %940  ;;  %v951_v19 = vpop.permute.xlu1 %950 }
 0x178   : > { %v1131_v15 = vsel %vm1058_vm8, %v951_v19, %v953_v37  ;;  %v1126_v52 = vsel %vm1058_vm8, %v939_v60, %v8484_v30 }
 0x179   : > { %812 = vrot.lane.b32.xlu0 %v429_v35, %s7721_s15  ;;  %814 = vrot.lane.b32.xlu1 %v430_v45, %s7721_s15 }
 0x17a   : > { %1315 = vmatpush1.msra.mxu0 %v1131_v15  ;;  %1387 = vmatprep.subr.mxu1 %v1126_v52 }
 0x17b   : > { %v8497_v10 = vpop.permute.xlu0 %660  ;;  %v8499_v8 = vpop.permute.xlu1 %662 }
 0x17d   : > { %824 = vrot.lane.b32.xlu0 %v453_v57, %s7721_s15  ;;  %475 = vrot.lane.b32.xlu1 %v8037_v46, %s7718_s30 }
 0x17f   : > { %v8507_v43 = vpop.permute.xlu0 %664  ;;  %v935_v37 = vpop.permute.xlu1 %934 }
 0x181   : > { %477 = vrot.lane.b32.xlu0 %v8040_v47, %s7718_s30  ;;  %808 = vrot.lane.b32.xlu1 %v427_v12, %s7721_s15 }
 0x183   : > { %v937_v22 = vpop.permute.xlu0 %936  ;;  %v8515_v59 = vpop.permute.xlu1 %658 }
 0x184   : > { %v1124_v27 = vsel %vm1058_vm8, %v935_v37, %v937_v22  ;;  %v1125_v19 = vsel %vm1058_vm8, %v937_v22, %v939_v60  ;;  %v426_v60 = vsel %vm425_vm14, %v8261_v54, %v8249_v31 }
 0x185   : > { %810 = vrot.lane.b32.xlu0 %v428_v9, %s7721_s15  ;;  %473 = vrot.lane.b32.xlu1 %v8060_v53, %s7718_s30 }
 0x186   : > { %1316 = vmatprep.subr.mxu0 %v1124_v27  ;;  %1388 = vmatpush1.msra.mxu1 %v1125_v19 }
 0x187   : > { %v921_v35 = vpop.permute.xlu0 %920  ;;  %v8525_v45 = vpop.permute.xlu1 %922 }
 0x188   : > { %v1118_v15 = vsel %vm1058_vm8, %v921_v35, %v8525_v45 }
 0x189   : > { %794 = vrot.lane.b32.xlu0 %v7807_v2, %s7721_s15  ;;  %796 = vrot.lane.b32.xlu1 %v7814_v3, %s7721_s15 }
 0x18a   : > { %1389 = vmatprep.subr.mxu1 %v1118_v15  ;;  %v781_v15 = vsel %vm774_vm0, %v8319_v0, %v8321_v51 }
 0x18b   : > { %v933_v14 = vpop.permute.xlu0 %932  ;;  %v8533_v48 = vpop.permute.xlu1 %633 }
 0x18c   : > { %v1123_v52 = vsel %vm1058_vm8, %v933_v14, %v935_v37  ;;  %v779_v14 = vsel %vm774_vm0, %v7934_v6, %v8339_v11 }
 0x18d   : > { %806 = vrot.lane.b32.xlu0 %v426_v60, %s7721_s15  ;;  %448 = vrot.lane.b32.xlu1 %v8037_v46, %s7719_s11  ;;  %v780_v60 = vsel %vm774_vm0, %v8339_v11, %v8319_v0 }
 0x18e   : > { %1317 = vmatpush1.msra.mxu0 %v1123_v52  ;;  %v755_v52 = vsel %vm747_vm1, %v8368_v61, %v8370_v62  ;;  %v752_v62 = vsel %vm747_vm1, %v7948_v13, %v8388_v24  ;;  %v727_v13 = vsel %vm720_vm2, %v8407_v34, %v8409_v55 }
 0x18f   : > { %v8542_v2 = vpop.permute.xlu0 %635  ;;  %v8544_v57 = vpop.permute.xlu1 %637 }
 0x191   : > { %450 = vrot.lane.b32.xlu0 %v8040_v47, %s7719_s11  ;;  %790 = vrot.lane.b32.xlu1 %v7817_v4, %s7721_s15 }
 0x193   : > { %v917_v3 = vpop.permute.xlu0 %916  ;;  %v919_v31 = vpop.permute.xlu1 %918 }
 0x194   : > { %v1116_v54 = vsel %vm1058_vm8, %v917_v3, %v919_v31  ;;  %v1117_v37 = vsel %vm1058_vm8, %v919_v31, %v921_v35 }
 0x195   : > { %792 = vrot.lane.b32.xlu0 %v7824_v5, %s7721_s15  ;;  %446 = vrot.lane.b32.xlu1 %v8060_v53, %s7719_s11 }
 0x196   : > { %1318 = vmatprep.subr.mxu0 %v1116_v54  ;;  %1390 = vmatpush1.msra.mxu1 %v1117_v37 }
 0x197   : > { %v8556_v12 = vpop.permute.xlu0 %631  ;;  %v903_v22 = vpop.permute.xlu1 %902 }
 0x199   : > { %788 = vrot.lane.b32.xlu0 %v15924_v42, %s7721_s15  ;;  %421 = vrot.lane.b32.xlu1 %v8037_v46, %s7720_s12  ;;  %v782_v46 = vsel %vm774_vm0, %v8321_v51, %v8329_v49  ;;  %vm2813_vm0 = vcmask 154624  }
 0x19b   : > { %v8562_v4 = vpop.permute.xlu0 %904  ;;  %v915_v9 = vpop.permute.xlu1 %914 }
 0x19c   : > { %v1115_v27 = vsel %vm1058_vm8, %v915_v9, %v917_v3  ;;  %v1110_v5 = vsel %vm1058_vm8, %v903_v22, %v8562_v4  ;;  %v754_v3 = vsel %vm747_vm1, %v8359_v33, %v8368_v61  ;;  %v753_v61 = vsel %vm747_vm1, %v8388_v24, %v8359_v33 }
 0x19d   : > { %423 = vrot.lane.b32.xlu0 %v8040_v47, %s7720_s12  ;;  %419 = vrot.lane.b32.xlu1 %v8060_v53, %s7720_s12  ;;  %v728_v9 = vsel %vm720_vm2, %v8409_v55, %v8419_v21  ;;  %v726_v21 = vsel %vm720_vm2, %v8427_v29, %v8407_v34  ;;  %vm2085_vm1 = vcmask 326656  }
 0x19e   : > { %1319 = vmatpush1.msra.mxu0 %v1115_v27  ;;  %1391 = vmatprep.subr.mxu1 %v1110_v5  ;;  %v725_v5 = vsel %vm720_vm2, %v7964_v18, %v8427_v29  ;;  %vm3558_vm2 = vcmask 146432  }
 0x19f   : > { %v8571_v19 = vpop.permute.xlu0 %606  ;;  %v8573_v35 = vpop.permute.xlu1 %608 }
 0x1a1   : > { %1054 = vrot.lane.b32.xlu0 %v781_v15, %s7721_s15  ;;  %1056 = vrot.lane.b32.xlu1 %v782_v46, %s7721_s15  ;;  %v701_v15 = vsel %vm693_vm3, %v8458_v63, %v8460_v36  ;;  %v698_v36 = vsel %vm693_vm3, %v7980_v23, %v8476_v41  ;;  %v673_v23 = vsel %vm666_vm4, %v8497_v10, %v8499_v8 }
 0x1a3   : > { %v8583_v47 = vpop.permute.xlu0 %610  ;;  %v899_v53 = vpop.permute.xlu1 %898 }
 0x1a5   : > { %1050 = vrot.lane.b32.xlu0 %v779_v14, %s7721_s15  ;;  %1052 = vrot.lane.b32.xlu1 %v780_v60, %s7721_s15 }
 0x1a7   : > { %v901_v51 = vpop.permute.xlu0 %900  ;;  %v8593_v49 = vpop.permute.xlu1 %604 }
 0x1a8   : > { %v1108_v6 = vsel %vm1058_vm8, %v899_v53, %v901_v51  ;;  %v1109_v31 = vsel %vm1058_vm8, %v901_v51, %v903_v22 }
 0x1a9   : > { %1036 = vrot.lane.b32.xlu0 %v754_v3, %s7721_s15  ;;  %1038 = vrot.lane.b32.xlu1 %v755_v52, %s7721_s15  ;;  %v674_v3 = vsel %vm666_vm4, %v8499_v8, %v8507_v43  ;;  %v671_v43 = vsel %vm666_vm4, %v8003_v32, %v8515_v59 }
 0x1aa   : > { %1320 = vmatprep.subr.mxu0 %v1108_v6  ;;  %1392 = vmatpush1.msra.mxu1 %v1109_v31  ;;  %v672_v31 = vsel %vm666_vm4, %v8515_v59, %v8497_v10 }
 0x1ab   : > { %v885_v0 = vpop.permute.xlu0 %884  ;;  %v8605_v11 = vpop.permute.xlu1 %886 }
 0x1ac   : > { %v1102_v54 = vsel %vm1058_vm8, %v885_v0, %v8605_v11 }
 0x1ad   : > { %1032 = vrot.lane.b32.xlu0 %v752_v62, %s7721_s15  ;;  %1034 = vrot.lane.b32.xlu1 %v753_v61, %s7721_s15  ;;  %v647_v62 = vsel %vm639_vm5, %v8542_v2, %v8544_v57  ;;  %v646_v61 = vsel %vm639_vm5, %v8533_v48, %v8542_v2  ;;  %v644_v57 = vsel %vm639_vm5, %v8021_v40, %v8556_v12 }
 0x1ae   : > { %1393 = vmatprep.subr.mxu1 %v1102_v54  ;;  %v645_v2 = vsel %vm639_vm5, %v8556_v12, %v8533_v48  ;;  %v619_v40 = vsel %vm612_vm6, %v8571_v19, %v8573_v35 }
 0x1af   : > { %v897_v37 = vpop.permute.xlu0 %896  ;;  %v8617_v22 = vpop.permute.xlu1 %581 }
 0x1b0   : > { %v1107_v33 = vsel %vm1058_vm8, %v897_v37, %v899_v53  ;;  %v700_v53 = vsel %vm693_vm3, %v8447_v28, %v8458_v63  ;;  %v699_v63 = vsel %vm693_vm3, %v8476_v41, %v8447_v28  ;;  %vm4303_vm3 = vcmask 138240  }
 0x1b1   : > { %1018 = vrot.lane.b32.xlu0 %v727_v13, %s7721_s15  ;;  %1020 = vrot.lane.b32.xlu1 %v728_v9, %s7721_s15 }
 0x1b2   : > { %1321 = vmatpush1.msra.mxu0 %v1107_v33  ;;  %v620_v33 = vsel %vm612_vm6, %v8573_v35, %v8583_v47  ;;  %v617_v47 = vsel %vm612_vm6, %v8050_v50, %v8593_v49 }
 0x1b3   : > { %v8628_v24 = vpop.permute.xlu0 %583  ;;  %v881_v27 = vpop.permute.xlu1 %880 }
 0x1b5   : > { %1014 = vrot.lane.b32.xlu0 %v725_v5, %s7721_s15  ;;  %1016 = vrot.lane.b32.xlu1 %v726_v21, %s7721_s15  ;;  %v618_v5 = vsel %vm612_vm6, %v8593_v49, %v8571_v19 }
 0x1b7   : > { %v883_v55 = vpop.permute.xlu0 %882  ;;  %v8638_v46 = vpop.permute.xlu1 %579 }
 0x1b8   : > { %v1100_v18 = vsel %vm1058_vm8, %v881_v27, %v883_v55  ;;  %v1101_v14 = vsel %vm1058_vm8, %v883_v55, %v885_v0  ;;  %v592_v55 = vsel %vm585_vm7, %v8617_v22, %v8628_v24  ;;  %v591_v49 = vsel %vm585_vm7, %v8638_v46, %v8617_v22 }
 0x1b9   : > { %1000 = vrot.lane.b32.xlu0 %v700_v53, %s7721_s15  ;;  %1002 = vrot.lane.b32.xlu1 %v701_v15, %s7721_s15 }
 0x1ba   : > { %1322 = vmatprep.subr.mxu0 %v1100_v18  ;;  %1394 = vmatpush1.msra.mxu1 %v1101_v14  ;;  %v590_v18 = vsel %vm585_vm7, %v8073_v58, %v8638_v46 }
 0x1bb   : > { %v867_v34 = vpop.permute.xlu0 %866  ;;  %v8650_v29 = vpop.permute.xlu1 %868 }
 0x1bc   : > { %v1094_v60 = vsel %vm1058_vm8, %v867_v34, %v8650_v29 }
 0x1bd   : > { %996 = vrot.lane.b32.xlu0 %v698_v36, %s7721_s15  ;;  %998 = vrot.lane.b32.xlu1 %v699_v63, %s7721_s15 }
 0x1be   : > { %1395 = vmatprep.subr.mxu1 %v1094_v60 }
 0x1bf   : > { %v879_v51 = vpop.permute.xlu0 %878  ;;  %v8662_v52 = vpop.permute.xlu1 %556 }
 0x1c0   : > { %v1099_v28 = vsel %vm1058_vm8, %v879_v51, %v881_v27 }
 0x1c1   : > { %984 = vrot.lane.b32.xlu1 %v674_v3, %s7721_s15  ;;  %982 = vrot.lane.b32.xlu0 %v673_v23, %s7721_s15 }
 0x1c2   : > { %1323 = vmatpush1.msra.mxu0 %v1099_v28 }
 0x1c3   : > { %v559_v41 = vpop.permute.xlu0 %558  ;;  %v863_v6 = vpop.permute.xlu1 %862 }
 0x1c4   : > { %v568_v36 = vsel %vm560_vm9, %v8662_v52, %v559_v41 }
 0x1c5   : > { %980 = vrot.lane.b32.xlu1 %v672_v31, %s7721_s15  ;;  %978 = vrot.lane.b32.xlu0 %v671_v43, %s7721_s15 }
 0x1c7   : > { %v865_v8 = vpop.permute.xlu0 %864  ;;  %v555_v0 = vpop.permute.xlu1 %554 }
 0x1c8   : > { %v1092_v10 = vsel %vm1058_vm8, %v863_v6, %v865_v8  ;;  %v1093_v54 = vsel %vm1058_vm8, %v865_v8, %v867_v34  ;;  %v567_v46 = vsel %vm560_vm9, %v555_v0, %v8662_v52  ;;  %v566_v60 = vsel %vm560_vm9, %v8099_v7, %v555_v0 }
 0x1c9   : > { %964 = vrot.lane.b32.xlu0 %v646_v61, %s7721_s15  ;;  %966 = vrot.lane.b32.xlu1 %v647_v62, %s7721_s15 }
 0x1ca   : > { %1324 = vmatprep.subr.mxu0 %v1092_v10  ;;  %1396 = vmatpush1.msra.mxu1 %v1093_v54 }
 0x1cb   : > { %v849_v32 = vpop.permute.xlu0 %848  ;;  %v8691_v59 = vpop.permute.xlu1 %850 }
 0x1cc   : > { %v1086_v37 = vsel %vm1058_vm8, %v849_v32, %v8691_v59 }
 0x1cd   : > { %960 = vrot.lane.b32.xlu0 %v644_v57, %s7721_s15  ;;  %962 = vrot.lane.b32.xlu1 %v645_v2, %s7721_s15 }
 0x1ce   : > { %1397 = vmatprep.subr.mxu1 %v1086_v37 }
 0x1cf   : > { %v861_v9 = vpop.permute.xlu0 %860  ;;  %v530_v13 = vpop.permute.xlu1 %529 }
 0x1d0   : > { %v1091_v48 = vsel %vm1058_vm8, %v861_v9, %v863_v6 }
 0x1d1   : > { %948 = vrot.lane.b32.xlu1 %v620_v33, %s7721_s15  ;;  %946 = vrot.lane.b32.xlu0 %v619_v40, %s7721_s15 }
 0x1d2   : > { %1325 = vmatpush1.msra.mxu0 %v1091_v48 }
 0x1d3   : > { %v532_v12 = vpop.permute.xlu0 %531  ;;  %v845_v27 = vpop.permute.xlu1 %844 }
 0x1d4   : > { %v541_v23 = vsel %vm533_vm10, %v530_v13, %v532_v12 }
 0x1d5   : > { %944 = vrot.lane.b32.xlu1 %v618_v5, %s7721_s15  ;;  %942 = vrot.lane.b32.xlu0 %v617_v47, %s7721_s15 }
 0x1d7   : > { %v847_v35 = vpop.permute.xlu0 %846  ;;  %v528_v21 = vpop.permute.xlu1 %527 }
 0x1d8   : > { %v1084_v15 = vsel %vm1058_vm8, %v845_v27, %v847_v35  ;;  %v1085_v53 = vsel %vm1058_vm8, %v847_v35, %v849_v32  ;;  %v540_v6 = vsel %vm533_vm10, %v528_v21, %v530_v13  ;;  %v539_v31 = vsel %vm533_vm10, %v8123_v16, %v528_v21 }
 0x1d9   : > { %930 = vrot.lane.b32.xlu1 %v8628_v24, %s7721_s15  ;;  %928 = vrot.lane.b32.xlu0 %v592_v55, %s7721_s15 }
 0x1da   : > { %1326 = vmatprep.subr.mxu0 %v1084_v15  ;;  %1398 = vmatpush1.msra.mxu1 %v1085_v53 }
 0x1db   : > { %v831_v50 = vpop.permute.xlu0 %830  ;;  %v8728_v19 = vpop.permute.xlu1 %832 }
 0x1dc   : > { %v1078_v14 = vsel %vm1058_vm8, %v831_v50, %v8728_v19 }
 0x1dd   : > { %926 = vrot.lane.b32.xlu1 %v591_v49, %s7721_s15  ;;  %924 = vrot.lane.b32.xlu0 %v590_v18, %s7721_s15 }
 0x1de   : > { %1399 = vmatprep.subr.mxu1 %v1078_v14  ;;  %v8800_v14 = vld [vmem:[%s15487_s1] sm:$0xff] }
 0x1df   : > { %v843_v24 = vpop.permute.xlu0 %842  ;;  %v503_v34 = vpop.permute.xlu1 %502 }
 0x1e0   : > { %v1083_v63 = vsel %vm1058_vm8, %v843_v24, %v845_v27 }
 0x1e1   : > { %912 = vrot.lane.b32.xlu1 %v559_v41, %s7721_s15  ;;  %910 = vrot.lane.b32.xlu0 %v568_v36, %s7721_s15 }
 0x1e2   : > { %1327 = vmatpush1.msra.mxu0 %v1083_v63  ;;  %v7722_v63 = vmov 0  }
 0x1e3   : > { %v505_v58 = vpop.permute.xlu0 %504  ;;  %v827_v22 = vpop.permute.xlu1 %826  ;;  %6864 = vset.pattern.permute.xlu0 %v7722_v63  ;;  %6925 = vset.pattern.permute.xlu1 %v7722_v63 }
 0x1e4   : > { %v514_v62 = vsel %vm506_vm11, %v503_v34, %v505_v58 }
 0x1e5   : > { %908 = vrot.lane.b32.xlu1 %v567_v46, %s7721_s15  ;;  %906 = vrot.lane.b32.xlu0 %v566_v60, %s7721_s15 }
 0x1e7   : > { %v829_v51 = vpop.permute.xlu0 %828  ;;  %v501_v3 = vpop.permute.xlu1 %500 }
 0x1e8   : > { %v1076_v28 = vsel %vm1058_vm8, %v827_v22, %v829_v51  ;;  %v1077_v41 = vsel %vm1058_vm8, %v829_v51, %v831_v50  ;;  %v513_v54 = vsel %vm506_vm11, %v501_v3, %v503_v34  ;;  %v512_v32 = vsel %vm506_vm11, %v8151_v26, %v501_v3 }
 0x1e9   : > { %894 = vrot.lane.b32.xlu1 %v532_v12, %s7721_s15  ;;  %892 = vrot.lane.b32.xlu0 %v541_v23, %s7721_s15 }
 0x1ea   : > { %1328 = vmatprep.subr.mxu0 %v1076_v28  ;;  %1400 = vmatpush1.msra.mxu1 %v1077_v41 }
 0x1eb   : > { %v813_v52 = vpop.permute.xlu0 %812  ;;  %v8756_v7 = vpop.permute.xlu1 %814 }
 0x1ec   : > { %v1070_v43 = vsel %vm1058_vm8, %v813_v52, %v8756_v7 }
 0x1ed   : > { %890 = vrot.lane.b32.xlu1 %v540_v6, %s7721_s15  ;;  %888 = vrot.lane.b32.xlu0 %v539_v31, %s7721_s15 }
 0x1ee   : > { %1401 = vmatprep.subr.mxu1 %v1070_v43 }
 0x1ef   : > { %v825_v8 = vpop.permute.xlu0 %824  ;;  %v476_v0 = vpop.permute.xlu1 %475 }
 0x1f0   : > { %v1075_v61 = vsel %vm1058_vm8, %v825_v8, %v827_v22 }
 0x1f1   : > { %876 = vrot.lane.b32.xlu1 %v505_v58, %s7721_s15  ;;  %874 = vrot.lane.b32.xlu0 %v514_v62, %s7721_s15  ;;  %v6943_v62 = vld [vmem:[%s7801_s18 + $0x28] sm:$0xff] }
 0x1f2   : > { %1329 = vmatpush1.msra.mxu0 %v1075_v61 }
 0x1f3   : > { %v478_v16 = vpop.permute.xlu0 %477  ;;  %v809_v10 = vpop.permute.xlu1 %808 }
 0x1f4   : > { %v487_v13 = vsel %vm479_vm12, %v476_v0, %v478_v16 }
 0x1f5   : > { %872 = vrot.lane.b32.xlu1 %v513_v54, %s7721_s15  ;;  %870 = vrot.lane.b32.xlu0 %v512_v32, %s7721_s15 }
 0x1f7   : > { %v811_v57 = vpop.permute.xlu0 %810  ;;  %v474_v2 = vpop.permute.xlu1 %473 }
 0x1f8   : > { %v1069_v37 = vsel %vm1058_vm8, %v811_v57, %v813_v52  ;;  %v1068_v9 = vsel %vm1058_vm8, %v809_v10, %v811_v57  ;;  %v486_v40 = vsel %vm479_vm12, %v474_v2, %v476_v0  ;;  %v485_v12 = vsel %vm479_vm12, %v8181_v38, %v474_v2  ;;  %v6941_v52 = vld [vmem:[%s7801_s18 + $0x38] sm:$0xff]  ;;  %v15925_v2 = vld [vmem:[#allocation6_spill] sm:$0xff] }
 0x1f9   : > { %858 = vrot.lane.b32.xlu1 %v478_v16, %s7721_s15  ;;  %1402 = vmatpush1.msra.mxu1 %v1069_v37  ;;  %v6944_v16 = vld [vmem:[%s7801_s18 + $0x20] sm:$0xff] }
 0x1fa   : > { %856 = vrot.lane.b32.xlu0 %v487_v13, %s7721_s15  ;;  %1330 = vmatprep.subr.mxu0 %v1068_v9 }
 0x1fb   : > { %v795_v33 = vpop.permute.xlu0 %794  ;;  %v8779_v26 = vpop.permute.xlu1 %796 }
 0x1fc   : > { %v1062_v48 = vsel %vm1058_vm8, %v795_v33, %v8779_v26 }
 0x1fd   : > { %854 = vrot.lane.b32.xlu1 %v486_v40, %s7721_s15  ;;  %1403 = vmatprep.subr.mxu1 %v1062_v48 }
 0x1fe   : > { %852 = vrot.lane.b32.xlu0 %v485_v12, %s7721_s15 }
 0x1ff   : > { %v807_v27 = vpop.permute.xlu0 %806  ;;  %v449_v5 = vpop.permute.xlu1 %448 }
 0x200   : > { %v1067_v47 = vsel %vm1058_vm8, %v807_v27, %v809_v10 }
 0x201   : > { %1331 = vmatpush1.msra.mxu0 %v1067_v47 }
 0x203   : > { %v451_v35 = vpop.permute.xlu0 %450  ;;  %v791_v21 = vpop.permute.xlu1 %790 }
 0x204   : > { %840 = vrot.lane.b32.xlu1 %v451_v35, %s7721_s15  ;;  %v460_v55 = vsel %vm452_vm13, %v449_v5, %v451_v35 }
 0x205   : > { %838 = vrot.lane.b32.xlu0 %v460_v55, %s7721_s15 }
 0x207   : > { %v793_v15 = vpop.permute.xlu0 %792  ;;  %v447_v53 = vpop.permute.xlu1 %446 }
 0x208   : > { %v1060_v38 = vsel %vm1058_vm8, %v791_v21, %v793_v15  ;;  %v1061_v50 = vsel %vm1058_vm8, %v793_v15, %v795_v33  ;;  %v459_v49 = vsel %vm452_vm13, %v447_v53, %v449_v5  ;;  %v458_v18 = vsel %vm452_vm13, %v8211_v44, %v447_v53 }
 0x209   : > { %1332 = vmatprep.subr.mxu0 %v1060_v38  ;;  %1404 = vmatpush1.msra.mxu1 %v1061_v50 }
 0x20a   : > { %836 = vrot.lane.b32.xlu1 %v459_v49, %s7721_s15  ;;  %834 = vrot.lane.b32.xlu0 %v458_v18, %s7721_s15 }
 0x20b   : > { %v789_v24 = vpop.permute.xlu0 %788  ;;  %v422_v34 = vpop.permute.xlu1 %421  ;;  %6176 = vmatmul.mubr.msk.f32.vlgmr.msra.gmra.mxu1 %vm612_vm6, %v8800_v14 }
 0x20c   : > { %v1059_v36 = vsel %vm1058_vm8, %v789_v24, %v791_v21  ;;  %1579 = vmatprep.mubr.f32.mxu1 %v15924_v42 }
 0x20d   : > { %1333 = vmatpush1.msra.mxu0 %v1059_v36 }
 0x20e   : > { %6175 = vmatmul.mubr.msk.f32.vlgmr.msra.gmra.mxu0 %vm612_vm6, %v8800_v14 }
 0x20f   : > { %v424_v44 = vpop.permute.xlu0 %423  ;;  %v420_v58 = vpop.permute.xlu1 %419  ;;  %1508 = vmatprep.mubr.f32.mxu0 %v15924_v42 }
 0x210   : > { %822 = vrot.lane.b32.xlu1 %v424_v44, %s7721_s15  ;;  %v433_v22 = vsel %vm425_vm14, %v422_v34, %v424_v44  ;;  %v432_v51 = vsel %vm425_vm14, %v420_v58, %v422_v34  ;;  %v431_v3 = vsel %vm425_vm14, %v8239_v17, %v420_v58  ;;  %v6942_v17 = vld [vmem:[%s7801_s18 + $0x30] sm:$0xff]  ;;  %s16615_s18 = smov 119  }
 0x211   : > { %820 = vrot.lane.b32.xlu0 %v433_v22, %s7721_s15 }
 0x213   : > { %v1055_v46 = vpop.permute.xlu0 %1054  ;;  %v1057_v60 = vpop.permute.xlu1 %1056 }
 0x214   : > { %818 = vrot.lane.b32.xlu1 %v432_v51, %s7721_s15  ;;  %v1178_v23 = vsel %vm1058_vm8, %v1055_v46, %v1057_v60 }
 0x215   : > { %816 = vrot.lane.b32.xlu0 %v431_v3, %s7721_s15  ;;  %1517 = vmatprep.subr.mxu1 %v1178_v23 }
 0x217   : > { %v1051_v28 = vpop.permute.xlu0 %1050  ;;  %v1053_v41 = vpop.permute.xlu1 %1052 }
 0x218   : > { %804 = vrot.lane.b32.xlu1 %v6941_v52, %s7721_s15  ;;  %v1176_v6 = vsel %vm1058_vm8, %v1051_v28, %v1053_v41  ;;  %v1177_v31 = vsel %vm1058_vm8, %v1053_v41, %v1055_v46  ;;  %v1175_v43 = vsel %vm1058_vm8, %v8267_v56, %v1051_v28  ;;  %v369_v56 = vld [vmem:[%s15488_s2] sm:$0xff] }
 0x219   : > { %802 = vrot.lane.b32.xlu0 %v6942_v17, %s7721_s15  ;;  %1446 = vmatprep.subr.mxu0 %v1176_v6 }
 0x21a   : > { %1518 = vmatpush1.msra.mxu1 %v1177_v31  ;;  %1447 = vmatpush1.msra.mxu0 %v1175_v43 }
 0x21b   : > { %v1037_v8 = vpop.permute.xlu0 %1036  ;;  %v1039_v0 = vpop.permute.xlu1 %1038 }
 0x21c   : > { %800 = vrot.lane.b32.xlu1 %v6943_v62, %s7721_s15  ;;  %v1170_v61 = vsel %vm1058_vm8, %v1037_v8, %v1039_v0 }
 0x21d   : > { %798 = vrot.lane.b32.xlu0 %v6944_v16, %s7721_s15  ;;  %1519 = vmatprep.subr.mxu1 %v1170_v61 }
 0x21f   : > { %v1033_v10 = vpop.permute.xlu0 %1032  ;;  %v1035_v54 = vpop.permute.xlu1 %1034 }
 0x220   : > { %v1168_v32 = vsel %vm1058_vm8, %v1033_v10, %v1035_v54  ;;  %v1169_v57 = vsel %vm1058_vm8, %v1035_v54, %v1037_v8  ;;  %v1167_v37 = vsel %vm1058_vm8, %v15925_v2, %v1033_v10 }
 0x221   : > { %1448 = vmatprep.subr.mxu0 %v1168_v32  ;;  %1520 = vmatpush1.msra.mxu1 %v1169_v57 }
 0x222   : > { %1449 = vmatpush1.msra.mxu0 %v1167_v37  ;;  %785 = vperm.xlu0 %6864, %v369_v56  }
 0x223   : > { %v1019_v9 = vpop.permute.xlu0 %1018  ;;  %v1021_v13 = vpop.permute.xlu1 %1020 }
 0x224   : > { %v1162_v33 = vsel %vm1058_vm8, %v1019_v9, %v1021_v13 }
 0x225   : > { %1521 = vmatprep.subr.mxu1 %v1162_v33 }
 0x227   : > { %v1015_v40 = vpop.permute.xlu0 %1014  ;;  %v1017_v48 = vpop.permute.xlu1 %1016 }
 0x228   : > { %v1160_v12 = vsel %vm1058_vm8, %v1015_v40, %v1017_v48  ;;  %v1161_v27 = vsel %vm1058_vm8, %v1017_v48, %v1019_v9  ;;  %v1159_v5 = vsel %vm1058_vm8, %v8308_v1, %v1015_v40 }
 0x229   : > { %1450 = vmatprep.subr.mxu0 %v1160_v12  ;;  %1522 = vmatpush1.msra.mxu1 %v1161_v27 }
 0x22a   : > { %1451 = vmatpush1.msra.mxu0 %v1159_v5 }
 0x22b   : > { %v1001_v47 = vpop.permute.xlu0 %1000  ;;  %v1003_v35 = vpop.permute.xlu1 %1002 }
 0x22c   : > { %v1154_v21 = vsel %vm1058_vm8, %v1001_v47, %v1003_v35 }
 0x22d   : > { %1523 = vmatprep.subr.mxu1 %v1154_v21 }
 0x22f   : > { %v997_v55 = vpop.permute.xlu0 %996  ;;  %v999_v15 = vpop.permute.xlu1 %998 }
 0x230   : > { %v1152_v53 = vsel %vm1058_vm8, %v997_v55, %v999_v15  ;;  %v1153_v38 = vsel %vm1058_vm8, %v999_v15, %v1001_v47  ;;  %v1151_v50 = vsel %vm1058_vm8, %v8349_v25, %v997_v55 }
 0x231   : > { %1452 = vmatprep.subr.mxu0 %v1152_v53  ;;  %1524 = vmatpush1.msra.mxu1 %v1153_v38 }
 0x232   : > { %1453 = vmatpush1.msra.mxu0 %v1151_v50 }
 0x233   : > { %v983_v1 = vpop.permute.xlu0 %982  ;;  %v985_v49 = vpop.permute.xlu1 %984 }
 0x234   : > { %v1146_v18 = vsel %vm1058_vm8, %v983_v1, %v985_v49 }
 0x235   : > { %1525 = vmatprep.subr.mxu1 %v1146_v18 }
 0x237   : > { %v979_v24 = vpop.permute.xlu0 %978  ;;  %v981_v34 = vpop.permute.xlu1 %980 }
 0x238   : > { %v1144_v36 = vsel %vm1058_vm8, %v979_v24, %v981_v34  ;;  %v1145_v63 = vsel %vm1058_vm8, %v981_v34, %v983_v1  ;;  %v1143_v44 = vsel %vm1058_vm8, %v8396_v20, %v979_v24 }
 0x239   : > { %1454 = vmatprep.subr.mxu0 %v1144_v36  ;;  %1526 = vmatpush1.msra.mxu1 %v1145_v63 }
 0x23a   : > { %1455 = vmatpush1.msra.mxu0 %v1143_v44 }
 0x23b   : > { %v965_v25 = vpop.permute.xlu0 %964  ;;  %v967_v58 = vpop.permute.xlu1 %966 }
 0x23c   : > { %v1138_v22 = vsel %vm1058_vm8, %v965_v25, %v967_v58 }
 0x23d   : > { %1527 = vmatprep.subr.mxu1 %v1138_v22 }
 0x23f   : > { %v961_v46 = vpop.permute.xlu0 %960  ;;  %v963_v60 = vpop.permute.xlu1 %962 }
 0x240   : > { %v1136_v51 = vsel %vm1058_vm8, %v961_v46, %v963_v60  ;;  %v1137_v3 = vsel %vm1058_vm8, %v963_v60, %v965_v25  ;;  %v1135_v23 = vsel %vm1058_vm8, %v8437_v39, %v961_v46 }
 0x241   : > { %1456 = vmatprep.subr.mxu0 %v1136_v51  ;;  %1528 = vmatpush1.msra.mxu1 %v1137_v3 }
 0x242   : > { %1457 = vmatpush1.msra.mxu0 %v1135_v23 }
 0x243   : > { %v947_v20 = vpop.permute.xlu0 %946  ;;  %v949_v28 = vpop.permute.xlu1 %948 }
 0x244   : > { %v1130_v41 = vsel %vm1058_vm8, %v947_v20, %v949_v28 }
 0x245   : > { %1529 = vmatprep.subr.mxu1 %v1130_v41 }
 0x247   : > { %v943_v52 = vpop.permute.xlu0 %942  ;;  %v945_v6 = vpop.permute.xlu1 %944 }
 0x248   : > { %v1128_v31 = vsel %vm1058_vm8, %v943_v52, %v945_v6  ;;  %v1129_v43 = vsel %vm1058_vm8, %v945_v6, %v947_v20  ;;  %v1127_v17 = vsel %vm1058_vm8, %v8484_v30, %v943_v52 }
 0x249   : > { %1458 = vmatprep.subr.mxu0 %v1128_v31  ;;  %1530 = vmatpush1.msra.mxu1 %v1129_v43 }
 0x24a   : > { %1459 = vmatpush1.msra.mxu0 %v1127_v17 }
 0x24b   : > { %v929_v39 = vpop.permute.xlu0 %928  ;;  %v931_v8 = vpop.permute.xlu1 %930 }
 0x24c   : > { %v1122_v0 = vsel %vm1058_vm8, %v929_v39, %v931_v8 }
 0x24d   : > { %1531 = vmatprep.subr.mxu1 %v1122_v0  ;;  %v1780_v0 = vld [vmem:[%s15491_s5 + $0x470] sm:$0xff] }
 0x24f   : > { %v925_v62 = vpop.permute.xlu0 %924  ;;  %v927_v61 = vpop.permute.xlu1 %926 }
 0x250   : > { %v1120_v16 = vsel %vm1058_vm8, %v925_v62, %v927_v61  ;;  %v1121_v10 = vsel %vm1058_vm8, %v927_v61, %v929_v39  ;;  %v1119_v54 = vsel %vm1058_vm8, %v8525_v45, %v925_v62  ;;  %v1684_v61 = vld [vmem:[%s15491_s5 + $0x170] sm:$0xff] }
 0x251   : > { %1460 = vmatprep.subr.mxu0 %v1120_v16  ;;  %1532 = vmatpush1.msra.mxu1 %v1121_v10  ;;  %v1683_v16 = vld [vmem:[%s15491_s5 + $0x168] sm:$0xff] }
 0x252   : > { %1461 = vmatpush1.msra.mxu0 %v1119_v54  ;;  %v1779_v10 = vld [vmem:[%s15491_s5 + $0x468] sm:$0xff]  ;;  %v1777_v54 = vld [vmem:[%s15491_s5 + $0x458] sm:$0xff] }
 0x253   : > { %v911_v30 = vpop.permute.xlu0 %910  ;;  %v913_v56 = vpop.permute.xlu1 %912 }
 0x254   : > { %v1114_v32 = vsel %vm1058_vm8, %v911_v30, %v913_v56  ;;  %v1776_v56 = vld [vmem:[%s15491_s5 + $0x450] sm:$0xff] }
 0x255   : > { %1533 = vmatprep.subr.mxu1 %v1114_v32  ;;  %v1678_v32 = vld [vmem:[%s15491_s5 + $0x140] sm:$0xff] }
 0x257   : > { %v907_v57 = vpop.permute.xlu0 %906  ;;  %v909_v2 = vpop.permute.xlu1 %908 }
 0x258   : > { %v1112_v37 = vsel %vm1058_vm8, %v907_v57, %v909_v2  ;;  %v1113_v9 = vsel %vm1058_vm8, %v909_v2, %v911_v30  ;;  %v1111_v13 = vsel %vm1058_vm8, %v8562_v4, %v907_v57  ;;  %v1680_v30 = vld [vmem:[%s15491_s5 + $0x150] sm:$0xff]  ;;  %v1774_v57 = vld [vmem:[%s15491_s5 + $0x440] sm:$0xff]  ;;  %v1773_v2 = vld [vmem:[%s15491_s5 + $0x438] sm:$0xff] }
 0x259   : > { %1462 = vmatprep.subr.mxu0 %v1112_v37  ;;  %1534 = vmatpush1.msra.mxu1 %v1113_v9 }
 0x25a   : > { %1463 = vmatpush1.msra.mxu0 %v1111_v13 }
 0x25b   : > { %v893_v45 = vpop.permute.xlu0 %892  ;;  %v895_v33 = vpop.permute.xlu1 %894 }
 0x25c   : > { %v1106_v40 = vsel %vm1058_vm8, %v893_v45, %v895_v33 }
 0x25d   : > { %1535 = vmatprep.subr.mxu1 %v1106_v40 }
 0x25f   : > { %v889_v48 = vpop.permute.xlu0 %888  ;;  %v891_v12 = vpop.permute.xlu1 %890 }
 0x260   : > { %v1104_v27 = vsel %vm1058_vm8, %v889_v48, %v891_v12  ;;  %v1105_v5 = vsel %vm1058_vm8, %v891_v12, %v893_v45  ;;  %v1103_v47 = vsel %vm1058_vm8, %v8605_v11, %v889_v48 }
 0x261   : > { %1464 = vmatprep.subr.mxu0 %v1104_v27  ;;  %1536 = vmatpush1.msra.mxu1 %v1105_v5 }
 0x262   : > { %1465 = vmatpush1.msra.mxu0 %v1103_v47 }
 0x263   : > { %v875_v4 = vpop.permute.xlu0 %874  ;;  %v877_v35 = vpop.permute.xlu1 %876 }
 0x264   : > { %v1098_v21 = vsel %vm1058_vm8, %v875_v4, %v877_v35 }
 0x265   : > { %1537 = vmatprep.subr.mxu1 %v1098_v21  ;;  %v1675_v21 = vld [vmem:[%s15491_s5 + $0x128] sm:$0xff] }
 0x267   : > { %v871_v55 = vpop.permute.xlu0 %870  ;;  %v873_v15 = vpop.permute.xlu1 %872 }
 0x268   : > { %v1096_v53 = vsel %vm1058_vm8, %v871_v55, %v873_v15  ;;  %v1097_v38 = vsel %vm1058_vm8, %v873_v15, %v875_v4  ;;  %v1095_v50 = vsel %vm1058_vm8, %v8650_v29, %v871_v55  ;;  %v1771_v55 = vld [vmem:[%s15491_s5 + $0x428] sm:$0xff] }
 0x269   : > { %1466 = vmatprep.subr.mxu0 %v1096_v53  ;;  %1538 = vmatpush1.msra.mxu1 %v1097_v38  ;;  %v1674_v53 = vld [vmem:[%s15491_s5 + $0x120] sm:$0xff] }
 0x26a   : > { %1467 = vmatpush1.msra.mxu0 %v1095_v50  ;;  %v1770_v38 = vld [vmem:[%s15491_s5 + $0x420] sm:$0xff] }
 0x26b   : > { %v859_v11 = vpop.permute.xlu1 %858 }
 0x26c   : > { %v857_v1 = vpop.permute.xlu0 %856 }
 0x26d   : > { %v1090_v49 = vsel %vm1058_vm8, %v857_v1, %v859_v11 }
 0x26e   : > { %1539 = vmatprep.subr.mxu1 %v1090_v49  ;;  %v1768_v49 = vld [vmem:[%s15491_s5 + $0x410] sm:$0xff] }
 0x26f   : > { %v855_v18 = vpop.permute.xlu1 %854 }
 0x270   : > { %v853_v24 = vpop.permute.xlu0 %852  ;;  %v1089_v34 = vsel %vm1058_vm8, %v855_v18, %v857_v1  ;;  %v1672_v1 = vld [vmem:[%s15491_s5 + $0x110] sm:$0xff] }
 0x271   : > { %v1088_v36 = vsel %vm1058_vm8, %v853_v24, %v855_v18  ;;  %1540 = vmatpush1.msra.mxu1 %v1089_v34  ;;  %v1087_v63 = vsel %vm1058_vm8, %v8691_v59, %v853_v24  ;;  %v1671_v24 = vld [vmem:[%s15491_s5 + $0x108] sm:$0xff] }
 0x272   : > { %1468 = vmatprep.subr.mxu0 %v1088_v36  ;;  %v1767_v34 = vld [vmem:[%s15491_s5 + $0x408] sm:$0xff] }
 0x273   : > { %1469 = vmatpush1.msra.mxu0 %v1087_v63 }
 0x276   : > { %v841_v29 = vpop.permute.xlu1 %840 }
 0x277   : > { %v839_v44 = vpop.permute.xlu0 %838 }
 0x278   : > { %v1082_v25 = vsel %vm1058_vm8, %v839_v44, %v841_v29  ;;  %v1669_v29 = vld [vmem:[%s15491_s5 + $0xf8] sm:$0xff] }
 0x279   : > { %1541 = vmatprep.subr.mxu1 %v1082_v25  ;;  %v1668_v25 = vld [vmem:[%s15491_s5 + $0xf0] sm:$0xff] }
 0x27c   : > { %v835_v58 = vpop.permute.xlu0 %834  ;;  %v837_v22 = vpop.permute.xlu1 %836 }
 0x27d   : > { %v1080_v46 = vsel %vm1058_vm8, %v835_v58, %v837_v22  ;;  %v1081_v60 = vsel %vm1058_vm8, %v837_v22, %v839_v44  ;;  %v1079_v51 = vsel %vm1058_vm8, %v8728_v19, %v835_v58  ;;  %v1765_v44 = vld [vmem:[%s15491_s5 + $0x3f8] sm:$0xff]  ;;  %v1764_v58 = vld [vmem:[%s15491_s5 + $0x3f0] sm:$0xff]  ;;  %v1666_v22 = vld [vmem:[%s15491_s5 + $0xe0] sm:$0xff] }
 0x27e   : > { %1470 = vmatprep.subr.mxu0 %v1080_v46  ;;  %1542 = vmatpush1.msra.mxu1 %v1081_v60  ;;  %v1762_v46 = vld [vmem:[%s15491_s5 + $0x3e0] sm:$0xff] }
 0x27f   : > { %1471 = vmatpush1.msra.mxu0 %v1079_v51  ;;  %v1665_v51 = vld [vmem:[%s15491_s5 + $0xd8] sm:$0xff] }
 0x282   : > { %v823_v59 = vpop.permute.xlu1 %822 }
 0x283   : > { %v821_v3 = vpop.permute.xlu0 %820 }
 0x284   : > { %v1074_v23 = vsel %vm1058_vm8, %v821_v3, %v823_v59  ;;  %v1761_v59 = vld [vmem:[%s15491_s5 + $0x3d8] sm:$0xff] }
 0x285   : > { %1543 = vmatprep.subr.mxu1 %v1074_v23  ;;  %v1759_v23 = vld [vmem:[%s15491_s5 + $0x3c8] sm:$0xff] }
 0x286   : > { %v819_v20 = vpop.permute.xlu1 %818 }
 0x287   : > { %v817_v28 = vpop.permute.xlu0 %816  ;;  %v1073_v41 = vsel %vm1058_vm8, %v819_v20, %v821_v3  ;;  %v1663_v3 = vld [vmem:[%s15491_s5 + $0xc8] sm:$0xff] }
 0x288   : > { %1544 = vmatpush1.msra.mxu1 %v1073_v41  ;;  %v1072_v52 = vsel %vm1058_vm8, %v817_v28, %v819_v20  ;;  %v1071_v6 = vsel %vm1058_vm8, %v8756_v7, %v817_v28  ;;  %v1758_v20 = vld [vmem:[%s15491_s5 + $0x3c0] sm:$0xff]  ;;  %v1660_v41 = vld [vmem:[%s15491_s5 + $0xb0] sm:$0xff] }
 0x289   : > { %1472 = vmatprep.subr.mxu0 %v1072_v52  ;;  %v1662_v28 = vld [vmem:[%s15491_s5 + $0xc0] sm:$0xff]  ;;  %v1756_v52 = vld [vmem:[%s15491_s5 + $0x3b0] sm:$0xff] }
 0x28a   : > { %1473 = vmatpush1.msra.mxu0 %v1071_v6  ;;  %v805_v19 = vpop.permute.xlu1 %804  ;;  %v1659_v6 = vld [vmem:[%s15491_s5 + $0xa8] sm:$0xff] }
 0x28b   : > { %v803_v31 = vpop.permute.xlu0 %802 }
 0x28c   : > { %v1066_v43 = vsel %vm1058_vm8, %v803_v31, %v805_v19  ;;  %v1755_v19 = vld [vmem:[%s15491_s5 + $0x3a8] sm:$0xff] }
 0x28d   : > { %1545 = vmatprep.subr.mxu1 %v1066_v43  ;;  %v1753_v43 = vld [vmem:[%s15491_s5 + $0x398] sm:$0xff] }
 0x28e   : > { %v801_v17 = vpop.permute.xlu1 %800 }
 0x28f   : > { %v799_v39 = vpop.permute.xlu0 %798  ;;  %v1065_v8 = vsel %vm1058_vm8, %v801_v17, %v803_v31  ;;  %v1657_v31 = vld [vmem:[%s15491_s5 + $0x98] sm:$0xff] }
 0x290   : > { %1546 = vmatpush1.msra.mxu1 %v1065_v8  ;;  %v1064_v62 = vsel %vm1058_vm8, %v799_v39, %v801_v17  ;;  %v1063_v7 = vsel %vm1058_vm8, %v8779_v26, %v799_v39  ;;  %v1681_v26 = vld [vmem:[%s15491_s5 + $0x158] sm:$0xff]  ;;  %v1656_v17 = vld [vmem:[%s15491_s5 + $0x90] sm:$0xff]  ;;  %v1654_v8 = vld [vmem:[%s15491_s5 + $0x80] sm:$0xff]  ;;  %vm7727_vm8 = vmmov 0  }
 0x291   : > { %1474 = vmatprep.subr.mxu0 %v1064_v62  ;;  %6178 = vmatmul.mubr.msk.f32.vlgmr.msra.gmra.mxu1 %vm612_vm6, %v8800_v14  ;;  %v1752_v39 = vld [vmem:[%s15491_s5 + $0x390] sm:$0xff]  ;;  %v1653_v62 = vld [vmem:[%s15491_s5 + $0x78] sm:$0xff] }
 0x292   : > { %1475 = vmatpush1.msra.mxu0 %v1063_v7  ;;  %2159 = vmatprep.subr.mxu1 %v1780_v0  ;;  %v1750_v0 = vld [vmem:[%s15491_s5 + $0x380] sm:$0xff]  ;;  %v1749_v7 = vld [vmem:[%s15491_s5 + $0x378] sm:$0xff] }
 0x293   : > { %6177 = vmatmul.mubr.msk.f32.vlgmr.msra.gmra.mxu0 %vm612_vm6, %v8800_v14  ;;  %2088 = vmatprep.subr.mxu0 %v1684_v61  ;;  %v1677_v14 = vld [vmem:[%s15491_s5 + $0x138] sm:$0xff]  ;;  %v1651_v61 = vld [vmem:[%s15491_s5 + $0x68] sm:$0xff] }
 0x294   : > { %2089 = vmatpush1.msra.mxu0 %v1683_v16  ;;  %2160 = vmatpush1.msra.mxu1 %v1779_v10  ;;  %v1747_v16 = vld [vmem:[%s15491_s5 + $0x368] sm:$0xff]  ;;  %v1650_v10 = vld [vmem:[%s15491_s5 + $0x60] sm:$0xff] }
 0x295   : > { %2090 = vmatprep.subr.mxu0 %v1681_v26  ;;  %2161 = vmatprep.subr.mxu1 %v1777_v54  ;;  %v1746_v26 = vld [vmem:[%s15491_s5 + $0x360] sm:$0xff]  ;;  %v1648_v54 = vld [vmem:[%s15491_s5 + $0x50] sm:$0xff] }
 0x296   : > { %2091 = vmatpush1.msra.mxu0 %v1680_v30  ;;  %2162 = vmatpush1.msra.mxu1 %v1776_v56  ;;  %v1744_v30 = vld [vmem:[%s15491_s5 + $0x350] sm:$0xff]  ;;  %v1647_v56 = vld [vmem:[%s15491_s5 + $0x48] sm:$0xff] }
 0x297   : > { %2092 = vmatprep.subr.mxu0 %v1678_v32  ;;  %2163 = vmatprep.subr.mxu1 %v1774_v57  ;;  %v1743_v32 = vld [vmem:[%s15491_s5 + $0x348] sm:$0xff]  ;;  %v1645_v57 = vld [vmem:[%s15491_s5 + $0x38] sm:$0xff] }
 0x298   : > { %2093 = vmatpush1.msra.mxu0 %v1677_v14  ;;  %2164 = vmatpush1.msra.mxu1 %v1773_v2  ;;  %v1741_v14 = vld [vmem:[%s15491_s5 + $0x338] sm:$0xff]  ;;  %v1644_v2 = vld [vmem:[%s15491_s5 + $0x30] sm:$0xff] }
 0x299   : > { %2094 = vmatprep.subr.mxu0 %v1675_v21  ;;  %2165 = vmatprep.subr.mxu1 %v1771_v55  ;;  %v1827_v21 = vld [vmem:[%s15491_s5 + $0x5e8] sm:$0xff]  ;;  %v1729_v55 = vld [vmem:[%s15491_s5 + $0x2d8] sm:$0xff] }
 0x29a   : > { %2095 = vmatpush1.msra.mxu0 %v1674_v53  ;;  %2166 = vmatpush1.msra.mxu1 %v1770_v38  ;;  %v1728_v53 = vld [vmem:[%s15491_s5 + $0x2d0] sm:$0xff] }
 0x29b   : > { %2096 = vmatprep.subr.mxu0 %v1672_v1  ;;  %2167 = vmatprep.subr.mxu1 %v1768_v49  ;;  %v1824_v38 = vld [vmem:[%s15491_s5 + $0x5d0] sm:$0xff]  ;;  %v1725_v1 = vld [vmem:[%s15491_s5 + $0x2b8] sm:$0xff] }
 0x29c   : > { %2097 = vmatpush1.msra.mxu0 %v1671_v24  ;;  %2168 = vmatpush1.msra.mxu1 %v1767_v34  ;;  %v1821_v49 = vld [vmem:[%s15491_s5 + $0x5b8] sm:$0xff]  ;;  %v1723_v24 = vld [vmem:[%s15491_s5 + $0x2a8] sm:$0xff] }
 0x29d   : > { %v8945_v37 = vpop.permute.xlu0 %785  ;;  %2098 = vmatprep.subr.mxu0 %v1669_v29  ;;  %2169 = vmatprep.subr.mxu1 %v1765_v44  ;;  %v1819_v34 = vld [vmem:[%s15491_s5 + $0x5a8] sm:$0xff]  ;;  %v1720_v29 = vld [vmem:[%s15491_s5 + $0x290] sm:$0xff] }
 0x29e   : > { %2099 = vmatpush1.msra.mxu0 %v1668_v25  ;;  %2170 = vmatpush1.msra.mxu1 %v1764_v58  ;;  %v1816_v44 = vld [vmem:[%s15491_s5 + $0x590] sm:$0xff]  ;;  %v1719_v25 = vld [vmem:[%s15491_s5 + $0x288] sm:$0xff] }
 0x29f   : > { %2100 = vmatprep.subr.mxu0 %v1666_v22  ;;  %2171 = vmatprep.subr.mxu1 %v1762_v46  ;;  %v1815_v58 = vld [vmem:[%s15491_s5 + $0x588] sm:$0xff]  ;;  %v1717_v22 = vld [vmem:[%s15491_s5 + $0x278] sm:$0xff] }
 0x2a0   : > { %2101 = vmatpush1.msra.mxu0 %v1665_v51  ;;  %2172 = vmatpush1.msra.mxu1 %v1761_v59  ;;  %v1813_v46 = vld [vmem:[%s15491_s5 + $0x578] sm:$0xff]  ;;  %v1716_v51 = vld [vmem:[%s15491_s5 + $0x270] sm:$0xff] }
 0x2a1   : > { %2102 = vmatprep.subr.mxu0 %v1663_v3  ;;  %2173 = vmatprep.subr.mxu1 %v1759_v23  ;;  %v1812_v59 = vld [vmem:[%s15491_s5 + $0x570] sm:$0xff]  ;;  %v1714_v3 = vld [vmem:[%s15491_s5 + $0x260] sm:$0xff] }
 0x2a2   : > { %2103 = vmatpush1.msra.mxu0 %v1662_v28  ;;  %2174 = vmatpush1.msra.mxu1 %v1758_v20  ;;  %v1810_v23 = vld [vmem:[%s15491_s5 + $0x560] sm:$0xff]  ;;  %v1713_v20 = vld [vmem:[%s15491_s5 + $0x258] sm:$0xff] }
 0x2a3   : > { %2104 = vmatprep.subr.mxu0 %v1660_v41  ;;  %2175 = vmatprep.subr.mxu1 %v1756_v52  ;;  %v1809_v28 = vld [vmem:[%s15491_s5 + $0x558] sm:$0xff]  ;;  %v1711_v41 = vld [vmem:[%s15491_s5 + $0x248] sm:$0xff] }
 0x2a4   : > { %2105 = vmatpush1.msra.mxu0 %v1659_v6  ;;  %2176 = vmatpush1.msra.mxu1 %v1755_v19  ;;  %v1807_v52 = vld [vmem:[%s15491_s5 + $0x548] sm:$0xff]  ;;  %v1710_v6 = vld [vmem:[%s15491_s5 + $0x240] sm:$0xff] }
 0x2a5   : > { %2106 = vmatprep.subr.mxu0 %v1657_v31  ;;  %2177 = vmatprep.subr.mxu1 %v1753_v43  ;;  %v1806_v19 = vld [vmem:[%s15491_s5 + $0x540] sm:$0xff]  ;;  %v1708_v31 = vld [vmem:[%s15491_s5 + $0x230] sm:$0xff] }
 0x2a6   : > { %2107 = vmatpush1.msra.mxu0 %v1656_v17  ;;  %2178 = vmatpush1.msra.mxu1 %v1752_v39  ;;  %v1804_v43 = vld [vmem:[%s15491_s5 + $0x530] sm:$0xff]  ;;  %v1707_v17 = vld [vmem:[%s15491_s5 + $0x228] sm:$0xff] }
 0x2a7   : > { %2108 = vmatprep.subr.mxu0 %v1654_v8  ;;  %2179 = vmatprep.subr.mxu1 %v1750_v0  ;;  %v1803_v39 = vld [vmem:[%s15491_s5 + $0x528] sm:$0xff]  ;;  %v1705_v8 = vld [vmem:[%s15491_s5 + $0x218] sm:$0xff] }
 0x2a8   : > { %2109 = vmatpush1.msra.mxu0 %v1653_v62  ;;  %2180 = vmatpush1.msra.mxu1 %v1749_v7  ;;  %v1801_v0 = vld [vmem:[%s15491_s5 + $0x518] sm:$0xff]  ;;  %v1704_v62 = vld [vmem:[%s15491_s5 + $0x210] sm:$0xff] }
 0x2a9   : > { %2110 = vmatprep.subr.mxu0 %v1651_v61  ;;  %2181 = vmatprep.subr.mxu1 %v1747_v16  ;;  %v1800_v7 = vld [vmem:[%s15491_s5 + $0x510] sm:$0xff]  ;;  %v1702_v61 = vld [vmem:[%s15491_s5 + $0x200] sm:$0xff] }
 0x2aa   : > { %2111 = vmatpush1.msra.mxu0 %v1650_v10  ;;  %2182 = vmatpush1.msra.mxu1 %v1746_v26  ;;  %v1798_v16 = vld [vmem:[%s15491_s5 + $0x500] sm:$0xff]  ;;  %v1701_v10 = vld [vmem:[%s15491_s5 + $0x1f8] sm:$0xff] }
 0x2ab   : > { %2112 = vmatprep.subr.mxu0 %v1648_v54  ;;  %2183 = vmatprep.subr.mxu1 %v1744_v30  ;;  %v1797_v26 = vld [vmem:[%s15491_s5 + $0x4f8] sm:$0xff]  ;;  %v1699_v54 = vld [vmem:[%s15491_s5 + $0x1e8] sm:$0xff] }
 0x2ac   : > { %2113 = vmatpush1.msra.mxu0 %v1647_v56  ;;  %2184 = vmatpush1.msra.mxu1 %v1743_v32  ;;  %v1795_v30 = vld [vmem:[%s15491_s5 + $0x4e8] sm:$0xff]  ;;  %v1698_v56 = vld [vmem:[%s15491_s5 + $0x1e0] sm:$0xff] }
 0x2ad   : > { %2114 = vmatprep.subr.mxu0 %v1645_v57  ;;  %2185 = vmatprep.subr.mxu1 %v1741_v14  ;;  %v1794_v32 = vld [vmem:[%s15491_s5 + $0x4e0] sm:$0xff]  ;;  %v1696_v57 = vld [vmem:[%s15491_s5 + $0x1d0] sm:$0xff] }
 0x2ae   : > { %2115 = vmatpush1.msra.mxu0 %v1644_v2  ;;  %v1792_v14 = vld [vmem:[%s15491_s5 + $0x4d0] sm:$0xff]  ;;  %v1695_v2 = vld [vmem:[%s15491_s5 + $0x1c8] sm:$0xff] }
 0x2cb   : > { %v1439_v9 = vpop.f32.mrf.mxu1 }
 0x2cc   : > { %v1440_v13 = vadd.f32 %v1439_v9, %v8945_v37  ;;  %v1740_v9 = vld [vmem:[%s15491_s5 + $0x330] sm:$0xff] }
 0x2cd   : > { %v1441_v45 = vpop.f32.mrf.mxu1  ;;  %2186 = vmatpush1.msra.mxu1 %v1740_v9  ;;  %v1791_v9 = vld [vmem:[%s15491_s5 + $0x4c8] sm:$0xff] }
 0x2ce   : > { %v1368_v33 = vpop.f32.mrf.mxu0  ;;  %v1442_v40 = vadd.f32 %v1441_v45, %v8945_v37  ;;  %v1588_v48 = vmul.f32 0.1, %v1440_v13  ;;  %v1738_v45 = vld [vmem:[%s15491_s5 + $0x320] sm:$0xff] }
 0x2cf   : > { %v1369_v12 = vadd.f32 %v1368_v33, %v8945_v37  ;;  %v1641_v33 = vld [vmem:[%s15491_s5 + $0x18] sm:$0xff]  ;;  %2187 = vmatprep.subr.mxu1 %v1738_v45 }
 0x2d0   : > { %v1370_v27 = vpop.f32.mrf.mxu0  ;;  %v1589_v5 = vmul.f32 0.1, %v1442_v40  ;;  %v1596_v47 = vmax.f32 %v1440_v13, %v1588_v48  ;;  %v1642_v13 = vld [vmem:[%s15491_s5 + $0x20] sm:$0xff]  ;;  %v1639_v48 = vld [vmem:[%s15491_s5 + $0x8] sm:$0xff]  ;;  %v1789_v45 = vld [vmem:[%s15491_s5 + $0x4b8] sm:$0xff] }
 0x2d1   : > { %v1586_v4 = vmul.f32 0.1, %v1369_v12  ;;  %v1371_v35 = vadd.f32 %v1370_v27, %v8945_v37  ;;  %2116 = vmatprep.subr.mxu0 %v1642_v13  ;;  %v1638_v27 = vld [vmem:[%s15491_s5] sm:$0xff]  ;;  %v1693_v13 = vld [vmem:[%s15491_s5 + $0x1b8] sm:$0xff] }
 0x2d2   : > { %v1597_v15 = vmax.f32 %v1442_v40, %v1589_v5  ;;  %v1737_v40 = vld [vmem:[%s15491_s5 + $0x318] sm:$0xff]  ;;  %2117 = vmatpush1.msra.mxu0 %v1641_v33  ;;  %v1734_v5 = vld [vmem:[%s15491_s5 + $0x300] sm:$0xff]  ;;  %v1692_v33 = vld [vmem:[%s15491_s5 + $0x1b0] sm:$0xff] }
 0x2d3   : > { %v1594_v50 = vmax.f32 %v1369_v12, %v1586_v4  ;;  %v1587_v11 = vmul.f32 0.1, %v1371_v35  ;;  %v1735_v12 = vld [vmem:[%s15491_s5 + $0x308] sm:$0xff]  ;;  %2188 = vmatpush1.msra.mxu1 %v1737_v40  ;;  %2118 = vmatprep.subr.mxu0 %v1639_v48  ;;  %v1828_v4 = vld [vmem:[%s15491_s5 + $0x5f0] sm:$0xff]  ;;  %v1690_v48 = vld [vmem:[%s15491_s5 + $0x1a0] sm:$0xff] }
 0x2d4   : > { %v8969_v18 = vpack.i.bf16 %v1597_v15, %v1596_v47  ;;  %v1732_v47 = vld [vmem:[%s15491_s5 + $0x2f0] sm:$0xff]  ;;  %2189 = vmatprep.subr.mxu1 %v1735_v12  ;;  %2119 = vmatpush1.msra.mxu0 %v1638_v27  ;;  %v1825_v15 = vld [vmem:[%s15491_s5 + $0x5d8] sm:$0xff]  ;;  %v1786_v12 = vld [vmem:[%s15491_s5 + $0x4a0] sm:$0xff] }
 0x2d5   : > { %v1595_v36 = vmax.f32 %v1371_v35, %v1587_v11  ;;  %v6870_v63 = vpack.i.bf16 %v15924_v42, %v1594_v50  ;;  %v1731_v35 = vld [vmem:[%s15491_s5 + $0x2e8] sm:$0xff]  ;;  %2190 = vmatpush1.msra.mxu1 %v1734_v5  ;;  %2120 = vmatprep.subr.mxu0 %v1732_v47  ;;  %v1822_v11 = vld [vmem:[%s15491_s5 + $0x5c0] sm:$0xff]  ;;  %v1788_v40 = vld [vmem:[%s15491_s5 + $0x4b0] sm:$0xff] }
 0x2d6   : > { %6866 = vrot.lane.b32.xlu1 %v8969_v18, %s7723_s25  ;;  %2191 = vmatprep.subr.mxu1 %v1828_v4  ;;  %v1689_v27 = vld [vmem:[%s15491_s5 + $0x198] sm:$0xff]  ;;  %v1687_v47 = vld [vmem:[%s15491_s5 + $0x188] sm:$0xff] }
 0x2d7   : > { %6871 = vrot.lane.b32.xlu0 %v6870_v63, %s7723_s25  ;;  %v8999_v60 = vpack.i.bf16 %v1595_v36, %v1594_v50  ;;  %2121 = vmatpush2.msra.mxu0 %v1731_v35  ;;  %v1726_v50 = vld [vmem:[%s15491_s5 + $0x2c0] sm:$0xff]  ;;  %v1785_v5 = vld [vmem:[%s15491_s5 + $0x498] sm:$0xff]  ;;  %v1783_v4 = vld [vmem:[%s15491_s5 + $0x488] sm:$0xff] }
 0x2d8   : > { %2192 = vmatpush2.msra.mxu1 %v1827_v21  ;;  %2122 = vmatprep.subr.mxu0 %v1729_v55  ;;  %v1818_v63 = vld [vmem:[%s15491_s5 + $0x5a0] sm:$0xff]  ;;  %v1876_v55 = vld [vmem:[%s15491_s5 + $0x770] sm:$0xff] }
 0x2d9   : > { %2193 = vmatprep.subr.mxu1 %v1825_v15  ;;  %2123 = vmatpush2.msra.mxu0 %v1728_v53  ;;  %v1686_v35 = vld [vmem:[%s15491_s5 + $0x180] sm:$0xff]  ;;  %v1972_v15 = vld [vmem:[%s15491_s5 + $0xa70] sm:$0xff] }
 0x2da   : > { %2051 = vrot.lane.b32.xlu1 %v1595_v36, %s7723_s25  ;;  %2194 = vmatpush2.msra.mxu1 %v1824_v38  ;;  %v1722_v36 = vld [vmem:[%s15491_s5 + $0x2a0] sm:$0xff] }
 0x2db   : > { %2124 = vmatprep.subr.mxu0 %v1726_v50  ;;  %2195 = vmatprep.subr.mxu1 %v1822_v11  ;;  %v1782_v21 = vld [vmem:[%s15491_s5 + $0x480] sm:$0xff] }
 0x2dc   : > { %2125 = vmatpush2.msra.mxu0 %v1725_v1  ;;  %2196 = vmatpush2.msra.mxu1 %v1821_v49 }
 0x2dd   : > { %2126 = vmatprep.subr.mxu0 %v1723_v24  ;;  %2197 = vmatprep.subr.mxu1 %v1819_v34 }
 0x2de   : > { %2127 = vmatpush2.msra.mxu0 %v1722_v36  ;;  %2198 = vmatpush2.msra.mxu1 %v1818_v63  ;;  %v1971_v63 = vld [vmem:[%s15491_s5 + $0xa68] sm:$0xff] }
 0x2df   : > { %2128 = vmatprep.subr.mxu0 %v1720_v29  ;;  %2199 = vmatprep.subr.mxu1 %v1816_v44 }
 0x2e0   : > { %2129 = vmatpush2.msra.mxu0 %v1719_v25  ;;  %2200 = vmatpush2.msra.mxu1 %v1815_v58  ;;  %v1875_v25 = vld [vmem:[%s15491_s5 + $0x768] sm:$0xff]  ;;  %v1969_v58 = vld [vmem:[%s15491_s5 + $0xa58] sm:$0xff] }
 0x2e1   : > { %2130 = vmatprep.subr.mxu0 %v1717_v22  ;;  %2201 = vmatprep.subr.mxu1 %v1813_v46  ;;  %v1873_v22 = vld [vmem:[%s15491_s5 + $0x758] sm:$0xff]  ;;  %v1968_v46 = vld [vmem:[%s15491_s5 + $0xa50] sm:$0xff] }
 0x2e2   : > { %2131 = vmatpush2.msra.mxu0 %v1716_v51  ;;  %2202 = vmatpush2.msra.mxu1 %v1812_v59  ;;  %v1872_v51 = vld [vmem:[%s15491_s5 + $0x750] sm:$0xff]  ;;  %v1966_v59 = vld [vmem:[%s15491_s5 + $0xa40] sm:$0xff] }
 0x2e3   : > { %2132 = vmatprep.subr.mxu0 %v1714_v3  ;;  %2203 = vmatprep.subr.mxu1 %v1810_v23  ;;  %v1870_v3 = vld [vmem:[%s15491_s5 + $0x740] sm:$0xff]  ;;  %v1965_v23 = vld [vmem:[%s15491_s5 + $0xa38] sm:$0xff] }
 0x2e4   : > { %2133 = vmatpush2.msra.mxu0 %v1713_v20  ;;  %2204 = vmatpush2.msra.mxu1 %v1809_v28  ;;  %v1869_v28 = vld [vmem:[%s15491_s5 + $0x738] sm:$0xff] }
 0x2e5   : > { %2134 = vmatprep.subr.mxu0 %v1711_v41  ;;  %2205 = vmatprep.subr.mxu1 %v1807_v52  ;;  %v1963_v41 = vld [vmem:[%s15491_s5 + $0xa28] sm:$0xff] }
 0x2e6   : > { %2135 = vmatpush2.msra.mxu0 %v1710_v6  ;;  %2206 = vmatpush2.msra.mxu1 %v1806_v19  ;;  %v1867_v6 = vld [vmem:[%s15491_s5 + $0x728] sm:$0xff]  ;;  %v1962_v19 = vld [vmem:[%s15491_s5 + $0xa20] sm:$0xff] }
 0x2e7   : > { %2136 = vmatprep.subr.mxu0 %v1708_v31  ;;  %2207 = vmatprep.subr.mxu1 %v1804_v43 }
 0x2e8   : > { %2137 = vmatpush2.msra.mxu0 %v1707_v17  ;;  %2208 = vmatpush2.msra.mxu1 %v1803_v39  ;;  %v1866_v17 = vld [vmem:[%s15491_s5 + $0x720] sm:$0xff]  ;;  %v1960_v39 = vld [vmem:[%s15491_s5 + $0xa10] sm:$0xff] }
 0x2e9   : > { %2138 = vmatprep.subr.mxu0 %v1705_v8  ;;  %2209 = vmatprep.subr.mxu1 %v1801_v0 }
 0x2ea   : > { %2139 = vmatpush2.msra.mxu0 %v1704_v62  ;;  %2210 = vmatpush2.msra.mxu1 %v1800_v7  ;;  %v1864_v62 = vld [vmem:[%s15491_s5 + $0x710] sm:$0xff]  ;;  %v1959_v7 = vld [vmem:[%s15491_s5 + $0xa08] sm:$0xff] }
 0x2eb   : > { %2140 = vmatprep.subr.mxu0 %v1702_v61  ;;  %2211 = vmatprep.subr.mxu1 %v1798_v16  ;;  %v1863_v16 = vld [vmem:[%s15491_s5 + $0x708] sm:$0xff] }
 0x2ec   : > { %2141 = vmatpush2.msra.mxu0 %v1701_v10  ;;  %2212 = vmatpush2.msra.mxu1 %v1797_v26  ;;  %v1957_v10 = vld [vmem:[%s15491_s5 + $0x9f8] sm:$0xff] }
 0x2ed   : > { %2142 = vmatprep.subr.mxu0 %v1699_v54  ;;  %2213 = vmatprep.subr.mxu1 %v1795_v30 }
 0x2ee   : > { %2143 = vmatpush2.msra.mxu0 %v1698_v56  ;;  %2214 = vmatpush2.msra.mxu1 %v1794_v32  ;;  %v1861_v56 = vld [vmem:[%s15491_s5 + $0x6f8] sm:$0xff]  ;;  %v1956_v32 = vld [vmem:[%s15491_s5 + $0x9f0] sm:$0xff] }
 0x2ef   : > { %2144 = vmatprep.subr.mxu0 %v1696_v57  ;;  %2215 = vmatprep.subr.mxu1 %v1792_v14  ;;  %v1860_v57 = vld [vmem:[%s15491_s5 + $0x6f0] sm:$0xff] }
 0x2f0   : > { %2145 = vmatpush2.msra.mxu0 %v1695_v2  ;;  %2216 = vmatpush2.msra.mxu1 %v1791_v9  ;;  %v1858_v9 = vld [vmem:[%s15491_s5 + $0x6e0] sm:$0xff] }
 0x2f1   : > { %2146 = vmatprep.subr.mxu0 %v1693_v13  ;;  %2217 = vmatprep.subr.mxu1 %v1789_v45  ;;  %v1954_v13 = vld [vmem:[%s15491_s5 + $0x9e0] sm:$0xff]  ;;  %v1857_v45 = vld [vmem:[%s15491_s5 + $0x6d8] sm:$0xff] }
 0x2f2   : > { %2147 = vmatpush2.msra.mxu0 %v1692_v33  ;;  %2218 = vmatpush2.msra.mxu1 %v1788_v40 }
 0x2f3   : > { %2148 = vmatprep.subr.mxu0 %v1690_v48  ;;  %2219 = vmatprep.subr.mxu1 %v1786_v12  ;;  %v1953_v48 = vld [vmem:[%s15491_s5 + $0x9d8] sm:$0xff]  ;;  %v1855_v12 = vld [vmem:[%s15491_s5 + $0x6c8] sm:$0xff] }
 0x2f4   : > { %2149 = vmatpush2.msra.mxu0 %v1689_v27  ;;  %2220 = vmatpush2.msra.mxu1 %v1785_v5 }
 0x2f5   : > { %2150 = vmatprep.subr.mxu0 %v1687_v47  ;;  %2221 = vmatprep.subr.mxu1 %v1783_v4  ;;  %v1951_v47 = vld [vmem:[%s15491_s5 + $0x9c8] sm:$0xff]  ;;  %v1854_v4 = vld [vmem:[%s15491_s5 + $0x6c0] sm:$0xff] }
 0x2f6   : > { %2151 = vmatpush2.msra.mxu0 %v1686_v35  ;;  %2222 = vmatpush2.msra.mxu1 %v1782_v21  ;;  %v1950_v35 = vld [vmem:[%s15491_s5 + $0x9c0] sm:$0xff]  ;;  %v1852_v21 = vld [vmem:[%s15491_s5 + $0x6b0] sm:$0xff] }
 0x2f7   : > { %2230 = vmatprep.subr.mxu0 %v1876_v55  ;;  %2301 = vmatprep.subr.mxu1 %v1972_v15  ;;  %v1948_v55 = vld [vmem:[%s15491_s5 + $0x9b0] sm:$0xff]  ;;  %v1851_v15 = vld [vmem:[%s15491_s5 + $0x6a8] sm:$0xff] }
 0x348   : > { %v9314_v53 = vpop.permute.xlu1 %6866 }
 0x349   : > { %v6869_v38 = vunpack.i.h.bf16 %v9314_v53  ;;  %v6868_v50 = vunpack.i.l.bf16 %v9314_v53  ;;  %v6872_v11 = vpop.permute.xlu0 %6871  ;;  %v1778_v53 = vld [vmem:[%s15491_s5 + $0x460] sm:$0xff] }
 0x34a   : > { %v6874_v1 = vunpack.i.h.bf16 %v6872_v11  ;;  %v6873_v49 = vunpack.i.l.bf16 %v6872_v11  ;;  %v1849_v11 = vld [vmem:[%s15491_s5 + $0x698] sm:$0xff] }
 0x34b   : > { %v9321_v24 = vsel %vm2067_vm15, %v6868_v50, %v6869_v38 }
 0x34c   : > { %v2052_v34 = vpop.permute.xlu1 %2051  ;;  %2223 = vmatprep.mubr.f32.mxu1 %v9321_v24  ;;  %v9325_v36 = vsel %vm2067_vm15, %v6874_v1, %v6873_v49  ;;  %v1945_v1 = vld [vmem:[%s15491_s5 + $0x998] sm:$0xff] }
 0x34d   : > { %v9331_v29 = vsel %vm2067_vm15, %v6873_v49, %v2052_v34  ;;  %v9334_v44 = vsel %vm2067_vm15, %v2052_v34, %v6868_v50  ;;  %v1947_v50 = vld [vmem:[%s15491_s5 + $0x9a8] sm:$0xff]  ;;  %v1848_v49 = vld [vmem:[%s15491_s5 + $0x690] sm:$0xff] }
 0x34e   : > { %2152 = vmatprep.mubr.f32.mxu0 %v9331_v29  ;;  %2224 = vmatmul.mubr.f32.vlgmr.msra.gmra.mxu1 %v9334_v44  ;;  %v1944_v34 = vld [vmem:[%s15491_s5 + $0x990] sm:$0xff] }
 0x34f   : > { %2153 = vmatmul.mubr.f32.vlgmr.msra.gmra.mxu0 %v9325_v36  ;;  %2302 = vmatpush1.msra.mxu1 %v1971_v63  ;;  %v1846_v63 = vld [vmem:[%s15491_s5 + $0x680] sm:$0xff] }
 0x350   : > { %2231 = vmatpush1.msra.mxu0 %v1875_v25  ;;  %2303 = vmatprep.subr.mxu1 %v1969_v58  ;;  %v1942_v58 = vld [vmem:[%s15491_s5 + $0x980] sm:$0xff] }
 0x351   : > { %v1581_v20 = vpop.f32.mrf.mxu1  ;;  %2232 = vmatprep.subr.mxu0 %v1873_v22  ;;  %2304 = vmatpush1.msra.mxu1 %v1968_v46  ;;  %v1845_v22 = vld [vmem:[%s15491_s5 + $0x678] sm:$0xff] }
 0x352   : > { %v1582_v52 = vadd.f32 %v1581_v20, %v8945_v37  ;;  %2233 = vmatpush1.msra.mxu0 %v1872_v51  ;;  %2305 = vmatprep.subr.mxu1 %v1966_v59  ;;  %v1941_v46 = vld [vmem:[%s15491_s5 + $0x978] sm:$0xff]  ;;  %v1843_v51 = vld [vmem:[%s15491_s5 + $0x668] sm:$0xff]  ;;  %v1840_v20 = vld [vmem:[%s15491_s5 + $0x650] sm:$0xff] }
 0x353   : > { %v1510_v31 = vpop.f32.mrf.mxu0  ;;  %v1583_v43 = vpop.f32.mrf.mxu1  ;;  %2234 = vmatprep.subr.mxu0 %v1870_v3  ;;  %2306 = vmatpush1.msra.mxu1 %v1965_v23  ;;  %v1939_v59 = vld [vmem:[%s15491_s5 + $0x968] sm:$0xff]  ;;  %v1842_v3 = vld [vmem:[%s15491_s5 + $0x660] sm:$0xff] }
 0x354   : > { %v1511_v8 = vadd.f32 %v1510_v31, %v8945_v37  ;;  %v1584_v0 = vadd.f32 %v1583_v43, %v8945_v37  ;;  %2235 = vmatpush1.msra.mxu0 %v1869_v28  ;;  %2307 = vmatprep.subr.mxu1 %v1963_v41  ;;  %v1592_v26 = vmul.f32 0.1, %v1582_v52  ;;  %v1938_v23 = vld [vmem:[%s15491_s5 + $0x960] sm:$0xff]  ;;  %v1936_v28 = vld [vmem:[%s15491_s5 + $0x950] sm:$0xff]  ;;  %v1839_v41 = vld [vmem:[%s15491_s5 + $0x648] sm:$0xff] }
 0x355   : > { %v1512_v61 = vpop.f32.mrf.mxu0  ;;  %2236 = vmatprep.subr.mxu0 %v1867_v6  ;;  %2308 = vmatpush1.msra.mxu1 %v1962_v19  ;;  %v1837_v6 = vld [vmem:[%s15491_s5 + $0x638] sm:$0xff]  ;;  %v1836_v31 = vld [vmem:[%s15491_s5 + $0x630] sm:$0xff] }
 0x356   : > { %v1593_v54 = vmul.f32 0.1, %v1584_v0  ;;  %v1513_v30 = vadd.f32 %v1512_v61, %v8945_v37  ;;  %2237 = vmatpush1.msra.mxu0 %v1866_v17  ;;  %2309 = vmatprep.subr.mxu1 %v1960_v39  ;;  %v1590_v14 = vmul.f32 0.1, %v1511_v8  ;;  %v9417_v33 = vmax.f32 %v1582_v52, %v1592_v26  ;;  %v1935_v52 = vld [vmem:[%s15491_s5 + $0x948] sm:$0xff]  ;;  %v1933_v19 = vld [vmem:[%s15491_s5 + $0x938] sm:$0xff] }
 0x357   : > { %2238 = vmatprep.subr.mxu0 %v1864_v62  ;;  %2310 = vmatpush1.msra.mxu1 %v1959_v7  ;;  %v1932_v43 = vld [vmem:[%s15491_s5 + $0x930] sm:$0xff]  ;;  %v1834_v17 = vld [vmem:[%s15491_s5 + $0x620] sm:$0xff]  ;;  %v1831_v62 = vld [vmem:[%s15491_s5 + $0x608] sm:$0xff] }
 0x358   : > { %v9406_v2 = vmax.f32 %v1584_v0, %v1593_v54  ;;  %v1591_v37 = vmul.f32 0.1, %v1513_v30  ;;  %2239 = vmatpush1.msra.mxu0 %v1863_v16  ;;  %2311 = vmatprep.subr.mxu1 %v1957_v10  ;;  %v1598_v27 = vmax.f32 %v1511_v8, %v1590_v14  ;;  %v1930_v39 = vld [vmem:[%s15491_s5 + $0x920] sm:$0xff]  ;;  %v1833_v8 = vld [vmem:[%s15491_s5 + $0x618] sm:$0xff]  ;;  %v1927_v7 = vld [vmem:[%s15491_s5 + $0x908] sm:$0xff] }
 0x359   : > { %2240 = vmatprep.subr.mxu0 %v1861_v56  ;;  %2312 = vmatpush1.msra.mxu1 %v1956_v32  ;;  %v1929_v0 = vld [vmem:[%s15491_s5 + $0x918] sm:$0xff]  ;;  %v1830_v61 = vld [vmem:[%s15491_s5 + $0x600] sm:$0xff]  ;;  %v1924_v10 = vld [vmem:[%s15491_s5 + $0x8f0] sm:$0xff] }
 0x35a   : > { %v1599_v40 = vmax.f32 %v1513_v30, %v1591_v37  ;;  %2063 = vrot.lane.b32.xlu0 %v9406_v2, %s7723_s25  ;;  %2241 = vmatpush1.msra.mxu0 %v1860_v57  ;;  %v1926_v16 = vld [vmem:[%s15491_s5 + $0x900] sm:$0xff]  ;;  %v2020_v26 = vld [vmem:[%s15491_s5 + $0xbf0] sm:$0xff]  ;;  %v1923_v54 = vld [vmem:[%s15491_s5 + $0x8e8] sm:$0xff] }
 0x35b   : > { %2242 = vmatprep.subr.mxu0 %v1858_v9  ;;  %2313 = vmatprep.subr.mxu1 %v1954_v13  ;;  %v2019_v30 = vld [vmem:[%s15491_s5 + $0xbe8] sm:$0xff]  ;;  %v1921_v56 = vld [vmem:[%s15491_s5 + $0x8d8] sm:$0xff]  ;;  %v1920_v57 = vld [vmem:[%s15491_s5 + $0x8d0] sm:$0xff] }
 0x35c   : > { %v6875_v5 = vpack.i.bf16 %v1599_v40, %v9417_v33  ;;  %2243 = vmatpush1.msra.mxu0 %v1857_v45  ;;  %2314 = vmatpush1.msra.mxu1 %v1953_v48  ;;  %v9470_v25 = vpack.i.bf16 %v1599_v40, %v1598_v27  ;;  %v2017_v32 = vld [vmem:[%s15491_s5 + $0xbd8] sm:$0xff]  ;;  %v2016_v14 = vld [vmem:[%s15491_s5 + $0xbd0] sm:$0xff]  ;;  %v1918_v37 = vld [vmem:[%s15491_s5 + $0x8c0] sm:$0xff] }
 0x35d   : > { %2244 = vmatprep.subr.mxu0 %v1855_v12  ;;  %2315 = vmatprep.subr.mxu1 %v1951_v47  ;;  %v2014_v9 = vld [vmem:[%s15491_s5 + $0xbc0] sm:$0xff]  ;;  %v1917_v13 = vld [vmem:[%s15491_s5 + $0x8b8] sm:$0xff]  ;;  %v1915_v40 = vld [vmem:[%s15491_s5 + $0x8a8] sm:$0xff] }
 0x35e   : > { %6876 = vrot.lane.b32.xlu1 %v6875_v5, %s7723_s25  ;;  %2057 = vrot.lane.b32.xlu0 %v1598_v27, %s7723_s25  ;;  %v2013_v45 = vld [vmem:[%s15491_s5 + $0xbb8] sm:$0xff]  ;;  %v2011_v48 = vld [vmem:[%s15491_s5 + $0xba8] sm:$0xff] }
 0x35f   : > { %2245 = vmatpush1.msra.mxu0 %v1854_v4  ;;  %2316 = vmatpush1.msra.mxu1 %v1950_v35  ;;  %v1914_v12 = vld [vmem:[%s15491_s5 + $0x8a0] sm:$0xff]  ;;  %v1912_v5 = vld [vmem:[%s15491_s5 + $0x890] sm:$0xff]  ;;  %v1911_v4 = vld [vmem:[%s15491_s5 + $0x888] sm:$0xff] }
 0x360   : > { %2246 = vmatprep.subr.mxu0 %v1852_v21  ;;  %2317 = vmatprep.subr.mxu1 %v1948_v55  ;;  %v2010_v27 = vld [vmem:[%s15491_s5 + $0xba0] sm:$0xff]  ;;  %v2008_v47 = vld [vmem:[%s15491_s5 + $0xb90] sm:$0xff]  ;;  %v2007_v35 = vld [vmem:[%s15491_s5 + $0xb88] sm:$0xff] }
 0x361   : > { %2247 = vmatpush1.msra.mxu0 %v1851_v15  ;;  %2318 = vmatpush1.msra.mxu1 %v1947_v50  ;;  %v1909_v21 = vld [vmem:[%s15491_s5 + $0x878] sm:$0xff]  ;;  %v1908_v15 = vld [vmem:[%s15491_s5 + $0x870] sm:$0xff] }
 0x362   : > { %2065 = vrot.lane.b32.xlu1 %v15924_v42, %s7723_s25  ;;  %2793 = vrot.lane.b32.xlu0 %v15924_v42, %s7724_s24  ;;  %v2005_v55 = vld [vmem:[%s15491_s5 + $0xb78] sm:$0xff]  ;;  %v2004_v50 = vld [vmem:[%s15491_s5 + $0xb70] sm:$0xff]  ;;  %s7729_s25 = smov 1  }
 0x363   : > { %2248 = vmatprep.subr.mxu0 %v1849_v11  ;;  %2319 = vmatprep.subr.mxu1 %v1945_v1  ;;  %v1906_v11 = vld [vmem:[%s15491_s5 + $0x860] sm:$0xff] }
 0x364   : > { %2249 = vmatpush1.msra.mxu0 %v1848_v49  ;;  %2320 = vmatpush1.msra.mxu1 %v1944_v34  ;;  %v2002_v1 = vld [vmem:[%s15491_s5 + $0xb60] sm:$0xff]  ;;  %v2001_v49 = vld [vmem:[%s15491_s5 + $0xb58] sm:$0xff]  ;;  %v1903_v34 = vld [vmem:[%s15491_s5 + $0x848] sm:$0xff] }
 0x365   : > { %2250 = vmatprep.subr.mxu0 %v1846_v63  ;;  %2321 = vmatprep.subr.mxu1 %v1942_v58  ;;  %v1999_v63 = vld [vmem:[%s15491_s5 + $0xb48] sm:$0xff]  ;;  %v1998_v58 = vld [vmem:[%s15491_s5 + $0xb40] sm:$0xff] }
 0x366   : > { %6881 = vrot.lane.b32.xlu1 %v8999_v60, %s7724_s24  ;;  %6891 = vrot.lane.b32.xlu0 %v9470_v25, %s7724_s24 }
 0x367   : > { %2251 = vmatpush1.msra.mxu0 %v1845_v22  ;;  %2322 = vmatpush1.msra.mxu1 %v1941_v46  ;;  %v1899_v22 = vld [vmem:[%s15491_s5 + $0x828] sm:$0xff] }
 0x368   : > { %2252 = vmatprep.subr.mxu0 %v1843_v51  ;;  %2323 = vmatprep.subr.mxu1 %v1939_v59  ;;  %v1995_v46 = vld [vmem:[%s15491_s5 + $0xb28] sm:$0xff]  ;;  %v1897_v51 = vld [vmem:[%s15491_s5 + $0x818] sm:$0xff] }
 0x369   : > { %2253 = vmatpush1.msra.mxu0 %v1842_v3  ;;  %2324 = vmatpush1.msra.mxu1 %v1938_v23  ;;  %v1993_v59 = vld [vmem:[%s15491_s5 + $0xb18] sm:$0xff]  ;;  %v1896_v3 = vld [vmem:[%s15491_s5 + $0x810] sm:$0xff]  ;;  %v1894_v23 = vld [vmem:[%s15491_s5 + $0x800] sm:$0xff] }
 0x36a   : > { %6886 = vrot.lane.b32.xlu1 %v8969_v18, %s7724_s24  ;;  %2809 = vrot.lane.b32.xlu0 %v9406_v2, %s7724_s24 }
 0x36b   : > { %2254 = vmatprep.subr.mxu0 %v1840_v20  ;;  %2325 = vmatprep.subr.mxu1 %v1936_v28  ;;  %v1990_v20 = vld [vmem:[%s15491_s5 + $0xb00] sm:$0xff]  ;;  %v1893_v28 = vld [vmem:[%s15491_s5 + $0x7f8] sm:$0xff] }
 0x36c   : > { %2255 = vmatpush1.msra.mxu0 %v1839_v41  ;;  %2326 = vmatpush1.msra.mxu1 %v1935_v52  ;;  %v1989_v41 = vld [vmem:[%s15491_s5 + $0xaf8] sm:$0xff]  ;;  %v1891_v52 = vld [vmem:[%s15491_s5 + $0x7e8] sm:$0xff] }
 0x36d   : > { %2256 = vmatprep.subr.mxu0 %v1837_v6  ;;  %2327 = vmatprep.subr.mxu1 %v1933_v19  ;;  %v1987_v6 = vld [vmem:[%s15491_s5 + $0xae8] sm:$0xff]  ;;  %v1890_v19 = vld [vmem:[%s15491_s5 + $0x7e0] sm:$0xff] }
 0x36e   : > { %2807 = vrot.lane.b32.xlu1 %v9417_v33, %s7724_s24  ;;  %6896 = vrot.lane.b32.xlu0 %v8999_v60, %s7725_s16 }
 0x36f   : > { %2257 = vmatpush1.msra.mxu0 %v1836_v31  ;;  %2328 = vmatpush1.msra.mxu1 %v1932_v43  ;;  %v1986_v31 = vld [vmem:[%s15491_s5 + $0xae0] sm:$0xff]  ;;  %v1888_v43 = vld [vmem:[%s15491_s5 + $0x7d0] sm:$0xff] }
 0x370   : > { %2258 = vmatprep.subr.mxu0 %v1834_v17  ;;  %2329 = vmatprep.subr.mxu1 %v1930_v39  ;;  %v1984_v17 = vld [vmem:[%s15491_s5 + $0xad0] sm:$0xff]  ;;  %v1887_v39 = vld [vmem:[%s15491_s5 + $0x7c8] sm:$0xff] }
 0x371   : > { %2259 = vmatpush1.msra.mxu0 %v1833_v8  ;;  %2330 = vmatpush1.msra.mxu1 %v1929_v0  ;;  %v1983_v8 = vld [vmem:[%s15491_s5 + $0xac8] sm:$0xff]  ;;  %v1885_v0 = vld [vmem:[%s15491_s5 + $0x7b8] sm:$0xff] }
 0x372   : > { %2811 = vrot.lane.b32.xlu1 %v15924_v42, %s7724_s24  ;;  %6901 = vrot.lane.b32.xlu0 %v8969_v18, %s7725_s16  ;;  %s7726_s24 = smov 17  }
 0x373   : > { %2260 = vmatprep.subr.mxu0 %v1831_v62  ;;  %2331 = vmatprep.subr.mxu1 %v1927_v7  ;;  %v1981_v62 = vld [vmem:[%s15491_s5 + $0xab8] sm:$0xff]  ;;  %v1884_v7 = vld [vmem:[%s15491_s5 + $0x7b0] sm:$0xff] }
 0x374   : > { %2261 = vmatpush1.msra.mxu0 %v1830_v61  ;;  %2332 = vmatpush1.msra.mxu1 %v1926_v16  ;;  %v1980_v61 = vld [vmem:[%s15491_s5 + $0xab0] sm:$0xff]  ;;  %v1882_v16 = vld [vmem:[%s15491_s5 + $0x7a0] sm:$0xff] }
 0x375   : > { %2262 = vmatprep.subr.mxu0 %v1924_v10  ;;  %2333 = vmatprep.subr.mxu1 %v2020_v26  ;;  %v1978_v10 = vld [vmem:[%s15491_s5 + $0xaa0] sm:$0xff]  ;;  %v1881_v26 = vld [vmem:[%s15491_s5 + $0x798] sm:$0xff] }
 0x376   : > { %3538 = vrot.lane.b32.xlu1 %v15924_v42, %s7725_s16  ;;  %3552 = vrot.lane.b32.xlu0 %v9417_v33, %s7725_s16 }
 0x377   : > { %2263 = vmatpush2.msra.mxu0 %v1923_v54  ;;  %2334 = vmatpush2.msra.mxu1 %v2019_v30  ;;  %v1977_v54 = vld [vmem:[%s15491_s5 + $0xa98] sm:$0xff]  ;;  %v1879_v30 = vld [vmem:[%s15491_s5 + $0x788] sm:$0xff] }
 0x378   : > { %2264 = vmatprep.subr.mxu0 %v1921_v56  ;;  %2335 = vmatprep.subr.mxu1 %v2017_v32  ;;  %v1975_v56 = vld [vmem:[%s15491_s5 + $0xa88] sm:$0xff]  ;;  %v1878_v32 = vld [vmem:[%s15491_s5 + $0x780] sm:$0xff] }
 0x379   : > { %2265 = vmatpush2.msra.mxu0 %v1920_v57  ;;  %2336 = vmatpush2.msra.mxu1 %v2016_v14  ;;  %v1974_v57 = vld [vmem:[%s15491_s5 + $0xa80] sm:$0xff]  ;;  %v1829_v14 = vld [vmem:[%s15491_s5 + $0x5f8] sm:$0xff] }
 0x37a   : > { %6906 = vrot.lane.b32.xlu1 %v9470_v25, %s7725_s16  ;;  %3556 = vrot.lane.b32.xlu0 %v15924_v42, %s7725_s16 }
 0x37b   : > { %2266 = vmatprep.subr.mxu0 %v1918_v37  ;;  %2337 = vmatprep.subr.mxu1 %v2014_v9  ;;  %v2035_v37 = vld [vmem:[%s15491_s5 + $0xc68] sm:$0xff] }
 0x37c   : > { %2267 = vmatpush2.msra.mxu0 %v1917_v13  ;;  %2338 = vmatpush2.msra.mxu1 %v2013_v45 }
 0x37d   : > { %2268 = vmatprep.subr.mxu0 %v1915_v40  ;;  %2339 = vmatprep.subr.mxu1 %v2011_v48 }
 0x37e   : > { %3554 = vrot.lane.b32.xlu1 %v9406_v2, %s7725_s16  ;;  %4283 = vrot.lane.b32.xlu0 %v15924_v42, %s7726_s24 }
 0x37f   : > { %2269 = vmatpush2.msra.mxu0 %v1914_v12  ;;  %2340 = vmatpush2.msra.mxu1 %v2010_v27 }
 0x380   : > { %2270 = vmatprep.subr.mxu0 %v1912_v5  ;;  %2341 = vmatprep.subr.mxu1 %v2008_v47  ;;  %v2034_v47 = vld [vmem:[%s15491_s5 + $0xc60] sm:$0xff] }
 0x381   : > { %2271 = vmatpush2.msra.mxu0 %v1911_v4  ;;  %2342 = vmatpush2.msra.mxu1 %v2007_v35  ;;  %v1781_v4 = vld [vmem:[%s15491_s5 + $0x478] sm:$0xff] }
 0x382   : > { %6911 = vrot.lane.b32.xlu1 %v8999_v60, %s7726_s24  ;;  %6921 = vrot.lane.b32.xlu0 %v9470_v25, %s7726_s24  ;;  %v1905_v60 = vld [vmem:[%s15491_s5 + $0x858] sm:$0xff]  ;;  %v1902_v25 = vld [vmem:[%s15491_s5 + $0x840] sm:$0xff] }
 0x383   : > { %2272 = vmatprep.subr.mxu0 %v1909_v21  ;;  %2343 = vmatprep.subr.mxu1 %v2005_v55 }
 0x384   : > { %2273 = vmatpush2.msra.mxu0 %v1908_v15  ;;  %2344 = vmatpush2.msra.mxu1 %v2004_v50  ;;  %v2032_v15 = vld [vmem:[%s15491_s5 + $0xc50] sm:$0xff]  ;;  %v1826_v50 = vld [vmem:[%s15491_s5 + $0x5e0] sm:$0xff] }
 0x385   : > { %2274 = vmatprep.subr.mxu0 %v1906_v11  ;;  %2345 = vmatprep.subr.mxu1 %v2002_v1  ;;  %v2031_v11 = vld [vmem:[%s15491_s5 + $0xc48] sm:$0xff] }
 0x386   : > { %6916 = vrot.lane.b32.xlu1 %v8969_v18, %s7726_s24  ;;  %4299 = vrot.lane.b32.xlu0 %v9406_v2, %s7726_s24  ;;  %v1900_v18 = vld [vmem:[%s15491_s5 + $0x830] sm:$0xff]  ;;  %v1823_v1 = vld [vmem:[%s15491_s5 + $0x5c8] sm:$0xff] }
 0x387   : > { %2275 = vmatpush2.msra.mxu0 %v1905_v60  ;;  %2346 = vmatpush2.msra.mxu1 %v2001_v49  ;;  %v1996_v2 = vld [vmem:[%s15491_s5 + $0xb30] sm:$0xff] }
 0x388   : > { %2276 = vmatprep.subr.mxu0 %v1903_v34  ;;  %2347 = vmatprep.subr.mxu1 %v1999_v63  ;;  %v2028_v60 = vld [vmem:[%s15491_s5 + $0xc30] sm:$0xff]  ;;  %v1775_v63 = vld [vmem:[%s15491_s5 + $0x448] sm:$0xff] }
 0x389   : > { %2277 = vmatpush2.msra.mxu0 %v1902_v25  ;;  %2348 = vmatpush2.msra.mxu1 %v1998_v58  ;;  %v2026_v25 = vld [vmem:[%s15491_s5 + $0xc20] sm:$0xff] }
 0x38a   : > { %4297 = vrot.lane.b32.xlu1 %v9417_v33, %s7726_s24  ;;  %2278 = vmatprep.subr.mxu0 %v1900_v18  ;;  %v1992_v33 = vld [vmem:[%s15491_s5 + $0xb10] sm:$0xff]  ;;  %v2025_v18 = vld [vmem:[%s15491_s5 + $0xc18] sm:$0xff] }
 0x38b   : > { %2349 = vmatprep.subr.mxu1 %v1996_v2  ;;  %2279 = vmatpush2.msra.mxu0 %v1899_v22  ;;  %v1772_v2 = vld [vmem:[%s15491_s5 + $0x430] sm:$0xff]  ;;  %v2023_v22 = vld [vmem:[%s15491_s5 + $0xc08] sm:$0xff] }
 0x38c   : > { %2350 = vmatpush2.msra.mxu1 %v1995_v46  ;;  %2280 = vmatprep.subr.mxu0 %v1897_v51  ;;  %v1817_v46 = vld [vmem:[%s15491_s5 + $0x598] sm:$0xff]  ;;  %v2022_v51 = vld [vmem:[%s15491_s5 + $0xc00] sm:$0xff] }
 0x38d   : > { %2351 = vmatprep.subr.mxu1 %v1993_v59  ;;  %2281 = vmatpush2.msra.mxu0 %v1896_v3 }
 0x38e   : > { %4301 = vrot.lane.b32.xlu1 %v15924_v42, %s7726_s24  ;;  %2352 = vmatpush2.msra.mxu1 %v1992_v33 }
 0x38f   : > { %2282 = vmatprep.subr.mxu0 %v1894_v23  ;;  %2353 = vmatprep.subr.mxu1 %v1990_v20  ;;  %v1769_v23 = vld [vmem:[%s15491_s5 + $0x418] sm:$0xff] }
 0x390   : > { %2283 = vmatpush2.msra.mxu0 %v1893_v28  ;;  %2354 = vmatpush2.msra.mxu1 %v1989_v41 }
 0x391   : > { %2284 = vmatprep.subr.mxu0 %v1891_v52  ;;  %2355 = vmatprep.subr.mxu1 %v1987_v6  ;;  %v1733_v6 = vld [vmem:[%s15491_s5 + $0x2f8] sm:$0xff] }
 0x392   : > { %2285 = vmatpush2.msra.mxu0 %v1890_v19  ;;  %2356 = vmatpush2.msra.mxu1 %v1986_v31  ;;  %v1814_v19 = vld [vmem:[%s15491_s5 + $0x580] sm:$0xff]  ;;  %v1685_v31 = vld [vmem:[%s15491_s5 + $0x178] sm:$0xff] }
 0x393   : > { %2286 = vmatprep.subr.mxu0 %v1888_v43  ;;  %2357 = vmatprep.subr.mxu1 %v1984_v17 }
 0x394   : > { %2287 = vmatpush2.msra.mxu0 %v1887_v39  ;;  %2358 = vmatpush2.msra.mxu1 %v1983_v8  ;;  %v1766_v39 = vld [vmem:[%s15491_s5 + $0x400] sm:$0xff] }
 0x395   : > { %2288 = vmatprep.subr.mxu0 %v1885_v0  ;;  %2359 = vmatprep.subr.mxu1 %v1981_v62 }
 0x396   : > { %2289 = vmatpush2.msra.mxu0 %v1884_v7  ;;  %2360 = vmatpush2.msra.mxu1 %v1980_v61  ;;  %v1730_v61 = vld [vmem:[%s15491_s5 + $0x2e0] sm:$0xff] }
 0x397   : > { %2290 = vmatprep.subr.mxu0 %v1882_v16  ;;  %2361 = vmatprep.subr.mxu1 %v1978_v10  ;;  %v1811_v16 = vld [vmem:[%s15491_s5 + $0x568] sm:$0xff]  ;;  %v1682_v10 = vld [vmem:[%s15491_s5 + $0x160] sm:$0xff] }
 0x398   : > { %2291 = vmatpush2.msra.mxu0 %v1881_v26  ;;  %2362 = vmatpush2.msra.mxu1 %v1977_v54  ;;  %v1763_v26 = vld [vmem:[%s15491_s5 + $0x3e8] sm:$0xff] }
 0x399   : > { %2292 = vmatprep.subr.mxu0 %v1879_v30  ;;  %2363 = vmatprep.subr.mxu1 %v1975_v56  ;;  %v1727_v30 = vld [vmem:[%s15491_s5 + $0x2c8] sm:$0xff]  ;;  %v1808_v56 = vld [vmem:[%s15491_s5 + $0x550] sm:$0xff] }
 0x39a   : > { %2293 = vmatpush2.msra.mxu0 %v1878_v32  ;;  %2364 = vmatpush2.msra.mxu1 %v1974_v57  ;;  %v1679_v32 = vld [vmem:[%s15491_s5 + $0x148] sm:$0xff]  ;;  %v1760_v57 = vld [vmem:[%s15491_s5 + $0x3d0] sm:$0xff] }
 0x39b   : > { %6231 = vmatprep.subr.mxu0 %v1829_v14  ;;  %2394 = vmatprep.subr.mxu1 %v2035_v37  ;;  %v1724_v37 = vld [vmem:[%s15491_s5 + $0x2b0] sm:$0xff] }
 0x3cc   : > { %v9779_v9 = vpop.permute.xlu0 %2063 }
 0x3d0   : > { %v2058_v13 = vpop.permute.xlu0 %2057  ;;  %v6877_v45 = vpop.permute.xlu1 %6876 }
 0x3d1   : > { %v6879_v40 = vunpack.i.h.bf16 %v6877_v45  ;;  %v6878_v48 = vunpack.i.l.bf16 %v6877_v45  ;;  %v9802_v55 = vsel %vm2067_vm15, %v6869_v38, %v2058_v13  ;;  %v2029_v38 = vld [vmem:[%s15491_s5 + $0xc38] sm:$0xff] }
 0x3d3   : > { %v9782_v12 = vsel %vm2067_vm15, %v2058_v13, %v6879_v40  ;;  %v9786_v27 = vsel %vm2067_vm15, %v6878_v48, %v9779_v9  ;;  %v9789_v5 = vsel %vm2067_vm15, %v6879_v40, %v6878_v48  ;;  %v1676_v40 = vld [vmem:[%s15491_s5 + $0x130] sm:$0xff]  ;;  %v1757_v48 = vld [vmem:[%s15491_s5 + $0x3b8] sm:$0xff] }
 0x3d4   : > { %v2794_v35 = vpop.permute.xlu0 %2793  ;;  %v2066_v21 = vpop.permute.xlu1 %2065  ;;  %2294 = vmatprep.mubr.f32.mxu0 %v9782_v12  ;;  %2365 = vmatprep.mubr.f32.mxu1 %v9786_v27 }
 0x3d5   : > { %2295 = vmatmul.mubr.f32.vlgmr.msra.gmra.mxu0 %v9802_v55  ;;  %2366 = vmatmul.mubr.f32.vlgmr.msra.gmra.mxu1 %v9789_v5  ;;  %v9884_v43 = vsel %vm2067_vm15, %v9779_v9, %v2066_v21  ;;  %v1805_v9 = vld [vmem:[%s15491_s5 + $0x538] sm:$0xff] }
 0x3d6   : > { %2395 = vmatpush1.msra.mxu1 %v2034_v47  ;;  %6232 = vmatpush3.msra.mxu0 %v1781_v4  ;;  %v1721_v47 = vld [vmem:[%s15491_s5 + $0x298] sm:$0xff]  ;;  %v1802_v4 = vld [vmem:[%s15491_s5 + $0x520] sm:$0xff] }
 0x3d7   : > { %2396 = vmatprep.subr.mxu1 %v2032_v15  ;;  %6233 = vmatprep.subr.mxu0 %v1826_v50  ;;  %v1673_v21 = vld [vmem:[%s15491_s5 + $0x118] sm:$0xff]  ;;  %v1754_v15 = vld [vmem:[%s15491_s5 + $0x3a0] sm:$0xff] }
 0x3d8   : > { %2577 = vmatprep.mubr.f32.mxu0 %v9321_v24  ;;  %2397 = vmatpush1.msra.mxu1 %v2031_v11  ;;  %v9828_v49 = vpop.permute.xlu0 %6891  ;;  %v9830_v34 = vpop.permute.xlu1 %6881  ;;  %v1820_v24 = vld [vmem:[%s15491_s5 + $0x5b0] sm:$0xff] }
 0x3d9   : > { %6234 = vmatpush3.msra.mxu0 %v1778_v53  ;;  %v15522_v58 = vunpack.i.l.bf16 %v9830_v34  ;;  %2398 = vmatprep.subr.mxu1 %v2029_v38  ;;  %v15518_v20 = vunpack.i.l.bf16 %v9828_v49  ;;  %v15523_v28 = vunpack.i.h.bf16 %v9830_v34  ;;  %v15519_v17 = vunpack.i.h.bf16 %v9828_v49  ;;  %v1718_v38 = vld [vmem:[%s15491_s5 + $0x280] sm:$0xff] }
 0x3da   : > { %6235 = vmatprep.subr.mxu0 %v1823_v1  ;;  %2399 = vmatpush1.msra.mxu1 %v2028_v60  ;;  %v1799_v1 = vld [vmem:[%s15491_s5 + $0x508] sm:$0xff] }
 0x3db   : > { %6236 = vmatpush3.msra.mxu0 %v1775_v63  ;;  %2400 = vmatprep.subr.mxu1 %v2026_v25  ;;  %v9860_v59 = vsel %vm2813_vm0, %v2794_v35, %v15522_v58  ;;  %v1670_v63 = vld [vmem:[%s15491_s5 + $0x100] sm:$0xff]  ;;  %v1751_v25 = vld [vmem:[%s15491_s5 + $0x388] sm:$0xff]  ;;  %v10405_v58 = vld [vmem:[%s15491_s5 + $0x7f0] sm:$0xff] }
 0x3dc   : > { %6237 = vmatprep.subr.mxu0 %v1820_v24  ;;  %2401 = vmatpush1.msra.mxu1 %v2025_v18  ;;  %v9862_v3 = vpop.permute.xlu0 %2809  ;;  %v9864_v33 = vpop.permute.xlu1 %6886  ;;  %v1715_v24 = vld [vmem:[%s15491_s5 + $0x268] sm:$0xff]  ;;  %v1796_v18 = vld [vmem:[%s15491_s5 + $0x4f0] sm:$0xff] }
 0x3dd   : > { %6238 = vmatpush3.msra.mxu0 %v1772_v2  ;;  %v15521_v41 = vunpack.i.h.bf16 %v9864_v33  ;;  %v15520_v52 = vunpack.i.l.bf16 %v9864_v33  ;;  %2402 = vmatprep.subr.mxu1 %v2023_v22  ;;  %v1667_v2 = vld [vmem:[%s15491_s5 + $0xe8] sm:$0xff]  ;;  %v1748_v22 = vld [vmem:[%s15491_s5 + $0x370] sm:$0xff] }
 0x3de   : > { %6239 = vmatprep.subr.mxu0 %v1817_v46  ;;  %2403 = vmatpush1.msra.mxu1 %v2022_v51 }
 0x3df   : > { %2436 = vmatprep.mubr.f32.mxu1 %v15924_v42  ;;  %6240 = vmatpush3.msra.mxu0 %v1769_v23  ;;  %v9896_v8 = vsel %vm2813_vm0, %v15523_v28, %v15520_v52  ;;  %v9903_v0 = vsel %vm2813_vm0, %v15521_v41, %v15518_v20  ;;  %v1712_v23 = vld [vmem:[%s15491_s5 + $0x250] sm:$0xff]  ;;  %v10381_v20 = vld [vmem:[%s15491_s5 + $0x808] sm:$0xff] }
 0x3e0   : > { %15926 = vst [vmem:[#allocation6_spill] sm:$0xff] %v9903_v0  ;;  %6179 = vmatmul.mubr.msk.f32.vlgmr.msra.gmra.mxu1 %vm2085_vm1, %v9884_v43  ;;  %6196 = vmatprep.subr.mxu1 %v1733_v6  ;;  %v9907_v62 = vpop.permute.xlu0 %6896  ;;  %v9909_v7 = vpop.permute.xlu1 %2807  ;;  %v1793_v6 = vld [vmem:[%s15491_s5 + $0x4d8] sm:$0xff]  ;;  %v10393_v52 = vld [vmem:[%s15491_s5 + $0x688] sm:$0xff]  ;;  %v10398_v41 = vld [vmem:[%s15491_s5 + $0x910] sm:$0xff] }
 0x3e1   : > { %6241 = vmatprep.subr.mxu0 %v1814_v19  ;;  %6197 = vmatpush3.msra.mxu1 %v1685_v31  ;;  %v9927_v54 = vsel %vm2813_vm0, %v15519_v17, %v9909_v7  ;;  %v15517_v13 = vunpack.i.h.bf16 %v9907_v62  ;;  %v15516_v35 = vunpack.i.l.bf16 %v9907_v62  ;;  %v10386_v17 = vld [vmem:[%s15491_s5 + $0xa90] sm:$0xff] }
 0x3e2   : > { %2507 = vmatprep.mubr.f32.mxu1 %v9331_v29  ;;  %6242 = vmatpush3.msra.mxu0 %v1766_v39  ;;  %v10412_v28 = vld [vmem:[%s15491_s5 + $0x670] sm:$0xff] }
 0x3e3   : > { %6198 = vmatprep.subr.mxu1 %v1730_v61  ;;  %6243 = vmatprep.subr.mxu0 %v1811_v16  ;;  %v1664_v61 = vld [vmem:[%s15491_s5 + $0xd0] sm:$0xff]  ;;  %v1745_v16 = vld [vmem:[%s15491_s5 + $0x358] sm:$0xff] }
 0x3e4   : > { %6199 = vmatpush3.msra.mxu1 %v1682_v10  ;;  %6244 = vmatpush3.msra.mxu0 %v1763_v26  ;;  %v9942_v29 = vpop.permute.xlu0 %6901  ;;  %v9944_v14 = vpop.permute.xlu1 %2811  ;;  %v1709_v10 = vld [vmem:[%s15491_s5 + $0x238] sm:$0xff]  ;;  %v1790_v26 = vld [vmem:[%s15491_s5 + $0x4c0] sm:$0xff] }
 0x3e5   : > { %15927 = vst [vmem:[#allocation7_spill] sm:$0xff] %v9942_v29  ;;  %6200 = vmatprep.subr.mxu1 %v1727_v30  ;;  %6245 = vmatprep.subr.mxu0 %v1808_v56  ;;  %v15514_v45 = vunpack.i.l.bf16 %v9942_v29  ;;  %v15515_v19 = vunpack.i.h.bf16 %v9942_v29  ;;  %v1661_v30 = vld [vmem:[%s15491_s5 + $0xb8] sm:$0xff]  ;;  %v1742_v56 = vld [vmem:[%s15491_s5 + $0x340] sm:$0xff]  ;;  %v10531_v29 = vld [vmem:[%s15491_s5 + $0xc70] sm:$0xff] }
 0x3e6   : > { %6201 = vmatpush3.msra.mxu1 %v1679_v32  ;;  %6246 = vmatpush3.msra.mxu0 %v1760_v57  ;;  %15953 = vst [vmem:[#allocation31_spill] sm:$0xff] %v10531_v29 }
 0x3e7   : > { %6202 = vmatprep.subr.mxu1 %v1724_v37  ;;  %6247 = vmatprep.subr.mxu0 %v1805_v9  ;;  %v9978_v50 = vsel %vm3558_vm2, %v15517_v13, %v15514_v45  ;;  %v10357_v45 = vld [vmem:[%s15491_s5 + $0x820] sm:$0xff]  ;;  %v10374_v13 = vld [vmem:[%s15491_s5 + $0x928] sm:$0xff] }
 0x3e8   : > { %15928 = vst [vmem:[#allocation8_spill] sm:$0xff] %v9978_v50  ;;  %6203 = vmatpush3.msra.mxu1 %v1676_v40  ;;  %6248 = vmatpush3.msra.mxu0 %v1757_v48  ;;  %v9980_v11 = vpop.permute.xlu0 %3552  ;;  %v3539_v53 = vpop.permute.xlu1 %3538  ;;  %v1706_v40 = vld [vmem:[%s15491_s5 + $0x220] sm:$0xff]  ;;  %v1787_v48 = vld [vmem:[%s15491_s5 + $0x4a8] sm:$0xff]  ;;  %v10512_v50 = vld [vmem:[%s15491_s5 + $0x610] sm:$0xff] }
 0x3e9   : > { %15929 = vst [vmem:[#allocation9_spill] sm:$0xff] %v9980_v11  ;;  %6204 = vmatprep.subr.mxu1 %v1721_v47  ;;  %6249 = vmatprep.subr.mxu0 %v1802_v4  ;;  %v9991_v60 = vsel %vm3558_vm2, %v3539_v53, %v15516_v35  ;;  %v1658_v47 = vld [vmem:[%s15491_s5 + $0xa0] sm:$0xff]  ;;  %v1739_v4 = vld [vmem:[%s15491_s5 + $0x328] sm:$0xff]  ;;  %15950 = vst [vmem:[#allocation28_spill] sm:$0xff] %v10512_v50 }
 0x3ea   : > { %15930 = vst [vmem:[#allocation10_spill] sm:$0xff] %v9991_v60  ;;  %6205 = vmatpush3.msra.mxu1 %v1673_v21  ;;  %6250 = vmatpush3.msra.mxu0 %v1754_v15  ;;  %v1703_v21 = vld [vmem:[%s15491_s5 + $0x208] sm:$0xff]  ;;  %v1784_v15 = vld [vmem:[%s15491_s5 + $0x490] sm:$0xff]  ;;  %v10369_v35 = vld [vmem:[%s15491_s5 + $0x6a0] sm:$0xff] }
 0x3eb   : > { %6206 = vmatprep.subr.mxu1 %v1718_v38  ;;  %6251 = vmatprep.subr.mxu0 %v1799_v1  ;;  %v1655_v53 = vld [vmem:[%s15491_s5 + $0x88] sm:$0xff]  ;;  %v1736_v38 = vld [vmem:[%s15491_s5 + $0x310] sm:$0xff] }
 0x3ec   : > { %6207 = vmatpush3.msra.mxu1 %v1670_v63  ;;  %6252 = vmatpush3.msra.mxu0 %v1751_v25  ;;  %v10011_v46 = vpop.permute.xlu0 %3556  ;;  %v10013_v51 = vpop.permute.xlu1 %6906  ;;  %v1700_v63 = vld [vmem:[%s15491_s5 + $0x1f0] sm:$0xff] }
 0x3ed   : > { %15931 = vst [vmem:[#allocation11_spill] sm:$0xff] %v10011_v46  ;;  %15932 = vst [vmem:[#allocation12_spill] sm:$0xff] %v10013_v51  ;;  %6208 = vmatprep.subr.mxu1 %v1715_v24  ;;  %6253 = vmatprep.subr.mxu0 %v1796_v18  ;;  %v15513_v31 = vunpack.i.h.bf16 %v10013_v51  ;;  %v15512_v39 = vunpack.i.l.bf16 %v10013_v51  ;;  %v2021_v24 = vld [vmem:[%s15491_s5 + $0xbf8] sm:$0xff]  ;;  %v1652_v18 = vld [vmem:[%s15491_s5 + $0x70] sm:$0xff] }
 0x3ee   : > { %6209 = vmatpush3.msra.mxu1 %v1667_v2  ;;  %6254 = vmatpush3.msra.mxu0 %v1748_v22  ;;  %v1973_v22 = vld [vmem:[%s15491_s5 + $0xa78] sm:$0xff]  ;;  %v10488_v46 = vld [vmem:[%s15491_s5 + $0x628] sm:$0xff]  ;;  %v10518_v51 = vld [vmem:[%s15491_s5 + $0x120] sm:$0xff] }
 0x3ef   : > { %6210 = vmatprep.subr.mxu1 %v1712_v23  ;;  %6255 = vmatprep.subr.mxu0 %v1793_v6  ;;  %v10047_v32 = vsel %vm3558_vm2, %v15515_v19, %v15512_v39  ;;  %v10053_v57 = vsel %vm3558_vm2, %v15513_v31, %v9980_v11  ;;  %v1697_v23 = vld [vmem:[%s15491_s5 + $0x1d8] sm:$0xff]  ;;  %v2018_v6 = vld [vmem:[%s15491_s5 + $0xbe0] sm:$0xff]  ;;  %v10362_v19 = vld [vmem:[%s15491_s5 + $0xaa8] sm:$0xff]  ;;  %15947 = vst [vmem:[#allocation25_spill] sm:$0xff] %v10488_v46 }
 0x3f0   : > { %15933 = vst [vmem:[#allocation13_spill] sm:$0xff] %v10047_v32  ;;  %15934 = vst [vmem:[#allocation14_spill] sm:$0xff] %v10053_v57  ;;  %6211 = vmatpush3.msra.mxu1 %v1664_v61  ;;  %6256 = vmatpush3.msra.mxu0 %v1745_v16  ;;  %v4284_v37 = vpop.permute.xlu0 %4283  ;;  %v10055_v9 = vpop.permute.xlu1 %3554  ;;  %v1649_v16 = vld [vmem:[%s15491_s5 + $0x58] sm:$0xff]  ;;  %v10350_v31 = vld [vmem:[%s15491_s5 + $0x940] sm:$0xff] }
 0x3f1   : > { %15935 = vst [vmem:[#allocation15_spill] sm:$0xff] %v10055_v9  ;;  %6212 = vmatprep.subr.mxu1 %v1709_v10  ;;  %6257 = vmatprep.subr.mxu0 %v1790_v26  ;;  %v10345_v39 = vld [vmem:[%s15491_s5 + $0x6b8] sm:$0xff]  ;;  %v10482_v57 = vld [vmem:[%s15491_s5 + $0x140] sm:$0xff]  ;;  %v10500_v11 = vld [vmem:[%s15491_s5 + $0x790] sm:$0xff] }
 0x3f2   : > { %6213 = vmatpush3.msra.mxu1 %v1661_v30  ;;  %6258 = vmatpush3.msra.mxu0 %v1742_v56  ;;  %v10494_v32 = vld [vmem:[%s15491_s5 + $0x138] sm:$0xff]  ;;  %15948 = vst [vmem:[#allocation26_spill] sm:$0xff] %v10500_v11  ;;  %v10506_v9 = vld [vmem:[%s15491_s5 + $0x128] sm:$0xff]  ;;  %15951 = vst [vmem:[#allocation29_spill] sm:$0xff] %v10518_v51 }
 0x3f3   : > { %6214 = vmatprep.subr.mxu1 %v1706_v40  ;;  %6259 = vmatprep.subr.mxu0 %v1787_v48  ;;  %v1694_v40 = vld [vmem:[%s15491_s5 + $0x1c0] sm:$0xff]  ;;  %v2015_v48 = vld [vmem:[%s15491_s5 + $0xbc8] sm:$0xff]  ;;  %15949 = vst [vmem:[#allocation27_spill] sm:$0xff] %v10506_v9  ;;  %v10525_v60 = vld [vmem:[%s15491_s5 + $0x110] sm:$0xff] }
 0x3f4   : > { %6215 = vmatpush3.msra.mxu1 %v1658_v47  ;;  %6260 = vmatpush3.msra.mxu0 %v1739_v4  ;;  %v10081_v1 = vpop.permute.xlu1 %6911  ;;  %v10093_v2 = vpop.permute.xlu0 %6921  ;;  %v1646_v47 = vld [vmem:[%s15491_s5 + $0x40] sm:$0xff]  ;;  %15952 = vst [vmem:[#allocation30_spill] sm:$0xff] %v10525_v60 }
 0x3f5   : > { %15936 = vst [vmem:[#allocation16_spill] sm:$0xff] %v10081_v1  ;;  %6216 = vmatprep.subr.mxu1 %v1703_v21  ;;  %6261 = vmatprep.subr.mxu0 %v1784_v15  ;;  %v15510_v25 = vunpack.i.l.bf16 %v10081_v1  ;;  %15937 = vst [vmem:[#allocation17_spill] sm:$0xff] %v10093_v2  ;;  %v15506_v26 = vunpack.i.l.bf16 %v10093_v2  ;;  %v15511_v30 = vunpack.i.h.bf16 %v10081_v1  ;;  %v15507_v4 = vunpack.i.h.bf16 %v10093_v2  ;;  %v1691_v21 = vld [vmem:[%s15491_s5 + $0x1a8] sm:$0xff]  ;;  %v2012_v15 = vld [vmem:[%s15491_s5 + $0xbb0] sm:$0xff] }
 0x3f6   : > { %6217 = vmatpush3.msra.mxu1 %v1655_v53  ;;  %6262 = vmatpush3.msra.mxu0 %v1736_v38  ;;  %v10440_v2 = vld [vmem:[%s15491_s5 + $0x658] sm:$0xff]  ;;  %v10476_v1 = vld [vmem:[%s15491_s5 + $0x7a8] sm:$0xff] }
 0x3f7   : > { %6218 = vmatprep.subr.mxu1 %v1700_v63  ;;  %2578 = vmatmul.mubr.f32.vlgmr.msra.gmra.mxu0 %v9334_v44  ;;  %v10108_v61 = vsel %vm4303_vm3, %v4284_v37, %v15510_v25  ;;  %v1970_v44 = vld [vmem:[%s15491_s5 + $0xa60] sm:$0xff]  ;;  %v1643_v63 = vld [vmem:[%s15491_s5 + $0x28] sm:$0xff]  ;;  %v10333_v25 = vld [vmem:[%s15491_s5 + $0x838] sm:$0xff]  ;;  %15946 = vst [vmem:[#allocation24_spill] sm:$0xff] %v10476_v1 }
 0x3f8   : > { %15938 = vst [vmem:[#allocation18_spill] sm:$0xff] %v10108_v61  ;;  %6301 = vmatprep.subr.mxu0 %v2021_v24  ;;  %6219 = vmatpush3.msra.mxu1 %v1652_v18  ;;  %v10116_v10 = vpop.permute.xlu1 %6916  ;;  %v1964_v24 = vld [vmem:[%s15491_s5 + $0xa30] sm:$0xff]  ;;  %v10445_v61 = vld [vmem:[%s15491_s5 + $0x168] sm:$0xff] }
 0x3f9   : > { %15939 = vst [vmem:[#allocation19_spill] sm:$0xff] %v10116_v10  ;;  %6302 = vmatpush3.msra.mxu0 %v1973_v22  ;;  %2717 = vmatprep.mubr.f32.mxu0 %v9786_v27  ;;  %v15509_v56 = vunpack.i.h.bf16 %v10116_v10  ;;  %v15508_v37 = vunpack.i.l.bf16 %v10116_v10  ;;  %v1967_v27 = vld [vmem:[%s15491_s5 + $0xa48] sm:$0xff]  ;;  %v1688_v22 = vld [vmem:[%s15491_s5 + $0x190] sm:$0xff] }
 0x3fa   : > { %6220 = vmatprep.subr.mxu1 %v1697_v23  ;;  %6303 = vmatprep.subr.mxu0 %v2018_v6  ;;  %v2009_v23 = vld [vmem:[%s15491_s5 + $0xb98] sm:$0xff]  ;;  %v10470_v10 = vld [vmem:[%s15491_s5 + $0x150] sm:$0xff] }
 0x3fb   : > { %6221 = vmatpush3.msra.mxu1 %v1649_v16  ;;  %6304 = vmatpush3.msra.mxu0 %v1970_v44  ;;  %v10147_v53 = vsel %vm4303_vm3, %v15511_v30, %v15508_v37  ;;  %v10154_v38 = vsel %vm4303_vm3, %v15509_v56, %v15506_v26  ;;  %v1640_v16 = vld [vmem:[%s15491_s5 + $0x10] sm:$0xff]  ;;  %v1961_v44 = vld [vmem:[%s15491_s5 + $0xa18] sm:$0xff]  ;;  %v10338_v30 = vld [vmem:[%s15491_s5 + $0xac0] sm:$0xff] }
 0x3fc   : > { %15940 = vst [vmem:[#allocation20_spill] sm:$0xff] %v10147_v53  ;;  %15941 = vst [vmem:[#allocation21_spill] sm:$0xff] %v10154_v38  ;;  %6222 = vmatprep.subr.mxu1 %v1694_v40  ;;  %6305 = vmatprep.subr.mxu0 %v2015_v48  ;;  %v10162_v18 = vpop.permute.xlu1 %4297  ;;  %v1925_v40 = vld [vmem:[%s15491_s5 + $0x8f8] sm:$0xff]  ;;  %v2006_v48 = vld [vmem:[%s15491_s5 + $0xb80] sm:$0xff]  ;;  %v15945_v53 = vunpack.i.l.bf16 %v9830_v34 }
 0x3fd   : > { %15942 = vst [vmem:[#allocation22_spill] sm:$0xff] %v10162_v18  ;;  %6223 = vmatpush3.msra.mxu1 %v1646_v47  ;;  %6306 = vmatpush3.msra.mxu0 %v1967_v27  ;;  %v10174_v6 = vsel %vm4303_vm3, %v15507_v4, %v10162_v18  ;;  %v1877_v47 = vld [vmem:[%s15491_s5 + $0x778] sm:$0xff]  ;;  %v1958_v27 = vld [vmem:[%s15491_s5 + $0xa00] sm:$0xff]  ;;  %v10309_v26 = vld [vmem:[%s15491_s5 + $0x850] sm:$0xff]  ;;  %v15944_v18 = vunpack.i.h.bf16 %v9830_v34 }
 0x3fe   : > { %15943 = vst [vmem:[#allocation23_spill] sm:$0xff] %v10174_v6  ;;  %6224 = vmatprep.subr.mxu1 %v1691_v21  ;;  %6307 = vmatprep.subr.mxu0 %v2012_v15  ;;  %v1922_v21 = vld [vmem:[%s15491_s5 + $0x8e0] sm:$0xff]  ;;  %v2003_v15 = vld [vmem:[%s15491_s5 + $0xb68] sm:$0xff]  ;;  %v10314_v4 = vld [vmem:[%s15491_s5 + $0xad8] sm:$0xff] }
 0x3ff   : > { %6225 = vmatpush3.msra.mxu1 %v1643_v63  ;;  %6308 = vmatpush3.msra.mxu0 %v1964_v24  ;;  %v1874_v63 = vld [vmem:[%s15491_s5 + $0x760] sm:$0xff]  ;;  %v1955_v24 = vld [vmem:[%s15491_s5 + $0x9e8] sm:$0xff]  ;;  %v10321_v37 = vld [vmem:[%s15491_s5 + $0x6d0] sm:$0xff] }
 0x400   : > { %6226 = vmatprep.subr.mxu1 %v1688_v22  ;;  %6309 = vmatprep.subr.mxu0 %v2009_v23  ;;  %v2000_v22 = vld [vmem:[%s15491_s5 + $0xb50] sm:$0xff]  ;;  %v1871_v23 = vld [vmem:[%s15491_s5 + $0x748] sm:$0xff]  ;;  %v10326_v56 = vld [vmem:[%s15491_s5 + $0x958] sm:$0xff] }
 0x401   : > { %6227 = vmatpush3.msra.mxu1 %v1640_v16  ;;  %6310 = vmatpush3.msra.mxu0 %v1961_v44  ;;  %v1952_v16 = vld [vmem:[%s15491_s5 + $0x9d0] sm:$0xff]  ;;  %v1997_v44 = vld [vmem:[%s15491_s5 + $0xb38] sm:$0xff]  ;;  %v10452_v34 = vld [vmem:[%s15491_s5 + $0x7c0] sm:$0xff] }
 0x402   : > { %2508 = vmatmul.mubr.f32.vlgmr.msra.gmra.mxu1 %v9325_v36  ;;  %6266 = vmatprep.subr.mxu1 %v1925_v40  ;;  %v1919_v36 = vld [vmem:[%s15491_s5 + $0x8c8] sm:$0xff]  ;;  %v10229_v40 = vld [vmem:[%s15491_s5 + $0x730] sm:$0xff]  ;;  %v10421_v6 = vld [vmem:[%s15491_s5 + $0x7d8] sm:$0xff] }
 0x403   : > { %6311 = vmatprep.subr.mxu0 %v2006_v48  ;;  %6267 = vmatpush3.msra.mxu1 %v1877_v47  ;;  %v10234_v48 = vld [vmem:[%s15491_s5 + $0x9b8] sm:$0xff]  ;;  %v10426_v38 = vld [vmem:[%s15491_s5 + $0x170] sm:$0xff] }
 0x404   : > { %2647 = vmatprep.mubr.f32.mxu1 %v9782_v12  ;;  %6312 = vmatpush3.msra.mxu0 %v1958_v27  ;;  %v1916_v12 = vld [vmem:[%s15491_s5 + $0x8b0] sm:$0xff]  ;;  %v10239_v47 = vld [vmem:[%s15491_s5 + $0x898] sm:$0xff]  ;;  %v10244_v27 = vld [vmem:[%s15491_s5 + $0xb20] sm:$0xff] }
 0x405   : > { %6268 = vmatprep.subr.mxu1 %v1922_v21  ;;  %6313 = vmatprep.subr.mxu0 %v2003_v15  ;;  %v10249_v21 = vld [vmem:[%s15491_s5 + $0x718] sm:$0xff]  ;;  %v10254_v15 = vld [vmem:[%s15491_s5 + $0x9a0] sm:$0xff] }
 0x406   : > { %6269 = vmatpush3.msra.mxu1 %v1874_v63  ;;  %6314 = vmatpush3.msra.mxu0 %v1955_v24  ;;  %v10261_v63 = vld [vmem:[%s15491_s5 + $0x880] sm:$0xff]  ;;  %v10266_v24 = vld [vmem:[%s15491_s5 + $0xb08] sm:$0xff] }
 0x407   : > { %6270 = vmatprep.subr.mxu1 %v1919_v36  ;;  %6315 = vmatprep.subr.mxu0 %v2000_v22  ;;  %v10273_v36 = vld [vmem:[%s15491_s5 + $0x700] sm:$0xff]  ;;  %v10278_v22 = vld [vmem:[%s15491_s5 + $0x988] sm:$0xff] }
 0x408   : > { %6271 = vmatpush3.msra.mxu1 %v1871_v23  ;;  %6316 = vmatpush3.msra.mxu0 %v1952_v16  ;;  %v10285_v23 = vld [vmem:[%s15491_s5 + $0x868] sm:$0xff]  ;;  %v10290_v16 = vld [vmem:[%s15491_s5 + $0xaf0] sm:$0xff] }
 0x409   : > { %6272 = vmatprep.subr.mxu1 %v1916_v12  ;;  %6317 = vmatprep.subr.mxu0 %v1997_v44  ;;  %v10297_v12 = vld [vmem:[%s15491_s5 + $0x6e8] sm:$0xff]  ;;  %v10302_v44 = vld [vmem:[%s15491_s5 + $0x970] sm:$0xff] }
 0x40a   : > { %6273 = vmatpush3.msra.mxu1 %v10229_v40  ;;  %6318 = vmatpush3.msra.mxu0 %v10234_v48 }
 0x40b   : > { %6274 = vmatprep.subr.mxu1 %v10239_v47  ;;  %6319 = vmatprep.subr.mxu0 %v10244_v27 }
 0x40c   : > { %6275 = vmatpush3.msra.mxu1 %v10249_v21  ;;  %6320 = vmatpush3.msra.mxu0 %v10254_v15 }
 0x40d   : > { %6276 = vmatprep.subr.mxu1 %v10261_v63  ;;  %6321 = vmatprep.subr.mxu0 %v10266_v24 }
 0x40e   : > { %6277 = vmatpush3.msra.mxu1 %v10273_v36  ;;  %6322 = vmatpush3.msra.mxu0 %v10278_v22 }
 0x40f   : > { %6278 = vmatprep.subr.mxu1 %v10285_v23  ;;  %6323 = vmatprep.subr.mxu0 %v10290_v16 }
 0x410   : > { %6279 = vmatpush3.msra.mxu1 %v10297_v12  ;;  %6324 = vmatpush3.msra.mxu0 %v10302_v44 }
 0x411   : > { %6280 = vmatprep.subr.mxu1 %v10309_v26  ;;  %6325 = vmatprep.subr.mxu0 %v10314_v4 }
 0x412   : > { %6281 = vmatpush3.msra.mxu1 %v10321_v37  ;;  %6326 = vmatpush3.msra.mxu0 %v10326_v56 }
 0x413   : > { %6282 = vmatprep.subr.mxu1 %v10333_v25  ;;  %6327 = vmatprep.subr.mxu0 %v10338_v30 }
 0x414   : > { %6283 = vmatpush3.msra.mxu1 %v10345_v39  ;;  %6328 = vmatpush3.msra.mxu0 %v10350_v31 }
 0x415   : > { %6284 = vmatprep.subr.mxu1 %v10357_v45  ;;  %6329 = vmatprep.subr.mxu0 %v10362_v19 }
 0x416   : > { %6285 = vmatpush3.msra.mxu1 %v10369_v35  ;;  %6330 = vmatpush3.msra.mxu0 %v10374_v13 }
 0x417   : > { %6286 = vmatprep.subr.mxu1 %v10381_v20  ;;  %6331 = vmatprep.subr.mxu0 %v10386_v17 }
 0x418   : > { %6287 = vmatpush3.msra.mxu1 %v10393_v52  ;;  %6332 = vmatpush3.msra.mxu0 %v10398_v41 }
 0x419   : > { %6288 = vmatprep.subr.mxu1 %v10405_v58  ;;  %2718 = vmatmul.mubr.f32.vlgmr.msra.gmra.mxu0 %v9789_v5  ;;  %v10435_v5 = vsel %vm2813_vm0, %v15945_v53, %v15944_v18  ;;  %v10458_v53 = vld [vmem:[%s15491_s5 + $0x158] sm:$0xff]  ;;  %v10464_v18 = vld [vmem:[%s15491_s5 + $0x640] sm:$0xff] }
 0x41a   : > { %2833 = vmatprep.subr.mxu0 %v10426_v38  ;;  %6289 = vmatpush3.msra.mxu1 %v10412_v28 }
 0x41b   : > { %2834 = vmatpush1.msra.mxu0 %v10445_v61  ;;  %2897 = vmatprep.mubr.f32.mxu0 %v10435_v5 }
 0x41c   : > { %6290 = vmatprep.subr.mxu1 %v10421_v6  ;;  %2835 = vmatprep.subr.mxu0 %v10458_v53 }
 0x41d   : > { %6291 = vmatpush3.msra.mxu1 %v10440_v2  ;;  %2836 = vmatpush1.msra.mxu0 %v10470_v10 }
 0x41e   : > { %6292 = vmatprep.subr.mxu1 %v10452_v34  ;;  %2837 = vmatprep.subr.mxu0 %v10482_v57 }
 0x41f   : > { %6293 = vmatpush3.msra.mxu1 %v10464_v18  ;;  %2838 = vmatpush1.msra.mxu0 %v10494_v32 }
 0x420   : > { %6294 = vmatprep.subr.mxu1 %v10476_v1  ;;  %2839 = vmatprep.subr.mxu0 %v10506_v9  ;;  %v12011_v1 = vld [vmem:[%s15491_s5 + $0xb30] sm:$0xff] }
 0x421   : > { %6295 = vmatpush3.msra.mxu1 %v10488_v46  ;;  %2840 = vmatpush1.msra.mxu0 %v10518_v51  ;;  %v10537_v51 = vld [vmem:[%s15491_s5 + $0x108] sm:$0xff]  ;;  %16197 = vst [vmem:[#allocation271_spill] sm:$0xff] %v12011_v1 }
 0x422   : > { %6296 = vmatprep.subr.mxu1 %v10500_v11  ;;  %2841 = vmatprep.subr.mxu0 %v10525_v60  ;;  %15954 = vst [vmem:[#allocation32_spill] sm:$0xff] %v10537_v51  ;;  %v10545_v60 = vld [vmem:[%s15491_s5 + $0xc58] sm:$0xff] }
 0x423   : > { %6297 = vmatpush3.msra.mxu1 %v10512_v50  ;;  %2842 = vmatpush1.msra.mxu0 %v10537_v51  ;;  %15955 = vst [vmem:[#allocation33_spill] sm:$0xff] %v10545_v60  ;;  %v10550_v50 = vld [vmem:[%s15491_s5 + $0xf8] sm:$0xff]  ;;  %v10564_v51 = vld [vmem:[%s15491_s5 + $0xc40] sm:$0xff] }
 0x424   : > { %2648 = vmatmul.mubr.f32.vlgmr.msra.gmra.mxu1 %v9802_v55  ;;  %6780 = vmatprep.subr.mxu1 %v15924_v42  ;;  %15956 = vst [vmem:[#allocation34_spill] sm:$0xff] %v10550_v50  ;;  %v10557_v55 = vld [vmem:[%s15491_s5 + $0xf0] sm:$0xff]  ;;  %15958 = vst [vmem:[#allocation36_spill] sm:$0xff] %v10564_v51 }
 0x425   : > { %2843 = vmatprep.subr.mxu0 %v10550_v50  ;;  %6781 = vmatpush3.msra.mxu1 %v10531_v29  ;;  %15957 = vst [vmem:[#allocation35_spill] sm:$0xff] %v10557_v55  ;;  %v10569_v50 = vld [vmem:[%s15491_s5 + $0xe0] sm:$0xff]  ;;  %v10583_v29 = vld [vmem:[%s15491_s5 + $0xc28] sm:$0xff] }
 0x426   : > { %2844 = vmatpush1.msra.mxu0 %v10557_v55  ;;  %6782 = vmatprep.subr.mxu1 %v15924_v42  ;;  %15959 = vst [vmem:[#allocation37_spill] sm:$0xff] %v10569_v50  ;;  %v10576_v55 = vld [vmem:[%s15491_s5 + $0xd8] sm:$0xff]  ;;  %15961 = vst [vmem:[#allocation39_spill] sm:$0xff] %v10583_v29 }
 0x427   : > { %2845 = vmatprep.subr.mxu0 %v10569_v50  ;;  %6783 = vmatpush3.msra.mxu1 %v10545_v60  ;;  %15960 = vst [vmem:[#allocation38_spill] sm:$0xff] %v10576_v55  ;;  %v10588_v50 = vld [vmem:[%s15491_s5 + $0xc8] sm:$0xff]  ;;  %v10602_v60 = vld [vmem:[%s15491_s5 + $0xc10] sm:$0xff] }
 0x428   : > { %2846 = vmatpush1.msra.mxu0 %v10576_v55  ;;  %6784 = vmatprep.subr.mxu1 %v15924_v42  ;;  %15962 = vst [vmem:[#allocation40_spill] sm:$0xff] %v10588_v50  ;;  %v10595_v55 = vld [vmem:[%s15491_s5 + $0xc0] sm:$0xff]  ;;  %15964 = vst [vmem:[#allocation42_spill] sm:$0xff] %v10602_v60 }
 0x429   : > { %2847 = vmatprep.subr.mxu0 %v10588_v50  ;;  %6785 = vmatpush3.msra.mxu1 %v10564_v51  ;;  %15963 = vst [vmem:[#allocation41_spill] sm:$0xff] %v10595_v55  ;;  %v10607_v50 = vld [vmem:[%s15491_s5 + $0xb0] sm:$0xff]  ;;  %v10621_v51 = vld [vmem:[%s15491_s5 + $0x98] sm:$0xff] }
 0x42a   : > { %2848 = vmatpush1.msra.mxu0 %v10595_v55  ;;  %6786 = vmatprep.subr.mxu1 %v15924_v42  ;;  %15965 = vst [vmem:[#allocation43_spill] sm:$0xff] %v10607_v50  ;;  %v10614_v55 = vld [vmem:[%s15491_s5 + $0xa8] sm:$0xff]  ;;  %15967 = vst [vmem:[#allocation45_spill] sm:$0xff] %v10621_v51 }
 0x42b   : > { %2849 = vmatprep.subr.mxu0 %v10607_v50  ;;  %6787 = vmatpush3.msra.mxu1 %v10583_v29  ;;  %15966 = vst [vmem:[#allocation44_spill] sm:$0xff] %v10614_v55  ;;  %v10630_v29 = vld [vmem:[%s15491_s5 + $0x90] sm:$0xff]  ;;  %v10663_v50 = vld [vmem:[%s15491_s5 + $0x468] sm:$0xff] }
 0x42c   : > { %2850 = vmatpush1.msra.mxu0 %v10614_v55  ;;  %6788 = vmatprep.subr.mxu1 %v15924_v42  ;;  %15968 = vst [vmem:[#allocation46_spill] sm:$0xff] %v10630_v29  ;;  %v15973_v55 = vunpack.i.l.bf16 %v9864_v33  ;;  %15974 = vst [vmem:[#allocation50_spill] sm:$0xff] %v10663_v50 }
 0x42d   : > { %2851 = vmatprep.subr.mxu0 %v10621_v51  ;;  %6789 = vmatpush3.msra.mxu1 %v10602_v60  ;;  %v10638_v51 = vld [vmem:[%s15491_s5 + $0x80] sm:$0xff]  ;;  %v10644_v60 = vld [vmem:[%s15491_s5 + $0x470] sm:$0xff] }
 0x42e   : > { %6790 = vmatprep.mubr.msk.f32.mxu1 %vm7727_vm8, %v15924_v42  ;;  %2852 = vmatpush1.msra.mxu0 %v10630_v29  ;;  %15969 = vst [vmem:[#allocation47_spill] sm:$0xff] %v10638_v51  ;;  %15970 = vst [vmem:[#allocation48_spill] sm:$0xff] %v10644_v60  ;;  %v10650_v29 = vld [vmem:[%s15491_s5 + $0x78] sm:$0xff] }
 0x42f   : > { %6791 = vmatmul.mubr.msk.f32.vlgmr.msra.gmra.mxu1 %vm2085_vm1, %v9884_v43  ;;  %2853 = vmatprep.subr.mxu0 %v10638_v51  ;;  %15971 = vst [vmem:[#allocation49_spill] sm:$0xff] %v10650_v29  ;;  %v15972_v43 = vunpack.i.h.bf16 %v9864_v33  ;;  %v10676_v33 = vld [vmem:[%s15491_s5 + $0x458] sm:$0xff] }
 0x430   : > { %2904 = vmatprep.subr.mxu1 %v10644_v60  ;;  %2854 = vmatpush1.msra.mxu0 %v10650_v29  ;;  %v10670_v29 = vld [vmem:[%s15491_s5 + $0x68] sm:$0xff]  ;;  %15976 = vst [vmem:[#allocation52_spill] sm:$0xff] %v10676_v33 }
 0x431   : > { %v10658_v51 = vsel %vm2813_vm0, %v15973_v55, %v15972_v43  ;;  %2905 = vmatpush1.msra.mxu1 %v10663_v50  ;;  %15975 = vst [vmem:[#allocation51_spill] sm:$0xff] %v10670_v29  ;;  %2855 = vmatprep.subr.mxu0 %v10670_v29  ;;  %v10682_v55 = vld [vmem:[%s15491_s5 + $0x60] sm:$0xff]  ;;  %v10688_v43 = vld [vmem:[%s15491_s5 + $0x450] sm:$0xff]  ;;  %v16063_v50 = vunpack.i.l.bf16 %v9828_v49  ;;  %v11200_v60 = vld [vmem:[%s15491_s5 + $0x768] sm:$0xff] }
 0x432   : > { %2968 = vmatprep.mubr.f32.mxu1 %v10658_v51  ;;  %2906 = vmatprep.subr.mxu1 %v10676_v33  ;;  %15977 = vst [vmem:[#allocation53_spill] sm:$0xff] %v10682_v55  ;;  %15978 = vst [vmem:[#allocation54_spill] sm:$0xff] %v10688_v43  ;;  %v10694_v29 = vld [vmem:[%s15491_s5 + $0x50] sm:$0xff]  ;;  %v10700_v33 = vld [vmem:[%s15491_s5 + $0x440] sm:$0xff] }
 0x433   : > { %2856 = vmatpush1.msra.mxu0 %v10682_v55  ;;  %2907 = vmatpush1.msra.mxu1 %v10688_v43  ;;  %15979 = vst [vmem:[#allocation55_spill] sm:$0xff] %v10694_v29  ;;  %15980 = vst [vmem:[#allocation56_spill] sm:$0xff] %v10700_v33  ;;  %v10706_v55 = vld [vmem:[%s15491_s5 + $0x48] sm:$0xff]  ;;  %v10712_v43 = vld [vmem:[%s15491_s5 + $0x438] sm:$0xff] }
 0x434   : > { %2857 = vmatprep.subr.mxu0 %v10694_v29  ;;  %2908 = vmatprep.subr.mxu1 %v10700_v33  ;;  %15981 = vst [vmem:[#allocation57_spill] sm:$0xff] %v10706_v55  ;;  %15982 = vst [vmem:[#allocation58_spill] sm:$0xff] %v10712_v43  ;;  %v10718_v29 = vld [vmem:[%s15491_s5 + $0x38] sm:$0xff]  ;;  %v10724_v33 = vld [vmem:[%s15491_s5 + $0x428] sm:$0xff] }
 0x435   : > { %2858 = vmatpush1.msra.mxu0 %v10706_v55  ;;  %2909 = vmatpush1.msra.mxu1 %v10712_v43  ;;  %15983 = vst [vmem:[#allocation59_spill] sm:$0xff] %v10718_v29  ;;  %15984 = vst [vmem:[#allocation60_spill] sm:$0xff] %v10724_v33  ;;  %v10730_v55 = vld [vmem:[%s15491_s5 + $0x30] sm:$0xff]  ;;  %v10736_v43 = vld [vmem:[%s15491_s5 + $0x420] sm:$0xff] }
 0x436   : > { %2859 = vmatprep.subr.mxu0 %v10718_v29  ;;  %2910 = vmatprep.subr.mxu1 %v10724_v33  ;;  %15985 = vst [vmem:[#allocation61_spill] sm:$0xff] %v10730_v55  ;;  %15986 = vst [vmem:[#allocation62_spill] sm:$0xff] %v10736_v43  ;;  %v10742_v29 = vld [vmem:[%s15491_s5 + $0x20] sm:$0xff]  ;;  %v10748_v33 = vld [vmem:[%s15491_s5 + $0x410] sm:$0xff] }
 0x437   : > { %2860 = vmatpush1.msra.mxu0 %v10730_v55  ;;  %2911 = vmatpush1.msra.mxu1 %v10736_v43  ;;  %15987 = vst [vmem:[#allocation63_spill] sm:$0xff] %v10742_v29  ;;  %15988 = vst [vmem:[#allocation64_spill] sm:$0xff] %v10748_v33  ;;  %v10754_v55 = vld [vmem:[%s15491_s5 + $0x18] sm:$0xff]  ;;  %v10760_v43 = vld [vmem:[%s15491_s5 + $0x408] sm:$0xff] }
 0x438   : > { %2861 = vmatprep.subr.mxu0 %v10742_v29  ;;  %2912 = vmatprep.subr.mxu1 %v10748_v33  ;;  %15989 = vst [vmem:[#allocation65_spill] sm:$0xff] %v10754_v55  ;;  %15990 = vst [vmem:[#allocation66_spill] sm:$0xff] %v10760_v43  ;;  %v10766_v29 = vld [vmem:[%s15491_s5 + $0x8] sm:$0xff]  ;;  %v10772_v33 = vld [vmem:[%s15491_s5 + $0x3f8] sm:$0xff] }
 0x439   : > { %2862 = vmatpush1.msra.mxu0 %v10754_v55  ;;  %2913 = vmatpush1.msra.mxu1 %v10760_v43  ;;  %15991 = vst [vmem:[#allocation67_spill] sm:$0xff] %v10766_v29  ;;  %15992 = vst [vmem:[#allocation68_spill] sm:$0xff] %v10772_v33  ;;  %v10778_v55 = vld [vmem:[%s15491_s5] sm:$0xff]  ;;  %v10784_v43 = vld [vmem:[%s15491_s5 + $0x3f0] sm:$0xff] }
 0x43a   : > { %2863 = vmatprep.subr.mxu0 %v10766_v29  ;;  %2914 = vmatprep.subr.mxu1 %v10772_v33  ;;  %15993 = vst [vmem:[#allocation69_spill] sm:$0xff] %v10778_v55  ;;  %15994 = vst [vmem:[#allocation70_spill] sm:$0xff] %v10784_v43  ;;  %v10790_v29 = vld [vmem:[%s15491_s5 + $0x2f0] sm:$0xff]  ;;  %v10796_v33 = vld [vmem:[%s15491_s5 + $0x3e0] sm:$0xff] }
 0x43b   : > { %2864 = vmatpush1.msra.mxu0 %v10778_v55  ;;  %2915 = vmatpush1.msra.mxu1 %v10784_v43  ;;  %15995 = vst [vmem:[#allocation71_spill] sm:$0xff] %v10790_v29  ;;  %15996 = vst [vmem:[#allocation72_spill] sm:$0xff] %v10796_v33  ;;  %v10802_v55 = vld [vmem:[%s15491_s5 + $0x2e8] sm:$0xff]  ;;  %v10808_v43 = vld [vmem:[%s15491_s5 + $0x3d8] sm:$0xff] }
 0x43c   : > { %2865 = vmatprep.subr.mxu0 %v10790_v29  ;;  %2916 = vmatprep.subr.mxu1 %v10796_v33  ;;  %15997 = vst [vmem:[#allocation73_spill] sm:$0xff] %v10802_v55  ;;  %15998 = vst [vmem:[#allocation74_spill] sm:$0xff] %v10808_v43  ;;  %v10814_v29 = vld [vmem:[%s15491_s5 + $0x2d8] sm:$0xff]  ;;  %v10820_v33 = vld [vmem:[%s15491_s5 + $0x3c8] sm:$0xff] }
 0x43d   : > { %2866 = vmatpush2.msra.mxu0 %v10802_v55  ;;  %2917 = vmatpush1.msra.mxu1 %v10808_v43  ;;  %15999 = vst [vmem:[#allocation75_spill] sm:$0xff] %v10814_v29  ;;  %16000 = vst [vmem:[#allocation76_spill] sm:$0xff] %v10820_v33  ;;  %v10826_v55 = vld [vmem:[%s15491_s5 + $0x2d0] sm:$0xff]  ;;  %v10832_v43 = vld [vmem:[%s15491_s5 + $0x3c0] sm:$0xff] }
 0x43e   : > { %2867 = vmatprep.subr.mxu0 %v10814_v29  ;;  %2918 = vmatprep.subr.mxu1 %v10820_v33  ;;  %16001 = vst [vmem:[#allocation77_spill] sm:$0xff] %v10826_v55  ;;  %16002 = vst [vmem:[#allocation78_spill] sm:$0xff] %v10832_v43  ;;  %v10838_v29 = vld [vmem:[%s15491_s5 + $0x2c0] sm:$0xff]  ;;  %v10844_v33 = vld [vmem:[%s15491_s5 + $0x3b0] sm:$0xff] }
 0x43f   : > { %2868 = vmatpush2.msra.mxu0 %v10826_v55  ;;  %2919 = vmatpush1.msra.mxu1 %v10832_v43  ;;  %16003 = vst [vmem:[#allocation79_spill] sm:$0xff] %v10838_v29  ;;  %16004 = vst [vmem:[#allocation80_spill] sm:$0xff] %v10844_v33  ;;  %v10850_v55 = vld [vmem:[%s15491_s5 + $0x2b8] sm:$0xff]  ;;  %v10856_v43 = vld [vmem:[%s15491_s5 + $0x3a8] sm:$0xff] }
 0x440   : > { %2869 = vmatprep.subr.mxu0 %v10838_v29  ;;  %2920 = vmatprep.subr.mxu1 %v10844_v33  ;;  %16005 = vst [vmem:[#allocation81_spill] sm:$0xff] %v10850_v55  ;;  %16006 = vst [vmem:[#allocation82_spill] sm:$0xff] %v10856_v43  ;;  %v10862_v29 = vld [vmem:[%s15491_s5 + $0x2a8] sm:$0xff]  ;;  %v10868_v33 = vld [vmem:[%s15491_s5 + $0x398] sm:$0xff] }
 0x441   : > { %2870 = vmatpush2.msra.mxu0 %v10850_v55  ;;  %2921 = vmatpush1.msra.mxu1 %v10856_v43  ;;  %16007 = vst [vmem:[#allocation83_spill] sm:$0xff] %v10862_v29  ;;  %16008 = vst [vmem:[#allocation84_spill] sm:$0xff] %v10868_v33  ;;  %v10874_v55 = vld [vmem:[%s15491_s5 + $0x2a0] sm:$0xff]  ;;  %v10880_v43 = vld [vmem:[%s15491_s5 + $0x390] sm:$0xff] }
 0x442   : > { %2871 = vmatprep.subr.mxu0 %v10862_v29  ;;  %2922 = vmatprep.subr.mxu1 %v10868_v33  ;;  %16009 = vst [vmem:[#allocation85_spill] sm:$0xff] %v10874_v55  ;;  %16010 = vst [vmem:[#allocation86_spill] sm:$0xff] %v10880_v43  ;;  %v10886_v29 = vld [vmem:[%s15491_s5 + $0x290] sm:$0xff]  ;;  %v10892_v33 = vld [vmem:[%s15491_s5 + $0x380] sm:$0xff] }
 0x443   : > { %2872 = vmatpush2.msra.mxu0 %v10874_v55  ;;  %2923 = vmatpush1.msra.mxu1 %v10880_v43  ;;  %16011 = vst [vmem:[#allocation87_spill] sm:$0xff] %v10886_v29  ;;  %16012 = vst [vmem:[#allocation88_spill] sm:$0xff] %v10892_v33  ;;  %v10898_v55 = vld [vmem:[%s15491_s5 + $0x288] sm:$0xff]  ;;  %v10904_v43 = vld [vmem:[%s15491_s5 + $0x378] sm:$0xff] }
 0x444   : > { %2873 = vmatprep.subr.mxu0 %v10886_v29  ;;  %2924 = vmatprep.subr.mxu1 %v10892_v33  ;;  %16013 = vst [vmem:[#allocation89_spill] sm:$0xff] %v10898_v55  ;;  %16014 = vst [vmem:[#allocation90_spill] sm:$0xff] %v10904_v43  ;;  %v10910_v29 = vld [vmem:[%s15491_s5 + $0x278] sm:$0xff]  ;;  %v10916_v33 = vld [vmem:[%s15491_s5 + $0x368] sm:$0xff] }
 0x445   : > { %2874 = vmatpush2.msra.mxu0 %v10898_v55  ;;  %2925 = vmatpush1.msra.mxu1 %v10904_v43  ;;  %16015 = vst [vmem:[#allocation91_spill] sm:$0xff] %v10910_v29  ;;  %16016 = vst [vmem:[#allocation92_spill] sm:$0xff] %v10916_v33  ;;  %v10922_v55 = vld [vmem:[%s15491_s5 + $0x270] sm:$0xff]  ;;  %v10928_v43 = vld [vmem:[%s15491_s5 + $0x360] sm:$0xff] }
 0x446   : > { %2875 = vmatprep.subr.mxu0 %v10910_v29  ;;  %2926 = vmatprep.subr.mxu1 %v10916_v33  ;;  %16017 = vst [vmem:[#allocation93_spill] sm:$0xff] %v10922_v55  ;;  %16018 = vst [vmem:[#allocation94_spill] sm:$0xff] %v10928_v43  ;;  %v10934_v29 = vld [vmem:[%s15491_s5 + $0x260] sm:$0xff]  ;;  %v10940_v33 = vld [vmem:[%s15491_s5 + $0x350] sm:$0xff] }
 0x447   : > { %2876 = vmatpush2.msra.mxu0 %v10922_v55  ;;  %2927 = vmatpush1.msra.mxu1 %v10928_v43  ;;  %16019 = vst [vmem:[#allocation95_spill] sm:$0xff] %v10934_v29  ;;  %16020 = vst [vmem:[#allocation96_spill] sm:$0xff] %v10940_v33  ;;  %v10946_v55 = vld [vmem:[%s15491_s5 + $0x258] sm:$0xff]  ;;  %v10952_v43 = vld [vmem:[%s15491_s5 + $0x348] sm:$0xff] }
 0x448   : > { %2877 = vmatprep.subr.mxu0 %v10934_v29  ;;  %2928 = vmatprep.subr.mxu1 %v10940_v33  ;;  %16021 = vst [vmem:[#allocation97_spill] sm:$0xff] %v10946_v55  ;;  %16022 = vst [vmem:[#allocation98_spill] sm:$0xff] %v10952_v43  ;;  %v10958_v29 = vld [vmem:[%s15491_s5 + $0x248] sm:$0xff]  ;;  %v10964_v33 = vld [vmem:[%s15491_s5 + $0x338] sm:$0xff] }
 0x449   : > { %2878 = vmatpush2.msra.mxu0 %v10946_v55  ;;  %2929 = vmatpush1.msra.mxu1 %v10952_v43  ;;  %16023 = vst [vmem:[#allocation99_spill] sm:$0xff] %v10958_v29  ;;  %16024 = vst [vmem:[#allocation100_spill] sm:$0xff] %v10964_v33  ;;  %v10970_v55 = vld [vmem:[%s15491_s5 + $0x240] sm:$0xff]  ;;  %v10976_v43 = vld [vmem:[%s15491_s5 + $0x330] sm:$0xff] }
 0x44a   : > { %2879 = vmatprep.subr.mxu0 %v10958_v29  ;;  %2930 = vmatprep.subr.mxu1 %v10964_v33  ;;  %16025 = vst [vmem:[#allocation101_spill] sm:$0xff] %v10970_v55  ;;  %16026 = vst [vmem:[#allocation102_spill] sm:$0xff] %v10976_v43  ;;  %v10982_v29 = vld [vmem:[%s15491_s5 + $0x230] sm:$0xff]  ;;  %v10988_v33 = vld [vmem:[%s15491_s5 + $0x320] sm:$0xff] }
 0x44b   : > { %2880 = vmatpush2.msra.mxu0 %v10970_v55  ;;  %2931 = vmatpush1.msra.mxu1 %v10976_v43  ;;  %16027 = vst [vmem:[#allocation103_spill] sm:$0xff] %v10982_v29  ;;  %16028 = vst [vmem:[#allocation104_spill] sm:$0xff] %v10988_v33  ;;  %v10994_v55 = vld [vmem:[%s15491_s5 + $0x228] sm:$0xff]  ;;  %v11000_v43 = vld [vmem:[%s15491_s5 + $0x318] sm:$0xff] }
 0x44c   : > { %2881 = vmatprep.subr.mxu0 %v10982_v29  ;;  %2932 = vmatprep.subr.mxu1 %v10988_v33  ;;  %16029 = vst [vmem:[#allocation105_spill] sm:$0xff] %v10994_v55  ;;  %16030 = vst [vmem:[#allocation106_spill] sm:$0xff] %v11000_v43  ;;  %v11006_v29 = vld [vmem:[%s15491_s5 + $0x218] sm:$0xff]  ;;  %v11012_v33 = vld [vmem:[%s15491_s5 + $0x308] sm:$0xff] }
 0x44d   : > { %2882 = vmatpush2.msra.mxu0 %v10994_v55  ;;  %2933 = vmatpush1.msra.mxu1 %v11000_v43  ;;  %16031 = vst [vmem:[#allocation107_spill] sm:$0xff] %v11006_v29  ;;  %16032 = vst [vmem:[#allocation108_spill] sm:$0xff] %v11012_v33  ;;  %v11018_v55 = vld [vmem:[%s15491_s5 + $0x210] sm:$0xff]  ;;  %v11024_v43 = vld [vmem:[%s15491_s5 + $0x300] sm:$0xff] }
 0x44e   : > { %2883 = vmatprep.subr.mxu0 %v11006_v29  ;;  %2934 = vmatprep.subr.mxu1 %v11012_v33  ;;  %16033 = vst [vmem:[#allocation109_spill] sm:$0xff] %v11018_v55  ;;  %16034 = vst [vmem:[#allocation110_spill] sm:$0xff] %v11024_v43  ;;  %v11030_v29 = vld [vmem:[%s15491_s5 + $0x200] sm:$0xff]  ;;  %v11036_v33 = vld [vmem:[%s15491_s5 + $0x5f0] sm:$0xff] }
 0x44f   : > { %2884 = vmatpush2.msra.mxu0 %v11018_v55  ;;  %2935 = vmatpush1.msra.mxu1 %v11024_v43  ;;  %16035 = vst [vmem:[#allocation111_spill] sm:$0xff] %v11030_v29  ;;  %16036 = vst [vmem:[#allocation112_spill] sm:$0xff] %v11036_v33  ;;  %v11042_v55 = vld [vmem:[%s15491_s5 + $0x1f8] sm:$0xff]  ;;  %v11048_v43 = vld [vmem:[%s15491_s5 + $0x5e8] sm:$0xff] }
 0x450   : > { %2885 = vmatprep.subr.mxu0 %v11030_v29  ;;  %2936 = vmatprep.subr.mxu1 %v11036_v33  ;;  %16037 = vst [vmem:[#allocation113_spill] sm:$0xff] %v11042_v55  ;;  %16038 = vst [vmem:[#allocation114_spill] sm:$0xff] %v11048_v43  ;;  %v11054_v29 = vld [vmem:[%s15491_s5 + $0x1e8] sm:$0xff]  ;;  %v11060_v33 = vld [vmem:[%s15491_s5 + $0x5d8] sm:$0xff] }
 0x451   : > { %2886 = vmatpush2.msra.mxu0 %v11042_v55  ;;  %2937 = vmatpush2.msra.mxu1 %v11048_v43  ;;  %16039 = vst [vmem:[#allocation115_spill] sm:$0xff] %v11054_v29  ;;  %16040 = vst [vmem:[#allocation116_spill] sm:$0xff] %v11060_v33  ;;  %v11066_v55 = vld [vmem:[%s15491_s5 + $0x1e0] sm:$0xff]  ;;  %v11072_v43 = vld [vmem:[%s15491_s5 + $0x5d0] sm:$0xff] }
 0x452   : > { %2887 = vmatprep.subr.mxu0 %v11054_v29  ;;  %2938 = vmatprep.subr.mxu1 %v11060_v33  ;;  %16041 = vst [vmem:[#allocation117_spill] sm:$0xff] %v11066_v55  ;;  %16042 = vst [vmem:[#allocation118_spill] sm:$0xff] %v11072_v43  ;;  %v11078_v29 = vld [vmem:[%s15491_s5 + $0x1d0] sm:$0xff]  ;;  %v11084_v33 = vld [vmem:[%s15491_s5 + $0x5c0] sm:$0xff] }
 0x453   : > { %2888 = vmatpush2.msra.mxu0 %v11066_v55  ;;  %2939 = vmatpush2.msra.mxu1 %v11072_v43  ;;  %16043 = vst [vmem:[#allocation119_spill] sm:$0xff] %v11078_v29  ;;  %16044 = vst [vmem:[#allocation120_spill] sm:$0xff] %v11084_v33  ;;  %v11090_v55 = vld [vmem:[%s15491_s5 + $0x1c8] sm:$0xff]  ;;  %v11096_v43 = vld [vmem:[%s15491_s5 + $0x5b8] sm:$0xff] }
 0x454   : > { %2889 = vmatprep.subr.mxu0 %v11078_v29  ;;  %2940 = vmatprep.subr.mxu1 %v11084_v33  ;;  %16045 = vst [vmem:[#allocation121_spill] sm:$0xff] %v11090_v55  ;;  %16046 = vst [vmem:[#allocation122_spill] sm:$0xff] %v11096_v43  ;;  %v11102_v29 = vld [vmem:[%s15491_s5 + $0x1b8] sm:$0xff]  ;;  %v11108_v33 = vld [vmem:[%s15491_s5 + $0x5a8] sm:$0xff] }
 0x455   : > { %2890 = vmatpush2.msra.mxu0 %v11090_v55  ;;  %2941 = vmatpush2.msra.mxu1 %v11096_v43  ;;  %16047 = vst [vmem:[#allocation123_spill] sm:$0xff] %v11102_v29  ;;  %16048 = vst [vmem:[#allocation124_spill] sm:$0xff] %v11108_v33  ;;  %v11114_v55 = vld [vmem:[%s15491_s5 + $0x1b0] sm:$0xff]  ;;  %v11120_v43 = vld [vmem:[%s15491_s5 + $0x5a0] sm:$0xff] }
 0x456   : > { %2891 = vmatprep.subr.mxu0 %v11102_v29  ;;  %2942 = vmatprep.subr.mxu1 %v11108_v33  ;;  %16049 = vst [vmem:[#allocation125_spill] sm:$0xff] %v11114_v55  ;;  %16050 = vst [vmem:[#allocation126_spill] sm:$0xff] %v11120_v43  ;;  %v11126_v29 = vld [vmem:[%s15491_s5 + $0x1a0] sm:$0xff]  ;;  %v11132_v33 = vld [vmem:[%s15491_s5 + $0x590] sm:$0xff] }
 0x457   : > { %2892 = vmatpush2.msra.mxu0 %v11114_v55  ;;  %2943 = vmatpush2.msra.mxu1 %v11120_v43  ;;  %16051 = vst [vmem:[#allocation127_spill] sm:$0xff] %v11126_v29  ;;  %16052 = vst [vmem:[#allocation128_spill] sm:$0xff] %v11132_v33  ;;  %v11138_v55 = vld [vmem:[%s15491_s5 + $0x198] sm:$0xff]  ;;  %v11144_v43 = vld [vmem:[%s15491_s5 + $0x588] sm:$0xff] }
 0x458   : > { %2893 = vmatprep.subr.mxu0 %v11126_v29  ;;  %2944 = vmatprep.subr.mxu1 %v11132_v33  ;;  %16053 = vst [vmem:[#allocation129_spill] sm:$0xff] %v11138_v55  ;;  %16054 = vst [vmem:[#allocation130_spill] sm:$0xff] %v11144_v43  ;;  %v11150_v29 = vld [vmem:[%s15491_s5 + $0x188] sm:$0xff]  ;;  %v11156_v33 = vld [vmem:[%s15491_s5 + $0x578] sm:$0xff] }
 0x459   : > { %2894 = vmatpush2.msra.mxu0 %v11138_v55  ;;  %2945 = vmatpush2.msra.mxu1 %v11144_v43  ;;  %16055 = vst [vmem:[#allocation131_spill] sm:$0xff] %v11150_v29  ;;  %16056 = vst [vmem:[#allocation132_spill] sm:$0xff] %v11156_v33  ;;  %v11162_v55 = vld [vmem:[%s15491_s5 + $0x180] sm:$0xff]  ;;  %v11168_v43 = vld [vmem:[%s15491_s5 + $0x570] sm:$0xff] }
 0x45a   : > { %2895 = vmatprep.subr.mxu0 %v11150_v29  ;;  %2946 = vmatprep.subr.mxu1 %v11156_v33  ;;  %16057 = vst [vmem:[#allocation133_spill] sm:$0xff] %v11162_v55  ;;  %16058 = vst [vmem:[#allocation134_spill] sm:$0xff] %v11168_v43  ;;  %v11175_v33 = vld [vmem:[%s15491_s5 + $0x560] sm:$0xff]  ;;  %v16062_v29 = vunpack.i.h.bf16 %v9828_v49  ;;  %v11213_v49 = vld [vmem:[%s15491_s5 + $0x758] sm:$0xff] }
 0x45b   : > { %2896 = vmatpush2.msra.mxu0 %v11162_v55  ;;  %2947 = vmatpush2.msra.mxu1 %v11168_v43  ;;  %16059 = vst [vmem:[#allocation135_spill] sm:$0xff] %v11175_v33  ;;  %v11181_v55 = vld [vmem:[%s15491_s5 + $0x770] sm:$0xff]  ;;  %v11187_v43 = vld [vmem:[%s15491_s5 + $0x558] sm:$0xff]  ;;  %16064 = vst [vmem:[#allocation138_spill] sm:$0xff] %v11200_v60 }
 0x45c   : > { %2898 = vmatmul.mubr.f32.vlgmr.msra.gmra.mxu0 %v9860_v59  ;;  %2948 = vmatprep.subr.mxu1 %v11175_v33  ;;  %16060 = vst [vmem:[#allocation136_spill] sm:$0xff] %v11181_v55  ;;  %16061 = vst [vmem:[#allocation137_spill] sm:$0xff] %v11187_v43  ;;  %v11195_v33 = vsel %vm2813_vm0, %v16063_v50, %v16062_v29  ;;  %v11219_v29 = vld [vmem:[%s15491_s5 + $0x540] sm:$0xff]  ;;  %v11225_v50 = vld [vmem:[%s15491_s5 + $0x750] sm:$0xff] }
 0x45d   : > { %2975 = vmatprep.subr.mxu0 %v11181_v55  ;;  %2949 = vmatpush2.msra.mxu1 %v11187_v43  ;;  %v11207_v43 = vld [vmem:[%s15491_s5 + $0x548] sm:$0xff]  ;;  %16066 = vst [vmem:[#allocation140_spill] sm:$0xff] %v11213_v49  ;;  %16067 = vst [vmem:[#allocation141_spill] sm:$0xff] %v11219_v29  ;;  %v11940_v55 = vld [vmem:[%s15491_s5 + $0xb78] sm:$0xff] }
 0x45e   : > { %2976 = vmatpush1.msra.mxu0 %v11200_v60  ;;  %3039 = vmatprep.mubr.f32.mxu0 %v11195_v33  ;;  %16065 = vst [vmem:[#allocation139_spill] sm:$0xff] %v11207_v43  ;;  %16068 = vst [vmem:[#allocation142_spill] sm:$0xff] %v11225_v50  ;;  %v2225_v60 = vpop.f32.mrf.mxu1 }
 0x45f   : > { %2950 = vmatprep.subr.mxu1 %v11207_v43  ;;  %2977 = vmatprep.subr.mxu0 %v11213_v49  ;;  %v11231_v43 = vld [vmem:[%s15491_s5 + $0x530] sm:$0xff]  ;;  %v11237_v49 = vld [vmem:[%s15491_s5 + $0x740] sm:$0xff]  ;;  %16186 = vst [vmem:[#allocation260_spill] sm:$0xff] %v11940_v55 }
 0x460   : > { %2951 = vmatpush2.msra.mxu1 %v11219_v29  ;;  %2978 = vmatpush1.msra.mxu0 %v11225_v50  ;;  %16069 = vst [vmem:[#allocation143_spill] sm:$0xff] %v11231_v43  ;;  %16070 = vst [vmem:[#allocation144_spill] sm:$0xff] %v11237_v49  ;;  %v11243_v29 = vld [vmem:[%s15491_s5 + $0x528] sm:$0xff]  ;;  %v11249_v50 = vld [vmem:[%s15491_s5 + $0x738] sm:$0xff]  ;;  %v11964_v11 = vpop.f32.mrf.mxu1 }
 0x461   : > { %2952 = vmatprep.subr.mxu1 %v11231_v43  ;;  %2979 = vmatprep.subr.mxu0 %v11237_v49  ;;  %16071 = vst [vmem:[#allocation145_spill] sm:$0xff] %v11243_v29  ;;  %16072 = vst [vmem:[#allocation146_spill] sm:$0xff] %v11249_v50  ;;  %v11255_v43 = vld [vmem:[%s15491_s5 + $0x518] sm:$0xff]  ;;  %v11261_v49 = vld [vmem:[%s15491_s5 + $0x728] sm:$0xff] }
 0x462   : > { %2953 = vmatpush2.msra.mxu1 %v11243_v29  ;;  %2980 = vmatpush1.msra.mxu0 %v11249_v50  ;;  %16073 = vst [vmem:[#allocation147_spill] sm:$0xff] %v11255_v43  ;;  %16074 = vst [vmem:[#allocation148_spill] sm:$0xff] %v11261_v49  ;;  %v11267_v29 = vld [vmem:[%s15491_s5 + $0x510] sm:$0xff]  ;;  %v11273_v50 = vld [vmem:[%s15491_s5 + $0x720] sm:$0xff] }
 0x463   : > { %2954 = vmatprep.subr.mxu1 %v11255_v43  ;;  %2981 = vmatprep.subr.mxu0 %v11261_v49  ;;  %16075 = vst [vmem:[#allocation149_spill] sm:$0xff] %v11267_v29  ;;  %16076 = vst [vmem:[#allocation150_spill] sm:$0xff] %v11273_v50  ;;  %v11279_v43 = vld [vmem:[%s15491_s5 + $0x500] sm:$0xff]  ;;  %v11285_v49 = vld [vmem:[%s15491_s5 + $0x710] sm:$0xff] }
 0x464   : > { %2955 = vmatpush2.msra.mxu1 %v11267_v29  ;;  %2982 = vmatpush1.msra.mxu0 %v11273_v50  ;;  %16077 = vst [vmem:[#allocation151_spill] sm:$0xff] %v11279_v43  ;;  %16078 = vst [vmem:[#allocation152_spill] sm:$0xff] %v11285_v49  ;;  %v11291_v29 = vld [vmem:[%s15491_s5 + $0x4f8] sm:$0xff]  ;;  %v11297_v50 = vld [vmem:[%s15491_s5 + $0x708] sm:$0xff] }
 0x465   : > { %2956 = vmatprep.subr.mxu1 %v11279_v43  ;;  %2983 = vmatprep.subr.mxu0 %v11285_v49  ;;  %16079 = vst [vmem:[#allocation153_spill] sm:$0xff] %v11291_v29  ;;  %16080 = vst [vmem:[#allocation154_spill] sm:$0xff] %v11297_v50  ;;  %v11303_v43 = vld [vmem:[%s15491_s5 + $0x4e8] sm:$0xff]  ;;  %v11309_v49 = vld [vmem:[%s15491_s5 + $0x6f8] sm:$0xff] }
 0x466   : > { %2957 = vmatpush2.msra.mxu1 %v11291_v29  ;;  %2984 = vmatpush1.msra.mxu0 %v11297_v50  ;;  %16081 = vst [vmem:[#allocation155_spill] sm:$0xff] %v11303_v43  ;;  %16082 = vst [vmem:[#allocation156_spill] sm:$0xff] %v11309_v49  ;;  %v11315_v29 = vld [vmem:[%s15491_s5 + $0x4e0] sm:$0xff]  ;;  %v11321_v50 = vld [vmem:[%s15491_s5 + $0x6f0] sm:$0xff] }
 0x467   : > { %2958 = vmatprep.subr.mxu1 %v11303_v43  ;;  %2985 = vmatprep.subr.mxu0 %v11309_v49  ;;  %16083 = vst [vmem:[#allocation157_spill] sm:$0xff] %v11315_v29  ;;  %16084 = vst [vmem:[#allocation158_spill] sm:$0xff] %v11321_v50  ;;  %v11327_v43 = vld [vmem:[%s15491_s5 + $0x4d0] sm:$0xff]  ;;  %v11333_v49 = vld [vmem:[%s15491_s5 + $0x6e0] sm:$0xff] }
 0x468   : > { %2959 = vmatpush2.msra.mxu1 %v11315_v29  ;;  %2986 = vmatpush1.msra.mxu0 %v11321_v50  ;;  %16085 = vst [vmem:[#allocation159_spill] sm:$0xff] %v11327_v43  ;;  %16086 = vst [vmem:[#allocation160_spill] sm:$0xff] %v11333_v49  ;;  %v11339_v29 = vld [vmem:[%s15491_s5 + $0x4c8] sm:$0xff]  ;;  %v11345_v50 = vld [vmem:[%s15491_s5 + $0x6d8] sm:$0xff] }
 0x469   : > { %2960 = vmatprep.subr.mxu1 %v11327_v43  ;;  %2987 = vmatprep.subr.mxu0 %v11333_v49  ;;  %16087 = vst [vmem:[#allocation161_spill] sm:$0xff] %v11339_v29  ;;  %16088 = vst [vmem:[#allocation162_spill] sm:$0xff] %v11345_v50  ;;  %v11351_v43 = vld [vmem:[%s15491_s5 + $0x4b8] sm:$0xff]  ;;  %v11357_v49 = vld [vmem:[%s15491_s5 + $0x6c8] sm:$0xff] }
 0x46a   : > { %2961 = vmatpush2.msra.mxu1 %v11339_v29  ;;  %2988 = vmatpush1.msra.mxu0 %v11345_v50  ;;  %16089 = vst [vmem:[#allocation163_spill] sm:$0xff] %v11351_v43  ;;  %16090 = vst [vmem:[#allocation164_spill] sm:$0xff] %v11357_v49  ;;  %v11363_v29 = vld [vmem:[%s15491_s5 + $0x4b0] sm:$0xff]  ;;  %v11369_v50 = vld [vmem:[%s15491_s5 + $0x6c0] sm:$0xff] }
 0x46b   : > { %2962 = vmatprep.subr.mxu1 %v11351_v43  ;;  %2989 = vmatprep.subr.mxu0 %v11357_v49  ;;  %16091 = vst [vmem:[#allocation165_spill] sm:$0xff] %v11363_v29  ;;  %16092 = vst [vmem:[#allocation166_spill] sm:$0xff] %v11369_v50  ;;  %v11375_v43 = vld [vmem:[%s15491_s5 + $0x4a0] sm:$0xff]  ;;  %v11381_v49 = vld [vmem:[%s15491_s5 + $0x6b0] sm:$0xff] }
 0x46c   : > { %2963 = vmatpush2.msra.mxu1 %v11363_v29  ;;  %2990 = vmatpush1.msra.mxu0 %v11369_v50  ;;  %16093 = vst [vmem:[#allocation167_spill] sm:$0xff] %v11375_v43  ;;  %16094 = vst [vmem:[#allocation168_spill] sm:$0xff] %v11381_v49  ;;  %v11387_v29 = vld [vmem:[%s15491_s5 + $0x498] sm:$0xff]  ;;  %v11393_v50 = vld [vmem:[%s15491_s5 + $0x6a8] sm:$0xff] }
 0x46d   : > { %2964 = vmatprep.subr.mxu1 %v11375_v43  ;;  %2991 = vmatprep.subr.mxu0 %v11381_v49  ;;  %16095 = vst [vmem:[#allocation169_spill] sm:$0xff] %v11387_v29  ;;  %16096 = vst [vmem:[#allocation170_spill] sm:$0xff] %v11393_v50  ;;  %v11399_v43 = vld [vmem:[%s15491_s5 + $0x488] sm:$0xff]  ;;  %v11405_v49 = vld [vmem:[%s15491_s5 + $0x698] sm:$0xff] }
 0x46e   : > { %2965 = vmatpush2.msra.mxu1 %v11387_v29  ;;  %2992 = vmatpush1.msra.mxu0 %v11393_v50  ;;  %16097 = vst [vmem:[#allocation171_spill] sm:$0xff] %v11399_v43  ;;  %16098 = vst [vmem:[#allocation172_spill] sm:$0xff] %v11405_v49  ;;  %v11411_v29 = vld [vmem:[%s15491_s5 + $0x480] sm:$0xff]  ;;  %v11417_v50 = vld [vmem:[%s15491_s5 + $0x690] sm:$0xff] }
 0x46f   : > { %2966 = vmatprep.subr.mxu1 %v11399_v43  ;;  %2993 = vmatprep.subr.mxu0 %v11405_v49  ;;  %16099 = vst [vmem:[#allocation173_spill] sm:$0xff] %v11411_v29  ;;  %16100 = vst [vmem:[#allocation174_spill] sm:$0xff] %v11417_v50  ;;  %v11424_v49 = vld [vmem:[%s15491_s5 + $0x680] sm:$0xff]  ;;  %v11442_v43 = vsel %vm2813_vm0, %v9909_v7, %v9862_v3  ;;  %v11460_v7 = vld [vmem:[%s15491_s5 + $0xa58] sm:$0xff] }
 0x470   : > { %2967 = vmatpush2.msra.mxu1 %v11411_v29  ;;  %2994 = vmatpush1.msra.mxu0 %v11417_v50  ;;  %16101 = vst [vmem:[#allocation175_spill] sm:$0xff] %v11424_v49  ;;  %v11430_v29 = vld [vmem:[%s15491_s5 + $0xa70] sm:$0xff]  ;;  %v11436_v50 = vld [vmem:[%s15491_s5 + $0x678] sm:$0xff]  ;;  %16106 = vst [vmem:[#allocation180_spill] sm:$0xff] %v11460_v7 }
 0x471   : > { %2969 = vmatmul.mubr.f32.vlgmr.msra.gmra.mxu1 %v9896_v8  ;;  %2995 = vmatprep.subr.mxu0 %v11424_v49  ;;  %16102 = vst [vmem:[#allocation176_spill] sm:$0xff] %v11430_v29  ;;  %16103 = vst [vmem:[#allocation177_spill] sm:$0xff] %v11436_v50  ;;  %v11447_v49 = vld [vmem:[%s15491_s5 + $0xa68] sm:$0xff] }
 0x472   : > { %3046 = vmatprep.subr.mxu1 %v11430_v29  ;;  %2996 = vmatpush1.msra.mxu0 %v11436_v50  ;;  %16104 = vst [vmem:[#allocation178_spill] sm:$0xff] %v11447_v49  ;;  %v11454_v29 = vld [vmem:[%s15491_s5 + $0x668] sm:$0xff]  ;;  %v11472_v50 = vld [vmem:[%s15491_s5 + $0xa50] sm:$0xff] }
 0x473   : > { %3047 = vmatpush1.msra.mxu1 %v11447_v49  ;;  %3110 = vmatprep.mubr.f32.mxu1 %v11442_v43  ;;  %16105 = vst [vmem:[#allocation179_spill] sm:$0xff] %v11454_v29  ;;  %v11466_v49 = vld [vmem:[%s15491_s5 + $0x660] sm:$0xff]  ;;  %16108 = vst [vmem:[#allocation182_spill] sm:$0xff] %v11472_v50 }
 0x474   : > { %2997 = vmatprep.subr.mxu0 %v11454_v29  ;;  %3048 = vmatprep.subr.mxu1 %v11460_v7  ;;  %16107 = vst [vmem:[#allocation181_spill] sm:$0xff] %v11466_v49  ;;  %v11478_v29 = vld [vmem:[%s15491_s5 + $0x650] sm:$0xff]  ;;  %v11484_v7 = vld [vmem:[%s15491_s5 + $0xa40] sm:$0xff] }
 0x475   : > { %2998 = vmatpush1.msra.mxu0 %v11466_v49  ;;  %3049 = vmatpush1.msra.mxu1 %v11472_v50  ;;  %16109 = vst [vmem:[#allocation183_spill] sm:$0xff] %v11478_v29  ;;  %16110 = vst [vmem:[#allocation184_spill] sm:$0xff] %v11484_v7  ;;  %v11490_v49 = vld [vmem:[%s15491_s5 + $0x648] sm:$0xff]  ;;  %v11496_v50 = vld [vmem:[%s15491_s5 + $0xa38] sm:$0xff] }
 0x476   : > { %2999 = vmatprep.subr.mxu0 %v11478_v29  ;;  %3050 = vmatprep.subr.mxu1 %v11484_v7  ;;  %16111 = vst [vmem:[#allocation185_spill] sm:$0xff] %v11490_v49  ;;  %16112 = vst [vmem:[#allocation186_spill] sm:$0xff] %v11496_v50  ;;  %v11502_v29 = vld [vmem:[%s15491_s5 + $0x638] sm:$0xff]  ;;  %v11508_v7 = vld [vmem:[%s15491_s5 + $0xa28] sm:$0xff] }
 0x477   : > { %3000 = vmatpush1.msra.mxu0 %v11490_v49  ;;  %3051 = vmatpush1.msra.mxu1 %v11496_v50  ;;  %16113 = vst [vmem:[#allocation187_spill] sm:$0xff] %v11502_v29  ;;  %16114 = vst [vmem:[#allocation188_spill] sm:$0xff] %v11508_v7  ;;  %v11514_v49 = vld [vmem:[%s15491_s5 + $0x630] sm:$0xff]  ;;  %v11520_v50 = vld [vmem:[%s15491_s5 + $0xa20] sm:$0xff] }
 0x478   : > { %3001 = vmatprep.subr.mxu0 %v11502_v29  ;;  %3052 = vmatprep.subr.mxu1 %v11508_v7  ;;  %16115 = vst [vmem:[#allocation189_spill] sm:$0xff] %v11514_v49  ;;  %16116 = vst [vmem:[#allocation190_spill] sm:$0xff] %v11520_v50  ;;  %v11526_v29 = vld [vmem:[%s15491_s5 + $0x620] sm:$0xff]  ;;  %v11532_v7 = vld [vmem:[%s15491_s5 + $0xa10] sm:$0xff] }
 0x479   : > { %3002 = vmatpush1.msra.mxu0 %v11514_v49  ;;  %3053 = vmatpush1.msra.mxu1 %v11520_v50  ;;  %16117 = vst [vmem:[#allocation191_spill] sm:$0xff] %v11526_v29  ;;  %16118 = vst [vmem:[#allocation192_spill] sm:$0xff] %v11532_v7  ;;  %v11538_v49 = vld [vmem:[%s15491_s5 + $0x618] sm:$0xff]  ;;  %v11544_v50 = vld [vmem:[%s15491_s5 + $0xa08] sm:$0xff] }
 0x47a   : > { %3003 = vmatprep.subr.mxu0 %v11526_v29  ;;  %3054 = vmatprep.subr.mxu1 %v11532_v7  ;;  %16119 = vst [vmem:[#allocation193_spill] sm:$0xff] %v11538_v49  ;;  %16120 = vst [vmem:[#allocation194_spill] sm:$0xff] %v11544_v50  ;;  %v11550_v29 = vld [vmem:[%s15491_s5 + $0x608] sm:$0xff]  ;;  %v11556_v7 = vld [vmem:[%s15491_s5 + $0x9f8] sm:$0xff] }
 0x47b   : > { %3004 = vmatpush1.msra.mxu0 %v11538_v49  ;;  %3055 = vmatpush1.msra.mxu1 %v11544_v50  ;;  %16121 = vst [vmem:[#allocation195_spill] sm:$0xff] %v11550_v29  ;;  %16122 = vst [vmem:[#allocation196_spill] sm:$0xff] %v11556_v7  ;;  %v11562_v49 = vld [vmem:[%s15491_s5 + $0x600] sm:$0xff]  ;;  %v11568_v50 = vld [vmem:[%s15491_s5 + $0x9f0] sm:$0xff] }
 0x47c   : > { %3005 = vmatprep.subr.mxu0 %v11550_v29  ;;  %3056 = vmatprep.subr.mxu1 %v11556_v7  ;;  %16123 = vst [vmem:[#allocation197_spill] sm:$0xff] %v11562_v49  ;;  %16124 = vst [vmem:[#allocation198_spill] sm:$0xff] %v11568_v50  ;;  %v11574_v29 = vld [vmem:[%s15491_s5 + $0x8f0] sm:$0xff]  ;;  %v11580_v7 = vld [vmem:[%s15491_s5 + $0x9e0] sm:$0xff] }
 0x47d   : > { %3006 = vmatpush1.msra.mxu0 %v11562_v49  ;;  %3057 = vmatpush1.msra.mxu1 %v11568_v50  ;;  %16125 = vst [vmem:[#allocation199_spill] sm:$0xff] %v11574_v29  ;;  %16126 = vst [vmem:[#allocation200_spill] sm:$0xff] %v11580_v7  ;;  %v11586_v49 = vld [vmem:[%s15491_s5 + $0x8e8] sm:$0xff]  ;;  %v11592_v50 = vld [vmem:[%s15491_s5 + $0x9d8] sm:$0xff] }
 0x47e   : > { %3007 = vmatprep.subr.mxu0 %v11574_v29  ;;  %3058 = vmatprep.subr.mxu1 %v11580_v7  ;;  %16127 = vst [vmem:[#allocation201_spill] sm:$0xff] %v11586_v49  ;;  %16128 = vst [vmem:[#allocation202_spill] sm:$0xff] %v11592_v50  ;;  %v11598_v29 = vld [vmem:[%s15491_s5 + $0x8d8] sm:$0xff]  ;;  %v11604_v7 = vld [vmem:[%s15491_s5 + $0x9c8] sm:$0xff] }
 0x47f   : > { %3008 = vmatpush2.msra.mxu0 %v11586_v49  ;;  %3059 = vmatpush1.msra.mxu1 %v11592_v50  ;;  %16129 = vst [vmem:[#allocation203_spill] sm:$0xff] %v11598_v29  ;;  %16130 = vst [vmem:[#allocation204_spill] sm:$0xff] %v11604_v7  ;;  %v11610_v49 = vld [vmem:[%s15491_s5 + $0x8d0] sm:$0xff]  ;;  %v11616_v50 = vld [vmem:[%s15491_s5 + $0x9c0] sm:$0xff] }
 0x480   : > { %3009 = vmatprep.subr.mxu0 %v11598_v29  ;;  %3060 = vmatprep.subr.mxu1 %v11604_v7  ;;  %16131 = vst [vmem:[#allocation205_spill] sm:$0xff] %v11610_v49  ;;  %16132 = vst [vmem:[#allocation206_spill] sm:$0xff] %v11616_v50  ;;  %v11622_v29 = vld [vmem:[%s15491_s5 + $0x8c0] sm:$0xff]  ;;  %v11628_v7 = vld [vmem:[%s15491_s5 + $0x9b0] sm:$0xff] }
 0x481   : > { %3010 = vmatpush2.msra.mxu0 %v11610_v49  ;;  %3061 = vmatpush1.msra.mxu1 %v11616_v50  ;;  %16133 = vst [vmem:[#allocation207_spill] sm:$0xff] %v11622_v29  ;;  %16134 = vst [vmem:[#allocation208_spill] sm:$0xff] %v11628_v7  ;;  %v11634_v49 = vld [vmem:[%s15491_s5 + $0x8b8] sm:$0xff]  ;;  %v11640_v50 = vld [vmem:[%s15491_s5 + $0x9a8] sm:$0xff] }
 0x482   : > { %3011 = vmatprep.subr.mxu0 %v11622_v29  ;;  %3062 = vmatprep.subr.mxu1 %v11628_v7  ;;  %16135 = vst [vmem:[#allocation209_spill] sm:$0xff] %v11634_v49  ;;  %16136 = vst [vmem:[#allocation210_spill] sm:$0xff] %v11640_v50  ;;  %v11646_v29 = vld [vmem:[%s15491_s5 + $0x8a8] sm:$0xff]  ;;  %v11652_v7 = vld [vmem:[%s15491_s5 + $0x998] sm:$0xff] }
 0x483   : > { %3012 = vmatpush2.msra.mxu0 %v11634_v49  ;;  %3063 = vmatpush1.msra.mxu1 %v11640_v50  ;;  %16137 = vst [vmem:[#allocation211_spill] sm:$0xff] %v11646_v29  ;;  %16138 = vst [vmem:[#allocation212_spill] sm:$0xff] %v11652_v7  ;;  %v11658_v49 = vld [vmem:[%s15491_s5 + $0x8a0] sm:$0xff]  ;;  %v11664_v50 = vld [vmem:[%s15491_s5 + $0x990] sm:$0xff] }
 0x484   : > { %3013 = vmatprep.subr.mxu0 %v11646_v29  ;;  %3064 = vmatprep.subr.mxu1 %v11652_v7  ;;  %16139 = vst [vmem:[#allocation213_spill] sm:$0xff] %v11658_v49  ;;  %16140 = vst [vmem:[#allocation214_spill] sm:$0xff] %v11664_v50  ;;  %v11670_v29 = vld [vmem:[%s15491_s5 + $0x890] sm:$0xff]  ;;  %v11676_v7 = vld [vmem:[%s15491_s5 + $0x980] sm:$0xff] }
 0x485   : > { %3014 = vmatpush2.msra.mxu0 %v11658_v49  ;;  %3065 = vmatpush1.msra.mxu1 %v11664_v50  ;;  %16141 = vst [vmem:[#allocation215_spill] sm:$0xff] %v11670_v29  ;;  %16142 = vst [vmem:[#allocation216_spill] sm:$0xff] %v11676_v7  ;;  %v11682_v49 = vld [vmem:[%s15491_s5 + $0x888] sm:$0xff]  ;;  %v11688_v50 = vld [vmem:[%s15491_s5 + $0x978] sm:$0xff] }
 0x486   : > { %3015 = vmatprep.subr.mxu0 %v11670_v29  ;;  %3066 = vmatprep.subr.mxu1 %v11676_v7  ;;  %16143 = vst [vmem:[#allocation217_spill] sm:$0xff] %v11682_v49  ;;  %16144 = vst [vmem:[#allocation218_spill] sm:$0xff] %v11688_v50  ;;  %v11694_v29 = vld [vmem:[%s15491_s5 + $0x878] sm:$0xff]  ;;  %v11700_v7 = vld [vmem:[%s15491_s5 + $0x968] sm:$0xff] }
 0x487   : > { %3016 = vmatpush2.msra.mxu0 %v11682_v49  ;;  %3067 = vmatpush1.msra.mxu1 %v11688_v50  ;;  %16145 = vst [vmem:[#allocation219_spill] sm:$0xff] %v11694_v29  ;;  %16146 = vst [vmem:[#allocation220_spill] sm:$0xff] %v11700_v7  ;;  %v11706_v49 = vld [vmem:[%s15491_s5 + $0x870] sm:$0xff]  ;;  %v11712_v50 = vld [vmem:[%s15491_s5 + $0x960] sm:$0xff] }
 0x488   : > { %3017 = vmatprep.subr.mxu0 %v11694_v29  ;;  %3068 = vmatprep.subr.mxu1 %v11700_v7  ;;  %16147 = vst [vmem:[#allocation221_spill] sm:$0xff] %v11706_v49  ;;  %16148 = vst [vmem:[#allocation222_spill] sm:$0xff] %v11712_v50  ;;  %v11718_v29 = vld [vmem:[%s15491_s5 + $0x860] sm:$0xff]  ;;  %v11724_v7 = vld [vmem:[%s15491_s5 + $0x950] sm:$0xff] }
 0x489   : > { %3018 = vmatpush2.msra.mxu0 %v11706_v49  ;;  %3069 = vmatpush1.msra.mxu1 %v11712_v50  ;;  %16149 = vst [vmem:[#allocation223_spill] sm:$0xff] %v11718_v29  ;;  %16150 = vst [vmem:[#allocation224_spill] sm:$0xff] %v11724_v7  ;;  %v11730_v49 = vld [vmem:[%s15491_s5 + $0x858] sm:$0xff]  ;;  %v11736_v50 = vld [vmem:[%s15491_s5 + $0x948] sm:$0xff] }
 0x48a   : > { %3019 = vmatprep.subr.mxu0 %v11718_v29  ;;  %3070 = vmatprep.subr.mxu1 %v11724_v7  ;;  %16151 = vst [vmem:[#allocation225_spill] sm:$0xff] %v11730_v49  ;;  %16152 = vst [vmem:[#allocation226_spill] sm:$0xff] %v11736_v50  ;;  %v11742_v29 = vld [vmem:[%s15491_s5 + $0x848] sm:$0xff]  ;;  %v11748_v7 = vld [vmem:[%s15491_s5 + $0x938] sm:$0xff] }
 0x48b   : > { %3020 = vmatpush2.msra.mxu0 %v11730_v49  ;;  %3071 = vmatpush1.msra.mxu1 %v11736_v50  ;;  %16153 = vst [vmem:[#allocation227_spill] sm:$0xff] %v11742_v29  ;;  %16154 = vst [vmem:[#allocation228_spill] sm:$0xff] %v11748_v7  ;;  %v11754_v49 = vld [vmem:[%s15491_s5 + $0x840] sm:$0xff]  ;;  %v11760_v50 = vld [vmem:[%s15491_s5 + $0x930] sm:$0xff] }
 0x48c   : > { %3021 = vmatprep.subr.mxu0 %v11742_v29  ;;  %3072 = vmatprep.subr.mxu1 %v11748_v7  ;;  %16155 = vst [vmem:[#allocation229_spill] sm:$0xff] %v11754_v49  ;;  %16156 = vst [vmem:[#allocation230_spill] sm:$0xff] %v11760_v50  ;;  %v11766_v29 = vld [vmem:[%s15491_s5 + $0x830] sm:$0xff]  ;;  %v11772_v7 = vld [vmem:[%s15491_s5 + $0x920] sm:$0xff] }
 0x48d   : > { %3022 = vmatpush2.msra.mxu0 %v11754_v49  ;;  %3073 = vmatpush1.msra.mxu1 %v11760_v50  ;;  %16157 = vst [vmem:[#allocation231_spill] sm:$0xff] %v11766_v29  ;;  %16158 = vst [vmem:[#allocation232_spill] sm:$0xff] %v11772_v7  ;;  %v11778_v49 = vld [vmem:[%s15491_s5 + $0x828] sm:$0xff]  ;;  %v11784_v50 = vld [vmem:[%s15491_s5 + $0x918] sm:$0xff] }
 0x48e   : > { %3023 = vmatprep.subr.mxu0 %v11766_v29  ;;  %3074 = vmatprep.subr.mxu1 %v11772_v7  ;;  %16159 = vst [vmem:[#allocation233_spill] sm:$0xff] %v11778_v49  ;;  %16160 = vst [vmem:[#allocation234_spill] sm:$0xff] %v11784_v50  ;;  %v11790_v29 = vld [vmem:[%s15491_s5 + $0x818] sm:$0xff]  ;;  %v11796_v7 = vld [vmem:[%s15491_s5 + $0x908] sm:$0xff] }
 0x48f   : > { %3024 = vmatpush2.msra.mxu0 %v11778_v49  ;;  %3075 = vmatpush1.msra.mxu1 %v11784_v50  ;;  %16161 = vst [vmem:[#allocation235_spill] sm:$0xff] %v11790_v29  ;;  %16162 = vst [vmem:[#allocation236_spill] sm:$0xff] %v11796_v7  ;;  %v11802_v49 = vld [vmem:[%s15491_s5 + $0x810] sm:$0xff]  ;;  %v11808_v50 = vld [vmem:[%s15491_s5 + $0x900] sm:$0xff] }
 0x490   : > { %3025 = vmatprep.subr.mxu0 %v11790_v29  ;;  %3076 = vmatprep.subr.mxu1 %v11796_v7  ;;  %16163 = vst [vmem:[#allocation237_spill] sm:$0xff] %v11802_v49  ;;  %16164 = vst [vmem:[#allocation238_spill] sm:$0xff] %v11808_v50  ;;  %v11814_v29 = vld [vmem:[%s15491_s5 + $0x800] sm:$0xff]  ;;  %v11820_v7 = vld [vmem:[%s15491_s5 + $0xbf0] sm:$0xff] }
 0x491   : > { %3026 = vmatpush2.msra.mxu0 %v11802_v49  ;;  %3077 = vmatpush1.msra.mxu1 %v11808_v50  ;;  %16165 = vst [vmem:[#allocation239_spill] sm:$0xff] %v11814_v29  ;;  %16166 = vst [vmem:[#allocation240_spill] sm:$0xff] %v11820_v7  ;;  %v11826_v49 = vld [vmem:[%s15491_s5 + $0x7f8] sm:$0xff]  ;;  %v11832_v50 = vld [vmem:[%s15491_s5 + $0xbe8] sm:$0xff] }
 0x492   : > { %3027 = vmatprep.subr.mxu0 %v11814_v29  ;;  %3078 = vmatprep.subr.mxu1 %v11820_v7  ;;  %16167 = vst [vmem:[#allocation241_spill] sm:$0xff] %v11826_v49  ;;  %16168 = vst [vmem:[#allocation242_spill] sm:$0xff] %v11832_v50  ;;  %v11838_v29 = vld [vmem:[%s15491_s5 + $0x7e8] sm:$0xff]  ;;  %v11844_v7 = vld [vmem:[%s15491_s5 + $0xbd8] sm:$0xff] }
 0x493   : > { %3028 = vmatpush2.msra.mxu0 %v11826_v49  ;;  %3079 = vmatpush2.msra.mxu1 %v11832_v50  ;;  %16169 = vst [vmem:[#allocation243_spill] sm:$0xff] %v11838_v29  ;;  %16170 = vst [vmem:[#allocation244_spill] sm:$0xff] %v11844_v7  ;;  %v11850_v49 = vld [vmem:[%s15491_s5 + $0x7e0] sm:$0xff]  ;;  %v11856_v50 = vld [vmem:[%s15491_s5 + $0xbd0] sm:$0xff] }
 0x494   : > { %3029 = vmatprep.subr.mxu0 %v11838_v29  ;;  %3080 = vmatprep.subr.mxu1 %v11844_v7  ;;  %16171 = vst [vmem:[#allocation245_spill] sm:$0xff] %v11850_v49  ;;  %16172 = vst [vmem:[#allocation246_spill] sm:$0xff] %v11856_v50  ;;  %v11862_v29 = vld [vmem:[%s15491_s5 + $0x7d0] sm:$0xff]  ;;  %v11868_v7 = vld [vmem:[%s15491_s5 + $0xbc0] sm:$0xff] }
 0x495   : > { %3030 = vmatpush2.msra.mxu0 %v11850_v49  ;;  %3081 = vmatpush2.msra.mxu1 %v11856_v50  ;;  %16173 = vst [vmem:[#allocation247_spill] sm:$0xff] %v11862_v29  ;;  %16174 = vst [vmem:[#allocation248_spill] sm:$0xff] %v11868_v7  ;;  %v11874_v49 = vld [vmem:[%s15491_s5 + $0x7c8] sm:$0xff]  ;;  %v11880_v50 = vld [vmem:[%s15491_s5 + $0xbb8] sm:$0xff]  ;;  %v2367_v46 = vpop.f32.mrf.mxu1 }
 0x496   : > { %3031 = vmatprep.subr.mxu0 %v11862_v29  ;;  %3082 = vmatprep.subr.mxu1 %v11868_v7  ;;  %16175 = vst [vmem:[#allocation249_spill] sm:$0xff] %v11874_v49  ;;  %16176 = vst [vmem:[#allocation250_spill] sm:$0xff] %v11880_v50  ;;  %v11886_v29 = vld [vmem:[%s15491_s5 + $0x7b8] sm:$0xff]  ;;  %v11892_v7 = vld [vmem:[%s15491_s5 + $0xba8] sm:$0xff] }
 0x497   : > { %3032 = vmatpush2.msra.mxu0 %v11874_v49  ;;  %3083 = vmatpush2.msra.mxu1 %v11880_v50  ;;  %16177 = vst [vmem:[#allocation251_spill] sm:$0xff] %v11886_v29  ;;  %16178 = vst [vmem:[#allocation252_spill] sm:$0xff] %v11892_v7  ;;  %v11898_v49 = vld [vmem:[%s15491_s5 + $0x7b0] sm:$0xff]  ;;  %v11904_v50 = vld [vmem:[%s15491_s5 + $0xba0] sm:$0xff] }
 0x498   : > { %3033 = vmatprep.subr.mxu0 %v11886_v29  ;;  %3084 = vmatprep.subr.mxu1 %v11892_v7  ;;  %16179 = vst [vmem:[#allocation253_spill] sm:$0xff] %v11898_v49  ;;  %16180 = vst [vmem:[#allocation254_spill] sm:$0xff] %v11904_v50  ;;  %v11910_v29 = vld [vmem:[%s15491_s5 + $0x7a0] sm:$0xff]  ;;  %v11916_v7 = vld [vmem:[%s15491_s5 + $0xb90] sm:$0xff] }
 0x499   : > { %3034 = vmatpush2.msra.mxu0 %v11898_v49  ;;  %3085 = vmatpush2.msra.mxu1 %v11904_v50  ;;  %16181 = vst [vmem:[#allocation255_spill] sm:$0xff] %v11910_v29  ;;  %16182 = vst [vmem:[#allocation256_spill] sm:$0xff] %v11916_v7  ;;  %v2154_v49 = vpop.f32.mrf.mxu0  ;;  %v11922_v50 = vld [vmem:[%s15491_s5 + $0x798] sm:$0xff] }
 0x49a   : > { %3035 = vmatprep.subr.mxu0 %v11910_v29  ;;  %3086 = vmatprep.subr.mxu1 %v11916_v7  ;;  %16183 = vst [vmem:[#allocation257_spill] sm:$0xff] %v11922_v50  ;;  %v11928_v29 = vld [vmem:[%s15491_s5 + $0xb88] sm:$0xff]  ;;  %v2226_v9 = vadd.f32 %v2225_v60, %v2154_v49 }
 0x49b   : > { %3036 = vmatpush2.msra.mxu0 %v11922_v50  ;;  %16184 = vst [vmem:[#allocation258_spill] sm:$0xff] %v11928_v29  ;;  %3087 = vmatpush2.msra.mxu1 %v11928_v29  ;;  %v11934_v7 = vld [vmem:[%s15491_s5 + $0x788] sm:$0xff]  ;;  %v11946_v50 = vld [vmem:[%s15491_s5 + $0x780] sm:$0xff]  ;;  %v11952_v29 = vld [vmem:[%s15491_s5 + $0xb70] sm:$0xff] }
 0x49c   : > { %16185 = vst [vmem:[#allocation259_spill] sm:$0xff] %v11934_v7  ;;  %3037 = vmatprep.subr.mxu0 %v11934_v7  ;;  %3088 = vmatprep.subr.mxu1 %v11940_v55  ;;  %16187 = vst [vmem:[#allocation261_spill] sm:$0xff] %v11946_v50  ;;  %v11959_v55 = vld [vmem:[%s15491_s5 + $0xb60] sm:$0xff]  ;;  %v11962_v7 = vpop.f32.mrf.mxu0  ;;  %v12023_v60 = vld [vmem:[%s15491_s5 + $0xb28] sm:$0xff] }
 0x49d   : > { %3038 = vmatpush2.msra.mxu0 %v11946_v50  ;;  %16188 = vst [vmem:[#allocation262_spill] sm:$0xff] %v11952_v29  ;;  %3089 = vmatpush2.msra.mxu1 %v11952_v29  ;;  %16189 = vst [vmem:[#allocation263_spill] sm:$0xff] %v11959_v55  ;;  %v11969_v50 = vld [vmem:[%s15491_s5 + $0xc68] sm:$0xff]  ;;  %v11975_v29 = vld [vmem:[%s15491_s5 + $0xb58] sm:$0xff] }
 0x49e   : > { %3040 = vmatmul.mubr.f32.vlgmr.msra.gmra.mxu0 %v9903_v0  ;;  %3090 = vmatprep.subr.mxu1 %v11959_v55  ;;  %16190 = vst [vmem:[#allocation264_spill] sm:$0xff] %v11969_v50  ;;  %16191 = vst [vmem:[#allocation265_spill] sm:$0xff] %v11975_v29  ;;  %v11981_v55 = vld [vmem:[%s15491_s5 + $0xc60] sm:$0xff]  ;;  %v11987_v0 = vld [vmem:[%s15491_s5 + $0xb48] sm:$0xff] }
 0x49f   : > { %3139 = vmatprep.subr.mxu0 %v11969_v50  ;;  %3091 = vmatpush2.msra.mxu1 %v11975_v29  ;;  %16192 = vst [vmem:[#allocation266_spill] sm:$0xff] %v11981_v55  ;;  %16193 = vst [vmem:[#allocation267_spill] sm:$0xff] %v11987_v0  ;;  %v2296_v50 = vpop.f32.mrf.mxu0  ;;  %v11993_v29 = vld [vmem:[%s15491_s5 + $0xc50] sm:$0xff] }
 0x4a0   : > { %3140 = vmatpush1.msra.mxu0 %v11981_v55  ;;  %3092 = vmatprep.subr.mxu1 %v11987_v0  ;;  %16194 = vst [vmem:[#allocation268_spill] sm:$0xff] %v11993_v29  ;;  %v11999_v55 = vld [vmem:[%s15491_s5 + $0xb40] sm:$0xff]  ;;  %v12005_v0 = vld [vmem:[%s15491_s5 + $0xc48] sm:$0xff]  ;;  %16199 = vst [vmem:[#allocation273_spill] sm:$0xff] %v12023_v60  ;;  %v2297_v49 = vadd.f32 %v2296_v50, %v2226_v9 }
 0x4a1   : > { %3141 = vmatprep.subr.mxu0 %v11993_v29  ;;  %16195 = vst [vmem:[#allocation269_spill] sm:$0xff] %v11999_v55  ;;  %3093 = vmatpush2.msra.mxu1 %v11999_v55  ;;  %16196 = vst [vmem:[#allocation270_spill] sm:$0xff] %v12005_v0  ;;  %v12017_v29 = vld [vmem:[%s15491_s5 + $0xc38] sm:$0xff]  ;;  %v12043_v9 = vld [vmem:[%s15491_s5 + $0xc20] sm:$0xff] }
 0x4a2   : > { %3142 = vmatpush1.msra.mxu0 %v12005_v0  ;;  %3094 = vmatprep.subr.mxu1 %v12011_v1  ;;  %16198 = vst [vmem:[#allocation272_spill] sm:$0xff] %v12017_v29  ;;  %v12029_v0 = vld [vmem:[%s15491_s5 + $0xc30] sm:$0xff]  ;;  %v12035_v1 = vld [vmem:[%s15491_s5 + $0xb18] sm:$0xff]  ;;  %16202 = vst [vmem:[#allocation276_spill] sm:$0xff] %v12043_v9 }
 0x4a3   : > { %3143 = vmatprep.subr.mxu0 %v12017_v29  ;;  %3095 = vmatpush2.msra.mxu1 %v12023_v60  ;;  %16200 = vst [vmem:[#allocation274_spill] sm:$0xff] %v12029_v0  ;;  %16201 = vst [vmem:[#allocation275_spill] sm:$0xff] %v12035_v1  ;;  %v12038_v29 = vpop.f32.mrf.mxu1  ;;  %v12049_v50 = vld [vmem:[%s15491_s5 + $0xb10] sm:$0xff]  ;;  %v12079_v60 = vsel %vm2813_vm0, %v9862_v3, %v9944_v14  ;;  %v12084_v55 = vld [vmem:[%s15491_s5 + $0xc00] sm:$0xff] }
 0x4a4   : > { %3144 = vmatpush1.msra.mxu0 %v12029_v0  ;;  %3096 = vmatprep.subr.mxu1 %v12035_v1  ;;  %16203 = vst [vmem:[#allocation277_spill] sm:$0xff] %v12049_v50  ;;  %v12055_v1 = vld [vmem:[%s15491_s5 + $0xc18] sm:$0xff]  ;;  %v12061_v0 = vld [vmem:[%s15491_s5 + $0xb00] sm:$0xff] }
 0x4a5   : > { %3145 = vmatprep.subr.mxu0 %v12043_v9  ;;  %3097 = vmatpush2.msra.mxu1 %v12049_v50  ;;  %16204 = vst [vmem:[#allocation278_spill] sm:$0xff] %v12055_v1  ;;  %16205 = vst [vmem:[#allocation279_spill] sm:$0xff] %v12061_v0  ;;  %v12067_v9 = vld [vmem:[%s15491_s5 + $0xc08] sm:$0xff]  ;;  %v12073_v50 = vld [vmem:[%s15491_s5 + $0xaf8] sm:$0xff] }
 0x4a6   : > { %3146 = vmatpush1.msra.mxu0 %v12055_v1  ;;  %3098 = vmatprep.subr.mxu1 %v12061_v0  ;;  %16206 = vst [vmem:[#allocation280_spill] sm:$0xff] %v12073_v50  ;;  %v2438_v1 = vpop.f32.mrf.mxu1  ;;  %v2368_v0 = vadd.f32 %v2367_v46, %v2297_v49  ;;  %v12101_v14 = vld [vmem:[%s15491_s5 + $0x5f8] sm:$0xff]  ;;  %v12107_v46 = vld [vmem:[%s15491_s5 + $0xae0] sm:$0xff] }
 0x4a7   : > { %3147 = vmatprep.subr.mxu0 %v12067_v9  ;;  %3099 = vmatpush2.msra.mxu1 %v12073_v50  ;;  %v12091_v50 = vld [vmem:[%s15491_s5 + $0xae8] sm:$0xff]  ;;  %v12113_v49 = vld [vmem:[%s15491_s5 + $0x478] sm:$0xff] }
 0x4a8   : > { %3148 = vmatpush1.msra.mxu0 %v12084_v55  ;;  %3181 = vmatprep.mubr.f32.mxu0 %v15924_v42  ;;  %v12096_v3 = vadd.f32 %v2438_v1, %v2368_v0  ;;  %16208 = vst [vmem:[#allocation282_spill] sm:$0xff] %v12113_v49  ;;  %v12120_v0 = vld [vmem:[%s15491_s5 + $0xad0] sm:$0xff]  ;;  %v12126_v1 = vld [vmem:[%s15491_s5 + $0x5e0] sm:$0xff] }
 0x4a9   : > { %3100 = vmatprep.subr.mxu1 %v12091_v50  ;;  %6181 = vmatmul.mubr.msk.f32.vlgmr.msra.gmra.mxu0 %vm2085_vm1, %v12079_v60  ;;  %16209 = vst [vmem:[#allocation283_spill] sm:$0xff] %v12120_v0  ;;  %16210 = vst [vmem:[#allocation284_spill] sm:$0xff] %v12126_v1 }
 0x4aa   : > { %16207 = vst [vmem:[#allocation281_spill] sm:$0xff] %v12096_v3  ;;  %6377 = vmatprep.subr.mxu0 %v12101_v14  ;;  %3101 = vmatpush2.msra.mxu1 %v12107_v46 }
 0x4ab   : > { %6378 = vmatpush3.msra.mxu0 %v12113_v49  ;;  %3322 = vmatprep.mubr.f32.mxu0 %v10658_v51  ;;  %v12132_v49 = vld [vmem:[%s15491_s5 + $0xac8] sm:$0xff]  ;;  %v12138_v51 = vld [vmem:[%s15491_s5 + $0x460] sm:$0xff] }
 0x4ac   : > { %3102 = vmatprep.subr.mxu1 %v12120_v0  ;;  %6379 = vmatprep.subr.mxu0 %v12126_v1  ;;  %16211 = vst [vmem:[#allocation285_spill] sm:$0xff] %v12132_v49  ;;  %16212 = vst [vmem:[#allocation286_spill] sm:$0xff] %v12138_v51  ;;  %v12148_v1 = vld [vmem:[%s15491_s5 + $0xab8] sm:$0xff]  ;;  %v12166_v0 = vld [vmem:[%s15491_s5 + $0x448] sm:$0xff] }
 0x4ad   : > { %3103 = vmatpush2.msra.mxu1 %v12132_v49  ;;  %6380 = vmatpush3.msra.mxu0 %v12138_v51  ;;  %16213 = vst [vmem:[#allocation287_spill] sm:$0xff] %v12148_v1  ;;  %v12154_v49 = vld [vmem:[%s15491_s5 + $0x5c8] sm:$0xff]  ;;  %v12160_v51 = vld [vmem:[%s15491_s5 + $0xab0] sm:$0xff]  ;;  %16216 = vst [vmem:[#allocation290_spill] sm:$0xff] %v12166_v0 }
 0x4ae   : > { %5400 = vrot.lane.b32.xlu0 %v12096_v3, %s7711_s23  ;;  %5120 = vrot.lane.b32.xlu1 %v12096_v3, %s7718_s30  ;;  %16214 = vst [vmem:[#allocation288_spill] sm:$0xff] %v12154_v49  ;;  %16215 = vst [vmem:[#allocation289_spill] sm:$0xff] %v12160_v51 }
 0x4af   : > { %3104 = vmatprep.subr.mxu1 %v12148_v1  ;;  %6381 = vmatprep.subr.mxu0 %v12154_v49  ;;  %v12172_v1 = vld [vmem:[%s15491_s5 + $0xaa0] sm:$0xff]  ;;  %v12178_v49 = vld [vmem:[%s15491_s5 + $0x5b0] sm:$0xff] }
 0x4b0   : > { %3105 = vmatpush2.msra.mxu1 %v12160_v51  ;;  %6382 = vmatpush3.msra.mxu0 %v12166_v0  ;;  %16217 = vst [vmem:[#allocation291_spill] sm:$0xff] %v12172_v1  ;;  %16218 = vst [vmem:[#allocation292_spill] sm:$0xff] %v12178_v49  ;;  %v12184_v51 = vld [vmem:[%s15491_s5 + $0xa98] sm:$0xff]  ;;  %v12190_v0 = vld [vmem:[%s15491_s5 + $0x430] sm:$0xff] }
 0x4b1   : > { %3106 = vmatprep.subr.mxu1 %v12172_v1  ;;  %6383 = vmatprep.subr.mxu0 %v12178_v49  ;;  %16219 = vst [vmem:[#allocation293_spill] sm:$0xff] %v12184_v51  ;;  %16220 = vst [vmem:[#allocation294_spill] sm:$0xff] %v12190_v0  ;;  %v12198_v49 = vld [vmem:[%s15491_s5 + $0xa88] sm:$0xff]  ;;  %v12216_v1 = vld [vmem:[%s15491_s5 + $0x418] sm:$0xff] }
 0x4b2   : > { %3107 = vmatpush2.msra.mxu1 %v12184_v51  ;;  %6384 = vmatpush3.msra.mxu0 %v12190_v0  ;;  %16221 = vst [vmem:[#allocation295_spill] sm:$0xff] %v12198_v49  ;;  %v12204_v51 = vld [vmem:[%s15491_s5 + $0x598] sm:$0xff]  ;;  %v12210_v0 = vld [vmem:[%s15491_s5 + $0xa80] sm:$0xff]  ;;  %16224 = vst [vmem:[#allocation298_spill] sm:$0xff] %v12216_v1 }
 0x4b3   : > { %5080 = vrot.lane.b32.xlu1 %v12096_v3, %s7719_s11  ;;  %3108 = vmatprep.subr.mxu1 %v12198_v49  ;;  %16222 = vst [vmem:[#allocation296_spill] sm:$0xff] %v12204_v51  ;;  %16223 = vst [vmem:[#allocation297_spill] sm:$0xff] %v12210_v0  ;;  %v12318_v49 = vld [vmem:[%s15491_s5 + $0x3b8] sm:$0xff] }
 0x4b4   : > { %6385 = vmatprep.subr.mxu0 %v12204_v51  ;;  %3109 = vmatpush2.msra.mxu1 %v12210_v0  ;;  %v12223_v51 = vld [vmem:[%s15491_s5 + $0x2f8] sm:$0xff]  ;;  %v12229_v0 = vld [vmem:[%s15491_s5 + $0x580] sm:$0xff]  ;;  %16240 = vst [vmem:[#allocation314_spill] sm:$0xff] %v12318_v49 }
 0x4b5   : > { %6386 = vmatpush3.msra.mxu0 %v12216_v1  ;;  %3111 = vmatmul.mubr.f32.vlgmr.msra.gmra.mxu1 %v9927_v54  ;;  %16225 = vst [vmem:[#allocation299_spill] sm:$0xff] %v12223_v51  ;;  %16226 = vst [vmem:[#allocation300_spill] sm:$0xff] %v12229_v0  ;;  %v12235_v1 = vld [vmem:[%s15491_s5 + $0x178] sm:$0xff] }
 0x4b6   : > { %6342 = vmatprep.subr.mxu1 %v12223_v51  ;;  %6387 = vmatprep.subr.mxu0 %v12229_v0  ;;  %16227 = vst [vmem:[#allocation301_spill] sm:$0xff] %v12235_v1  ;;  %v12242_v51 = vld [vmem:[%s15491_s5 + $0x400] sm:$0xff] }
 0x4b7   : > { %6343 = vmatpush3.msra.mxu1 %v12235_v1  ;;  %3252 = vmatprep.mubr.f32.mxu1 %v10435_v5  ;;  %16228 = vst [vmem:[#allocation302_spill] sm:$0xff] %v12242_v51  ;;  %v12250_v0 = vld [vmem:[%s15491_s5 + $0x2e0] sm:$0xff]  ;;  %v12256_v5 = vld [vmem:[%s15491_s5 + $0x568] sm:$0xff] }
 0x4b8   : > { %6388 = vmatpush3.msra.mxu0 %v12242_v51  ;;  %5040 = vrot.lane.b32.xlu1 %v12096_v3, %s7720_s12  ;;  %16229 = vst [vmem:[#allocation303_spill] sm:$0xff] %v12250_v0  ;;  %16230 = vst [vmem:[#allocation304_spill] sm:$0xff] %v12256_v5  ;;  %v12262_v51 = vld [vmem:[%s15491_s5 + $0x160] sm:$0xff]  ;;  %v12268_v1 = vld [vmem:[%s15491_s5 + $0x3e8] sm:$0xff] }
 0x4b9   : > { %6344 = vmatprep.subr.mxu1 %v12250_v0  ;;  %6389 = vmatprep.subr.mxu0 %v12256_v5  ;;  %16231 = vst [vmem:[#allocation305_spill] sm:$0xff] %v12262_v51  ;;  %16232 = vst [vmem:[#allocation306_spill] sm:$0xff] %v12268_v1  ;;  %v12274_v0 = vld [vmem:[%s15491_s5 + $0x2c8] sm:$0xff]  ;;  %v12280_v5 = vld [vmem:[%s15491_s5 + $0x550] sm:$0xff] }
 0x4ba   : > { %6345 = vmatpush3.msra.mxu1 %v12262_v51  ;;  %6390 = vmatpush3.msra.mxu0 %v12268_v1  ;;  %16233 = vst [vmem:[#allocation307_spill] sm:$0xff] %v12274_v0  ;;  %16234 = vst [vmem:[#allocation308_spill] sm:$0xff] %v12280_v5  ;;  %v12286_v51 = vld [vmem:[%s15491_s5 + $0x148] sm:$0xff]  ;;  %v12292_v1 = vld [vmem:[%s15491_s5 + $0x3d0] sm:$0xff] }
 0x4bb   : > { %6346 = vmatprep.subr.mxu1 %v12274_v0  ;;  %6391 = vmatprep.subr.mxu0 %v12280_v5  ;;  %16235 = vst [vmem:[#allocation309_spill] sm:$0xff] %v12286_v51  ;;  %16236 = vst [vmem:[#allocation310_spill] sm:$0xff] %v12292_v1  ;;  %v12300_v5 = vld [vmem:[%s15491_s5 + $0x2b0] sm:$0xff]  ;;  %v2298_v0 = vpop.f32.mrf.mxu0 }
 0x4bc   : > { %6347 = vmatpush3.msra.mxu1 %v12286_v51  ;;  %6392 = vmatpush3.msra.mxu0 %v12292_v1  ;;  %16237 = vst [vmem:[#allocation311_spill] sm:$0xff] %v12300_v5  ;;  %v12306_v51 = vld [vmem:[%s15491_s5 + $0x538] sm:$0xff]  ;;  %v12312_v1 = vld [vmem:[%s15491_s5 + $0x130] sm:$0xff] }
 0x4bd   : > { %5280 = vrot.lane.b32.xlu1 %v12096_v3, %s7714_s26  ;;  %6348 = vmatprep.subr.mxu1 %v12300_v5  ;;  %16238 = vst [vmem:[#allocation312_spill] sm:$0xff] %v12306_v51  ;;  %16239 = vst [vmem:[#allocation313_spill] sm:$0xff] %v12312_v1  ;;  %v12324_v5 = vld [vmem:[%s15491_s5 + $0x298] sm:$0xff] }
 0x4be   : > { %6393 = vmatprep.subr.mxu0 %v12306_v51  ;;  %6349 = vmatpush3.msra.mxu1 %v12312_v1  ;;  %16241 = vst [vmem:[#allocation315_spill] sm:$0xff] %v12324_v5  ;;  %v2228_v51 = vadd.f32 %v11964_v11, %v11962_v7  ;;  %v12332_v1 = vld [vmem:[%s15491_s5 + $0x520] sm:$0xff] }
 0x4bf   : > { %6394 = vmatpush3.msra.mxu0 %v12318_v49  ;;  %6350 = vmatprep.subr.mxu1 %v12324_v5  ;;  %v12338_v49 = vld [vmem:[%s15491_s5 + $0x118] sm:$0xff]  ;;  %v12344_v5 = vld [vmem:[%s15491_s5 + $0x3a0] sm:$0xff] }
 0x4c0   : > { %6395 = vmatprep.subr.mxu0 %v12332_v1  ;;  %16242 = vst [vmem:[#allocation316_spill] sm:$0xff] %v12338_v49  ;;  %6351 = vmatpush3.msra.mxu1 %v12338_v49  ;;  %16243 = vst [vmem:[#allocation317_spill] sm:$0xff] %v12344_v5  ;;  %v2299_v11 = vadd.f32 %v2298_v0, %v2228_v51  ;;  %v12352_v7 = vld [vmem:[%s15491_s5 + $0x280] sm:$0xff]  ;;  %v12358_v49 = vld [vmem:[%s15491_s5 + $0x508] sm:$0xff] }
 0x4c1   : > { %6396 = vmatpush3.msra.mxu0 %v12344_v5  ;;  %5240 = vrot.lane.b32.xlu1 %v12096_v3, %s7715_s27  ;;  %16244 = vst [vmem:[#allocation318_spill] sm:$0xff] %v12352_v7  ;;  %16245 = vst [vmem:[#allocation319_spill] sm:$0xff] %v12358_v49  ;;  %v12364_v5 = vld [vmem:[%s15491_s5 + $0x100] sm:$0xff]  ;;  %v12370_v0 = vld [vmem:[%s15491_s5 + $0x388] sm:$0xff] }
 0x4c2   : > { %6352 = vmatprep.subr.mxu1 %v12352_v7  ;;  %6397 = vmatprep.subr.mxu0 %v12358_v49  ;;  %16246 = vst [vmem:[#allocation320_spill] sm:$0xff] %v12364_v5  ;;  %16247 = vst [vmem:[#allocation321_spill] sm:$0xff] %v12370_v0  ;;  %v12376_v51 = vld [vmem:[%s15491_s5 + $0x268] sm:$0xff]  ;;  %v12382_v49 = vld [vmem:[%s15491_s5 + $0x4f0] sm:$0xff] }
 0x4c3   : > { %6353 = vmatpush3.msra.mxu1 %v12364_v5  ;;  %6398 = vmatpush3.msra.mxu0 %v12370_v0  ;;  %16248 = vst [vmem:[#allocation322_spill] sm:$0xff] %v12376_v51  ;;  %16249 = vst [vmem:[#allocation323_spill] sm:$0xff] %v12382_v49  ;;  %v2440_v5 = vpop.f32.mrf.mxu1  ;;  %v12388_v7 = vld [vmem:[%s15491_s5 + $0xe8] sm:$0xff]  ;;  %v12394_v0 = vld [vmem:[%s15491_s5 + $0x370] sm:$0xff] }
 0x4c4   : > { %6354 = vmatprep.subr.mxu1 %v12376_v51  ;;  %6399 = vmatprep.subr.mxu0 %v12382_v49  ;;  %16250 = vst [vmem:[#allocation324_spill] sm:$0xff] %v12388_v7  ;;  %v2370_v51 = vadd.f32 %v12038_v29, %v2299_v11  ;;  %v12403_v49 = vld [vmem:[%s15491_s5 + $0x250] sm:$0xff] }
 0x4c5   : > { %6355 = vmatpush3.msra.mxu1 %v12388_v7  ;;  %6400 = vmatpush3.msra.mxu0 %v12394_v0  ;;  %v12409_v7 = vld [vmem:[%s15491_s5 + $0x4d8] sm:$0xff]  ;;  %v12415_v29 = vld [vmem:[%s15491_s5 + $0xd0] sm:$0xff] }
 0x4c6   : > { %5200 = vrot.lane.b32.xlu1 %v12096_v3, %s7716_s28  ;;  %6356 = vmatprep.subr.mxu1 %v12403_v49  ;;  %16251 = vst [vmem:[#allocation325_spill] sm:$0xff] %v12409_v7  ;;  %16252 = vst [vmem:[#allocation326_spill] sm:$0xff] %v12415_v29  ;;  %v12418_v11 = vadd.f32 %v2440_v5, %v2370_v51  ;;  %v12423_v3 = vld [vmem:[%s15491_s5 + $0x358] sm:$0xff]  ;;  %v12447_v51 = vld [vmem:[%s15491_s5 + $0x340] sm:$0xff] }
 0x4c7   : > { %6401 = vmatprep.subr.mxu0 %v12409_v7  ;;  %6357 = vmatpush3.msra.mxu1 %v12415_v29  ;;  %v12429_v7 = vld [vmem:[%s15491_s5 + $0x238] sm:$0xff]  ;;  %v12435_v29 = vld [vmem:[%s15491_s5 + $0x4c0] sm:$0xff]  ;;  %16257 = vst [vmem:[#allocation331_spill] sm:$0xff] %v12447_v51 }
 0x4c8   : > { %16253 = vst [vmem:[#allocation327_spill] sm:$0xff] %v12418_v11  ;;  %6402 = vmatpush3.msra.mxu0 %v12423_v3  ;;  %16254 = vst [vmem:[#allocation328_spill] sm:$0xff] %v12429_v7  ;;  %6358 = vmatprep.subr.mxu1 %v12429_v7  ;;  %v12441_v5 = vld [vmem:[%s15491_s5 + $0xb8] sm:$0xff]  ;;  %v12473_v7 = vld [vmem:[%s15491_s5 + $0x328] sm:$0xff] }
 0x4c9   : > { %16255 = vst [vmem:[#allocation329_spill] sm:$0xff] %v12435_v29  ;;  %6403 = vmatprep.subr.mxu0 %v12435_v29  ;;  %16256 = vst [vmem:[#allocation330_spill] sm:$0xff] %v12441_v5  ;;  %6359 = vmatpush3.msra.mxu1 %v12441_v5  ;;  %v12455_v29 = vld [vmem:[%s15491_s5 + $0x220] sm:$0xff]  ;;  %v12461_v5 = vld [vmem:[%s15491_s5 + $0x4a8] sm:$0xff] }
 0x4ca   : > { %6404 = vmatpush3.msra.mxu0 %v12447_v51  ;;  %5122 = vrot.lane.b32.xlu1 %v12418_v11, %s7718_s30  ;;  %16258 = vst [vmem:[#allocation332_spill] sm:$0xff] %v12455_v29  ;;  %16259 = vst [vmem:[#allocation333_spill] sm:$0xff] %v12461_v5  ;;  %v12467_v51 = vld [vmem:[%s15491_s5 + $0xa0] sm:$0xff] }
 0x4cb   : > { %6360 = vmatprep.subr.mxu1 %v12455_v29  ;;  %6405 = vmatprep.subr.mxu0 %v12461_v5  ;;  %16260 = vst [vmem:[#allocation334_spill] sm:$0xff] %v12467_v51  ;;  %16261 = vst [vmem:[#allocation335_spill] sm:$0xff] %v12473_v7  ;;  %v12479_v29 = vld [vmem:[%s15491_s5 + $0x208] sm:$0xff]  ;;  %v12485_v5 = vld [vmem:[%s15491_s5 + $0x490] sm:$0xff] }
 0x4cc   : > { %6361 = vmatpush3.msra.mxu1 %v12467_v51  ;;  %6406 = vmatpush3.msra.mxu0 %v12473_v7  ;;  %16262 = vst [vmem:[#allocation336_spill] sm:$0xff] %v12485_v5  ;;  %v12491_v51 = vld [vmem:[%s15491_s5 + $0x88] sm:$0xff]  ;;  %v12497_v7 = vld [vmem:[%s15491_s5 + $0x310] sm:$0xff] }
 0x4cd   : > { %6362 = vmatprep.subr.mxu1 %v12479_v29  ;;  %6407 = vmatprep.subr.mxu0 %v12485_v5  ;;  %16263 = vst [vmem:[#allocation337_spill] sm:$0xff] %v12491_v51  ;;  %16264 = vst [vmem:[#allocation338_spill] sm:$0xff] %v12497_v7  ;;  %v12505_v5 = vld [vmem:[%s15491_s5 + $0x1f0] sm:$0xff] }
 0x4ce   : > { %6363 = vmatpush3.msra.mxu1 %v12491_v51  ;;  %6408 = vmatpush3.msra.mxu0 %v12497_v7  ;;  %16265 = vst [vmem:[#allocation339_spill] sm:$0xff] %v12505_v5  ;;  %v12512_v51 = vld [vmem:[%s15491_s5 + $0xbf8] sm:$0xff]  ;;  %v12518_v7 = vld [vmem:[%s15491_s5 + $0x70] sm:$0xff] }
 0x4cf   : > { %5082 = vrot.lane.b32.xlu1 %v12418_v11, %s7719_s11  ;;  %6364 = vmatprep.subr.mxu1 %v12505_v5  ;;  %16266 = vst [vmem:[#allocation340_spill] sm:$0xff] %v12518_v7  ;;  %v12524_v5 = vld [vmem:[%s15491_s5 + $0xa78] sm:$0xff] }
 0x4d0   : > { %3323 = vmatmul.mubr.f32.vlgmr.msra.gmra.mxu0 %v9896_v8  ;;  %6447 = vmatprep.subr.mxu0 %v12512_v51  ;;  %16267 = vst [vmem:[#allocation341_spill] sm:$0xff] %v12524_v5  ;;  %v12531_v8 = vld [vmem:[%s15491_s5 + $0x1d8] sm:$0xff] }
 0x4d1   : > { %6365 = vmatpush3.msra.mxu1 %v12518_v7  ;;  %6448 = vmatpush3.msra.mxu0 %v12524_v5  ;;  %16268 = vst [vmem:[#allocation342_spill] sm:$0xff] %v12531_v8  ;;  %v12537_v7 = vld [vmem:[%s15491_s5 + $0xbe0] sm:$0xff]  ;;  %v12543_v5 = vld [vmem:[%s15491_s5 + $0x58] sm:$0xff] }
 0x4d2   : > { %3462 = vmatprep.mubr.f32.mxu0 %v11442_v43  ;;  %6366 = vmatprep.subr.mxu1 %v12531_v8  ;;  %16269 = vst [vmem:[#allocation343_spill] sm:$0xff] %v12537_v7  ;;  %16270 = vst [vmem:[#allocation344_spill] sm:$0xff] %v12543_v5  ;;  %v12549_v43 = vld [vmem:[%s15491_s5 + $0xa60] sm:$0xff]  ;;  %v12575_v8 = vld [vmem:[%s15491_s5 + $0xa48] sm:$0xff] }
 0x4d3   : > { %6449 = vmatprep.subr.mxu0 %v12537_v7  ;;  %6367 = vmatpush3.msra.mxu1 %v12543_v5  ;;  %16271 = vst [vmem:[#allocation345_spill] sm:$0xff] %v12549_v43  ;;  %v12557_v7 = vld [vmem:[%s15491_s5 + $0x1c0] sm:$0xff]  ;;  %v12563_v5 = vld [vmem:[%s15491_s5 + $0xbc8] sm:$0xff]  ;;  %16275 = vst [vmem:[#allocation349_spill] sm:$0xff] %v12575_v8 }
 0x4d4   : > { %6450 = vmatpush3.msra.mxu0 %v12549_v43  ;;  %5042 = vrot.lane.b32.xlu1 %v12418_v11, %s7720_s12  ;;  %16272 = vst [vmem:[#allocation346_spill] sm:$0xff] %v12557_v7  ;;  %16273 = vst [vmem:[#allocation347_spill] sm:$0xff] %v12563_v5  ;;  %v12569_v43 = vld [vmem:[%s15491_s5 + $0x40] sm:$0xff] }
 0x4d5   : > { %6368 = vmatprep.subr.mxu1 %v12557_v7  ;;  %6451 = vmatprep.subr.mxu0 %v12563_v5  ;;  %16274 = vst [vmem:[#allocation348_spill] sm:$0xff] %v12569_v43  ;;  %v12581_v7 = vld [vmem:[%s15491_s5 + $0x1a8] sm:$0xff]  ;;  %v12587_v5 = vld [vmem:[%s15491_s5 + $0xbb0] sm:$0xff] }
 0x4d6   : > { %6369 = vmatpush3.msra.mxu1 %v12569_v43  ;;  %6452 = vmatpush3.msra.mxu0 %v12575_v8  ;;  %16276 = vst [vmem:[#allocation350_spill] sm:$0xff] %v12581_v7  ;;  %16277 = vst [vmem:[#allocation351_spill] sm:$0xff] %v12587_v5  ;;  %v12593_v43 = vld [vmem:[%s15491_s5 + $0x28] sm:$0xff]  ;;  %v12599_v8 = vld [vmem:[%s15491_s5 + $0xa30] sm:$0xff] }
 0x4d7   : > { %6370 = vmatprep.subr.mxu1 %v12581_v7  ;;  %6453 = vmatprep.subr.mxu0 %v12587_v5  ;;  %16278 = vst [vmem:[#allocation352_spill] sm:$0xff] %v12593_v43  ;;  %16279 = vst [vmem:[#allocation353_spill] sm:$0xff] %v12599_v8  ;;  %v12607_v5 = vld [vmem:[%s15491_s5 + $0x190] sm:$0xff]  ;;  %v12625_v7 = vld [vmem:[%s15491_s5 + $0xa18] sm:$0xff] }
 0x4d8   : > { %6371 = vmatpush3.msra.mxu1 %v12593_v43  ;;  %6454 = vmatpush3.msra.mxu0 %v12599_v8  ;;  %v12613_v43 = vld [vmem:[%s15491_s5 + $0xb98] sm:$0xff]  ;;  %v12619_v8 = vld [vmem:[%s15491_s5 + $0x10] sm:$0xff]  ;;  %16282 = vst [vmem:[#allocation356_spill] sm:$0xff] %v12625_v7 }
 0x4d9   : > { %5282 = vrot.lane.b32.xlu1 %v12418_v11, %s7714_s26  ;;  %6372 = vmatprep.subr.mxu1 %v12607_v5  ;;  %16280 = vst [vmem:[#allocation354_spill] sm:$0xff] %v12613_v43  ;;  %16281 = vst [vmem:[#allocation355_spill] sm:$0xff] %v12619_v8 }
 0x4da   : > { %6455 = vmatprep.subr.mxu0 %v12613_v43  ;;  %6373 = vmatpush3.msra.mxu1 %v12619_v8  ;;  %v12632_v43 = vld [vmem:[%s15491_s5 + $0x8f8] sm:$0xff]  ;;  %v12638_v8 = vld [vmem:[%s15491_s5 + $0xb80] sm:$0xff] }
 0x4db   : > { %6456 = vmatpush3.msra.mxu0 %v12625_v7  ;;  %3253 = vmatmul.mubr.f32.vlgmr.msra.gmra.mxu1 %v9860_v59  ;;  %16283 = vst [vmem:[#allocation357_spill] sm:$0xff] %v12638_v8  ;;  %v12644_v7 = vld [vmem:[%s15491_s5 + $0x778] sm:$0xff]  ;;  %v12651_v59 = vld [vmem:[%s15491_s5 + $0xa00] sm:$0xff] }
 0x4dc   : > { %6412 = vmatprep.subr.mxu1 %v12632_v43  ;;  %6457 = vmatprep.subr.mxu0 %v12638_v8  ;;  %16284 = vst [vmem:[#allocation358_spill] sm:$0xff] %v12644_v7  ;;  %16285 = vst [vmem:[#allocation359_spill] sm:$0xff] %v12651_v59  ;;  %v12659_v8 = vld [vmem:[%s15491_s5 + $0x8e0] sm:$0xff] }
 0x4dd   : > { %6413 = vmatpush3.msra.mxu1 %v12644_v7  ;;  %3392 = vmatprep.mubr.f32.mxu1 %v11195_v33  ;;  %16286 = vst [vmem:[#allocation360_spill] sm:$0xff] %v12659_v8  ;;  %v12665_v33 = vld [vmem:[%s15491_s5 + $0xb68] sm:$0xff] }
 0x4de   : > { %6458 = vmatpush3.msra.mxu0 %v12651_v59  ;;  %5242 = vrot.lane.b32.xlu1 %v12418_v11, %s7715_s27  ;;  %16287 = vst [vmem:[#allocation361_spill] sm:$0xff] %v12665_v33  ;;  %v12671_v59 = vld [vmem:[%s15491_s5 + $0x760] sm:$0xff]  ;;  %v12677_v7 = vld [vmem:[%s15491_s5 + $0x9e8] sm:$0xff] }
 0x4df   : > { %6414 = vmatprep.subr.mxu1 %v12659_v8  ;;  %6459 = vmatprep.subr.mxu0 %v12665_v33  ;;  %16288 = vst [vmem:[#allocation362_spill] sm:$0xff] %v12671_v59  ;;  %16289 = vst [vmem:[#allocation363_spill] sm:$0xff] %v12677_v7  ;;  %v12683_v8 = vld [vmem:[%s15491_s5 + $0x8c8] sm:$0xff]  ;;  %v12689_v33 = vld [vmem:[%s15491_s5 + $0xb50] sm:$0xff] }
 0x4e0   : > { %6415 = vmatpush3.msra.mxu1 %v12671_v59  ;;  %6460 = vmatpush3.msra.mxu0 %v12677_v7  ;;  %16290 = vst [vmem:[#allocation364_spill] sm:$0xff] %v12683_v8  ;;  %16291 = vst [vmem:[#allocation365_spill] sm:$0xff] %v12689_v33  ;;  %v12695_v59 = vld [vmem:[%s15491_s5 + $0x748] sm:$0xff]  ;;  %v12701_v7 = vld [vmem:[%s15491_s5 + $0x9d0] sm:$0xff] }
 0x4e1   : > { %6416 = vmatprep.subr.mxu1 %v12683_v8  ;;  %6461 = vmatprep.subr.mxu0 %v12689_v33  ;;  %16292 = vst [vmem:[#allocation366_spill] sm:$0xff] %v12695_v59  ;;  %16293 = vst [vmem:[#allocation367_spill] sm:$0xff] %v12701_v7  ;;  %v6228_v8 = vpop.f32.mrf.mxu1  ;;  %v12709_v33 = vld [vmem:[%s15491_s5 + $0x8b0] sm:$0xff] }
 0x4e2   : > { %6417 = vmatpush3.msra.mxu1 %v12695_v59  ;;  %6462 = vmatpush3.msra.mxu0 %v12701_v7  ;;  %v12715_v59 = vld [vmem:[%s15491_s5 + $0xb38] sm:$0xff] }
 0x4e3   : > { %5402 = vrot.lane.b32.xlu1 %v12418_v11, %s7711_s23  ;;  %6418 = vmatprep.subr.mxu1 %v12709_v33  ;;  %v6229_v7 = vpop.f32.mrf.mxu1 }
 0x4e4   : > { %6463 = vmatprep.subr.mxu0 %v12715_v59  ;;  %6419 = vmatpush3.msra.mxu1 %v10229_v40 }
 0x4e5   : > { %6464 = vmatpush3.msra.mxu0 %v10234_v48  ;;  %6420 = vmatprep.subr.mxu1 %v10239_v47  ;;  %v6298_v40 = vpop.f32.mrf.mxu1  ;;  %v6263_v47 = vpop.f32.mrf.mxu0 }
 0x4e6   : > { %6465 = vmatprep.subr.mxu0 %v10244_v27  ;;  %6421 = vmatpush3.msra.mxu1 %v10249_v21  ;;  %v16309_v21 = vld [vmem:[#allocation37_spill] sm:$0xff] }
 0x4e7   : > { %6466 = vmatpush3.msra.mxu0 %v10254_v15  ;;  %5202 = vrot.lane.b32.xlu1 %v12418_v11, %s7716_s28  ;;  %v6299_v48 = vpop.f32.mrf.mxu1  ;;  %v16310_v15 = vld [vmem:[#allocation33_spill] sm:$0xff] }
 0x4e8   : > { %6422 = vmatprep.subr.mxu1 %v10261_v63  ;;  %6467 = vmatprep.subr.mxu0 %v10266_v24  ;;  %v16311_v63 = vld [vmem:[#allocation38_spill] sm:$0xff]  ;;  %v16312_v24 = vld [vmem:[#allocation40_spill] sm:$0xff] }
 0x4e9   : > { %6423 = vmatpush3.msra.mxu1 %v10273_v36  ;;  %6468 = vmatpush3.msra.mxu0 %v10278_v22  ;;  %v16313_v36 = vld [vmem:[#allocation36_spill] sm:$0xff]  ;;  %v16314_v22 = vld [vmem:[#allocation41_spill] sm:$0xff] }
 0x4ea   : > { %6424 = vmatprep.subr.mxu1 %v10285_v23  ;;  %6469 = vmatprep.subr.mxu0 %v10290_v16  ;;  %v16315_v23 = vld [vmem:[#allocation43_spill] sm:$0xff] }
 0x4eb   : > { %6425 = vmatpush3.msra.mxu1 %v10297_v12  ;;  %6470 = vmatpush3.msra.mxu0 %v10302_v44  ;;  %v16316_v16 = vld [vmem:[#allocation39_spill] sm:$0xff]  ;;  %v16317_v12 = vld [vmem:[#allocation44_spill] sm:$0xff]  ;;  %v16318_v44 = vld [vmem:[#allocation45_spill] sm:$0xff] }
 0x4ec   : > { %6426 = vmatprep.subr.mxu1 %v10309_v26  ;;  %6471 = vmatprep.subr.mxu0 %v10314_v4  ;;  %v16306_v4 = vld [vmem:[#allocation34_spill] sm:$0xff] }
 0x4ed   : > { %6427 = vmatpush3.msra.mxu1 %v10321_v37  ;;  %6472 = vmatpush3.msra.mxu0 %v10326_v56  ;;  %v6264_v56 = vpop.f32.mrf.mxu0 }
 0x4ee   : > { %6428 = vmatprep.subr.mxu1 %v10333_v25  ;;  %6473 = vmatprep.subr.mxu0 %v10338_v30  ;;  %v6230_v25 = vadd.f32 %v6229_v7, %v6228_v8  ;;  %v16302_v30 = vld [vmem:[#allocation28_spill] sm:$0xff]  ;;  %v16323_v8 = vld [vmem:[#allocation49_spill] sm:$0xff] }
 0x4ef   : > { %6429 = vmatpush3.msra.mxu1 %v10345_v39  ;;  %6474 = vmatpush3.msra.mxu0 %v10350_v31  ;;  %v2789_v27 = vpop.f32.mrf.mxu1  ;;  %v6333_v31 = vpop.f32.mrf.mxu0  ;;  %v16299_v39 = vld [vmem:[#allocation29_spill] sm:$0xff]  ;;  %v16322_v7 = vld [vmem:[#allocation48_spill] sm:$0xff] }
 0x4f0   : > { %6430 = vmatprep.subr.mxu1 %v10357_v45  ;;  %6475 = vmatprep.subr.mxu0 %v10362_v19  ;;  %v6265_v45 = vadd.f32 %v6264_v56, %v6263_v47  ;;  %v16298_v19 = vld [vmem:[#allocation25_spill] sm:$0xff]  ;;  %v16329_v56 = vld [vmem:[#allocation52_spill] sm:$0xff] }
 0x4f1   : > { %6431 = vmatpush3.msra.mxu1 %v10369_v35  ;;  %6476 = vmatpush3.msra.mxu0 %v10374_v13  ;;  %v6792_v26 = vpop.f32.mrf.mxu1  ;;  %v16294_v13 = vunpack.i.h.bf16 %v9907_v62  ;;  %v16297_v35 = vld [vmem:[#allocation27_spill] sm:$0xff] }
 0x4f2   : > { %6432 = vmatprep.subr.mxu1 %v10381_v20  ;;  %6477 = vmatprep.subr.mxu0 %v10386_v17  ;;  %v16295_v20 = vunpack.i.l.bf16 %v9907_v62  ;;  %v16327_v26 = vld [vmem:[#allocation50_spill] sm:$0xff] }
 0x4f3   : > { %6433 = vmatpush3.msra.mxu1 %v10393_v52  ;;  %6478 = vmatpush3.msra.mxu0 %v10398_v41  ;;  %v6300_v52 = vadd.f32 %v6299_v48, %v6298_v40  ;;  %v6334_v41 = vpop.f32.mrf.mxu0  ;;  %v16324_v40 = vld [vmem:[#allocation7_spill] sm:$0xff] }
 0x4f4   : > { %6434 = vmatprep.subr.mxu1 %v10405_v58  ;;  %3463 = vmatmul.mubr.f32.vlgmr.msra.gmra.mxu0 %v9927_v54  ;;  %v12759_v17 = vsel %vm3558_vm2, %v16295_v20, %v16294_v13  ;;  %v2580_v58 = vadd.f32 %v6265_v45, %v6230_v25  ;;  %v6335_v62 = vadd.f32 %v6334_v41, %v6333_v31  ;;  %v16296_v54 = vld [vmem:[#allocation24_spill] sm:$0xff]  ;;  %v16325_v48 = vunpack.i.h.bf16 %v16324_v40  ;;  %v16330_v25 = vld [vmem:[#allocation53_spill] sm:$0xff]  ;;  %v16331_v31 = vld [vmem:[#allocation54_spill] sm:$0xff] }
 0x4f5   : > { %3578 = vmatprep.subr.mxu0 %v10426_v38  ;;  %6435 = vmatpush3.msra.mxu1 %v10412_v28  ;;  %v16307_v38 = vld [vmem:[#allocation31_spill] sm:$0xff]  ;;  %v16326_v47 = vunpack.i.l.bf16 %v16324_v40  ;;  %v16333_v13 = vld [vmem:[#allocation56_spill] sm:$0xff]  ;;  %v16334_v20 = vld [vmem:[#allocation57_spill] sm:$0xff] }
 0x4f6   : > { %3579 = vmatpush1.msra.mxu0 %v10445_v61  ;;  %3642 = vmatprep.mubr.f32.mxu0 %v12759_v17  ;;  %v2650_v28 = vadd.f32 %v6300_v52, %v2580_v58  ;;  %v16301_v61 = vld [vmem:[#allocation30_spill] sm:$0xff]  ;;  %v16332_v45 = vld [vmem:[#allocation55_spill] sm:$0xff]  ;;  %v16337_v41 = vld [vmem:[#allocation60_spill] sm:$0xff] }
 0x4f7   : > { %6436 = vmatprep.subr.mxu1 %v10421_v6  ;;  %3580 = vmatprep.subr.mxu0 %v10458_v53  ;;  %v16308_v6 = vld [vmem:[#allocation35_spill] sm:$0xff]  ;;  %v16320_v53 = vld [vmem:[#allocation46_spill] sm:$0xff] }
 0x4f8   : > { %6437 = vmatpush3.msra.mxu1 %v10440_v2  ;;  %3581 = vmatpush1.msra.mxu0 %v10470_v10  ;;  %v16300_v2 = vld [vmem:[#allocation26_spill] sm:$0xff]  ;;  %v2720_v10 = vadd.f32 %v6335_v62, %v2650_v28  ;;  %v16336_v58 = vld [vmem:[#allocation59_spill] sm:$0xff]  ;;  %v16338_v28 = vld [vmem:[#allocation61_spill] sm:$0xff] }
 0x4f9   : > { %6438 = vmatprep.subr.mxu1 %v10452_v34  ;;  %3582 = vmatprep.subr.mxu0 %v10482_v57  ;;  %v16303_v57 = vld [vmem:[#allocation32_spill] sm:$0xff]  ;;  %v16319_v34 = vld [vmem:[#allocation42_spill] sm:$0xff]  ;;  %v16368_v40 = vld [vmem:[#allocation91_spill] sm:$0xff] }
 0x4fa   : > { %6439 = vmatpush3.msra.mxu1 %v10464_v18  ;;  %3583 = vmatpush1.msra.mxu0 %v10494_v32  ;;  %v12779_v37 = vadd.f32 %v2789_v27, %v2720_v10  ;;  %v16305_v32 = vld [vmem:[#allocation6_spill] sm:$0xff]  ;;  %v16321_v18 = vld [vmem:[#allocation47_spill] sm:$0xff]  ;;  %v12818_v27 = vsel %vm3558_vm2, %v16326_v47, %v16325_v48  ;;  %v16346_v10 = vld [vmem:[#allocation69_spill] sm:$0xff] }
 0x4fb   : > { %6440 = vmatprep.subr.mxu1 %v16296_v54  ;;  %3584 = vmatprep.subr.mxu0 %v16297_v35  ;;  %v16335_v52 = vld [vmem:[#allocation58_spill] sm:$0xff]  ;;  %v16340_v54 = vld [vmem:[#allocation63_spill] sm:$0xff]  ;;  %v16341_v35 = vld [vmem:[#allocation64_spill] sm:$0xff] }
 0x4fc   : > { %6441 = vmatpush3.msra.mxu1 %v16298_v19  ;;  %3585 = vmatpush1.msra.mxu0 %v16299_v39  ;;  %16304 = vst [vmem:[#allocation24_spill] sm:$0xff] %v12779_v37  ;;  %v16339_v62 = vld [vmem:[#allocation62_spill] sm:$0xff]  ;;  %v16342_v19 = vld [vmem:[#allocation65_spill] sm:$0xff]  ;;  %v16369_v48 = vld [vmem:[#allocation92_spill] sm:$0xff] }
 0x4fd   : > { %6442 = vmatprep.subr.mxu1 %v16300_v2  ;;  %3586 = vmatprep.subr.mxu0 %v16301_v61  ;;  %v16343_v39 = vld [vmem:[#allocation66_spill] sm:$0xff]  ;;  %v16344_v2 = vld [vmem:[#allocation67_spill] sm:$0xff]  ;;  %v16345_v61 = vld [vmem:[#allocation68_spill] sm:$0xff] }
 0x4fe   : > { %6443 = vmatpush3.msra.mxu1 %v16302_v30  ;;  %3587 = vmatpush1.msra.mxu0 %v16303_v57  ;;  %v16347_v30 = vld [vmem:[#allocation70_spill] sm:$0xff]  ;;  %v16348_v57 = vld [vmem:[#allocation71_spill] sm:$0xff]  ;;  %v16370_v47 = vld [vmem:[#allocation93_spill] sm:$0xff] }
 0x4ff   : > { %3393 = vmatmul.mubr.f32.vlgmr.msra.gmra.mxu1 %v16305_v32  ;;  %6793 = vmatprep.subr.mxu1 %v15924_v42  ;;  %v16349_v32 = vld [vmem:[#allocation72_spill] sm:$0xff] }
 0x500   : > { %3588 = vmatprep.subr.mxu0 %v16306_v4  ;;  %6794 = vmatpush3.msra.mxu1 %v16307_v38  ;;  %v16350_v4 = vld [vmem:[#allocation73_spill] sm:$0xff]  ;;  %v16351_v38 = vld [vmem:[#allocation74_spill] sm:$0xff] }
 0x501   : > { %3589 = vmatpush1.msra.mxu0 %v16308_v6  ;;  %6795 = vmatprep.subr.mxu1 %v15924_v42  ;;  %v16352_v6 = vld [vmem:[#allocation75_spill] sm:$0xff] }
 0x502   : > { %3590 = vmatprep.subr.mxu0 %v16309_v21  ;;  %6796 = vmatpush3.msra.mxu1 %v16310_v15  ;;  %v16353_v21 = vld [vmem:[#allocation76_spill] sm:$0xff]  ;;  %v16354_v15 = vld [vmem:[#allocation77_spill] sm:$0xff] }
 0x503   : > { %3591 = vmatpush1.msra.mxu0 %v16311_v63  ;;  %5124 = vrot.lane.b32.xlu0 %v12779_v37, %s7718_s30  ;;  %v16355_v63 = vld [vmem:[#allocation78_spill] sm:$0xff] }
 0x504   : > { %6797 = vmatprep.subr.mxu1 %v15924_v42  ;;  %3592 = vmatprep.subr.mxu0 %v16312_v24  ;;  %v16356_v24 = vld [vmem:[#allocation79_spill] sm:$0xff] }
 0x505   : > { %6798 = vmatpush3.msra.mxu1 %v16313_v36  ;;  %3593 = vmatpush1.msra.mxu0 %v16314_v22  ;;  %v16357_v36 = vld [vmem:[#allocation80_spill] sm:$0xff]  ;;  %v16358_v22 = vld [vmem:[#allocation81_spill] sm:$0xff] }
 0x506   : > { %6799 = vmatprep.subr.mxu1 %v15924_v42  ;;  %3594 = vmatprep.subr.mxu0 %v16315_v23  ;;  %v16359_v23 = vld [vmem:[#allocation82_spill] sm:$0xff] }
 0x507   : > { %6800 = vmatpush3.msra.mxu1 %v16316_v16  ;;  %3595 = vmatpush1.msra.mxu0 %v16317_v12  ;;  %v16360_v16 = vld [vmem:[#allocation83_spill] sm:$0xff]  ;;  %v16361_v12 = vld [vmem:[#allocation84_spill] sm:$0xff] }
 0x508   : > { %5084 = vrot.lane.b32.xlu0 %v12779_v37, %s7719_s11  ;;  %6801 = vmatprep.subr.mxu1 %v15924_v42 }
 0x509   : > { %3596 = vmatprep.subr.mxu0 %v16318_v44  ;;  %6802 = vmatpush3.msra.mxu1 %v16319_v34  ;;  %v16362_v44 = vld [vmem:[#allocation85_spill] sm:$0xff]  ;;  %v16363_v34 = vld [vmem:[#allocation86_spill] sm:$0xff] }
 0x50a   : > { %6803 = vmatprep.mubr.msk.f32.mxu1 %vm7727_vm8, %v15924_v42  ;;  %3597 = vmatpush1.msra.mxu0 %v16320_v53  ;;  %v16364_v53 = vld [vmem:[#allocation87_spill] sm:$0xff] }
 0x50b   : > { %6804 = vmatmul.mubr.msk.f32.vlgmr.msra.gmra.mxu1 %vm2085_vm1, %v12079_v60  ;;  %3598 = vmatprep.subr.mxu0 %v16321_v18  ;;  %v16328_v60 = vld [vmem:[#allocation51_spill] sm:$0xff]  ;;  %v16365_v18 = vld [vmem:[#allocation88_spill] sm:$0xff] }
 0x50c   : > { %3649 = vmatprep.subr.mxu1 %v16322_v7  ;;  %3599 = vmatpush1.msra.mxu0 %v16323_v8  ;;  %v16366_v7 = vld [vmem:[#allocation89_spill] sm:$0xff]  ;;  %v16367_v8 = vld [vmem:[#allocation90_spill] sm:$0xff] }
 0x50d   : > { %3650 = vmatpush1.msra.mxu1 %v16327_v26  ;;  %3713 = vmatprep.mubr.f32.mxu1 %v12818_v27  ;;  %v16371_v26 = vld [vmem:[#allocation94_spill] sm:$0xff] }
 0x50e   : > { %5044 = vrot.lane.b32.xlu0 %v12779_v37, %s7720_s12  ;;  %3600 = vmatprep.subr.mxu0 %v16328_v60  ;;  %v16372_v60 = vld [vmem:[#allocation95_spill] sm:$0xff] }
 0x50f   : > { %3651 = vmatprep.subr.mxu1 %v16329_v56  ;;  %3601 = vmatpush1.msra.mxu0 %v16330_v25  ;;  %v16373_v56 = vld [vmem:[#allocation96_spill] sm:$0xff]  ;;  %v16374_v25 = vld [vmem:[#allocation97_spill] sm:$0xff] }
 0x510   : > { %3652 = vmatpush1.msra.mxu1 %v16331_v31  ;;  %3602 = vmatprep.subr.mxu0 %v16332_v45  ;;  %v16375_v31 = vld [vmem:[#allocation98_spill] sm:$0xff]  ;;  %v16376_v45 = vld [vmem:[#allocation99_spill] sm:$0xff] }
 0x511   : > { %3653 = vmatprep.subr.mxu1 %v16333_v13  ;;  %3603 = vmatpush1.msra.mxu0 %v16334_v20  ;;  %v16377_v13 = vld [vmem:[#allocation100_spill] sm:$0xff]  ;;  %v16378_v20 = vld [vmem:[#allocation101_spill] sm:$0xff] }
 0x512   : > { %3654 = vmatpush1.msra.mxu1 %v16335_v52  ;;  %5284 = vrot.lane.b32.xlu0 %v12779_v37, %s7714_s26  ;;  %v16379_v52 = vld [vmem:[#allocation102_spill] sm:$0xff] }
 0x513   : > { %3604 = vmatprep.subr.mxu0 %v16336_v58  ;;  %3655 = vmatprep.subr.mxu1 %v16337_v41  ;;  %v16380_v58 = vld [vmem:[#allocation103_spill] sm:$0xff]  ;;  %v16381_v41 = vld [vmem:[#allocation104_spill] sm:$0xff] }
 0x514   : > { %3605 = vmatpush1.msra.mxu0 %v16338_v28  ;;  %3656 = vmatpush1.msra.mxu1 %v16339_v62  ;;  %v16382_v28 = vld [vmem:[#allocation105_spill] sm:$0xff]  ;;  %v16383_v62 = vld [vmem:[#allocation106_spill] sm:$0xff] }
 0x515   : > { %3606 = vmatprep.subr.mxu0 %v16340_v54  ;;  %3657 = vmatprep.subr.mxu1 %v16341_v35  ;;  %v16384_v54 = vld [vmem:[#allocation107_spill] sm:$0xff]  ;;  %v16385_v35 = vld [vmem:[#allocation108_spill] sm:$0xff] }
 0x516   : > { %3607 = vmatpush1.msra.mxu0 %v16342_v19  ;;  %3658 = vmatpush1.msra.mxu1 %v16343_v39  ;;  %v16386_v19 = vld [vmem:[#allocation109_spill] sm:$0xff]  ;;  %v16387_v39 = vld [vmem:[#allocation110_spill] sm:$0xff] }
 0x517   : > { %5244 = vrot.lane.b32.xlu0 %v12779_v37, %s7715_s27  ;;  %3608 = vmatprep.subr.mxu0 %v16344_v2  ;;  %v16388_v2 = vld [vmem:[#allocation111_spill] sm:$0xff] }
 0x518   : > { %3659 = vmatprep.subr.mxu1 %v16345_v61  ;;  %3609 = vmatpush1.msra.mxu0 %v16346_v10  ;;  %v16389_v61 = vld [vmem:[#allocation112_spill] sm:$0xff]  ;;  %v16390_v10 = vld [vmem:[#allocation113_spill] sm:$0xff] }
 0x519   : > { %3660 = vmatpush1.msra.mxu1 %v16347_v30  ;;  %3610 = vmatprep.subr.mxu0 %v16348_v57  ;;  %v16391_v30 = vld [vmem:[#allocation114_spill] sm:$0xff]  ;;  %v16392_v57 = vld [vmem:[#allocation115_spill] sm:$0xff] }
 0x51a   : > { %3661 = vmatprep.subr.mxu1 %v16349_v32  ;;  %3611 = vmatpush2.msra.mxu0 %v16350_v4  ;;  %v16393_v32 = vld [vmem:[#allocation116_spill] sm:$0xff]  ;;  %v16394_v4 = vld [vmem:[#allocation117_spill] sm:$0xff] }
 0x51b   : > { %3662 = vmatpush1.msra.mxu1 %v16351_v38  ;;  %5404 = vrot.lane.b32.xlu0 %v12779_v37, %s7711_s23  ;;  %v16395_v38 = vld [vmem:[#allocation118_spill] sm:$0xff] }
 0x51c   : > { %3612 = vmatprep.subr.mxu0 %v16352_v6  ;;  %3663 = vmatprep.subr.mxu1 %v16353_v21  ;;  %v16396_v6 = vld [vmem:[#allocation119_spill] sm:$0xff]  ;;  %v16397_v21 = vld [vmem:[#allocation120_spill] sm:$0xff] }
 0x51d   : > { %3613 = vmatpush2.msra.mxu0 %v16354_v15  ;;  %3664 = vmatpush1.msra.mxu1 %v16355_v63  ;;  %v16398_v15 = vld [vmem:[#allocation121_spill] sm:$0xff]  ;;  %v16399_v63 = vld [vmem:[#allocation122_spill] sm:$0xff] }
 0x51e   : > { %3614 = vmatprep.subr.mxu0 %v16356_v24  ;;  %3665 = vmatprep.subr.mxu1 %v16357_v36  ;;  %v16400_v24 = vld [vmem:[#allocation123_spill] sm:$0xff]  ;;  %v16401_v36 = vld [vmem:[#allocation124_spill] sm:$0xff] }
 0x51f   : > { %3615 = vmatpush2.msra.mxu0 %v16358_v22  ;;  %3666 = vmatpush1.msra.mxu1 %v16359_v23  ;;  %v16402_v22 = vld [vmem:[#allocation125_spill] sm:$0xff]  ;;  %v16403_v23 = vld [vmem:[#allocation126_spill] sm:$0xff] }
 0x520   : > { %5204 = vrot.lane.b32.xlu0 %v12779_v37, %s7716_s28  ;;  %3616 = vmatprep.subr.mxu0 %v16360_v16  ;;  %v16404_v16 = vld [vmem:[#allocation127_spill] sm:$0xff] }
 0x521   : > { %3667 = vmatprep.subr.mxu1 %v16361_v12  ;;  %3617 = vmatpush2.msra.mxu0 %v16362_v44  ;;  %v16405_v12 = vld [vmem:[#allocation128_spill] sm:$0xff]  ;;  %v16406_v44 = vld [vmem:[#allocation129_spill] sm:$0xff] }
 0x522   : > { %3668 = vmatpush1.msra.mxu1 %v16363_v34  ;;  %3618 = vmatprep.subr.mxu0 %v16364_v53  ;;  %v16407_v34 = vld [vmem:[#allocation130_spill] sm:$0xff]  ;;  %v16408_v53 = vld [vmem:[#allocation131_spill] sm:$0xff] }
 0x523   : > { %3669 = vmatprep.subr.mxu1 %v16365_v18  ;;  %3619 = vmatpush2.msra.mxu0 %v16366_v7  ;;  %v16409_v18 = vld [vmem:[#allocation132_spill] sm:$0xff]  ;;  %v16410_v7 = vld [vmem:[#allocation133_spill] sm:$0xff] }
 0x524   : > { %3670 = vmatpush1.msra.mxu1 %v16367_v8  ;;  %3620 = vmatprep.subr.mxu0 %v16368_v40  ;;  %v16411_v8 = vld [vmem:[#allocation134_spill] sm:$0xff] }
 0x525   : > { %3671 = vmatprep.subr.mxu1 %v16369_v48  ;;  %3621 = vmatpush2.msra.mxu0 %v16370_v47  ;;  %v16412_v40 = vld [vmem:[#allocation10_spill] sm:$0xff]  ;;  %v16413_v48 = vld [vmem:[#allocation135_spill] sm:$0xff]  ;;  %v16414_v47 = vld [vmem:[#allocation136_spill] sm:$0xff] }
 0x526   : > { %3672 = vmatpush1.msra.mxu1 %v16371_v26  ;;  %3622 = vmatprep.subr.mxu0 %v16372_v60  ;;  %v16415_v26 = vld [vmem:[#allocation137_spill] sm:$0xff]  ;;  %v16416_v60 = vld [vmem:[#allocation138_spill] sm:$0xff] }
 0x527   : > { %3673 = vmatprep.subr.mxu1 %v16373_v56  ;;  %3623 = vmatpush2.msra.mxu0 %v16374_v25  ;;  %v16417_v56 = vld [vmem:[#allocation12_spill] sm:$0xff] }
 0x528   : > { %3674 = vmatpush1.msra.mxu1 %v16375_v31  ;;  %3624 = vmatprep.subr.mxu0 %v16376_v45  ;;  %v16418_v25 = vunpack.i.h.bf16 %v16417_v56  ;;  %v16419_v31 = vunpack.i.l.bf16 %v16417_v56  ;;  %v16459_v56 = vld [vmem:[#allocation177_spill] sm:$0xff] }
 0x529   : > { %3675 = vmatprep.subr.mxu1 %v16377_v13  ;;  %3625 = vmatpush2.msra.mxu0 %v16378_v20  ;;  %v16420_v13 = vld [vmem:[#allocation139_spill] sm:$0xff]  ;;  %v16421_v20 = vld [vmem:[#allocation140_spill] sm:$0xff] }
 0x52a   : > { %3676 = vmatpush1.msra.mxu1 %v16379_v52  ;;  %3626 = vmatprep.subr.mxu0 %v16380_v58  ;;  %v12926_v45 = vsel %vm3558_vm2, %v16419_v31, %v16418_v25  ;;  %v16422_v52 = vld [vmem:[#allocation141_spill] sm:$0xff]  ;;  %v16423_v58 = vld [vmem:[#allocation142_spill] sm:$0xff]  ;;  %v16461_v31 = vld [vmem:[#allocation15_spill] sm:$0xff] }
 0x52b   : > { %3677 = vmatprep.subr.mxu1 %v16381_v41  ;;  %3627 = vmatpush2.msra.mxu0 %v16382_v28  ;;  %v16424_v41 = vld [vmem:[#allocation143_spill] sm:$0xff]  ;;  %v16425_v28 = vld [vmem:[#allocation144_spill] sm:$0xff]  ;;  %v16460_v25 = vld [vmem:[#allocation178_spill] sm:$0xff] }
 0x52c   : > { %3678 = vmatpush1.msra.mxu1 %v16383_v62  ;;  %3628 = vmatprep.subr.mxu0 %v16384_v54  ;;  %v16426_v62 = vld [vmem:[#allocation145_spill] sm:$0xff]  ;;  %v16427_v54 = vld [vmem:[#allocation146_spill] sm:$0xff] }
 0x52d   : > { %3679 = vmatprep.subr.mxu1 %v16385_v35  ;;  %3629 = vmatpush2.msra.mxu0 %v16386_v19  ;;  %v16428_v35 = vld [vmem:[#allocation147_spill] sm:$0xff]  ;;  %v16429_v19 = vld [vmem:[#allocation148_spill] sm:$0xff] }
 0x52e   : > { %3680 = vmatpush1.msra.mxu1 %v16387_v39  ;;  %3630 = vmatprep.subr.mxu0 %v16388_v2  ;;  %v16430_v39 = vld [vmem:[#allocation149_spill] sm:$0xff]  ;;  %v16431_v2 = vld [vmem:[#allocation150_spill] sm:$0xff] }
 0x52f   : > { %3681 = vmatprep.subr.mxu1 %v16389_v61  ;;  %3631 = vmatpush2.msra.mxu0 %v16390_v10  ;;  %v16432_v61 = vld [vmem:[#allocation151_spill] sm:$0xff]  ;;  %v16433_v10 = vld [vmem:[#allocation152_spill] sm:$0xff] }
 0x530   : > { %3682 = vmatpush2.msra.mxu1 %v16391_v30  ;;  %3632 = vmatprep.subr.mxu0 %v16392_v57  ;;  %v16434_v30 = vld [vmem:[#allocation153_spill] sm:$0xff]  ;;  %v16435_v57 = vld [vmem:[#allocation154_spill] sm:$0xff] }
 0x531   : > { %3683 = vmatprep.subr.mxu1 %v16393_v32  ;;  %3633 = vmatpush2.msra.mxu0 %v16394_v4  ;;  %v16436_v32 = vld [vmem:[#allocation155_spill] sm:$0xff]  ;;  %v16437_v4 = vld [vmem:[#allocation156_spill] sm:$0xff] }
 0x532   : > { %3684 = vmatpush2.msra.mxu1 %v16395_v38  ;;  %3634 = vmatprep.subr.mxu0 %v16396_v6  ;;  %v16438_v38 = vld [vmem:[#allocation157_spill] sm:$0xff]  ;;  %v16439_v6 = vld [vmem:[#allocation158_spill] sm:$0xff] }
 0x533   : > { %3685 = vmatprep.subr.mxu1 %v16397_v21  ;;  %3635 = vmatpush2.msra.mxu0 %v16398_v15  ;;  %v16440_v21 = vld [vmem:[#allocation159_spill] sm:$0xff]  ;;  %v16441_v15 = vld [vmem:[#allocation160_spill] sm:$0xff] }
 0x534   : > { %3686 = vmatpush2.msra.mxu1 %v16399_v63  ;;  %3636 = vmatprep.subr.mxu0 %v16400_v24  ;;  %v16442_v63 = vld [vmem:[#allocation161_spill] sm:$0xff]  ;;  %v16443_v24 = vld [vmem:[#allocation162_spill] sm:$0xff] }
 0x535   : > { %3687 = vmatprep.subr.mxu1 %v16401_v36  ;;  %3637 = vmatpush2.msra.mxu0 %v16402_v22  ;;  %v16444_v36 = vld [vmem:[#allocation163_spill] sm:$0xff]  ;;  %v16445_v22 = vld [vmem:[#allocation164_spill] sm:$0xff] }
 0x536   : > { %3688 = vmatpush2.msra.mxu1 %v16403_v23  ;;  %3638 = vmatprep.subr.mxu0 %v16404_v16  ;;  %v16446_v23 = vld [vmem:[#allocation165_spill] sm:$0xff]  ;;  %v16447_v16 = vld [vmem:[#allocation166_spill] sm:$0xff] }
 0x537   : > { %3689 = vmatprep.subr.mxu1 %v16405_v12  ;;  %3639 = vmatpush2.msra.mxu0 %v16406_v44  ;;  %v16448_v12 = vld [vmem:[#allocation167_spill] sm:$0xff]  ;;  %v16449_v44 = vld [vmem:[#allocation168_spill] sm:$0xff] }
 0x538   : > { %3690 = vmatpush2.msra.mxu1 %v16407_v34  ;;  %3640 = vmatprep.subr.mxu0 %v16408_v53  ;;  %v16450_v34 = vld [vmem:[#allocation169_spill] sm:$0xff]  ;;  %v16451_v53 = vld [vmem:[#allocation170_spill] sm:$0xff] }
 0x539   : > { %3691 = vmatprep.subr.mxu1 %v16409_v18  ;;  %3641 = vmatpush2.msra.mxu0 %v16410_v7  ;;  %v16452_v18 = vld [vmem:[#allocation171_spill] sm:$0xff]  ;;  %v16453_v7 = vld [vmem:[#allocation172_spill] sm:$0xff] }
 0x53a   : > { %3692 = vmatpush2.msra.mxu1 %v16411_v8  ;;  %3643 = vmatmul.mubr.f32.vlgmr.msra.gmra.mxu0 %v16412_v40  ;;  %v16454_v8 = vld [vmem:[#allocation173_spill] sm:$0xff] }
 0x53b   : > { %3693 = vmatprep.subr.mxu1 %v16413_v48  ;;  %3720 = vmatprep.subr.mxu0 %v16414_v47  ;;  %v16455_v48 = vld [vmem:[#allocation174_spill] sm:$0xff]  ;;  %v16456_v47 = vld [vmem:[#allocation8_spill] sm:$0xff] }
 0x53c   : > { %3694 = vmatpush2.msra.mxu1 %v16415_v26  ;;  %3721 = vmatpush1.msra.mxu0 %v16416_v60  ;;  %v16457_v26 = vld [vmem:[#allocation175_spill] sm:$0xff]  ;;  %v16458_v60 = vld [vmem:[#allocation176_spill] sm:$0xff] }
 0x53d   : > { %3784 = vmatprep.mubr.f32.mxu0 %v12926_v45  ;;  %3695 = vmatprep.subr.mxu1 %v16420_v13  ;;  %v16462_v13 = vld [vmem:[#allocation9_spill] sm:$0xff] }
 0x53e   : > { %3722 = vmatprep.subr.mxu0 %v16421_v20  ;;  %3696 = vmatpush2.msra.mxu1 %v16422_v52  ;;  %v12973_v20 = vsel %vm3558_vm2, %v16462_v13, %v16461_v31  ;;  %v16463_v52 = vld [vmem:[#allocation179_spill] sm:$0xff]  ;;  %v16501_v13 = vld [vmem:[#allocation217_spill] sm:$0xff] }
 0x53f   : > { %3723 = vmatpush1.msra.mxu0 %v16423_v58  ;;  %3697 = vmatprep.subr.mxu1 %v16424_v41  ;;  %v16464_v58 = vld [vmem:[#allocation180_spill] sm:$0xff]  ;;  %v16465_v41 = vld [vmem:[#allocation181_spill] sm:$0xff] }
 0x540   : > { %3724 = vmatprep.subr.mxu0 %v16425_v28  ;;  %3698 = vmatpush2.msra.mxu1 %v16426_v62  ;;  %v16466_v28 = vld [vmem:[#allocation182_spill] sm:$0xff]  ;;  %v16467_v62 = vld [vmem:[#allocation183_spill] sm:$0xff] }
 0x541   : > { %3725 = vmatpush1.msra.mxu0 %v16427_v54  ;;  %3699 = vmatprep.subr.mxu1 %v16428_v35  ;;  %v16468_v54 = vld [vmem:[#allocation184_spill] sm:$0xff]  ;;  %v16469_v35 = vld [vmem:[#allocation185_spill] sm:$0xff] }
 0x542   : > { %3726 = vmatprep.subr.mxu0 %v16429_v19  ;;  %3700 = vmatpush2.msra.mxu1 %v16430_v39  ;;  %v16470_v19 = vld [vmem:[#allocation186_spill] sm:$0xff]  ;;  %v16471_v39 = vld [vmem:[#allocation187_spill] sm:$0xff] }
 0x543   : > { %3727 = vmatpush1.msra.mxu0 %v16431_v2  ;;  %3701 = vmatprep.subr.mxu1 %v16432_v61  ;;  %v16472_v2 = vld [vmem:[#allocation188_spill] sm:$0xff]  ;;  %v16473_v61 = vld [vmem:[#allocation189_spill] sm:$0xff] }
 0x544   : > { %3728 = vmatprep.subr.mxu0 %v16433_v10  ;;  %3702 = vmatpush2.msra.mxu1 %v16434_v30  ;;  %v16474_v10 = vld [vmem:[#allocation190_spill] sm:$0xff]  ;;  %v16475_v30 = vld [vmem:[#allocation191_spill] sm:$0xff] }
 0x545   : > { %3729 = vmatpush1.msra.mxu0 %v16435_v57  ;;  %3703 = vmatprep.subr.mxu1 %v16436_v32  ;;  %v16476_v57 = vld [vmem:[#allocation192_spill] sm:$0xff]  ;;  %v16477_v32 = vld [vmem:[#allocation193_spill] sm:$0xff] }
 0x546   : > { %3730 = vmatprep.subr.mxu0 %v16437_v4  ;;  %3704 = vmatpush2.msra.mxu1 %v16438_v38  ;;  %v16478_v4 = vld [vmem:[#allocation194_spill] sm:$0xff]  ;;  %v16479_v38 = vld [vmem:[#allocation195_spill] sm:$0xff] }
 0x547   : > { %3731 = vmatpush1.msra.mxu0 %v16439_v6  ;;  %3705 = vmatprep.subr.mxu1 %v16440_v21  ;;  %v16480_v6 = vld [vmem:[#allocation196_spill] sm:$0xff]  ;;  %v16481_v21 = vld [vmem:[#allocation197_spill] sm:$0xff] }
 0x548   : > { %3732 = vmatprep.subr.mxu0 %v16441_v15  ;;  %3706 = vmatpush2.msra.mxu1 %v16442_v63  ;;  %v16482_v15 = vld [vmem:[#allocation198_spill] sm:$0xff]  ;;  %v16483_v63 = vld [vmem:[#allocation199_spill] sm:$0xff] }
 0x549   : > { %3733 = vmatpush1.msra.mxu0 %v16443_v24  ;;  %3707 = vmatprep.subr.mxu1 %v16444_v36  ;;  %v16484_v24 = vld [vmem:[#allocation200_spill] sm:$0xff]  ;;  %v16485_v36 = vld [vmem:[#allocation201_spill] sm:$0xff] }
 0x54a   : > { %3734 = vmatprep.subr.mxu0 %v16445_v22  ;;  %3708 = vmatpush2.msra.mxu1 %v16446_v23  ;;  %v16486_v22 = vld [vmem:[#allocation202_spill] sm:$0xff]  ;;  %v16487_v23 = vld [vmem:[#allocation203_spill] sm:$0xff] }
 0x54b   : > { %3735 = vmatpush1.msra.mxu0 %v16447_v16  ;;  %3709 = vmatprep.subr.mxu1 %v16448_v12  ;;  %v16488_v16 = vld [vmem:[#allocation204_spill] sm:$0xff]  ;;  %v16489_v12 = vld [vmem:[#allocation205_spill] sm:$0xff] }
 0x54c   : > { %3736 = vmatprep.subr.mxu0 %v16449_v44  ;;  %3710 = vmatpush2.msra.mxu1 %v16450_v34  ;;  %v16490_v44 = vld [vmem:[#allocation206_spill] sm:$0xff]  ;;  %v16491_v34 = vld [vmem:[#allocation207_spill] sm:$0xff] }
 0x54d   : > { %3737 = vmatpush1.msra.mxu0 %v16451_v53  ;;  %3711 = vmatprep.subr.mxu1 %v16452_v18  ;;  %v16492_v53 = vld [vmem:[#allocation208_spill] sm:$0xff]  ;;  %v16493_v18 = vld [vmem:[#allocation209_spill] sm:$0xff] }
 0x54e   : > { %3738 = vmatprep.subr.mxu0 %v16453_v7  ;;  %3712 = vmatpush2.msra.mxu1 %v16454_v8  ;;  %v16494_v7 = vld [vmem:[#allocation210_spill] sm:$0xff]  ;;  %v16495_v8 = vld [vmem:[#allocation211_spill] sm:$0xff] }
 0x54f   : > { %3739 = vmatpush1.msra.mxu0 %v16455_v48  ;;  %3714 = vmatmul.mubr.f32.vlgmr.msra.gmra.mxu1 %v16456_v47  ;;  %v16496_v48 = vld [vmem:[#allocation212_spill] sm:$0xff] }
 0x550   : > { %3740 = vmatprep.subr.mxu0 %v16457_v26  ;;  %3791 = vmatprep.subr.mxu1 %v16458_v60  ;;  %v16497_v26 = vld [vmem:[#allocation213_spill] sm:$0xff]  ;;  %v16498_v60 = vld [vmem:[#allocation214_spill] sm:$0xff] }
 0x551   : > { %3741 = vmatpush1.msra.mxu0 %v16459_v56  ;;  %3792 = vmatpush1.msra.mxu1 %v16460_v25  ;;  %v16499_v56 = vld [vmem:[#allocation215_spill] sm:$0xff]  ;;  %v16500_v25 = vld [vmem:[#allocation216_spill] sm:$0xff] }
 0x552   : > { %3855 = vmatprep.mubr.f32.mxu1 %v12973_v20  ;;  %3742 = vmatprep.subr.mxu0 %v16463_v52  ;;  %v16502_v52 = vld [vmem:[#allocation218_spill] sm:$0xff] }
 0x553   : > { %3793 = vmatprep.subr.mxu1 %v16464_v58  ;;  %3743 = vmatpush1.msra.mxu0 %v16465_v41  ;;  %v16503_v58 = vld [vmem:[#allocation219_spill] sm:$0xff]  ;;  %v16504_v41 = vld [vmem:[#allocation220_spill] sm:$0xff] }
 0x554   : > { %3794 = vmatpush1.msra.mxu1 %v16466_v28  ;;  %3744 = vmatprep.subr.mxu0 %v16467_v62  ;;  %v16505_v28 = vld [vmem:[#allocation221_spill] sm:$0xff]  ;;  %v16506_v62 = vld [vmem:[#allocation222_spill] sm:$0xff] }
 0x555   : > { %3795 = vmatprep.subr.mxu1 %v16468_v54  ;;  %3745 = vmatpush1.msra.mxu0 %v16469_v35  ;;  %v16507_v54 = vld [vmem:[#allocation223_spill] sm:$0xff]  ;;  %v16508_v35 = vld [vmem:[#allocation224_spill] sm:$0xff] }
 0x556   : > { %3796 = vmatpush1.msra.mxu1 %v16470_v19  ;;  %3746 = vmatprep.subr.mxu0 %v16471_v39  ;;  %v16509_v19 = vld [vmem:[#allocation225_spill] sm:$0xff]  ;;  %v16510_v39 = vld [vmem:[#allocation226_spill] sm:$0xff] }
 0x557   : > { %3797 = vmatprep.subr.mxu1 %v16472_v2  ;;  %3747 = vmatpush1.msra.mxu0 %v16473_v61  ;;  %v16511_v2 = vld [vmem:[#allocation227_spill] sm:$0xff]  ;;  %v16512_v61 = vld [vmem:[#allocation228_spill] sm:$0xff] }
 0x558   : > { %3798 = vmatpush1.msra.mxu1 %v16474_v10  ;;  %3748 = vmatprep.subr.mxu0 %v16475_v30  ;;  %v16513_v10 = vld [vmem:[#allocation229_spill] sm:$0xff]  ;;  %v16514_v30 = vld [vmem:[#allocation230_spill] sm:$0xff] }
 0x559   : > { %3799 = vmatprep.subr.mxu1 %v16476_v57  ;;  %3749 = vmatpush1.msra.mxu0 %v16477_v32  ;;  %v16515_v57 = vld [vmem:[#allocation231_spill] sm:$0xff]  ;;  %v16516_v32 = vld [vmem:[#allocation232_spill] sm:$0xff] }
 0x55a   : > { %3800 = vmatpush1.msra.mxu1 %v16478_v4  ;;  %3750 = vmatprep.subr.mxu0 %v16479_v38  ;;  %v16517_v4 = vld [vmem:[#allocation233_spill] sm:$0xff]  ;;  %v16518_v38 = vld [vmem:[#allocation234_spill] sm:$0xff] }
 0x55b   : > { %3801 = vmatprep.subr.mxu1 %v16480_v6  ;;  %3751 = vmatpush1.msra.mxu0 %v16481_v21  ;;  %v16519_v6 = vld [vmem:[#allocation235_spill] sm:$0xff]  ;;  %v16520_v21 = vld [vmem:[#allocation236_spill] sm:$0xff] }
 0x55c   : > { %3802 = vmatpush1.msra.mxu1 %v16482_v15  ;;  %3752 = vmatprep.subr.mxu0 %v16483_v63  ;;  %v16521_v15 = vld [vmem:[#allocation237_spill] sm:$0xff]  ;;  %v16522_v63 = vld [vmem:[#allocation238_spill] sm:$0xff] }
 0x55d   : > { %3803 = vmatprep.subr.mxu1 %v16484_v24  ;;  %3753 = vmatpush2.msra.mxu0 %v16485_v36  ;;  %v16523_v24 = vld [vmem:[#allocation239_spill] sm:$0xff]  ;;  %v16524_v36 = vld [vmem:[#allocation240_spill] sm:$0xff] }
 0x55e   : > { %3804 = vmatpush1.msra.mxu1 %v16486_v22  ;;  %3754 = vmatprep.subr.mxu0 %v16487_v23  ;;  %v16525_v22 = vld [vmem:[#allocation241_spill] sm:$0xff]  ;;  %v16526_v23 = vld [vmem:[#allocation242_spill] sm:$0xff] }
 0x55f   : > { %3805 = vmatprep.subr.mxu1 %v16488_v16  ;;  %3755 = vmatpush2.msra.mxu0 %v16489_v12  ;;  %v16527_v16 = vld [vmem:[#allocation243_spill] sm:$0xff]  ;;  %v16528_v12 = vld [vmem:[#allocation244_spill] sm:$0xff] }
 0x560   : > { %3806 = vmatpush1.msra.mxu1 %v16490_v44  ;;  %3756 = vmatprep.subr.mxu0 %v16491_v34  ;;  %v16529_v44 = vld [vmem:[#allocation245_spill] sm:$0xff]  ;;  %v16530_v34 = vld [vmem:[#allocation246_spill] sm:$0xff] }
 0x561   : > { %3807 = vmatprep.subr.mxu1 %v16492_v53  ;;  %3757 = vmatpush2.msra.mxu0 %v16493_v18  ;;  %v16531_v53 = vld [vmem:[#allocation247_spill] sm:$0xff]  ;;  %v16532_v18 = vld [vmem:[#allocation248_spill] sm:$0xff] }
 0x562   : > { %3808 = vmatpush1.msra.mxu1 %v16494_v7  ;;  %3758 = vmatprep.subr.mxu0 %v16495_v8  ;;  %v16533_v7 = vld [vmem:[#allocation249_spill] sm:$0xff]  ;;  %v16534_v8 = vld [vmem:[#allocation250_spill] sm:$0xff] }
 0x563   : > { %3809 = vmatprep.subr.mxu1 %v16496_v48  ;;  %3759 = vmatpush2.msra.mxu0 %v16497_v26  ;;  %v16535_v48 = vld [vmem:[#allocation251_spill] sm:$0xff]  ;;  %v16536_v26 = vld [vmem:[#allocation252_spill] sm:$0xff] }
 0x564   : > { %3810 = vmatpush1.msra.mxu1 %v16498_v60  ;;  %3760 = vmatprep.subr.mxu0 %v16499_v56  ;;  %v16537_v60 = vld [vmem:[#allocation253_spill] sm:$0xff]  ;;  %v16538_v56 = vld [vmem:[#allocation254_spill] sm:$0xff] }
 0x565   : > { %3811 = vmatprep.subr.mxu1 %v16500_v25  ;;  %3761 = vmatpush2.msra.mxu0 %v16501_v13  ;;  %v16539_v25 = vld [vmem:[#allocation255_spill] sm:$0xff]  ;;  %v16540_v13 = vld [vmem:[#allocation256_spill] sm:$0xff] }
 0x566   : > { %3812 = vmatpush1.msra.mxu1 %v16502_v52  ;;  %3762 = vmatprep.subr.mxu0 %v16503_v58  ;;  %v16541_v52 = vld [vmem:[#allocation257_spill] sm:$0xff]  ;;  %v16542_v58 = vld [vmem:[#allocation258_spill] sm:$0xff] }
 0x567   : > { %3813 = vmatprep.subr.mxu1 %v16504_v41  ;;  %3763 = vmatpush2.msra.mxu0 %v16505_v28  ;;  %v16543_v41 = vld [vmem:[#allocation259_spill] sm:$0xff]  ;;  %v2899_v28 = vpop.f32.mrf.mxu0 }
 0x568   : > { %3814 = vmatpush1.msra.mxu1 %v16506_v62  ;;  %3764 = vmatprep.subr.mxu0 %v16507_v54  ;;  %v16544_v62 = vld [vmem:[#allocation260_spill] sm:$0xff]  ;;  %v16545_v54 = vld [vmem:[#allocation261_spill] sm:$0xff] }
 0x569   : > { %3815 = vmatprep.subr.mxu1 %v16508_v35  ;;  %3765 = vmatpush2.msra.mxu0 %v16509_v19  ;;  %v16546_v35 = vld [vmem:[#allocation262_spill] sm:$0xff]  ;;  %v16547_v19 = vld [vmem:[#allocation13_spill] sm:$0xff] }
 0x56a   : > { %3816 = vmatpush1.msra.mxu1 %v16510_v39  ;;  %3766 = vmatprep.subr.mxu0 %v16511_v2  ;;  %v2970_v39 = vpop.f32.mrf.mxu1  ;;  %v16548_v2 = vld [vmem:[#allocation263_spill] sm:$0xff] }
 0x56b   : > { %3817 = vmatprep.subr.mxu1 %v16512_v61  ;;  %3767 = vmatpush2.msra.mxu0 %v16513_v10  ;;  %v16549_v61 = vld [vmem:[#allocation264_spill] sm:$0xff]  ;;  %v16550_v10 = vld [vmem:[#allocation265_spill] sm:$0xff] }
 0x56c   : > { %3818 = vmatpush1.msra.mxu1 %v16514_v30  ;;  %3768 = vmatprep.subr.mxu0 %v16515_v57  ;;  %v16551_v30 = vld [vmem:[#allocation266_spill] sm:$0xff]  ;;  %v2901_v57 = vpop.f32.mrf.mxu0 }
 0x56d   : > { %3819 = vmatprep.subr.mxu1 %v16516_v32  ;;  %3769 = vmatpush2.msra.mxu0 %v16517_v4  ;;  %v16552_v32 = vld [vmem:[#allocation267_spill] sm:$0xff]  ;;  %v16553_v4 = vld [vmem:[#allocation268_spill] sm:$0xff] }
 0x56e   : > { %3820 = vmatpush1.msra.mxu1 %v16518_v38  ;;  %3770 = vmatprep.subr.mxu0 %v16519_v6  ;;  %v16554_v38 = vld [vmem:[#allocation269_spill] sm:$0xff]  ;;  %v16555_v6 = vld [vmem:[#allocation270_spill] sm:$0xff] }
 0x56f   : > { %3821 = vmatprep.subr.mxu1 %v16520_v21  ;;  %3771 = vmatpush2.msra.mxu0 %v16521_v15  ;;  %v2972_v21 = vpop.f32.mrf.mxu1  ;;  %v3041_v15 = vpop.f32.mrf.mxu0 }
 0x570   : > { %3822 = vmatpush1.msra.mxu1 %v16522_v63  ;;  %3772 = vmatprep.subr.mxu0 %v16523_v24  ;;  %v16556_v63 = vld [vmem:[#allocation271_spill] sm:$0xff]  ;;  %v16557_v24 = vld [vmem:[#allocation272_spill] sm:$0xff] }
 0x571   : > { %3823 = vmatprep.subr.mxu1 %v16524_v36  ;;  %3773 = vmatpush2.msra.mxu0 %v16525_v22  ;;  %v2971_v36 = vadd.f32 %v2970_v39, %v2899_v28  ;;  %v16558_v22 = vld [vmem:[#allocation273_spill] sm:$0xff]  ;;  %v2973_v28 = vadd.f32 %v2972_v21, %v2901_v57  ;;  %v16580_v39 = vld [vmem:[#allocation294_spill] sm:$0xff] }
 0x572   : > { %3824 = vmatpush2.msra.mxu1 %v16526_v23  ;;  %3774 = vmatprep.subr.mxu0 %v16527_v16  ;;  %v16559_v23 = vld [vmem:[#allocation274_spill] sm:$0xff]  ;;  %v16560_v16 = vld [vmem:[#allocation275_spill] sm:$0xff]  ;;  %v16588_v21 = vld [vmem:[#allocation301_spill] sm:$0xff] }
 0x573   : > { %3825 = vmatprep.subr.mxu1 %v16528_v12  ;;  %3775 = vmatpush2.msra.mxu0 %v16529_v44  ;;  %v16561_v12 = vld [vmem:[#allocation276_spill] sm:$0xff] }
 0x574   : > { %3826 = vmatpush2.msra.mxu1 %v16530_v34  ;;  %3776 = vmatprep.subr.mxu0 %v16531_v53  ;;  %v3042_v34 = vadd.f32 %v3041_v15, %v2971_v36  ;;  %v16562_v53 = vld [vmem:[#allocation277_spill] sm:$0xff] }
 0x575   : > { %3827 = vmatprep.subr.mxu1 %v16532_v18  ;;  %3777 = vmatpush2.msra.mxu0 %v16533_v7  ;;  %v3112_v44 = vpop.f32.mrf.mxu1  ;;  %v16563_v18 = vld [vmem:[#allocation278_spill] sm:$0xff]  ;;  %v16564_v7 = vld [vmem:[#allocation279_spill] sm:$0xff] }
 0x576   : > { %3828 = vmatpush2.msra.mxu1 %v16534_v8  ;;  %3778 = vmatprep.subr.mxu0 %v16535_v48  ;;  %v16565_v8 = vld [vmem:[#allocation280_spill] sm:$0xff]  ;;  %v3113_v48 = vadd.f32 %v3112_v44, %v3042_v34  ;;  %v16597_v44 = vld [vmem:[#allocation309_spill] sm:$0xff]  ;;  %v16598_v34 = vld [vmem:[#allocation310_spill] sm:$0xff] }
 0x577   : > { %3829 = vmatprep.subr.mxu1 %v16536_v26  ;;  %3779 = vmatpush2.msra.mxu0 %v16537_v60  ;;  %v16566_v26 = vld [vmem:[#allocation11_spill] sm:$0xff] }
 0x578   : > { %3830 = vmatpush2.msra.mxu1 %v16538_v56  ;;  %3780 = vmatprep.subr.mxu0 %v16539_v25  ;;  %v13084_v60 = vsel %vm3558_vm2, %v16461_v31, %v16566_v26  ;;  %v3043_v56 = vpop.f32.mrf.mxu0  ;;  %v16569_v31 = vld [vmem:[#allocation283_spill] sm:$0xff]  ;;  %v16604_v26 = vld [vmem:[#allocation316_spill] sm:$0xff] }
 0x579   : > { %3831 = vmatprep.subr.mxu1 %v16540_v13  ;;  %3781 = vmatpush2.msra.mxu0 %v16541_v52  ;;  %v16570_v13 = vld [vmem:[#allocation284_spill] sm:$0xff]  ;;  %v16571_v52 = vld [vmem:[#allocation285_spill] sm:$0xff] }
 0x57a   : > { %3832 = vmatpush2.msra.mxu1 %v16542_v58  ;;  %3782 = vmatprep.subr.mxu0 %v16543_v41  ;;  %v16573_v58 = vld [vmem:[#allocation287_spill] sm:$0xff]  ;;  %v16575_v41 = vld [vmem:[#allocation289_spill] sm:$0xff] }
 0x57b   : > { %3833 = vmatprep.subr.mxu1 %v16544_v62  ;;  %3783 = vmatpush2.msra.mxu0 %v16545_v54  ;;  %v16578_v62 = vld [vmem:[#allocation292_spill] sm:$0xff]  ;;  %v16579_v54 = vld [vmem:[#allocation293_spill] sm:$0xff] }
 0x57c   : > { %3834 = vmatpush2.msra.mxu1 %v16546_v35  ;;  %3785 = vmatmul.mubr.f32.vlgmr.msra.gmra.mxu0 %v16547_v19  ;;  %v3114_v35 = vpop.f32.mrf.mxu1 }
 0x57d   : > { %3835 = vmatprep.subr.mxu1 %v16548_v2  ;;  %3884 = vmatprep.subr.mxu0 %v16549_v61  ;;  %v16581_v2 = vld [vmem:[#allocation295_spill] sm:$0xff]  ;;  %v3044_v61 = vadd.f32 %v3043_v56, %v2973_v28  ;;  %v16605_v56 = vld [vmem:[#allocation317_spill] sm:$0xff] }
 0x57e   : > { %3836 = vmatpush2.msra.mxu1 %v16550_v10  ;;  %3885 = vmatpush1.msra.mxu0 %v16551_v30  ;;  %v16582_v10 = vld [vmem:[#allocation296_spill] sm:$0xff]  ;;  %v16583_v30 = vld [vmem:[#allocation297_spill] sm:$0xff] }
 0x57f   : > { %3837 = vmatprep.subr.mxu1 %v16552_v32  ;;  %3886 = vmatprep.subr.mxu0 %v16553_v4  ;;  %v16584_v32 = vld [vmem:[#allocation298_spill] sm:$0xff]  ;;  %v3115_v57 = vadd.f32 %v3114_v35, %v3044_v61  ;;  %v16621_v28 = vld [vmem:[#allocation333_spill] sm:$0xff]  ;;  %v16628_v61 = vld [vmem:[#allocation340_spill] sm:$0xff] }
 0x580   : > { %3838 = vmatpush2.msra.mxu1 %v16554_v38  ;;  %3887 = vmatpush1.msra.mxu0 %v16555_v6  ;;  %v16585_v4 = vld [vmem:[#allocation14_spill] sm:$0xff]  ;;  %v16586_v38 = vld [vmem:[#allocation299_spill] sm:$0xff]  ;;  %v16587_v6 = vld [vmem:[#allocation300_spill] sm:$0xff] }
 0x581   : > { %3839 = vmatprep.subr.mxu1 %v16556_v63  ;;  %3888 = vmatprep.subr.mxu0 %v16557_v24  ;;  %v16589_v63 = vld [vmem:[#allocation302_spill] sm:$0xff]  ;;  %v16590_v24 = vld [vmem:[#allocation303_spill] sm:$0xff]  ;;  %v16625_v35 = vld [vmem:[#allocation337_spill] sm:$0xff] }
 0x582   : > { %3840 = vmatpush2.msra.mxu1 %v16558_v22  ;;  %3889 = vmatpush1.msra.mxu0 %v16559_v23  ;;  %v16592_v22 = vld [vmem:[#allocation304_spill] sm:$0xff]  ;;  %v16593_v23 = vld [vmem:[#allocation305_spill] sm:$0xff] }
 0x583   : > { %3841 = vmatprep.subr.mxu1 %v16560_v16  ;;  %3890 = vmatprep.subr.mxu0 %v16561_v12  ;;  %v16594_v16 = vld [vmem:[#allocation306_spill] sm:$0xff]  ;;  %v16596_v12 = vld [vmem:[#allocation308_spill] sm:$0xff] }
 0x584   : > { %3842 = vmatpush2.msra.mxu1 %v16562_v53  ;;  %3891 = vmatpush1.msra.mxu0 %v16563_v18  ;;  %v16599_v53 = vld [vmem:[#allocation311_spill] sm:$0xff]  ;;  %v16600_v18 = vld [vmem:[#allocation312_spill] sm:$0xff] }
 0x585   : > { %3843 = vmatprep.subr.mxu1 %v16564_v7  ;;  %3892 = vmatprep.subr.mxu0 %v12067_v9  ;;  %v3183_v9 = vpop.f32.mrf.mxu0  ;;  %v16601_v7 = vld [vmem:[#allocation313_spill] sm:$0xff] }
 0x586   : > { %3844 = vmatpush2.msra.mxu1 %v16565_v8  ;;  %3893 = vmatpush1.msra.mxu0 %v12084_v55  ;;  %v16567_v55 = vld [vmem:[#allocation282_spill] sm:$0xff]  ;;  %v13093_v25 = vadd.f32 %v3183_v9, %v3113_v48  ;;  %v16603_v48 = vld [vmem:[#allocation315_spill] sm:$0xff] }
 0x587   : > { %3926 = vmatprep.mubr.f32.mxu0 %v15924_v42  ;;  %3845 = vmatprep.subr.mxu1 %v12091_v50  ;;  %v16572_v50 = vld [vmem:[#allocation286_spill] sm:$0xff]  ;;  %v3185_v15 = vpop.f32.mrf.mxu0 }
 0x588   : > { %6183 = vmatmul.mubr.msk.f32.vlgmr.msra.gmra.mxu0 %vm2085_vm1, %v13084_v60  ;;  %6523 = vmatprep.subr.mxu0 %v12101_v14  ;;  %16568 = vst [vmem:[#allocation27_spill] sm:$0xff] %v13093_v25  ;;  %v16574_v14 = vld [vmem:[#allocation288_spill] sm:$0xff]  ;;  %v13127_v36 = vadd.f32 %v3185_v15, %v3115_v57  ;;  %v16602_v8 = vld [vmem:[#allocation314_spill] sm:$0xff]  ;;  %v16633_v57 = vld [vmem:[#allocation345_spill] sm:$0xff] }
 0x589   : > { %3846 = vmatpush2.msra.mxu1 %v12107_v46  ;;  %6524 = vmatpush3.msra.mxu0 %v16567_v55  ;;  %v16576_v46 = vld [vmem:[#allocation290_spill] sm:$0xff]  ;;  %v16607_v55 = vld [vmem:[#allocation319_spill] sm:$0xff]  ;;  %v16640_v15 = vld [vmem:[#allocation352_spill] sm:$0xff] }
 0x58a   : > { %4067 = vmatprep.mubr.f32.mxu0 %v12818_v27  ;;  %3847 = vmatprep.subr.mxu1 %v16569_v31  ;;  %v16577_v27 = vld [vmem:[#allocation291_spill] sm:$0xff]  ;;  %16591 = vst [vmem:[#allocation25_spill] sm:$0xff] %v13127_v36  ;;  %v16606_v9 = vld [vmem:[#allocation318_spill] sm:$0xff]  ;;  %v16608_v31 = vld [vmem:[#allocation320_spill] sm:$0xff] }
 0x58b   : > { %6525 = vmatprep.subr.mxu0 %v16570_v13  ;;  %3848 = vmatpush2.msra.mxu1 %v16571_v52  ;;  %v16609_v13 = vld [vmem:[#allocation321_spill] sm:$0xff]  ;;  %v16610_v52 = vld [vmem:[#allocation322_spill] sm:$0xff] }
 0x58c   : > { %6526 = vmatpush3.msra.mxu0 %v16572_v50  ;;  %3849 = vmatprep.subr.mxu1 %v16573_v58  ;;  %v16612_v50 = vld [vmem:[#allocation324_spill] sm:$0xff]  ;;  %v16613_v58 = vld [vmem:[#allocation325_spill] sm:$0xff] }
 0x58d   : > { %6527 = vmatprep.subr.mxu0 %v16574_v14  ;;  %3850 = vmatpush2.msra.mxu1 %v16575_v41  ;;  %v16614_v14 = vld [vmem:[#allocation326_spill] sm:$0xff]  ;;  %v16616_v41 = vld [vmem:[#allocation328_spill] sm:$0xff] }
 0x58e   : > { %6528 = vmatpush3.msra.mxu0 %v16576_v46  ;;  %5126 = vrot.lane.b32.xlu0 %v13093_v25, %s7718_s30  ;;  %v16617_v46 = vld [vmem:[#allocation329_spill] sm:$0xff] }
 0x58f   : > { %5246 = vrot.lane.b32.xlu1 %v13093_v25, %s7715_s27  ;;  %3851 = vmatprep.subr.mxu1 %v16577_v27  ;;  %v16618_v27 = vld [vmem:[#allocation330_spill] sm:$0xff] }
 0x590   : > { %6529 = vmatprep.subr.mxu0 %v16578_v62  ;;  %3852 = vmatpush2.msra.mxu1 %v16579_v54  ;;  %v16622_v62 = vld [vmem:[#allocation334_spill] sm:$0xff]  ;;  %v16624_v54 = vld [vmem:[#allocation336_spill] sm:$0xff] }
 0x591   : > { %6530 = vmatpush3.msra.mxu0 %v16580_v39  ;;  %3853 = vmatprep.subr.mxu1 %v16581_v2  ;;  %v16626_v39 = vld [vmem:[#allocation338_spill] sm:$0xff]  ;;  %v16627_v2 = vld [vmem:[#allocation339_spill] sm:$0xff] }
 0x592   : > { %6531 = vmatprep.subr.mxu0 %v16582_v10  ;;  %3854 = vmatpush2.msra.mxu1 %v16583_v30  ;;  %v16629_v10 = vld [vmem:[#allocation341_spill] sm:$0xff]  ;;  %v16631_v30 = vld [vmem:[#allocation343_spill] sm:$0xff] }
 0x593   : > { %6532 = vmatpush3.msra.mxu0 %v16584_v32  ;;  %5086 = vrot.lane.b32.xlu0 %v13093_v25, %s7719_s11  ;;  %v16632_v32 = vld [vmem:[#allocation344_spill] sm:$0xff] }
 0x594   : > { %5206 = vrot.lane.b32.xlu1 %v13093_v25, %s7716_s28  ;;  %3856 = vmatmul.mubr.f32.vlgmr.msra.gmra.mxu1 %v16585_v4 }
 0x595   : > { %6488 = vmatprep.subr.mxu1 %v16586_v38  ;;  %6533 = vmatprep.subr.mxu0 %v16587_v6  ;;  %v16636_v38 = vld [vmem:[#allocation348_spill] sm:$0xff]  ;;  %v16637_v6 = vld [vmem:[#allocation349_spill] sm:$0xff] }
 0x596   : > { %6489 = vmatpush3.msra.mxu1 %v16588_v21  ;;  %3997 = vmatprep.mubr.f32.mxu1 %v12759_v17  ;;  %v16595_v17 = vld [vmem:[#allocation307_spill] sm:$0xff] }
 0x597   : > { %6534 = vmatpush3.msra.mxu0 %v16589_v63  ;;  %6490 = vmatprep.subr.mxu1 %v16590_v24  ;;  %v16639_v21 = vld [vmem:[#allocation351_spill] sm:$0xff]  ;;  %v16641_v63 = vld [vmem:[#allocation353_spill] sm:$0xff]  ;;  %v16642_v24 = vld [vmem:[#allocation354_spill] sm:$0xff] }
 0x598   : > { %6535 = vmatprep.subr.mxu0 %v16592_v22  ;;  %6491 = vmatpush3.msra.mxu1 %v16593_v23  ;;  %v16643_v22 = vld [vmem:[#allocation355_spill] sm:$0xff]  ;;  %v16644_v23 = vld [vmem:[#allocation356_spill] sm:$0xff] }
 0x599   : > { %6536 = vmatpush3.msra.mxu0 %v16594_v16  ;;  %5046 = vrot.lane.b32.xlu0 %v13093_v25, %s7720_s12  ;;  %v16645_v16 = vld [vmem:[#allocation357_spill] sm:$0xff] }
 0x59a   : > { %5248 = vrot.lane.b32.xlu1 %v13127_v36, %s7715_s27  ;;  %6492 = vmatprep.subr.mxu1 %v16595_v17  ;;  %v16646_v17 = vld [vmem:[#allocation358_spill] sm:$0xff] }
 0x59b   : > { %6537 = vmatprep.subr.mxu0 %v16596_v12  ;;  %6493 = vmatpush3.msra.mxu1 %v16597_v44  ;;  %v16647_v12 = vld [vmem:[#allocation359_spill] sm:$0xff]  ;;  %v16648_v44 = vld [vmem:[#allocation360_spill] sm:$0xff] }
 0x59c   : > { %6538 = vmatpush3.msra.mxu0 %v16598_v34  ;;  %6494 = vmatprep.subr.mxu1 %v16599_v53  ;;  %v16649_v34 = vld [vmem:[#allocation361_spill] sm:$0xff]  ;;  %v16650_v53 = vld [vmem:[#allocation362_spill] sm:$0xff] }
 0x59d   : > { %6539 = vmatprep.subr.mxu0 %v16600_v18  ;;  %6495 = vmatpush3.msra.mxu1 %v16601_v7  ;;  %v16651_v18 = vld [vmem:[#allocation363_spill] sm:$0xff]  ;;  %v16654_v7 = vld [vmem:[#allocation366_spill] sm:$0xff] }
 0x59e   : > { %6540 = vmatpush3.msra.mxu0 %v16602_v8  ;;  %5286 = vrot.lane.b32.xlu0 %v13093_v25, %s7714_s26 }
 0x59f   : > { %5408 = vrot.lane.b32.xlu1 %v13127_v36, %s7711_s23  ;;  %6496 = vmatprep.subr.mxu1 %v16603_v48  ;;  %v13237_v48 = vld [vmem:[%s15491_s5 + $0x730] sm:$0xff] }
 0x5a0   : > { %6541 = vmatprep.subr.mxu0 %v12332_v1  ;;  %6497 = vmatpush3.msra.mxu1 %v16604_v26  ;;  %v16611_v1 = vld [vmem:[#allocation323_spill] sm:$0xff]  ;;  %v13243_v26 = vld [vmem:[%s15491_s5 + $0x9b8] sm:$0xff] }
 0x5a1   : > { %6542 = vmatpush3.msra.mxu0 %v16605_v56  ;;  %6498 = vmatprep.subr.mxu1 %v16606_v9  ;;  %v13257_v56 = vld [vmem:[%s15491_s5 + $0xb20] sm:$0xff]  ;;  %v13263_v9 = vld [vmem:[%s15491_s5 + $0x718] sm:$0xff] }
 0x5a2   : > { %6543 = vmatprep.subr.mxu0 %v16607_v55  ;;  %6499 = vmatpush3.msra.mxu1 %v16608_v31  ;;  %v13269_v55 = vld [vmem:[%s15491_s5 + $0x9a0] sm:$0xff] }
 0x5a3   : > { %6544 = vmatpush3.msra.mxu0 %v16609_v13  ;;  %5406 = vrot.lane.b32.xlu0 %v13093_v25, %s7711_s23  ;;  %v13275_v31 = vld [vmem:[%s15491_s5 + $0x880] sm:$0xff]  ;;  %v13281_v13 = vld [vmem:[%s15491_s5 + $0xb08] sm:$0xff] }
 0x5a4   : > { %5208 = vrot.lane.b32.xlu1 %v13127_v36, %s7716_s28  ;;  %6500 = vmatprep.subr.mxu1 %v16610_v52  ;;  %v13287_v52 = vld [vmem:[%s15491_s5 + $0x700] sm:$0xff] }
 0x5a5   : > { %6545 = vmatprep.subr.mxu0 %v16611_v1  ;;  %6501 = vmatpush3.msra.mxu1 %v16612_v50  ;;  %v13293_v1 = vld [vmem:[%s15491_s5 + $0x988] sm:$0xff] }
 0x5a6   : > { %6546 = vmatpush3.msra.mxu0 %v12394_v0  ;;  %6502 = vmatprep.subr.mxu1 %v12403_v49  ;;  %v16619_v0 = vld [vmem:[#allocation331_spill] sm:$0xff]  ;;  %v16620_v49 = vld [vmem:[#allocation332_spill] sm:$0xff] }
 0x5a7   : > { %6547 = vmatprep.subr.mxu0 %v16613_v58  ;;  %6503 = vmatpush3.msra.mxu1 %v16614_v14  ;;  %v13299_v50 = vld [vmem:[%s15491_s5 + $0x868] sm:$0xff]  ;;  %v13305_v14 = vld [vmem:[%s15491_s5 + $0xaf0] sm:$0xff] }
 0x5a8   : > { %6548 = vmatpush3.msra.mxu0 %v12423_v3  ;;  %5366 = vrot.lane.b32.xlu0 %v13093_v25, %s16615_s18  ;;  %v16623_v3 = vld [vmem:[#allocation335_spill] sm:$0xff] }
 0x5a9   : > { %5368 = vrot.lane.b32.xlu1 %v13127_v36, %s16615_s18  ;;  %6504 = vmatprep.subr.mxu1 %v16616_v41  ;;  %v13311_v41 = vld [vmem:[%s15491_s5 + $0x6e8] sm:$0xff] }
 0x5aa   : > { %6549 = vmatprep.subr.mxu0 %v16617_v46  ;;  %6505 = vmatpush3.msra.mxu1 %v16618_v27  ;;  %v13317_v46 = vld [vmem:[%s15491_s5 + $0x970] sm:$0xff] }
 0x5ab   : > { %6550 = vmatpush3.msra.mxu0 %v16619_v0  ;;  %6506 = vmatprep.subr.mxu1 %v16620_v49  ;;  %v13323_v27 = vld [vmem:[%s15491_s5 + $0x850] sm:$0xff]  ;;  %v13331_v49 = vld [vmem:[%s15491_s5 + $0xad8] sm:$0xff] }
 0x5ac   : > { %6551 = vmatprep.subr.mxu0 %v16621_v28  ;;  %6507 = vmatpush3.msra.mxu1 %v16622_v62  ;;  %v13337_v28 = vld [vmem:[%s15491_s5 + $0x6d0] sm:$0xff]  ;;  %v13343_v62 = vld [vmem:[%s15491_s5 + $0x958] sm:$0xff] }
 0x5ad   : > { %6552 = vmatpush3.msra.mxu0 %v16623_v3  ;;  %5128 = vrot.lane.b32.xlu0 %v13127_v36, %s7718_s30  ;;  %v13349_v3 = vld [vmem:[%s15491_s5 + $0x838] sm:$0xff] }
 0x5ae   : > { %6508 = vmatprep.subr.mxu1 %v12479_v29  ;;  %6553 = vmatprep.subr.mxu0 %v16624_v54  ;;  %v16630_v29 = vld [vmem:[#allocation342_spill] sm:$0xff] }
 0x5af   : > { %6509 = vmatpush3.msra.mxu1 %v16625_v35  ;;  %6554 = vmatpush3.msra.mxu0 %v16626_v39  ;;  %v6409_v35 = vpop.f32.mrf.mxu0  ;;  %v13355_v39 = vld [vmem:[%s15491_s5 + $0xac0] sm:$0xff] }
 0x5b0   : > { %6510 = vmatprep.subr.mxu1 %v16627_v2  ;;  %4068 = vmatmul.mubr.f32.vlgmr.msra.gmra.mxu0 %v16456_v47  ;;  %v16634_v47 = vld [vmem:[#allocation346_spill] sm:$0xff]  ;;  %v13361_v2 = vld [vmem:[%s15491_s5 + $0x6b8] sm:$0xff] }
 0x5b1   : > { %6593 = vmatprep.subr.mxu0 %v12512_v51  ;;  %6511 = vmatpush3.msra.mxu1 %v16628_v61  ;;  %v16635_v51 = vld [vmem:[#allocation347_spill] sm:$0xff]  ;;  %v13367_v61 = vld [vmem:[%s15491_s5 + $0x940] sm:$0xff] }
 0x5b2   : > { %6594 = vmatpush3.msra.mxu0 %v16629_v10  ;;  %4207 = vmatprep.mubr.f32.mxu0 %v12973_v20  ;;  %v16638_v20 = vld [vmem:[#allocation350_spill] sm:$0xff] }
 0x5b3   : > { %5088 = vrot.lane.b32.xlu0 %v13127_v36, %s7719_s11  ;;  %6512 = vmatprep.subr.mxu1 %v16630_v29  ;;  %v13373_v10 = vld [vmem:[%s15491_s5 + $0x820] sm:$0xff]  ;;  %v13379_v29 = vld [vmem:[%s15491_s5 + $0xaa8] sm:$0xff] }
 0x5b4   : > { %6595 = vmatprep.subr.mxu0 %v16631_v30  ;;  %6513 = vmatpush3.msra.mxu1 %v16632_v32  ;;  %v13385_v30 = vld [vmem:[%s15491_s5 + $0x6a0] sm:$0xff]  ;;  %v13391_v32 = vld [vmem:[%s15491_s5 + $0x928] sm:$0xff] }
 0x5b5   : > { %6596 = vmatpush3.msra.mxu0 %v16633_v57  ;;  %6514 = vmatprep.subr.mxu1 %v16634_v47  ;;  %v13397_v57 = vld [vmem:[%s15491_s5 + $0x808] sm:$0xff]  ;;  %v6410_v47 = vpop.f32.mrf.mxu0 }
 0x5b6   : > { %6597 = vmatprep.subr.mxu0 %v16635_v51  ;;  %6515 = vmatpush3.msra.mxu1 %v16636_v38  ;;  %v13403_v51 = vld [vmem:[%s15491_s5 + $0xa90] sm:$0xff]  ;;  %v13409_v38 = vld [vmem:[%s15491_s5 + $0x688] sm:$0xff] }
 0x5b7   : > { %6598 = vmatpush3.msra.mxu0 %v16637_v6  ;;  %5048 = vrot.lane.b32.xlu0 %v13127_v36, %s7720_s12 }
 0x5b8   : > { %6516 = vmatprep.subr.mxu1 %v16638_v20  ;;  %6599 = vmatprep.subr.mxu0 %v16639_v21  ;;  %v13417_v20 = vld [vmem:[%s15491_s5 + $0x910] sm:$0xff] }
 0x5b9   : > { %6517 = vmatpush3.msra.mxu1 %v16640_v15  ;;  %6600 = vmatpush3.msra.mxu0 %v16641_v63  ;;  %v13423_v21 = vld [vmem:[%s15491_s5 + $0x7f0] sm:$0xff]  ;;  %v6479_v15 = vpop.f32.mrf.mxu0 }
 0x5ba   : > { %6518 = vmatprep.subr.mxu1 %v12607_v5  ;;  %6601 = vmatprep.subr.mxu0 %v16642_v24  ;;  %v13219_v5 = vpop.f32.mrf.mxu1  ;;  %v7330_v63 = vld [vmem:[%s15491_s5 + $0x170] sm:$0xff]  ;;  %v6411_v24 = vadd.f32 %v6410_v47, %v6409_v35  ;;  %v7342_v47 = vld [vmem:[%s15491_s5 + $0x128] sm:$0xff] }
 0x5bb   : > { %6519 = vmatpush3.msra.mxu1 %v16643_v22  ;;  %6602 = vmatpush3.msra.mxu0 %v16644_v23  ;;  %v13433_v22 = vld [vmem:[%s15491_s5 + $0x670] sm:$0xff]  ;;  %v7332_v23 = vld [vmem:[%s15491_s5 + $0x168] sm:$0xff] }
 0x5bc   : > { %5288 = vrot.lane.b32.xlu0 %v13127_v36, %s7714_s26  ;;  %3998 = vmatmul.mubr.f32.vlgmr.msra.gmra.mxu1 %v16412_v40  ;;  %v16652_v40 = vld [vmem:[#allocation364_spill] sm:$0xff]  ;;  %v13229_v8 = vpop.f32.mrf.mxu1 }
 0x5bd   : > { %6558 = vmatprep.subr.mxu1 %v12632_v43  ;;  %6603 = vmatprep.subr.mxu0 %v16645_v16  ;;  %v16653_v43 = vld [vmem:[#allocation365_spill] sm:$0xff]  ;;  %v6376_v6 = vadd.f32 %v13229_v8, %v13219_v5  ;;  %v16656_v16 = vld [vmem:[#allocation16_spill] sm:$0xff] }
 0x5be   : > { %6559 = vmatpush3.msra.mxu1 %v16646_v17  ;;  %4137 = vmatprep.mubr.f32.mxu1 %v12926_v45  ;;  %v16655_v45 = vld [vmem:[#allocation367_spill] sm:$0xff]  ;;  %v16658_v17 = vunpack.i.l.bf16 %v16656_v16 }
 0x5bf   : > { %6604 = vmatpush3.msra.mxu0 %v16647_v12  ;;  %6560 = vmatprep.subr.mxu1 %v16648_v44  ;;  %v13451_v44 = vld [vmem:[%s15491_s5 + $0x7d8] sm:$0xff] }
 0x5c0   : > { %6605 = vmatprep.subr.mxu0 %v16649_v34  ;;  %6561 = vmatpush3.msra.mxu1 %v16650_v53  ;;  %v3325_v34 = vadd.f32 %v6411_v24, %v6376_v6  ;;  %v7334_v53 = vld [vmem:[%s15491_s5 + $0x158] sm:$0xff]  ;;  %v13496_v6 = vld [vmem:[%s15491_s5 + $0x628] sm:$0xff]  ;;  %v7346_v24 = vld [vmem:[%s15491_s5 + $0x110] sm:$0xff] }
 0x5c1   : > { %6606 = vmatpush3.msra.mxu0 %v16651_v18  ;;  %6562 = vmatprep.subr.mxu1 %v16652_v40  ;;  %v13460_v18 = vld [vmem:[%s15491_s5 + $0x658] sm:$0xff]  ;;  %v6480_v40 = vpop.f32.mrf.mxu0 }
 0x5c2   : > { %6607 = vmatprep.subr.mxu0 %v16653_v43  ;;  %6563 = vmatpush3.msra.mxu1 %v16654_v7  ;;  %v7336_v43 = vld [vmem:[%s15491_s5 + $0x150] sm:$0xff]  ;;  %v13469_v7 = vld [vmem:[%s15491_s5 + $0x7c0] sm:$0xff]  ;;  %v6481_v35 = vadd.f32 %v6480_v40, %v6479_v15  ;;  %v7354_v40 = vld [vmem:[%s15491_s5 + $0xd8] sm:$0xff] }
 0x5c3   : > { %6608 = vmatpush3.msra.mxu0 %v16655_v45  ;;  %6564 = vmatprep.subr.mxu1 %v12709_v33  ;;  %v13249_v33 = vld [vmem:[%s15491_s5 + $0x898] sm:$0xff]  ;;  %v7338_v45 = vld [vmem:[%s15491_s5 + $0x140] sm:$0xff]  ;;  %v13505_v15 = vld [vmem:[%s15491_s5 + $0x790] sm:$0xff] }
 0x5c4   : > { %6609 = vmatprep.subr.mxu0 %v12715_v59  ;;  %6565 = vmatpush3.msra.mxu1 %v13237_v48  ;;  %v13252_v59 = vpop.f32.mrf.mxu1 }
 0x5c5   : > { %6610 = vmatpush3.msra.mxu0 %v13243_v26  ;;  %6566 = vmatprep.subr.mxu1 %v13249_v33 }
 0x5c6   : > { %6611 = vmatprep.subr.mxu0 %v13257_v56  ;;  %6567 = vmatpush3.msra.mxu1 %v13263_v9  ;;  %v6445_v58 = vpop.f32.mrf.mxu1 }
 0x5c7   : > { %6612 = vmatpush3.msra.mxu0 %v13269_v55  ;;  %6568 = vmatprep.subr.mxu1 %v13275_v31  ;;  %v6446_v12 = vadd.f32 %v6445_v58, %v13252_v59  ;;  %v13478_v59 = vld [vmem:[%s15491_s5 + $0x640] sm:$0xff]  ;;  %v7340_v58 = vld [vmem:[%s15491_s5 + $0x138] sm:$0xff] }
 0x5c8   : > { %6613 = vmatprep.subr.mxu0 %v13281_v13  ;;  %6569 = vmatpush3.msra.mxu1 %v13287_v52 }
 0x5c9   : > { %6614 = vmatpush3.msra.mxu0 %v13293_v1  ;;  %6570 = vmatprep.subr.mxu1 %v13299_v50  ;;  %v3395_v8 = vadd.f32 %v6446_v12, %v3325_v34  ;;  %v7349_v12 = vld [vmem:[%s15491_s5 + $0xf8] sm:$0xff]  ;;  %v13531_v34 = vld [vmem:[%s15491_s5 + $0xc70] sm:$0xff] }
 0x5ca   : > { %6615 = vmatprep.subr.mxu0 %v13305_v14  ;;  %6571 = vmatpush3.msra.mxu1 %v13311_v41 }
 0x5cb   : > { %6616 = vmatpush3.msra.mxu0 %v13317_v46  ;;  %6572 = vmatprep.subr.mxu1 %v13323_v27  ;;  %v13326_v0 = vpop.f32.mrf.mxu1 }
 0x5cc   : > { %6617 = vmatprep.subr.mxu0 %v13331_v49  ;;  %6573 = vmatpush3.msra.mxu1 %v13337_v28 }
 0x5cd   : > { %6618 = vmatpush3.msra.mxu0 %v13343_v62  ;;  %6574 = vmatprep.subr.mxu1 %v13349_v3  ;;  %v6805_v54 = vpop.f32.mrf.mxu1 }
 0x5ce   : > { %6619 = vmatprep.subr.mxu0 %v13355_v39  ;;  %6575 = vmatpush3.msra.mxu1 %v13361_v2  ;;  %v13487_v54 = vld [vmem:[%s15491_s5 + $0x7a8] sm:$0xff] }
 0x5cf   : > { %6620 = vmatpush3.msra.mxu0 %v13367_v61  ;;  %6576 = vmatprep.subr.mxu1 %v13373_v10 }
 0x5d0   : > { %6621 = vmatprep.subr.mxu0 %v13379_v29  ;;  %6577 = vmatpush3.msra.mxu1 %v13385_v30 }
 0x5d1   : > { %6622 = vmatpush3.msra.mxu0 %v13391_v32  ;;  %6578 = vmatprep.subr.mxu1 %v13397_v57 }
 0x5d2   : > { %6623 = vmatprep.subr.mxu0 %v13403_v51  ;;  %6579 = vmatpush3.msra.mxu1 %v13409_v38 }
 0x5d3   : > { %6624 = vmatpush3.msra.mxu0 %v13417_v20  ;;  %6580 = vmatprep.subr.mxu1 %v13423_v21 }
 0x5d4   : > { %4208 = vmatmul.mubr.f32.vlgmr.msra.gmra.mxu0 %v16585_v4  ;;  %4323 = vmatprep.subr.mxu0 %v7330_v63  ;;  %v16657_v4 = vunpack.i.h.bf16 %v16656_v16  ;;  %v7344_v63 = vld [vmem:[%s15491_s5 + $0x120] sm:$0xff]  ;;  %v3465_v16 = vadd.f32 %v6481_v35, %v3395_v8  ;;  %v13574_v35 = vld [vmem:[%s15491_s5 + $0xc28] sm:$0xff] }
 0x5d5   : > { %6581 = vmatpush3.msra.mxu1 %v13433_v22  ;;  %4324 = vmatpush1.msra.mxu0 %v7332_v23  ;;  %v13514_v23 = vld [vmem:[%s15491_s5 + $0x610] sm:$0xff]  ;;  %v13561_v8 = vld [vmem:[%s15491_s5 + $0xc40] sm:$0xff] }
 0x5d6   : > { %v13444_v5 = vsel %vm4303_vm3, %v16658_v17, %v16657_v4  ;;  %6582 = vmatprep.subr.mxu1 %v13451_v44  ;;  %4325 = vmatprep.subr.mxu0 %v7334_v53  ;;  %v7348_v4 = vld [vmem:[%s15491_s5 + $0x108] sm:$0xff]  ;;  %v13522_v17 = vadd.f32 %v13326_v0, %v3465_v16  ;;  %v7352_v0 = vld [vmem:[%s15491_s5 + $0xe0] sm:$0xff]  ;;  %v13544_v53 = vld [vmem:[%s15491_s5 + $0xc58] sm:$0xff] }
 0x5d7   : > { %4387 = vmatprep.mubr.f32.mxu0 %v13444_v5  ;;  %6583 = vmatpush3.msra.mxu1 %v13460_v18  ;;  %v7363_v16 = vld [vmem:[%s15491_s5 + $0x90] sm:$0xff] }
 0x5d8   : > { %4326 = vmatpush1.msra.mxu0 %v7336_v43  ;;  %6584 = vmatprep.subr.mxu1 %v13469_v7  ;;  %16659 = vst [vmem:[#allocation29_spill] sm:$0xff] %v13522_v17  ;;  %v7355_v43 = vld [vmem:[%s15491_s5 + $0xc8] sm:$0xff] }
 0x5d9   : > { %4327 = vmatprep.subr.mxu0 %v7338_v45  ;;  %6585 = vmatpush3.msra.mxu1 %v13478_v59  ;;  %v7357_v45 = vld [vmem:[%s15491_s5 + $0xc0] sm:$0xff] }
 0x5da   : > { %4328 = vmatpush1.msra.mxu0 %v7340_v58  ;;  %6586 = vmatprep.subr.mxu1 %v13487_v54  ;;  %v7358_v58 = vld [vmem:[%s15491_s5 + $0xb0] sm:$0xff] }
 0x5db   : > { %4329 = vmatprep.subr.mxu0 %v7342_v47  ;;  %6587 = vmatpush3.msra.mxu1 %v13496_v6  ;;  %v7360_v47 = vld [vmem:[%s15491_s5 + $0xa8] sm:$0xff] }
 0x5dc   : > { %4330 = vmatpush1.msra.mxu0 %v7344_v63  ;;  %6588 = vmatprep.subr.mxu1 %v13505_v15  ;;  %v7361_v63 = vld [vmem:[%s15491_s5 + $0x98] sm:$0xff] }
 0x5dd   : > { %4331 = vmatprep.subr.mxu0 %v7346_v24  ;;  %6589 = vmatpush3.msra.mxu1 %v13514_v23  ;;  %v13591_v24 = vld [vmem:[%s15491_s5 + $0xc10] sm:$0xff] }
 0x5de   : > { %4332 = vmatpush1.msra.mxu0 %v7348_v4  ;;  %4138 = vmatmul.mubr.f32.vlgmr.msra.gmra.mxu1 %v16547_v19  ;;  %v7351_v19 = vld [vmem:[%s15491_s5 + $0xf0] sm:$0xff]  ;;  %16660 = vst [vmem:[#allocation26_spill] sm:$0xff] %v13591_v24  ;;  %v7364_v4 = vld [vmem:[%s15491_s5 + $0x80] sm:$0xff] }
 0x5df   : > { %6806 = vmatprep.subr.mxu1 %v15924_v42  ;;  %4333 = vmatprep.subr.mxu0 %v7349_v12  ;;  %v7365_v12 = vld [vmem:[%s15491_s5 + $0x470] sm:$0xff] }
 0x5e0   : > { %6807 = vmatpush3.msra.mxu1 %v13531_v34  ;;  %4334 = vmatpush1.msra.mxu0 %v7351_v19  ;;  %v7366_v19 = vld [vmem:[%s15491_s5 + $0x78] sm:$0xff] }
 0x5e1   : > { %6808 = vmatprep.subr.mxu1 %v15924_v42  ;;  %4335 = vmatprep.subr.mxu0 %v7352_v0  ;;  %v7367_v0 = vld [vmem:[%s15491_s5 + $0x468] sm:$0xff] }
 0x5e2   : > { %6809 = vmatpush3.msra.mxu1 %v13544_v53  ;;  %4336 = vmatpush1.msra.mxu0 %v7354_v40 }
 0x5e3   : > { %5250 = vrot.lane.b32.xlu0 %v13522_v17, %s7715_s27  ;;  %5130 = vrot.lane.b32.xlu1 %v13522_v17, %s7718_s30 }
 0x5e4   : > { %6810 = vmatprep.subr.mxu1 %v15924_v42  ;;  %4337 = vmatprep.subr.mxu0 %v7355_v43 }
 0x5e5   : > { %6811 = vmatpush3.msra.mxu1 %v13561_v8  ;;  %4338 = vmatpush1.msra.mxu0 %v7357_v45 }
 0x5e6   : > { %6812 = vmatprep.subr.mxu1 %v15924_v42  ;;  %4339 = vmatprep.subr.mxu0 %v7358_v58  ;;  %v7368_v58 = vld [vmem:[%s15491_s5 + $0x68] sm:$0xff] }
 0x5e7   : > { %6813 = vmatpush3.msra.mxu1 %v13574_v35  ;;  %4340 = vmatpush1.msra.mxu0 %v7360_v47  ;;  %v7369_v47 = vld [vmem:[%s15491_s5 + $0x458] sm:$0xff] }
 0x5e8   : > { %5410 = vrot.lane.b32.xlu0 %v13522_v17, %s7711_s23  ;;  %5090 = vrot.lane.b32.xlu1 %v13522_v17, %s7719_s11 }
 0x5e9   : > { %6814 = vmatprep.subr.mxu1 %v15924_v42  ;;  %4341 = vmatprep.subr.mxu0 %v7361_v63  ;;  %v7370_v63 = vld [vmem:[%s15491_s5 + $0x60] sm:$0xff] }
 0x5ea   : > { %6815 = vmatpush3.msra.mxu1 %v13591_v24  ;;  %6816 = vmatprep.mubr.msk.f32.mxu1 %vm7727_vm8, %v15924_v42 }
 0x5eb   : > { %4342 = vmatpush1.msra.mxu0 %v7363_v16  ;;  %6817 = vmatmul.mubr.msk.f32.vlgmr.msra.gmra.mxu1 %vm2085_vm1, %v13084_v60  ;;  %v16661_v60 = vld [vmem:[#allocation19_spill] sm:$0xff]  ;;  %v7371_v16 = vld [vmem:[%s15491_s5 + $0x450] sm:$0xff] }
 0x5ec   : > { %4343 = vmatprep.subr.mxu0 %v7364_v4  ;;  %4394 = vmatprep.subr.mxu1 %v7365_v12  ;;  %v16662_v40 = vunpack.i.h.bf16 %v16661_v60  ;;  %v16663_v43 = vunpack.i.l.bf16 %v16661_v60  ;;  %v7372_v4 = vld [vmem:[%s15491_s5 + $0x50] sm:$0xff]  ;;  %v7373_v12 = vld [vmem:[%s15491_s5 + $0x440] sm:$0xff]  ;;  %v7376_v60 = vld [vmem:[%s15491_s5 + $0x38] sm:$0xff] }
 0x5ed   : > { %4344 = vmatpush1.msra.mxu0 %v7366_v19  ;;  %4395 = vmatpush1.msra.mxu1 %v7367_v0  ;;  %v7374_v19 = vld [vmem:[%s15491_s5 + $0x48] sm:$0xff]  ;;  %v7375_v0 = vld [vmem:[%s15491_s5 + $0x438] sm:$0xff] }
 0x5ee   : > { %v13618_v45 = vsel %vm4303_vm3, %v16663_v43, %v16662_v40  ;;  %5210 = vrot.lane.b32.xlu0 %v13522_v17, %s7716_s28  ;;  %5050 = vrot.lane.b32.xlu1 %v13522_v17, %s7720_s12  ;;  %v7377_v40 = vld [vmem:[%s15491_s5 + $0x428] sm:$0xff]  ;;  %v7378_v43 = vld [vmem:[%s15491_s5 + $0x30] sm:$0xff] }
 0x5ef   : > { %4458 = vmatprep.mubr.f32.mxu1 %v13618_v45  ;;  %4345 = vmatprep.subr.mxu0 %v7368_v58  ;;  %v7379_v58 = vld [vmem:[%s15491_s5 + $0x420] sm:$0xff] }
 0x5f0   : > { %4396 = vmatprep.subr.mxu1 %v7369_v47  ;;  %4346 = vmatpush1.msra.mxu0 %v7370_v63  ;;  %v7380_v47 = vld [vmem:[%s15491_s5 + $0x20] sm:$0xff]  ;;  %v7381_v63 = vld [vmem:[%s15491_s5 + $0x410] sm:$0xff] }
 0x5f1   : > { %4397 = vmatpush1.msra.mxu1 %v7371_v16  ;;  %4347 = vmatprep.subr.mxu0 %v7372_v4  ;;  %v7382_v16 = vld [vmem:[%s15491_s5 + $0x18] sm:$0xff]  ;;  %v7383_v4 = vld [vmem:[%s15491_s5 + $0x408] sm:$0xff] }
 0x5f2   : > { %4398 = vmatprep.subr.mxu1 %v7373_v12  ;;  %4348 = vmatpush1.msra.mxu0 %v7374_v19  ;;  %v7384_v12 = vld [vmem:[%s15491_s5 + $0x8] sm:$0xff]  ;;  %v7385_v19 = vld [vmem:[%s15491_s5 + $0x3f8] sm:$0xff] }
 0x5f3   : > { %4399 = vmatpush1.msra.mxu1 %v7375_v0  ;;  %5370 = vrot.lane.b32.xlu0 %v13522_v17, %s16615_s18  ;;  %v7386_v0 = vld [vmem:[%s15491_s5] sm:$0xff] }
 0x5f4   : > { %5290 = vrot.lane.b32.xlu1 %v13522_v17, %s7714_s26  ;;  %4349 = vmatprep.subr.mxu0 %v7376_v60  ;;  %v7387_v60 = vld [vmem:[%s15491_s5 + $0x3f0] sm:$0xff] }
 0x5f5   : > { %4400 = vmatprep.subr.mxu1 %v7377_v40  ;;  %4350 = vmatpush1.msra.mxu0 %v7378_v43  ;;  %v7388_v40 = vld [vmem:[%s15491_s5 + $0x2f0] sm:$0xff]  ;;  %v7389_v43 = vld [vmem:[%s15491_s5 + $0x3e0] sm:$0xff] }
 0x5f6   : > { %4401 = vmatpush1.msra.mxu1 %v7379_v58  ;;  %4351 = vmatprep.subr.mxu0 %v7380_v47  ;;  %v7390_v58 = vld [vmem:[%s15491_s5 + $0x2e8] sm:$0xff]  ;;  %v7391_v47 = vld [vmem:[%s15491_s5 + $0x3d8] sm:$0xff] }
 0x5f7   : > { %4402 = vmatprep.subr.mxu1 %v7381_v63  ;;  %4352 = vmatpush1.msra.mxu0 %v7382_v16  ;;  %v7392_v63 = vld [vmem:[%s15491_s5 + $0x2d8] sm:$0xff]  ;;  %v7393_v16 = vld [vmem:[%s15491_s5 + $0x3c8] sm:$0xff] }
 0x5f8   : > { %4403 = vmatpush1.msra.mxu1 %v7383_v4  ;;  %4353 = vmatprep.subr.mxu0 %v7384_v12  ;;  %v7394_v4 = vld [vmem:[%s15491_s5 + $0x2d0] sm:$0xff]  ;;  %v7395_v12 = vld [vmem:[%s15491_s5 + $0x3c0] sm:$0xff] }
 0x5f9   : > { %4404 = vmatprep.subr.mxu1 %v7385_v19  ;;  %4354 = vmatpush1.msra.mxu0 %v7386_v0  ;;  %v7396_v19 = vld [vmem:[%s15491_s5 + $0x2c0] sm:$0xff]  ;;  %v7397_v0 = vld [vmem:[%s15491_s5 + $0x3b0] sm:$0xff] }
 0x5fa   : > { %4405 = vmatpush1.msra.mxu1 %v7387_v60  ;;  %4355 = vmatprep.subr.mxu0 %v7388_v40  ;;  %v7398_v60 = vld [vmem:[%s15491_s5 + $0x2b8] sm:$0xff]  ;;  %v7399_v40 = vld [vmem:[%s15491_s5 + $0x3a8] sm:$0xff] }
 0x5fb   : > { %4406 = vmatprep.subr.mxu1 %v7389_v43  ;;  %4356 = vmatpush2.msra.mxu0 %v7390_v58  ;;  %v7400_v43 = vld [vmem:[%s15491_s5 + $0x2a8] sm:$0xff]  ;;  %v7401_v58 = vld [vmem:[%s15491_s5 + $0x398] sm:$0xff] }
 0x5fc   : > { %4407 = vmatpush1.msra.mxu1 %v7391_v47  ;;  %4357 = vmatprep.subr.mxu0 %v7392_v63  ;;  %v7402_v47 = vld [vmem:[%s15491_s5 + $0x2a0] sm:$0xff]  ;;  %v7403_v63 = vld [vmem:[%s15491_s5 + $0x390] sm:$0xff] }
 0x5fd   : > { %4408 = vmatprep.subr.mxu1 %v7393_v16  ;;  %4358 = vmatpush2.msra.mxu0 %v7394_v4  ;;  %v7404_v16 = vld [vmem:[%s15491_s5 + $0x290] sm:$0xff]  ;;  %v7405_v4 = vld [vmem:[%s15491_s5 + $0x380] sm:$0xff] }
 0x5fe   : > { %4409 = vmatpush1.msra.mxu1 %v7395_v12  ;;  %4359 = vmatprep.subr.mxu0 %v7396_v19  ;;  %v7406_v12 = vld [vmem:[%s15491_s5 + $0x288] sm:$0xff]  ;;  %v7407_v19 = vld [vmem:[%s15491_s5 + $0x378] sm:$0xff] }
 0x5ff   : > { %4410 = vmatprep.subr.mxu1 %v7397_v0  ;;  %4360 = vmatpush2.msra.mxu0 %v7398_v60  ;;  %v7408_v0 = vld [vmem:[%s15491_s5 + $0x278] sm:$0xff]  ;;  %v7409_v60 = vld [vmem:[%s15491_s5 + $0x368] sm:$0xff] }
 0x600   : > { %4411 = vmatpush1.msra.mxu1 %v7399_v40  ;;  %4361 = vmatprep.subr.mxu0 %v7400_v43  ;;  %v7410_v40 = vld [vmem:[%s15491_s5 + $0x270] sm:$0xff]  ;;  %v7411_v43 = vld [vmem:[%s15491_s5 + $0x360] sm:$0xff] }
 0x601   : > { %4412 = vmatprep.subr.mxu1 %v7401_v58  ;;  %4362 = vmatpush2.msra.mxu0 %v7402_v47  ;;  %v7412_v58 = vld [vmem:[%s15491_s5 + $0x260] sm:$0xff]  ;;  %v7413_v47 = vld [vmem:[%s15491_s5 + $0x350] sm:$0xff] }
 0x602   : > { %4413 = vmatpush1.msra.mxu1 %v7403_v63  ;;  %4363 = vmatprep.subr.mxu0 %v7404_v16  ;;  %v7414_v63 = vld [vmem:[%s15491_s5 + $0x258] sm:$0xff]  ;;  %v7415_v16 = vld [vmem:[%s15491_s5 + $0x348] sm:$0xff] }
 0x603   : > { %4414 = vmatprep.subr.mxu1 %v7405_v4  ;;  %4364 = vmatpush2.msra.mxu0 %v7406_v12  ;;  %v7416_v4 = vld [vmem:[%s15491_s5 + $0x248] sm:$0xff]  ;;  %v7417_v12 = vld [vmem:[%s15491_s5 + $0x338] sm:$0xff] }
 0x604   : > { %4415 = vmatpush1.msra.mxu1 %v7407_v19  ;;  %4365 = vmatprep.subr.mxu0 %v7408_v0  ;;  %v7418_v19 = vld [vmem:[%s15491_s5 + $0x240] sm:$0xff]  ;;  %v7419_v0 = vld [vmem:[%s15491_s5 + $0x330] sm:$0xff] }
 0x605   : > { %4416 = vmatprep.subr.mxu1 %v7409_v60  ;;  %4366 = vmatpush2.msra.mxu0 %v7410_v40  ;;  %v7420_v60 = vld [vmem:[%s15491_s5 + $0x230] sm:$0xff]  ;;  %v7421_v40 = vld [vmem:[%s15491_s5 + $0x320] sm:$0xff] }
 0x606   : > { %4417 = vmatpush1.msra.mxu1 %v7411_v43  ;;  %4367 = vmatprep.subr.mxu0 %v7412_v58  ;;  %v7422_v43 = vld [vmem:[%s15491_s5 + $0x228] sm:$0xff]  ;;  %v7423_v58 = vld [vmem:[%s15491_s5 + $0x318] sm:$0xff] }
 0x607   : > { %4418 = vmatprep.subr.mxu1 %v7413_v47  ;;  %4368 = vmatpush2.msra.mxu0 %v7414_v63  ;;  %v7424_v47 = vld [vmem:[%s15491_s5 + $0x218] sm:$0xff]  ;;  %v7425_v63 = vld [vmem:[%s15491_s5 + $0x308] sm:$0xff] }
 0x608   : > { %4419 = vmatpush1.msra.mxu1 %v7415_v16  ;;  %4369 = vmatprep.subr.mxu0 %v7416_v4  ;;  %v7426_v16 = vld [vmem:[%s15491_s5 + $0x210] sm:$0xff]  ;;  %v7427_v4 = vld [vmem:[%s15491_s5 + $0x300] sm:$0xff] }
 0x609   : > { %4420 = vmatprep.subr.mxu1 %v7417_v12  ;;  %4370 = vmatpush2.msra.mxu0 %v7418_v19  ;;  %v7428_v12 = vld [vmem:[%s15491_s5 + $0x200] sm:$0xff]  ;;  %v7429_v19 = vld [vmem:[%s15491_s5 + $0x5f0] sm:$0xff] }
 0x60a   : > { %4421 = vmatpush1.msra.mxu1 %v7419_v0  ;;  %4371 = vmatprep.subr.mxu0 %v7420_v60  ;;  %v7430_v0 = vld [vmem:[%s15491_s5 + $0x1f8] sm:$0xff]  ;;  %v7431_v60 = vld [vmem:[%s15491_s5 + $0x5e8] sm:$0xff] }
 0x60b   : > { %4422 = vmatprep.subr.mxu1 %v7421_v40  ;;  %4372 = vmatpush2.msra.mxu0 %v7422_v43  ;;  %v7432_v40 = vld [vmem:[%s15491_s5 + $0x1e8] sm:$0xff]  ;;  %v7433_v43 = vld [vmem:[%s15491_s5 + $0x5d8] sm:$0xff] }
 0x60c   : > { %4423 = vmatpush1.msra.mxu1 %v7423_v58  ;;  %4373 = vmatprep.subr.mxu0 %v7424_v47  ;;  %v7434_v58 = vld [vmem:[%s15491_s5 + $0x1e0] sm:$0xff]  ;;  %v7435_v47 = vld [vmem:[%s15491_s5 + $0x5d0] sm:$0xff] }
 0x60d   : > { %4424 = vmatprep.subr.mxu1 %v7425_v63  ;;  %4374 = vmatpush2.msra.mxu0 %v7426_v16  ;;  %v7436_v63 = vld [vmem:[%s15491_s5 + $0x1d0] sm:$0xff]  ;;  %v7437_v16 = vld [vmem:[%s15491_s5 + $0x5c0] sm:$0xff] }
 0x60e   : > { %4425 = vmatpush1.msra.mxu1 %v7427_v4  ;;  %4375 = vmatprep.subr.mxu0 %v7428_v12  ;;  %v7438_v4 = vld [vmem:[%s15491_s5 + $0x1c8] sm:$0xff]  ;;  %v7439_v12 = vld [vmem:[%s15491_s5 + $0x5b8] sm:$0xff] }
 0x60f   : > { %4426 = vmatprep.subr.mxu1 %v7429_v19  ;;  %4376 = vmatpush2.msra.mxu0 %v7430_v0  ;;  %v7440_v19 = vld [vmem:[%s15491_s5 + $0x1b8] sm:$0xff]  ;;  %v7441_v0 = vld [vmem:[%s15491_s5 + $0x5a8] sm:$0xff]  ;;  %v3715_v36 = vpop.f32.mrf.mxu1 }
 0x610   : > { %4427 = vmatpush2.msra.mxu1 %v7431_v60  ;;  %4377 = vmatprep.subr.mxu0 %v7432_v40  ;;  %v7442_v60 = vld [vmem:[%s15491_s5 + $0x1b0] sm:$0xff]  ;;  %v7443_v40 = vld [vmem:[%s15491_s5 + $0x5a0] sm:$0xff] }
 0x611   : > { %4428 = vmatprep.subr.mxu1 %v7433_v43  ;;  %4378 = vmatpush2.msra.mxu0 %v7434_v58  ;;  %v7444_v43 = vld [vmem:[%s15491_s5 + $0x1a0] sm:$0xff]  ;;  %v7445_v58 = vld [vmem:[%s15491_s5 + $0x590] sm:$0xff]  ;;  %v14310_v11 = vpop.f32.mrf.mxu1 }
 0x612   : > { %4429 = vmatpush2.msra.mxu1 %v7435_v47  ;;  %4379 = vmatprep.subr.mxu0 %v7436_v63  ;;  %v7446_v47 = vld [vmem:[%s15491_s5 + $0x198] sm:$0xff]  ;;  %v7447_v63 = vld [vmem:[%s15491_s5 + $0x588] sm:$0xff] }
 0x613   : > { %4430 = vmatprep.subr.mxu1 %v7437_v16  ;;  %4380 = vmatpush2.msra.mxu0 %v7438_v4  ;;  %v7448_v16 = vld [vmem:[%s15491_s5 + $0x188] sm:$0xff]  ;;  %v7449_v4 = vld [vmem:[%s15491_s5 + $0x578] sm:$0xff] }
 0x614   : > { %4431 = vmatpush2.msra.mxu1 %v7439_v12  ;;  %4381 = vmatprep.subr.mxu0 %v7440_v19  ;;  %v7450_v12 = vld [vmem:[%s15491_s5 + $0x180] sm:$0xff]  ;;  %v7451_v19 = vld [vmem:[%s15491_s5 + $0x570] sm:$0xff] }
 0x615   : > { %4432 = vmatprep.subr.mxu1 %v7441_v0  ;;  %4382 = vmatpush2.msra.mxu0 %v7442_v60  ;;  %v16664_v0 = vld [vmem:[#allocation18_spill] sm:$0xff] }
 0x616   : > { %4433 = vmatpush2.msra.mxu1 %v7443_v40  ;;  %4383 = vmatprep.subr.mxu0 %v7444_v43  ;;  %v7452_v60 = vld [vmem:[%s15491_s5 + $0x560] sm:$0xff]  ;;  %v7453_v40 = vld [vmem:[%s15491_s5 + $0x770] sm:$0xff]  ;;  %v7454_v43 = vld [vmem:[%s15491_s5 + $0x558] sm:$0xff] }
 0x617   : > { %4434 = vmatprep.subr.mxu1 %v7445_v58  ;;  %4384 = vmatpush2.msra.mxu0 %v7446_v47  ;;  %v7455_v58 = vld [vmem:[%s15491_s5 + $0x768] sm:$0xff]  ;;  %v16665_v47 = vld [vmem:[#allocation17_spill] sm:$0xff] }
 0x618   : > { %4435 = vmatpush2.msra.mxu1 %v7447_v63  ;;  %4385 = vmatprep.subr.mxu0 %v7448_v16  ;;  %v16666_v63 = vunpack.i.h.bf16 %v16665_v47  ;;  %v16667_v16 = vunpack.i.l.bf16 %v16665_v47  ;;  %v7462_v47 = vld [vmem:[%s15491_s5 + $0x528] sm:$0xff] }
 0x619   : > { %4436 = vmatprep.subr.mxu1 %v7449_v4  ;;  %4386 = vmatpush2.msra.mxu0 %v7450_v12  ;;  %v7456_v12 = vld [vmem:[%s15491_s5 + $0x548] sm:$0xff] }
 0x61a   : > { %4437 = vmatpush2.msra.mxu1 %v7451_v19  ;;  %4388 = vmatmul.mubr.f32.vlgmr.msra.gmra.mxu0 %v16664_v0  ;;  %v13899_v4 = vsel %vm4303_vm3, %v16667_v16, %v16666_v63  ;;  %v7457_v19 = vld [vmem:[%s15491_s5 + $0x758] sm:$0xff] }
 0x61b   : > { %4438 = vmatprep.subr.mxu1 %v7452_v60  ;;  %4465 = vmatprep.subr.mxu0 %v7453_v40  ;;  %v7458_v60 = vld [vmem:[%s15491_s5 + $0x540] sm:$0xff]  ;;  %v7459_v40 = vld [vmem:[%s15491_s5 + $0x750] sm:$0xff]  ;;  %v7463_v63 = vld [vmem:[%s15491_s5 + $0x738] sm:$0xff] }
 0x61c   : > { %4439 = vmatpush2.msra.mxu1 %v7454_v43  ;;  %4466 = vmatpush1.msra.mxu0 %v7455_v58  ;;  %v7460_v43 = vld [vmem:[%s15491_s5 + $0x530] sm:$0xff]  ;;  %v7461_v58 = vld [vmem:[%s15491_s5 + $0x740] sm:$0xff]  ;;  %v7464_v16 = vld [vmem:[%s15491_s5 + $0x518] sm:$0xff] }
 0x61d   : > { %4529 = vmatprep.mubr.f32.mxu0 %v13899_v4  ;;  %4440 = vmatprep.subr.mxu1 %v7456_v12  ;;  %v7465_v12 = vld [vmem:[%s15491_s5 + $0x728] sm:$0xff] }
 0x61e   : > { %4467 = vmatprep.subr.mxu0 %v7457_v19  ;;  %4441 = vmatpush2.msra.mxu1 %v7458_v60  ;;  %v7466_v19 = vld [vmem:[%s15491_s5 + $0x510] sm:$0xff]  ;;  %v7467_v60 = vld [vmem:[%s15491_s5 + $0x720] sm:$0xff] }
 0x61f   : > { %4468 = vmatpush1.msra.mxu0 %v7459_v40  ;;  %4442 = vmatprep.subr.mxu1 %v7460_v43  ;;  %v7468_v40 = vld [vmem:[%s15491_s5 + $0x500] sm:$0xff]  ;;  %v7469_v43 = vld [vmem:[%s15491_s5 + $0x710] sm:$0xff] }
 0x620   : > { %4469 = vmatprep.subr.mxu0 %v7461_v58  ;;  %4443 = vmatpush2.msra.mxu1 %v7462_v47  ;;  %v7470_v58 = vld [vmem:[%s15491_s5 + $0x4f8] sm:$0xff]  ;;  %v7471_v47 = vld [vmem:[%s15491_s5 + $0x708] sm:$0xff] }
 0x621   : > { %4470 = vmatpush1.msra.mxu0 %v7463_v63  ;;  %4444 = vmatprep.subr.mxu1 %v7464_v16  ;;  %v7472_v63 = vld [vmem:[%s15491_s5 + $0x4e8] sm:$0xff]  ;;  %v7473_v16 = vld [vmem:[%s15491_s5 + $0x6f8] sm:$0xff] }
 0x622   : > { %4471 = vmatprep.subr.mxu0 %v7465_v12  ;;  %4445 = vmatpush2.msra.mxu1 %v7466_v19  ;;  %v7474_v12 = vld [vmem:[%s15491_s5 + $0x4e0] sm:$0xff]  ;;  %v7475_v19 = vld [vmem:[%s15491_s5 + $0x6f0] sm:$0xff] }
 0x623   : > { %4472 = vmatpush1.msra.mxu0 %v7467_v60  ;;  %4446 = vmatprep.subr.mxu1 %v7468_v40  ;;  %v7476_v60 = vld [vmem:[%s15491_s5 + $0x4d0] sm:$0xff]  ;;  %v7477_v40 = vld [vmem:[%s15491_s5 + $0x6e0] sm:$0xff] }
 0x624   : > { %4473 = vmatprep.subr.mxu0 %v7469_v43  ;;  %4447 = vmatpush2.msra.mxu1 %v7470_v58  ;;  %v7478_v43 = vld [vmem:[%s15491_s5 + $0x4c8] sm:$0xff]  ;;  %v7479_v58 = vld [vmem:[%s15491_s5 + $0x6d8] sm:$0xff] }
 0x625   : > { %4474 = vmatpush1.msra.mxu0 %v7471_v47  ;;  %4448 = vmatprep.subr.mxu1 %v7472_v63  ;;  %v7480_v47 = vld [vmem:[%s15491_s5 + $0x4b8] sm:$0xff]  ;;  %v7481_v63 = vld [vmem:[%s15491_s5 + $0x6c8] sm:$0xff] }
 0x626   : > { %4475 = vmatprep.subr.mxu0 %v7473_v16  ;;  %4449 = vmatpush2.msra.mxu1 %v7474_v12  ;;  %v7482_v16 = vld [vmem:[%s15491_s5 + $0x4b0] sm:$0xff]  ;;  %v7483_v12 = vld [vmem:[%s15491_s5 + $0x6c0] sm:$0xff] }
 0x627   : > { %4476 = vmatpush1.msra.mxu0 %v7475_v19  ;;  %4450 = vmatprep.subr.mxu1 %v7476_v60  ;;  %v7484_v19 = vld [vmem:[%s15491_s5 + $0x4a0] sm:$0xff]  ;;  %v7485_v60 = vld [vmem:[%s15491_s5 + $0x6b0] sm:$0xff] }
 0x628   : > { %4477 = vmatprep.subr.mxu0 %v7477_v40  ;;  %4451 = vmatpush2.msra.mxu1 %v7478_v43  ;;  %v7486_v40 = vld [vmem:[%s15491_s5 + $0x498] sm:$0xff]  ;;  %v7487_v43 = vld [vmem:[%s15491_s5 + $0x6a8] sm:$0xff] }
 0x629   : > { %4478 = vmatpush1.msra.mxu0 %v7479_v58  ;;  %4452 = vmatprep.subr.mxu1 %v7480_v47  ;;  %v7488_v58 = vld [vmem:[%s15491_s5 + $0x488] sm:$0xff]  ;;  %v7489_v47 = vld [vmem:[%s15491_s5 + $0x698] sm:$0xff] }
 0x62a   : > { %4479 = vmatprep.subr.mxu0 %v7481_v63  ;;  %4453 = vmatpush2.msra.mxu1 %v7482_v16  ;;  %v7490_v63 = vld [vmem:[%s15491_s5 + $0x480] sm:$0xff]  ;;  %v7491_v16 = vld [vmem:[%s15491_s5 + $0x690] sm:$0xff] }
 0x62b   : > { %4480 = vmatpush1.msra.mxu0 %v7483_v12  ;;  %4454 = vmatprep.subr.mxu1 %v7484_v19  ;;  %v16668_v12 = vld [vmem:[#allocation20_spill] sm:$0xff]  ;;  %v14011_v19 = vpop.permute.xlu0 %4299 }
 0x62c   : > { %4481 = vmatprep.subr.mxu0 %v7485_v60  ;;  %4455 = vmatpush2.msra.mxu1 %v7486_v40  ;;  %v7492_v60 = vld [vmem:[%s15491_s5 + $0x680] sm:$0xff]  ;;  %v7493_v40 = vld [vmem:[%s15491_s5 + $0xa70] sm:$0xff] }
 0x62d   : > { %4482 = vmatpush1.msra.mxu0 %v7487_v43  ;;  %4456 = vmatprep.subr.mxu1 %v7488_v58  ;;  %v7494_v43 = vld [vmem:[%s15491_s5 + $0x678] sm:$0xff]  ;;  %v7495_v58 = vld [vmem:[%s15491_s5 + $0xa68] sm:$0xff] }
 0x62e   : > { %4483 = vmatprep.subr.mxu0 %v7489_v47  ;;  %4457 = vmatpush2.msra.mxu1 %v7490_v63  ;;  %v16669_v47 = vld [vmem:[#allocation22_spill] sm:$0xff] }
 0x62f   : > { %4484 = vmatpush1.msra.mxu0 %v7491_v16  ;;  %4459 = vmatmul.mubr.f32.vlgmr.msra.gmra.mxu1 %v16668_v12  ;;  %v14028_v63 = vsel %vm4303_vm3, %v16669_v47, %v14011_v19  ;;  %v7496_v16 = vld [vmem:[%s15491_s5 + $0x668] sm:$0xff]  ;;  %v7501_v47 = vld [vmem:[%s15491_s5 + $0xa40] sm:$0xff] }
 0x630   : > { %4485 = vmatprep.subr.mxu0 %v7492_v60  ;;  %4536 = vmatprep.subr.mxu1 %v7493_v40  ;;  %v7497_v60 = vld [vmem:[%s15491_s5 + $0xa58] sm:$0xff]  ;;  %v7498_v40 = vld [vmem:[%s15491_s5 + $0x660] sm:$0xff] }
 0x631   : > { %4486 = vmatpush1.msra.mxu0 %v7494_v43  ;;  %4537 = vmatpush1.msra.mxu1 %v7495_v58  ;;  %v7499_v43 = vld [vmem:[%s15491_s5 + $0xa50] sm:$0xff] }
 0x632   : > { %4600 = vmatprep.mubr.f32.mxu1 %v14028_v63  ;;  %4487 = vmatprep.subr.mxu0 %v7496_v16  ;;  %v7500_v58 = vld [vmem:[%s15491_s5 + $0x650] sm:$0xff]  ;;  %v7502_v16 = vld [vmem:[%s15491_s5 + $0x648] sm:$0xff] }
 0x633   : > { %4538 = vmatprep.subr.mxu1 %v7497_v60  ;;  %4488 = vmatpush1.msra.mxu0 %v7498_v40  ;;  %v7503_v60 = vld [vmem:[%s15491_s5 + $0xa38] sm:$0xff] }
 0x634   : > { %4539 = vmatpush1.msra.mxu1 %v7499_v43  ;;  %4489 = vmatprep.subr.mxu0 %v7500_v58  ;;  %v7504_v40 = vld [vmem:[%s15491_s5 + $0x638] sm:$0xff]  ;;  %v7505_v43 = vld [vmem:[%s15491_s5 + $0xa28] sm:$0xff]  ;;  %v7506_v58 = vld [vmem:[%s15491_s5 + $0x630] sm:$0xff] }
 0x635   : > { %4540 = vmatprep.subr.mxu1 %v7501_v47  ;;  %4490 = vmatpush1.msra.mxu0 %v7502_v16  ;;  %v7507_v47 = vld [vmem:[%s15491_s5 + $0xa20] sm:$0xff] }
 0x636   : > { %4541 = vmatpush1.msra.mxu1 %v7503_v60  ;;  %4491 = vmatprep.subr.mxu0 %v7504_v40  ;;  %v7508_v16 = vld [vmem:[%s15491_s5 + $0x620] sm:$0xff]  ;;  %v7509_v60 = vld [vmem:[%s15491_s5 + $0xa10] sm:$0xff]  ;;  %v7510_v40 = vld [vmem:[%s15491_s5 + $0x618] sm:$0xff] }
 0x637   : > { %4542 = vmatprep.subr.mxu1 %v7505_v43  ;;  %4492 = vmatpush1.msra.mxu0 %v7506_v58  ;;  %v7511_v43 = vld [vmem:[%s15491_s5 + $0xa08] sm:$0xff] }
 0x638   : > { %4543 = vmatpush1.msra.mxu1 %v7507_v47  ;;  %4493 = vmatprep.subr.mxu0 %v7508_v16  ;;  %v7512_v58 = vld [vmem:[%s15491_s5 + $0x608] sm:$0xff]  ;;  %v7513_v47 = vld [vmem:[%s15491_s5 + $0x9f8] sm:$0xff]  ;;  %v7514_v16 = vld [vmem:[%s15491_s5 + $0x600] sm:$0xff] }
 0x639   : > { %4544 = vmatprep.subr.mxu1 %v7509_v60  ;;  %4494 = vmatpush1.msra.mxu0 %v7510_v40  ;;  %v7515_v60 = vld [vmem:[%s15491_s5 + $0x9f0] sm:$0xff] }
 0x63a   : > { %4545 = vmatpush1.msra.mxu1 %v7511_v43  ;;  %4495 = vmatprep.subr.mxu0 %v7512_v58  ;;  %v7516_v40 = vld [vmem:[%s15491_s5 + $0x8f0] sm:$0xff]  ;;  %v7517_v43 = vld [vmem:[%s15491_s5 + $0x9e0] sm:$0xff]  ;;  %v7518_v58 = vld [vmem:[%s15491_s5 + $0x8e8] sm:$0xff] }
 0x63b   : > { %4546 = vmatprep.subr.mxu1 %v7513_v47  ;;  %4496 = vmatpush1.msra.mxu0 %v7514_v16  ;;  %v7519_v47 = vld [vmem:[%s15491_s5 + $0x9d8] sm:$0xff] }
 0x63c   : > { %4547 = vmatpush1.msra.mxu1 %v7515_v60  ;;  %4497 = vmatprep.subr.mxu0 %v7516_v40  ;;  %v7520_v16 = vld [vmem:[%s15491_s5 + $0x8d8] sm:$0xff]  ;;  %v7521_v60 = vld [vmem:[%s15491_s5 + $0x9c8] sm:$0xff]  ;;  %v7522_v40 = vld [vmem:[%s15491_s5 + $0x8d0] sm:$0xff] }
 0x63d   : > { %4548 = vmatprep.subr.mxu1 %v7517_v43  ;;  %4498 = vmatpush2.msra.mxu0 %v7518_v58  ;;  %v7523_v43 = vld [vmem:[%s15491_s5 + $0x9c0] sm:$0xff] }
 0x63e   : > { %4549 = vmatpush1.msra.mxu1 %v7519_v47  ;;  %4499 = vmatprep.subr.mxu0 %v7520_v16  ;;  %v7524_v58 = vld [vmem:[%s15491_s5 + $0x8c0] sm:$0xff]  ;;  %v7525_v47 = vld [vmem:[%s15491_s5 + $0x9b0] sm:$0xff]  ;;  %v7526_v16 = vld [vmem:[%s15491_s5 + $0x8b8] sm:$0xff] }
 0x63f   : > { %4550 = vmatprep.subr.mxu1 %v7521_v60  ;;  %4500 = vmatpush2.msra.mxu0 %v7522_v40  ;;  %v7527_v60 = vld [vmem:[%s15491_s5 + $0x9a8] sm:$0xff] }
 0x640   : > { %4551 = vmatpush1.msra.mxu1 %v7523_v43  ;;  %4501 = vmatprep.subr.mxu0 %v7524_v58  ;;  %v7528_v40 = vld [vmem:[%s15491_s5 + $0x8a8] sm:$0xff]  ;;  %v7529_v43 = vld [vmem:[%s15491_s5 + $0x998] sm:$0xff]  ;;  %v7530_v58 = vld [vmem:[%s15491_s5 + $0x8a0] sm:$0xff] }
 0x641   : > { %4552 = vmatprep.subr.mxu1 %v7525_v47  ;;  %4502 = vmatpush2.msra.mxu0 %v7526_v16  ;;  %v7531_v47 = vld [vmem:[%s15491_s5 + $0x990] sm:$0xff] }
 0x642   : > { %4553 = vmatpush1.msra.mxu1 %v7527_v60  ;;  %4503 = vmatprep.subr.mxu0 %v7528_v40  ;;  %v7532_v16 = vld [vmem:[%s15491_s5 + $0x890] sm:$0xff]  ;;  %v7533_v60 = vld [vmem:[%s15491_s5 + $0x980] sm:$0xff]  ;;  %v7534_v40 = vld [vmem:[%s15491_s5 + $0x888] sm:$0xff] }
 0x643   : > { %4554 = vmatprep.subr.mxu1 %v7529_v43  ;;  %4504 = vmatpush2.msra.mxu0 %v7530_v58  ;;  %v7535_v43 = vld [vmem:[%s15491_s5 + $0x978] sm:$0xff] }
 0x644   : > { %4555 = vmatpush1.msra.mxu1 %v7531_v47  ;;  %4505 = vmatprep.subr.mxu0 %v7532_v16  ;;  %v7536_v58 = vld [vmem:[%s15491_s5 + $0x878] sm:$0xff]  ;;  %v7537_v47 = vld [vmem:[%s15491_s5 + $0x968] sm:$0xff]  ;;  %v7538_v16 = vld [vmem:[%s15491_s5 + $0x870] sm:$0xff] }
 0x645   : > { %4556 = vmatprep.subr.mxu1 %v7533_v60  ;;  %4506 = vmatpush2.msra.mxu0 %v7534_v40  ;;  %v7539_v60 = vld [vmem:[%s15491_s5 + $0x960] sm:$0xff] }
 0x646   : > { %4557 = vmatpush1.msra.mxu1 %v7535_v43  ;;  %4507 = vmatprep.subr.mxu0 %v7536_v58  ;;  %v7540_v40 = vld [vmem:[%s15491_s5 + $0x860] sm:$0xff]  ;;  %v7541_v43 = vld [vmem:[%s15491_s5 + $0x950] sm:$0xff]  ;;  %v7542_v58 = vld [vmem:[%s15491_s5 + $0x858] sm:$0xff] }
 0x647   : > { %4558 = vmatprep.subr.mxu1 %v7537_v47  ;;  %4508 = vmatpush2.msra.mxu0 %v7538_v16  ;;  %v7543_v47 = vld [vmem:[%s15491_s5 + $0x948] sm:$0xff] }
 0x648   : > { %4559 = vmatpush1.msra.mxu1 %v7539_v60  ;;  %4509 = vmatprep.subr.mxu0 %v7540_v40  ;;  %v7544_v16 = vld [vmem:[%s15491_s5 + $0x848] sm:$0xff]  ;;  %v7545_v60 = vld [vmem:[%s15491_s5 + $0x938] sm:$0xff]  ;;  %v7546_v40 = vld [vmem:[%s15491_s5 + $0x840] sm:$0xff] }
 0x649   : > { %4560 = vmatprep.subr.mxu1 %v7541_v43  ;;  %4510 = vmatpush2.msra.mxu0 %v7542_v58  ;;  %v7547_v43 = vld [vmem:[%s15491_s5 + $0x930] sm:$0xff] }
 0x64a   : > { %4561 = vmatpush1.msra.mxu1 %v7543_v47  ;;  %4511 = vmatprep.subr.mxu0 %v7544_v16  ;;  %v7548_v58 = vld [vmem:[%s15491_s5 + $0x830] sm:$0xff]  ;;  %v7549_v47 = vld [vmem:[%s15491_s5 + $0x920] sm:$0xff]  ;;  %v7550_v16 = vld [vmem:[%s15491_s5 + $0x828] sm:$0xff] }
 0x64b   : > { %4562 = vmatprep.subr.mxu1 %v7545_v60  ;;  %4512 = vmatpush2.msra.mxu0 %v7546_v40  ;;  %v7551_v60 = vld [vmem:[%s15491_s5 + $0x918] sm:$0xff] }
 0x64c   : > { %4563 = vmatpush1.msra.mxu1 %v7547_v43  ;;  %4513 = vmatprep.subr.mxu0 %v7548_v58  ;;  %v7552_v40 = vld [vmem:[%s15491_s5 + $0x818] sm:$0xff]  ;;  %v7553_v43 = vld [vmem:[%s15491_s5 + $0x908] sm:$0xff]  ;;  %v7554_v58 = vld [vmem:[%s15491_s5 + $0x810] sm:$0xff] }
 0x64d   : > { %4564 = vmatprep.subr.mxu1 %v7549_v47  ;;  %4514 = vmatpush2.msra.mxu0 %v7550_v16  ;;  %v7555_v47 = vld [vmem:[%s15491_s5 + $0x900] sm:$0xff] }
 0x64e   : > { %4565 = vmatpush1.msra.mxu1 %v7551_v60  ;;  %4515 = vmatprep.subr.mxu0 %v7552_v40  ;;  %v7556_v16 = vld [vmem:[%s15491_s5 + $0x800] sm:$0xff]  ;;  %v7557_v60 = vld [vmem:[%s15491_s5 + $0xbf0] sm:$0xff]  ;;  %v7558_v40 = vld [vmem:[%s15491_s5 + $0x7f8] sm:$0xff] }
 0x64f   : > { %4566 = vmatprep.subr.mxu1 %v7553_v43  ;;  %4516 = vmatpush2.msra.mxu0 %v7554_v58  ;;  %v7559_v43 = vld [vmem:[%s15491_s5 + $0xbe8] sm:$0xff] }
 0x650   : > { %4567 = vmatpush1.msra.mxu1 %v7555_v47  ;;  %4517 = vmatprep.subr.mxu0 %v7556_v16  ;;  %v7560_v58 = vld [vmem:[%s15491_s5 + $0x7e8] sm:$0xff]  ;;  %v7561_v47 = vld [vmem:[%s15491_s5 + $0xbd8] sm:$0xff]  ;;  %v7562_v16 = vld [vmem:[%s15491_s5 + $0x7e0] sm:$0xff] }
 0x651   : > { %4568 = vmatprep.subr.mxu1 %v7557_v60  ;;  %4518 = vmatpush2.msra.mxu0 %v7558_v40  ;;  %v7563_v60 = vld [vmem:[%s15491_s5 + $0xbd0] sm:$0xff] }
 0x652   : > { %4569 = vmatpush2.msra.mxu1 %v7559_v43  ;;  %4519 = vmatprep.subr.mxu0 %v7560_v58  ;;  %v7564_v40 = vld [vmem:[%s15491_s5 + $0x7d0] sm:$0xff]  ;;  %v7565_v43 = vld [vmem:[%s15491_s5 + $0xbc0] sm:$0xff]  ;;  %v7566_v58 = vld [vmem:[%s15491_s5 + $0x7c8] sm:$0xff] }
 0x653   : > { %4570 = vmatprep.subr.mxu1 %v7561_v47  ;;  %4520 = vmatpush2.msra.mxu0 %v7562_v16  ;;  %v7567_v47 = vld [vmem:[%s15491_s5 + $0xbb8] sm:$0xff] }
 0x654   : > { %4571 = vmatpush2.msra.mxu1 %v7563_v60  ;;  %4521 = vmatprep.subr.mxu0 %v7564_v40  ;;  %v7568_v16 = vld [vmem:[%s15491_s5 + $0x7b8] sm:$0xff]  ;;  %v7569_v60 = vld [vmem:[%s15491_s5 + $0xba8] sm:$0xff]  ;;  %v7570_v40 = vld [vmem:[%s15491_s5 + $0x7b0] sm:$0xff] }
 0x655   : > { %4572 = vmatprep.subr.mxu1 %v7565_v43  ;;  %4522 = vmatpush2.msra.mxu0 %v7566_v58  ;;  %v7571_v43 = vld [vmem:[%s15491_s5 + $0xba0] sm:$0xff] }
 0x656   : > { %4573 = vmatpush2.msra.mxu1 %v7567_v47  ;;  %4523 = vmatprep.subr.mxu0 %v7568_v16  ;;  %v7572_v58 = vld [vmem:[%s15491_s5 + $0x7a0] sm:$0xff]  ;;  %v7573_v47 = vld [vmem:[%s15491_s5 + $0xb90] sm:$0xff]  ;;  %v7574_v16 = vld [vmem:[%s15491_s5 + $0x798] sm:$0xff] }
 0x657   : > { %4574 = vmatprep.subr.mxu1 %v7569_v60  ;;  %4524 = vmatpush2.msra.mxu0 %v7570_v40  ;;  %v7575_v60 = vld [vmem:[%s15491_s5 + $0xb88] sm:$0xff] }
 0x658   : > { %4575 = vmatpush2.msra.mxu1 %v7571_v43  ;;  %4525 = vmatprep.subr.mxu0 %v7572_v58  ;;  %v7576_v40 = vld [vmem:[%s15491_s5 + $0x788] sm:$0xff]  ;;  %v3644_v43 = vpop.f32.mrf.mxu0  ;;  %v7577_v58 = vld [vmem:[%s15491_s5 + $0xb78] sm:$0xff] }
 0x659   : > { %4576 = vmatprep.subr.mxu1 %v7573_v47  ;;  %4526 = vmatpush2.msra.mxu0 %v7574_v16  ;;  %v7578_v47 = vld [vmem:[%s15491_s5 + $0x780] sm:$0xff]  ;;  %v7579_v16 = vld [vmem:[%s15491_s5 + $0xb70] sm:$0xff]  ;;  %v3716_v37 = vadd.f32 %v3715_v36, %v3644_v43  ;;  %v3857_v36 = vpop.f32.mrf.mxu1  ;;  %v4302_v43 = vpop.permute.xlu1 %4301 }
 0x65a   : > { %4577 = vmatpush2.msra.mxu1 %v7575_v60  ;;  %4527 = vmatprep.subr.mxu0 %v7576_v40  ;;  %v16670_v60 = vld [vmem:[#allocation21_spill] sm:$0xff]  ;;  %v7580_v40 = vld [vmem:[%s15491_s5 + $0xb60] sm:$0xff]  ;;  %v14296_v25 = vpop.f32.mrf.mxu0 }
 0x65b   : > { %4578 = vmatprep.subr.mxu1 %v7577_v58  ;;  %4528 = vmatpush2.msra.mxu0 %v7578_v47  ;;  %v7581_v58 = vld [vmem:[%s15491_s5 + $0xc68] sm:$0xff]  ;;  %v7582_v47 = vld [vmem:[%s15491_s5 + $0xb58] sm:$0xff] }
 0x65c   : > { %4579 = vmatpush2.msra.mxu1 %v7579_v16  ;;  %4530 = vmatmul.mubr.f32.vlgmr.msra.gmra.mxu0 %v16670_v60  ;;  %v7583_v16 = vld [vmem:[%s15491_s5 + $0xc60] sm:$0xff]  ;;  %v3786_v17 = vpop.f32.mrf.mxu0 }
 0x65d   : > { %4580 = vmatprep.subr.mxu1 %v7580_v40  ;;  %4629 = vmatprep.subr.mxu0 %v7581_v58  ;;  %v7584_v40 = vld [vmem:[%s15491_s5 + $0xb48] sm:$0xff]  ;;  %v7585_v58 = vld [vmem:[%s15491_s5 + $0xc50] sm:$0xff]  ;;  %v3787_v24 = vadd.f32 %v3786_v17, %v3716_v37  ;;  %v7598_v37 = vld [vmem:[%s15491_s5 + $0xaf8] sm:$0xff] }
 0x65e   : > { %4581 = vmatpush2.msra.mxu1 %v7582_v47  ;;  %4630 = vmatpush1.msra.mxu0 %v7583_v16  ;;  %v7586_v47 = vld [vmem:[%s15491_s5 + $0xb40] sm:$0xff]  ;;  %v7587_v16 = vld [vmem:[%s15491_s5 + $0xc48] sm:$0xff] }
 0x65f   : > { %4582 = vmatprep.subr.mxu1 %v7584_v40  ;;  %4631 = vmatprep.subr.mxu0 %v7585_v58  ;;  %v7588_v40 = vld [vmem:[%s15491_s5 + $0xb30] sm:$0xff]  ;;  %v7589_v58 = vld [vmem:[%s15491_s5 + $0xc38] sm:$0xff]  ;;  %v7599_v17 = vld [vmem:[%s15491_s5 + $0xc00] sm:$0xff] }
 0x660   : > { %4583 = vmatpush2.msra.mxu1 %v7586_v47  ;;  %4632 = vmatpush1.msra.mxu0 %v7587_v16  ;;  %v7590_v47 = vld [vmem:[%s15491_s5 + $0xb28] sm:$0xff]  ;;  %v7591_v16 = vld [vmem:[%s15491_s5 + $0xc30] sm:$0xff] }
 0x661   : > { %4584 = vmatprep.subr.mxu1 %v7588_v40  ;;  %4633 = vmatprep.subr.mxu0 %v7589_v58  ;;  %v7592_v40 = vld [vmem:[%s15491_s5 + $0xb18] sm:$0xff]  ;;  %v7593_v58 = vld [vmem:[%s15491_s5 + $0xc20] sm:$0xff] }
 0x662   : > { %4585 = vmatpush2.msra.mxu1 %v7590_v47  ;;  %4634 = vmatpush1.msra.mxu0 %v7591_v16  ;;  %v7594_v47 = vld [vmem:[%s15491_s5 + $0xb10] sm:$0xff]  ;;  %v7595_v16 = vld [vmem:[%s15491_s5 + $0xc18] sm:$0xff] }
 0x663   : > { %4586 = vmatprep.subr.mxu1 %v7592_v40  ;;  %4635 = vmatprep.subr.mxu0 %v7593_v58  ;;  %v7596_v40 = vld [vmem:[%s15491_s5 + $0xb00] sm:$0xff]  ;;  %v7597_v58 = vld [vmem:[%s15491_s5 + $0xc08] sm:$0xff] }
 0x664   : > { %4587 = vmatpush2.msra.mxu1 %v7594_v47  ;;  %4636 = vmatpush1.msra.mxu0 %v7595_v16  ;;  %v3858_v47 = vadd.f32 %v3857_v36, %v3787_v24  ;;  %v14350_v16 = vsel %vm4303_vm3, %v14011_v19, %v4302_v43  ;;  %v7601_v24 = vld [vmem:[%s15491_s5 + $0x5f8] sm:$0xff]  ;;  %v7602_v19 = vld [vmem:[%s15491_s5 + $0xae0] sm:$0xff] }
 0x665   : > { %4588 = vmatprep.subr.mxu1 %v7596_v40  ;;  %4637 = vmatprep.subr.mxu0 %v7597_v58  ;;  %v14352_v40 = vpop.f32.mrf.mxu0  ;;  %v7600_v58 = vld [vmem:[%s15491_s5 + $0xae8] sm:$0xff]  ;;  %v7603_v43 = vld [vmem:[%s15491_s5 + $0x478] sm:$0xff] }
 0x666   : > { %4589 = vmatpush2.msra.mxu1 %v7598_v37  ;;  %4638 = vmatpush1.msra.mxu0 %v7599_v17  ;;  %v7604_v17 = vld [vmem:[%s15491_s5 + $0xad0] sm:$0xff] }
 0x667   : > { %4671 = vmatprep.mubr.f32.mxu0 %v15924_v42  ;;  %4590 = vmatprep.subr.mxu1 %v7600_v58  ;;  %v3928_v36 = vpop.f32.mrf.mxu0  ;;  %v7605_v58 = vld [vmem:[%s15491_s5 + $0x5e0] sm:$0xff] }
 0x668   : > { %6185 = vmatmul.mubr.msk.f32.vlgmr.msra.gmra.mxu0 %vm2085_vm1, %v14350_v16  ;;  %6669 = vmatprep.subr.mxu0 %v7601_v24  ;;  %v14369_v37 = vadd.f32 %v3928_v36, %v3858_v47  ;;  %v7606_v24 = vld [vmem:[%s15491_s5 + $0xac8] sm:$0xff]  ;;  %v7607_v47 = vld [vmem:[%s15491_s5 + $0x460] sm:$0xff] }
 0x669   : > { %4591 = vmatpush2.msra.mxu1 %v7602_v19  ;;  %6670 = vmatpush3.msra.mxu0 %v7603_v43  ;;  %v7609_v36 = vld [vmem:[%s15491_s5 + $0x5c8] sm:$0xff]  ;;  %v7610_v19 = vld [vmem:[%s15491_s5 + $0xab0] sm:$0xff] }
 0x66a   : > { %16671 = vst [vmem:[#allocation30_spill] sm:$0xff] %v14369_v37  ;;  %4812 = vmatprep.mubr.f32.mxu0 %v13618_v45  ;;  %4592 = vmatprep.subr.mxu1 %v7604_v17  ;;  %v7608_v45 = vld [vmem:[%s15491_s5 + $0xab8] sm:$0xff]  ;;  %v7611_v43 = vld [vmem:[%s15491_s5 + $0x448] sm:$0xff]  ;;  %v7612_v17 = vld [vmem:[%s15491_s5 + $0xaa0] sm:$0xff] }
 0x66b   : > { %6671 = vmatprep.subr.mxu0 %v7605_v58  ;;  %4593 = vmatpush2.msra.mxu1 %v7606_v24  ;;  %v7613_v58 = vld [vmem:[%s15491_s5 + $0x5b0] sm:$0xff]  ;;  %v7614_v24 = vld [vmem:[%s15491_s5 + $0xa98] sm:$0xff] }
 0x66c   : > { %6672 = vmatpush3.msra.mxu0 %v7607_v47  ;;  %4594 = vmatprep.subr.mxu1 %v7608_v45  ;;  %v7615_v47 = vld [vmem:[%s15491_s5 + $0x430] sm:$0xff]  ;;  %v7616_v45 = vld [vmem:[%s15491_s5 + $0xa88] sm:$0xff] }
 0x66d   : > { %6673 = vmatprep.subr.mxu0 %v7609_v36  ;;  %4595 = vmatpush2.msra.mxu1 %v7610_v19  ;;  %v7617_v36 = vld [vmem:[%s15491_s5 + $0x598] sm:$0xff]  ;;  %v7618_v19 = vld [vmem:[%s15491_s5 + $0xa80] sm:$0xff] }
 0x66e   : > { %6674 = vmatpush3.msra.mxu0 %v7611_v43  ;;  %5412 = vrot.lane.b32.xlu0 %v14369_v37, %s7711_s23  ;;  %v7619_v43 = vld [vmem:[%s15491_s5 + $0x418] sm:$0xff] }
 0x66f   : > { %5132 = vrot.lane.b32.xlu1 %v14369_v37, %s7718_s30  ;;  %4596 = vmatprep.subr.mxu1 %v7612_v17  ;;  %v16672_v17 = vld [vmem:[#allocation23_spill] sm:$0xff] }
 0x670   : > { %6675 = vmatprep.subr.mxu0 %v7613_v58  ;;  %4597 = vmatpush2.msra.mxu1 %v7614_v24  ;;  %v7620_v58 = vld [vmem:[%s15491_s5 + $0x2f8] sm:$0xff]  ;;  %v7621_v24 = vld [vmem:[%s15491_s5 + $0x580] sm:$0xff] }
 0x671   : > { %6676 = vmatpush3.msra.mxu0 %v7615_v47  ;;  %4598 = vmatprep.subr.mxu1 %v7616_v45  ;;  %v7622_v47 = vld [vmem:[%s15491_s5 + $0x178] sm:$0xff]  ;;  %v7623_v45 = vld [vmem:[%s15491_s5 + $0x400] sm:$0xff] }
 0x672   : > { %6677 = vmatprep.subr.mxu0 %v7617_v36  ;;  %4599 = vmatpush2.msra.mxu1 %v7618_v19  ;;  %v7624_v36 = vld [vmem:[%s15491_s5 + $0x2e0] sm:$0xff]  ;;  %v7625_v19 = vld [vmem:[%s15491_s5 + $0x568] sm:$0xff] }
 0x673   : > { %6678 = vmatpush3.msra.mxu0 %v7619_v43  ;;  %5372 = vrot.lane.b32.xlu0 %v14369_v37, %s16615_s18  ;;  %v7626_v43 = vld [vmem:[%s15491_s5 + $0x160] sm:$0xff] }
 0x674   : > { %5092 = vrot.lane.b32.xlu1 %v14369_v37, %s7719_s11  ;;  %4601 = vmatmul.mubr.f32.vlgmr.msra.gmra.mxu1 %v16672_v17 }
 0x675   : > { %6634 = vmatprep.subr.mxu1 %v7620_v58  ;;  %6679 = vmatprep.subr.mxu0 %v7621_v24  ;;  %v7628_v58 = vld [vmem:[%s15491_s5 + $0x2c8] sm:$0xff]  ;;  %v7629_v24 = vld [vmem:[%s15491_s5 + $0x550] sm:$0xff] }
 0x676   : > { %6635 = vmatpush3.msra.mxu1 %v7622_v47  ;;  %4742 = vmatprep.mubr.f32.mxu1 %v13444_v5  ;;  %v7627_v5 = vld [vmem:[%s15491_s5 + $0x3e8] sm:$0xff] }
 0x677   : > { %6680 = vmatpush3.msra.mxu0 %v7623_v45  ;;  %6636 = vmatprep.subr.mxu1 %v7624_v36  ;;  %v7630_v47 = vld [vmem:[%s15491_s5 + $0x148] sm:$0xff]  ;;  %v7631_v45 = vld [vmem:[%s15491_s5 + $0x3d0] sm:$0xff] }
 0x678   : > { %6681 = vmatprep.subr.mxu0 %v7625_v19  ;;  %6637 = vmatpush3.msra.mxu1 %v7626_v43  ;;  %v7632_v36 = vld [vmem:[%s15491_s5 + $0x2b0] sm:$0xff]  ;;  %v7633_v19 = vld [vmem:[%s15491_s5 + $0x538] sm:$0xff] }
 0x679   : > { %6682 = vmatpush3.msra.mxu0 %v7627_v5  ;;  %5052 = vrot.lane.b32.xlu1 %v14369_v37, %s7720_s12  ;;  %v7634_v43 = vld [vmem:[%s15491_s5 + $0x130] sm:$0xff]  ;;  %v7635_v5 = vld [vmem:[%s15491_s5 + $0x3b8] sm:$0xff] }
 0x67a   : > { %6638 = vmatprep.subr.mxu1 %v7628_v58  ;;  %6683 = vmatprep.subr.mxu0 %v7629_v24  ;;  %v7636_v58 = vld [vmem:[%s15491_s5 + $0x298] sm:$0xff]  ;;  %v7637_v24 = vld [vmem:[%s15491_s5 + $0x520] sm:$0xff] }
 0x67b   : > { %6639 = vmatpush3.msra.mxu1 %v7630_v47  ;;  %6684 = vmatpush3.msra.mxu0 %v7631_v45  ;;  %v7638_v47 = vld [vmem:[%s15491_s5 + $0x118] sm:$0xff]  ;;  %v7639_v45 = vld [vmem:[%s15491_s5 + $0x3a0] sm:$0xff] }
 0x67c   : > { %6640 = vmatprep.subr.mxu1 %v7632_v36  ;;  %6685 = vmatprep.subr.mxu0 %v7633_v19  ;;  %v7640_v36 = vld [vmem:[%s15491_s5 + $0x280] sm:$0xff]  ;;  %v3718_v19 = vadd.f32 %v14310_v11, %v14296_v25  ;;  %v7644_v25 = vld [vmem:[%s15491_s5 + $0x268] sm:$0xff] }
 0x67d   : > { %6641 = vmatpush3.msra.mxu1 %v7634_v43  ;;  %6686 = vmatpush3.msra.mxu0 %v7635_v5  ;;  %v7641_v43 = vld [vmem:[%s15491_s5 + $0x508] sm:$0xff]  ;;  %v7642_v5 = vld [vmem:[%s15491_s5 + $0x100] sm:$0xff] }
 0x67e   : > { %5292 = vrot.lane.b32.xlu1 %v14369_v37, %s7714_s26  ;;  %6642 = vmatprep.subr.mxu1 %v7636_v58  ;;  %v3859_v58 = vpop.f32.mrf.mxu1  ;;  %v3789_v11 = vadd.f32 %v14352_v40, %v3718_v19  ;;  %v7648_v19 = vld [vmem:[%s15491_s5 + $0x250] sm:$0xff] }
 0x67f   : > { %6687 = vmatprep.subr.mxu0 %v7637_v24  ;;  %6643 = vmatpush3.msra.mxu1 %v7638_v47  ;;  %v7643_v24 = vld [vmem:[%s15491_s5 + $0x388] sm:$0xff]  ;;  %v7645_v47 = vld [vmem:[%s15491_s5 + $0x4f0] sm:$0xff] }
 0x680   : > { %6688 = vmatpush3.msra.mxu0 %v7639_v45  ;;  %6644 = vmatprep.subr.mxu1 %v7640_v36  ;;  %v7646_v45 = vld [vmem:[%s15491_s5 + $0xe8] sm:$0xff]  ;;  %v7647_v36 = vld [vmem:[%s15491_s5 + $0x370] sm:$0xff]  ;;  %v3860_v40 = vadd.f32 %v3859_v58, %v3789_v11  ;;  %v7652_v58 = vld [vmem:[%s15491_s5 + $0x238] sm:$0xff]  ;;  %v3930_v11 = vpop.f32.mrf.mxu0 }
 0x681   : > { %6689 = vmatprep.subr.mxu0 %v7641_v43  ;;  %6645 = vmatpush3.msra.mxu1 %v7642_v5  ;;  %v7649_v43 = vld [vmem:[%s15491_s5 + $0x4d8] sm:$0xff]  ;;  %v7650_v5 = vld [vmem:[%s15491_s5 + $0xd0] sm:$0xff] }
 0x682   : > { %6690 = vmatpush3.msra.mxu0 %v7643_v24  ;;  %5252 = vrot.lane.b32.xlu1 %v14369_v37, %s7715_s27  ;;  %v7651_v24 = vld [vmem:[%s15491_s5 + $0x358] sm:$0xff] }
 0x683   : > { %6646 = vmatprep.subr.mxu1 %v7644_v25  ;;  %6691 = vmatprep.subr.mxu0 %v7645_v47  ;;  %v7653_v25 = vld [vmem:[%s15491_s5 + $0x4c0] sm:$0xff]  ;;  %v7654_v47 = vld [vmem:[%s15491_s5 + $0xb8] sm:$0xff] }
 0x684   : > { %6647 = vmatpush3.msra.mxu1 %v7646_v45  ;;  %6692 = vmatpush3.msra.mxu0 %v7647_v36  ;;  %v14546_v45 = vadd.f32 %v3930_v11, %v3860_v40  ;;  %v7655_v36 = vld [vmem:[%s15491_s5 + $0x340] sm:$0xff]  ;;  %v7662_v11 = vld [vmem:[%s15491_s5 + $0x88] sm:$0xff] }
 0x685   : > { %6648 = vmatprep.subr.mxu1 %v7648_v19  ;;  %6693 = vmatprep.subr.mxu0 %v7649_v43  ;;  %v7656_v19 = vld [vmem:[%s15491_s5 + $0x220] sm:$0xff]  ;;  %v7657_v43 = vld [vmem:[%s15491_s5 + $0x4a8] sm:$0xff] }
 0x686   : > { %6649 = vmatpush3.msra.mxu1 %v7650_v5  ;;  %6694 = vmatpush3.msra.mxu0 %v7651_v24  ;;  %16673 = vst [vmem:[#allocation28_spill] sm:$0xff] %v14546_v45  ;;  %v7658_v40 = vld [vmem:[%s15491_s5 + $0xa0] sm:$0xff]  ;;  %v7659_v5 = vld [vmem:[%s15491_s5 + $0x328] sm:$0xff] }
 0x687   : > { %5212 = vrot.lane.b32.xlu1 %v14369_v37, %s7716_s28  ;;  %6650 = vmatprep.subr.mxu1 %v7652_v58  ;;  %v7660_v24 = vld [vmem:[%s15491_s5 + $0x208] sm:$0xff]  ;;  %v7661_v58 = vld [vmem:[%s15491_s5 + $0x490] sm:$0xff] }
 0x688   : > { %6695 = vmatprep.subr.mxu0 %v7653_v25  ;;  %6651 = vmatpush3.msra.mxu1 %v7654_v47  ;;  %v7663_v25 = vld [vmem:[%s15491_s5 + $0x310] sm:$0xff] }
 0x689   : > { %6696 = vmatpush3.msra.mxu0 %v7655_v36  ;;  %6652 = vmatprep.subr.mxu1 %v7656_v19  ;;  %v7664_v47 = vld [vmem:[%s15491_s5 + $0x1f0] sm:$0xff]  ;;  %v7665_v36 = vld [vmem:[%s15491_s5 + $0xbf8] sm:$0xff] }
 0x68a   : > { %6697 = vmatprep.subr.mxu0 %v7657_v43  ;;  %6653 = vmatpush3.msra.mxu1 %v7658_v40  ;;  %v7666_v19 = vld [vmem:[%s15491_s5 + $0x70] sm:$0xff]  ;;  %v7667_v43 = vld [vmem:[%s15491_s5 + $0xa78] sm:$0xff]  ;;  %v7669_v40 = vld [vmem:[%s15491_s5 + $0xbe0] sm:$0xff] }
 0x68b   : > { %6698 = vmatpush3.msra.mxu0 %v7659_v5  ;;  %5134 = vrot.lane.b32.xlu1 %v14546_v45, %s7718_s30  ;;  %v7670_v5 = vld [vmem:[%s15491_s5 + $0x58] sm:$0xff] }
 0x68c   : > { %6654 = vmatprep.subr.mxu1 %v7660_v24  ;;  %6699 = vmatprep.subr.mxu0 %v7661_v58  ;;  %v7672_v24 = vld [vmem:[%s15491_s5 + $0x1c0] sm:$0xff]  ;;  %v7673_v58 = vld [vmem:[%s15491_s5 + $0xbc8] sm:$0xff] }
 0x68d   : > { %6655 = vmatpush3.msra.mxu1 %v7662_v11  ;;  %6700 = vmatpush3.msra.mxu0 %v7663_v25  ;;  %v7674_v11 = vld [vmem:[%s15491_s5 + $0x40] sm:$0xff]  ;;  %v7675_v25 = vld [vmem:[%s15491_s5 + $0xa48] sm:$0xff] }
 0x68e   : > { %6656 = vmatprep.subr.mxu1 %v7664_v47  ;;  %4813 = vmatmul.mubr.f32.vlgmr.msra.gmra.mxu0 %v16668_v12  ;;  %v7668_v12 = vld [vmem:[%s15491_s5 + $0x1d8] sm:$0xff]  ;;  %v7676_v47 = vld [vmem:[%s15491_s5 + $0x1a8] sm:$0xff] }
 0x68f   : > { %6739 = vmatprep.subr.mxu0 %v7665_v36  ;;  %6657 = vmatpush3.msra.mxu1 %v7666_v19  ;;  %v7677_v36 = vld [vmem:[%s15491_s5 + $0xbb0] sm:$0xff]  ;;  %v7678_v19 = vld [vmem:[%s15491_s5 + $0x28] sm:$0xff] }
 0x690   : > { %6740 = vmatpush3.msra.mxu0 %v7667_v43  ;;  %4952 = vmatprep.mubr.f32.mxu0 %v14028_v63  ;;  %v7671_v63 = vld [vmem:[%s15491_s5 + $0xa60] sm:$0xff]  ;;  %v7679_v43 = vld [vmem:[%s15491_s5 + $0xa30] sm:$0xff] }
 0x691   : > { %5094 = vrot.lane.b32.xlu1 %v14546_v45, %s7719_s11  ;;  %6658 = vmatprep.subr.mxu1 %v7668_v12  ;;  %v7680_v12 = vld [vmem:[%s15491_s5 + $0x190] sm:$0xff] }
 0x692   : > { %6741 = vmatprep.subr.mxu0 %v7669_v40  ;;  %6659 = vmatpush3.msra.mxu1 %v7670_v5  ;;  %v7681_v40 = vld [vmem:[%s15491_s5 + $0xb98] sm:$0xff]  ;;  %v7682_v5 = vld [vmem:[%s15491_s5 + $0x10] sm:$0xff] }
 0x693   : > { %6742 = vmatpush3.msra.mxu0 %v7671_v63  ;;  %6660 = vmatprep.subr.mxu1 %v7672_v24  ;;  %v7683_v63 = vld [vmem:[%s15491_s5 + $0xa18] sm:$0xff]  ;;  %v6520_v24 = vpop.f32.mrf.mxu1 }
 0x694   : > { %6743 = vmatprep.subr.mxu0 %v7673_v58  ;;  %6661 = vmatpush3.msra.mxu1 %v7674_v11  ;;  %v7684_v58 = vld [vmem:[%s15491_s5 + $0x8f8] sm:$0xff]  ;;  %v7685_v11 = vld [vmem:[%s15491_s5 + $0xb80] sm:$0xff] }
 0x695   : > { %6744 = vmatpush3.msra.mxu0 %v7675_v25  ;;  %5054 = vrot.lane.b32.xlu1 %v14546_v45, %s7720_s12  ;;  %v7686_v25 = vld [vmem:[%s15491_s5 + $0x778] sm:$0xff] }
 0x696   : > { %6662 = vmatprep.subr.mxu1 %v7676_v47  ;;  %6745 = vmatprep.subr.mxu0 %v7677_v36  ;;  %v7688_v47 = vld [vmem:[%s15491_s5 + $0x8e0] sm:$0xff]  ;;  %v6521_v36 = vpop.f32.mrf.mxu1 }
 0x697   : > { %6663 = vmatpush3.msra.mxu1 %v7678_v19  ;;  %6746 = vmatpush3.msra.mxu0 %v7679_v43  ;;  %v7689_v19 = vld [vmem:[%s15491_s5 + $0xb68] sm:$0xff] }
 0x698   : > { %6664 = vmatprep.subr.mxu1 %v7680_v12  ;;  %6747 = vmatprep.subr.mxu0 %v7681_v40  ;;  %v7691_v43 = vld [vmem:[%s15491_s5 + $0x9e8] sm:$0xff]  ;;  %v6555_v12 = vpop.f32.mrf.mxu0 }
 0x699   : > { %6665 = vmatpush3.msra.mxu1 %v7682_v5  ;;  %6748 = vmatpush3.msra.mxu0 %v7683_v63  ;;  %v7692_v40 = vld [vmem:[%s15491_s5 + $0x8c8] sm:$0xff]  ;;  %v7693_v5 = vld [vmem:[%s15491_s5 + $0xb50] sm:$0xff] }
 0x69a   : > { %5294 = vrot.lane.b32.xlu1 %v14546_v45, %s7714_s26  ;;  %4743 = vmatmul.mubr.f32.vlgmr.msra.gmra.mxu1 %v16664_v0  ;;  %v7687_v0 = vld [vmem:[%s15491_s5 + $0xa00] sm:$0xff] }
 0x69b   : > { %6704 = vmatprep.subr.mxu1 %v7684_v58  ;;  %6749 = vmatprep.subr.mxu0 %v7685_v11  ;;  %v7694_v58 = vld [vmem:[%s15491_s5 + $0x748] sm:$0xff]  ;;  %v7695_v11 = vld [vmem:[%s15491_s5 + $0x9d0] sm:$0xff] }
 0x69c   : > { %6705 = vmatpush3.msra.mxu1 %v7686_v25  ;;  %4882 = vmatprep.mubr.f32.mxu1 %v13899_v4  ;;  %v7690_v4 = vld [vmem:[%s15491_s5 + $0x760] sm:$0xff]  ;;  %v7696_v25 = vld [vmem:[%s15491_s5 + $0x8b0] sm:$0xff] }
 0x69d   : > { %6750 = vmatpush3.msra.mxu0 %v7687_v0  ;;  %6706 = vmatprep.subr.mxu1 %v7688_v47  ;;  %v7697_v0 = vld [vmem:[%s15491_s5 + $0xb38] sm:$0xff]  ;;  %v6556_v47 = vpop.f32.mrf.mxu0 }
 0x69e   : > { %6751 = vmatprep.subr.mxu0 %v7689_v19  ;;  %6707 = vmatpush3.msra.mxu1 %v7690_v4  ;;  %v6590_v63 = vpop.f32.mrf.mxu1  ;;  %v6522_v4 = vadd.f32 %v6521_v36, %v6520_v24 }
 0x69f   : > { %6752 = vmatpush3.msra.mxu0 %v7691_v43  ;;  %5254 = vrot.lane.b32.xlu1 %v14546_v45, %s7715_s27  ;;  %v6625_v43 = vpop.f32.mrf.mxu0 }
 0x6a0   : > { %6708 = vmatprep.subr.mxu1 %v7692_v40  ;;  %6753 = vmatprep.subr.mxu0 %v7693_v5  ;;  %v6591_v19 = vpop.f32.mrf.mxu1 }
 0x6a1   : > { %6709 = vmatpush3.msra.mxu1 %v7694_v58  ;;  %6754 = vmatpush3.msra.mxu0 %v7695_v11 }
 0x6a2   : > { %6710 = vmatprep.subr.mxu1 %v7696_v25  ;;  %6755 = vmatprep.subr.mxu0 %v7697_v0 }
 0x6a3   : > { %6711 = vmatpush3.msra.mxu1 %v13237_v48  ;;  %6756 = vmatpush3.msra.mxu0 %v13243_v26  ;;  %v6557_v48 = vadd.f32 %v6556_v47, %v6555_v12  ;;  %v6592_v26 = vadd.f32 %v6591_v19, %v6590_v63 }
 0x6a4   : > { %5414 = vrot.lane.b32.xlu1 %v14546_v45, %s7711_s23  ;;  %6712 = vmatprep.subr.mxu1 %v13249_v33 }
 0x6a5   : > { %6757 = vmatprep.subr.mxu0 %v13257_v56  ;;  %6713 = vmatpush3.msra.mxu1 %v13263_v9  ;;  %v4070_v33 = vadd.f32 %v6557_v48, %v6522_v4  ;;  %v6626_v56 = vpop.f32.mrf.mxu0 }
 0x6a6   : > { %6758 = vmatpush3.msra.mxu0 %v13269_v55  ;;  %6714 = vmatprep.subr.mxu1 %v13275_v31  ;;  %v6627_v31 = vadd.f32 %v6626_v56, %v6625_v43 }
 0x6a7   : > { %6759 = vmatprep.subr.mxu0 %v13281_v13  ;;  %6715 = vmatpush3.msra.mxu1 %v13287_v52  ;;  %v4140_v9 = vadd.f32 %v6592_v26, %v4070_v33 }
 0x6a8   : > { %6760 = vmatpush3.msra.mxu0 %v13293_v1  ;;  %5214 = vrot.lane.b32.xlu1 %v14546_v45, %s7716_s28 }
 0x6a9   : > { %6716 = vmatprep.subr.mxu1 %v13299_v50  ;;  %6761 = vmatprep.subr.mxu0 %v13305_v14  ;;  %v4210_v52 = vadd.f32 %v6627_v31, %v4140_v9  ;;  %v16674_v50 = vld [vmem:[#allocation26_spill] sm:$0xff]  ;;  %v14772_v14 = vpop.permute.xlu0 %5400  ;;  %v16694_v31 = vld [vmem:[#allocation24_spill] sm:$0xff] }
 0x6aa   : > { %6717 = vmatpush3.msra.mxu1 %v13311_v41  ;;  %6762 = vmatpush3.msra.mxu0 %v13317_v46 }
 0x6ab   : > { %6718 = vmatprep.subr.mxu1 %v13323_v27  ;;  %6763 = vmatprep.subr.mxu0 %v13331_v49  ;;  %v4279_v55 = vpop.f32.mrf.mxu1  ;;  %v14780_v49 = vpop.permute.xlu1 %5120 }
 0x6ac   : > { %6719 = vmatpush3.msra.mxu1 %v13337_v28  ;;  %6764 = vmatpush3.msra.mxu0 %v13343_v62  ;;  %v14724_v1 = vadd.f32 %v4279_v55, %v4210_v52 }
 0x6ad   : > { %5374 = vrot.lane.b32.xlu1 %v14546_v45, %s16615_s18  ;;  %6720 = vmatprep.subr.mxu1 %v13349_v3  ;;  %v6818_v13 = vpop.f32.mrf.mxu1  ;;  %v14774_v41 = vpop.permute.xlu0 %5124 }
 0x6ae   : > { %6765 = vmatprep.subr.mxu0 %v13355_v39  ;;  %6721 = vmatpush3.msra.mxu1 %v13361_v2  ;;  %v16695_v13 = vld [vmem:[#allocation281_spill] sm:$0xff] }
 0x6af   : > { %6766 = vmatpush3.msra.mxu0 %v13367_v61  ;;  %6722 = vmatprep.subr.mxu1 %v13373_v10  ;;  %v14784_v62 = vpop.permute.xlu1 %5080 }
 0x6b0   : > { %6767 = vmatprep.subr.mxu0 %v13379_v29  ;;  %6723 = vmatpush3.msra.mxu1 %v13385_v30 }
 0x6b1   : > { %6768 = vmatpush3.msra.mxu0 %v13391_v32  ;;  %6724 = vmatprep.subr.mxu1 %v13397_v57  ;;  %v14776_v46 = vpop.permute.xlu0 %5084 }
 0x6b2   : > { %6769 = vmatprep.subr.mxu0 %v13403_v51  ;;  %6725 = vmatpush3.msra.mxu1 %v13409_v38 }
 0x6b3   : > { %6770 = vmatpush3.msra.mxu0 %v13417_v20  ;;  %6726 = vmatprep.subr.mxu1 %v13423_v21  ;;  %v14788_v39 = vpop.permute.xlu1 %5040 }
 0x6b4   : > { %4953 = vmatmul.mubr.f32.vlgmr.msra.gmra.mxu0 %v16672_v17  ;;  %6727 = vmatpush3.msra.mxu1 %v13433_v22 }
 0x6b5   : > { %6728 = vmatprep.subr.mxu1 %v13451_v44  ;;  %5136 = vrot.lane.b32.xlu0 %v14724_v1, %s7718_s30  ;;  %v14778_v27 = vpop.permute.xlu0 %5044 }
 0x6b6   : > { %6729 = vmatpush3.msra.mxu1 %v13460_v18 }
 0x6b7   : > { %6730 = vmatprep.subr.mxu1 %v13469_v7  ;;  %v14792_v61 = vpop.permute.xlu1 %5280 }
 0x6b8   : > { %6731 = vmatpush3.msra.mxu1 %v13478_v59  ;;  %16677 = vst [vmem:[#allocation34_spill] sm:$0xff] %v14792_v61 }
 0x6b9   : > { %6732 = vmatprep.subr.mxu1 %v13487_v54  ;;  %5096 = vrot.lane.b32.xlu0 %v14724_v1, %s7719_s11  ;;  %v14782_v28 = vpop.permute.xlu0 %5284 }
 0x6ba   : > { %6733 = vmatpush3.msra.mxu1 %v13496_v6  ;;  %16675 = vst [vmem:[#allocation32_spill] sm:$0xff] %v14782_v28 }
 0x6bb   : > { %6734 = vmatprep.subr.mxu1 %v13505_v15  ;;  %v14796_v29 = vpop.permute.xlu1 %5240 }
 0x6bc   : > { %6735 = vmatpush3.msra.mxu1 %v13514_v23  ;;  %16679 = vst [vmem:[#allocation35_spill] sm:$0xff] %v14796_v29 }
 0x6bd   : > { %4883 = vmatmul.mubr.f32.vlgmr.msra.gmra.mxu1 %v16670_v60  ;;  %6819 = vmatprep.subr.mxu1 %v15924_v42  ;;  %v14786_v3 = vpop.permute.xlu0 %5244 }
 0x6be   : > { %6820 = vmatpush3.msra.mxu1 %v13531_v34  ;;  %6829 = vmatprep.mubr.msk.f32.mxu1 %vm7727_vm8, %v15924_v42  ;;  %16676 = vst [vmem:[#allocation6_spill] sm:$0xff] %v14786_v3 }
 0x6bf   : > { %6821 = vmatprep.subr.mxu1 %v15924_v42  ;;  %5056 = vrot.lane.b32.xlu0 %v14724_v1, %s7720_s12  ;;  %v14800_v32 = vpop.permute.xlu1 %5200 }
 0x6c0   : > { %6822 = vmatpush3.msra.mxu1 %v13544_v53  ;;  %16680 = vst [vmem:[#allocation37_spill] sm:$0xff] %v14800_v32 }
 0x6c1   : > { %6823 = vmatprep.subr.mxu1 %v15924_v42  ;;  %v14790_v2 = vpop.permute.xlu0 %5404 }
 0x6c2   : > { %6824 = vmatpush3.msra.mxu1 %v13561_v8 }
 0x6c3   : > { %6825 = vmatprep.subr.mxu1 %v15924_v42  ;;  %5296 = vrot.lane.b32.xlu0 %v14724_v1, %s7714_s26  ;;  %v14804_v21 = vpop.permute.xlu1 %5122 }
 0x6c4   : > { %6826 = vmatpush3.msra.mxu1 %v13574_v35 }
 0x6c5   : > { %6827 = vmatprep.subr.mxu1 %v15924_v42  ;;  %v14794_v10 = vpop.permute.xlu0 %5204 }
 0x6c6   : > { %6828 = vmatpush3.msra.mxu1 %v16674_v50  ;;  %16678 = vst [vmem:[#allocation31_spill] sm:$0xff] %v14794_v10 }
 0x6c7   : > { %6830 = vmatmul.mubr.msk.f32.vlgmr.msra.gmra.mxu1 %vm2085_vm1, %v14350_v16  ;;  %5256 = vrot.lane.b32.xlu0 %v14724_v1, %s7715_s27  ;;  %v14808_v54 = vpop.permute.xlu1 %5082 }
 0x6c8   : > { %5598 = vmatprep.mubr.f32.mxu1 %v15924_v42 }
 0x6c9   : > { %v14798_v30 = vpop.permute.xlu0 %5126 }
 0x6cb   : > { %5416 = vrot.lane.b32.xlu0 %v14724_v1, %s7711_s23  ;;  %v14814_v24 = vpop.permute.xlu1 %5042 }
 0x6cd   : > { %v14802_v57 = vpop.permute.xlu0 %5086 }
 0x6cf   : > { %5216 = vrot.lane.b32.xlu0 %v14724_v1, %s7716_s28  ;;  %v14828_v5 = vpop.permute.xlu1 %5282 }
 0x6d0   : > { %16684 = vst [vmem:[#allocation36_spill] sm:$0xff] %v14828_v5 }
 0x6d1   : > { %v14806_v22 = vpop.permute.xlu0 %5046 }
 0x6d3   : > { %5376 = vrot.lane.b32.xlu0 %v14724_v1, %s16615_s18  ;;  %v14840_v58 = vpop.permute.xlu1 %5242 }
 0x6d4   : > { %16685 = vst [vmem:[#allocation41_spill] sm:$0xff] %v14840_v58  ;;  %v16708_v58 = vld [vmem:[#allocation25_spill] sm:$0xff] }
 0x6d5   : > { %v14810_v23 = vpop.permute.xlu0 %5286 }
 0x6d6   : > { %16681 = vst [vmem:[#allocation33_spill] sm:$0xff] %v14810_v23  ;;  %v1608_v23 = vld [vmem:[%s15490_s4] sm:$0xff] }
 0x6d7   : > { %v14848_v25 = vpop.permute.xlu1 %5402 }
 0x6d9   : > { %v14820_v36 = vpop.permute.xlu0 %5406 }
 0x6da   : > { %v4389_v51 = vpop.f32.mrf.mxu0 }
 0x6db   : > { %v14856_v47 = vpop.permute.xlu1 %5202 }
 0x6dc   : > { %v4391_v38 = vpop.f32.mrf.mxu0  ;;  %16687 = vst [vmem:[#allocation43_spill] sm:$0xff] %v14856_v47 }
 0x6dd   : > { %v14830_v63 = vpop.permute.xlu0 %5366 }
 0x6df   : > { %v14862_v4 = vpop.permute.xlu1 %5246 }
 0x6e0   : > { %16688 = vst [vmem:[#allocation39_spill] sm:$0xff] %v14862_v4 }
 0x6e1   : > { %v14842_v11 = vpop.permute.xlu0 %5128 }
 0x6e3   : > { %v14868_v48 = vpop.permute.xlu1 %5206 }
 0x6e4   : > { %16690 = vst [vmem:[#allocation45_spill] sm:$0xff] %v14868_v48 }
 0x6e5   : > { %v14850_v0 = vpop.permute.xlu0 %5088 }
 0x6e7   : > { %v14876_v33 = vpop.permute.xlu1 %5248 }
 0x6e8   : > { %16692 = vst [vmem:[#allocation46_spill] sm:$0xff] %v14876_v33 }
 0x6e9   : > { %v14858_v19 = vpop.permute.xlu0 %5048 }
 0x6eb   : > { %v14882_v9 = vpop.permute.xlu1 %5408 }
 0x6ed   : > { %v14864_v43 = vpop.permute.xlu0 %5288 }
 0x6ee   : > { %16689 = vst [vmem:[#allocation44_spill] sm:$0xff] %v14864_v43 }
 0x6ef   : > { %v4460_v20 = vpop.f32.mrf.mxu1  ;;  %v14890_v52 = vpop.permute.xlu1 %5208 }
 0x6f0   : > { %v4461_v7 = vadd.f32 %v4460_v20, %v4389_v51  ;;  %16696 = vst [vmem:[#allocation48_spill] sm:$0xff] %v14890_v52 }
 0x6f1   : > { %v4462_v18 = vpop.f32.mrf.mxu1  ;;  %v14870_v26 = vpop.permute.xlu0 %5250 }
 0x6f2   : > { %v4463_v6 = vadd.f32 %v4462_v18, %v4391_v38  ;;  %16691 = vst [vmem:[#allocation42_spill] sm:$0xff] %v14870_v26  ;;  %v1603_v26 = vld [vmem:[%s15489_s3 + $0x8] sm:$0xff] }
 0x6f3   : > { %v14898_v38 = vpop.permute.xlu1 %5368  ;;  %5521 = vmatprep.mubr.f32.mxu0 %v1603_v26 }
 0x6f5   : > { %v14878_v56 = vpop.permute.xlu0 %5410 }
 0x6f7   : > { %v14902_v18 = vpop.permute.xlu1 %5130 }
 0x6f9   : > { %v14884_v55 = vpop.permute.xlu0 %5210 }
 0x6fa   : > { %16693 = vst [vmem:[#allocation47_spill] sm:$0xff] %v14884_v55 }
 0x6fd   : > { %v14892_v50 = vpop.permute.xlu0 %5370 }
 0x701   : > { %v14896_v51 = vpop.permute.xlu0 %5412 }
 0x71c   : > { %v4531_v44 = vpop.f32.mrf.mxu0 }
 0x71d   : > { %v4532_v15 = vadd.f32 %v4531_v44, %v4461_v7  ;;  %v14904_v7 = vpop.permute.xlu0 %5372 }
 0x71e   : > { %v4533_v59 = vpop.f32.mrf.mxu0 }
 0x71f   : > { %v4534_v53 = vadd.f32 %v4533_v59, %v4463_v6  ;;  %v16698_v6 = vld [vmem:[#allocation29_spill] sm:$0xff] }
 0x728   : > { %v4673_v35 = vpop.f32.mrf.mxu0 }
 0x72a   : > { %v4675_v12 = vpop.f32.mrf.mxu0 }
 0x734   : > { %v4602_v34 = vpop.f32.mrf.mxu1 }
 0x735   : > { %v4603_v8 = vadd.f32 %v4602_v34, %v4532_v15  ;;  %v14908_v34 = vpop.permute.xlu0 %5136 }
 0x736   : > { %v4604_v60 = vpop.f32.mrf.mxu1 }
 0x737   : > { %v14812_v16 = vadd.f32 %v4673_v35, %v4603_v8  ;;  %v4605_v17 = vadd.f32 %v4604_v60, %v4534_v53  ;;  %v14912_v60 = vpop.permute.xlu1 %5090 }
 0x739   : > { %16682 = vst [vmem:[#allocation38_spill] sm:$0xff] %v14812_v16  ;;  %5138 = vrot.lane.b32.xlu0 %v14812_v16, %s7718_s30  ;;  %5218 = vrot.lane.b32.xlu1 %v14812_v16, %s7716_s28  ;;  %v14822_v40 = vadd.f32 %v4675_v12, %v4605_v17  ;;  %v14916_v48 = vpop.permute.xlu0 %5096 }
 0x73b   : > { %16683 = vst [vmem:[#allocation40_spill] sm:$0xff] %v14822_v40  ;;  %v14918_v52 = vpop.permute.xlu1 %5050 }
 0x73d   : > { %5098 = vrot.lane.b32.xlu0 %v14812_v16, %s7719_s11  ;;  %5420 = vrot.lane.b32.xlu1 %v14822_v40, %s7711_s23 }
 0x741   : > { %5058 = vrot.lane.b32.xlu0 %v14812_v16, %s7720_s12  ;;  %5220 = vrot.lane.b32.xlu1 %v14822_v40, %s7716_s28 }
 0x745   : > { %5298 = vrot.lane.b32.xlu0 %v14812_v16, %s7714_s26  ;;  %5380 = vrot.lane.b32.xlu1 %v14822_v40, %s16615_s18 }
 0x749   : > { %5258 = vrot.lane.b32.xlu0 %v14812_v16, %s7715_s27  ;;  %5180 = vrot.lane.b32.xlu1 %v14822_v40, %s16686_s19 }
 0x74d   : > { %5418 = vrot.lane.b32.xlu0 %v14812_v16, %s7711_s23 }
 0x74e   : > { %v6701_v44 = vpop.f32.mrf.mxu0 }
 0x750   : > { %v6702_v15 = vpop.f32.mrf.mxu0 }
 0x751   : > { %5378 = vrot.lane.b32.xlu0 %v14812_v16, %s16615_s18  ;;  %v6703_v17 = vadd.f32 %v6702_v15, %v6701_v44  ;;  %v14922_v44 = vpop.permute.xlu0 %5056 }
 0x755   : > { %5140 = vrot.lane.b32.xlu0 %v14822_v40, %s7718_s30 }
 0x759   : > { %5100 = vrot.lane.b32.xlu0 %v14822_v40, %s7719_s11 }
 0x75a   : > { %v6666_v20 = vpop.f32.mrf.mxu1 }
 0x75c   : > { %v6667_v59 = vpop.f32.mrf.mxu1 }
 0x75d   : > { %5060 = vrot.lane.b32.xlu0 %v14822_v40, %s7720_s12  ;;  %v6668_v53 = vadd.f32 %v6667_v59, %v6666_v20 }
 0x75f   : > { %v4815_v42 = vadd.f32 %v6703_v17, %v6668_v53  ;;  %v14926_v53 = vpop.permute.xlu1 %5290 }
 0x760   : > { %16699 = vst [vmem:[#allocation49_spill] sm:$0xff] %v14926_v53 }
 0x761   : > { %5300 = vrot.lane.b32.xlu0 %v14822_v40, %s7714_s26 }
 0x765   : > { %5260 = vrot.lane.b32.xlu0 %v14822_v40, %s7715_s27 }
 0x769   : > { %5364 = vrot.lane.b32.xlu0 %v16694_v31, %s16615_s18 }
 0x76d   : > { %5360 = vrot.lane.b32.xlu0 %v16695_v13, %s16615_s18 }
 0x771   : > { %5176 = vrot.lane.b32.xlu0 %v14724_v1, %s16686_s19 }
 0x774   : > { %v6771_v8 = vpop.f32.mrf.mxu0 }
 0x775   : > { %5338 = vrot.lane.b32.xlu0 %v14812_v16, %s16697_s20 }
 0x776   : > { %v6772_v47 = vpop.f32.mrf.mxu0 }
 0x777   : > { %v6773_v20 = vadd.f32 %v6772_v47, %v6771_v8 }
 0x779   : > { %5170 = vrot.lane.b32.xlu0 %v16698_v6, %s16686_s19 }
 0x77d   : > { %v6736_v35 = vpop.f32.mrf.mxu1  ;;  %5336 = vrot.lane.b32.xlu0 %v14724_v1, %s16697_s20 }
 0x77f   : > { %v6737_v12 = vpop.f32.mrf.mxu1 }
 0x780   : > { %v6738_v32 = vadd.f32 %v6737_v12, %v6736_v35 }
 0x781   : > { %5332 = vrot.lane.b32.xlu0 %v14369_v37, %s16697_s20 }
 0x782   : > { %v4885_v10 = vadd.f32 %v6738_v32, %v4815_v42  ;;  %v14930_v42 = vpop.permute.xlu1 %5132  ;;  %v16700_v32 = vld [vmem:[#allocation327_spill] sm:$0xff] }
 0x784   : > { %v4955_v1 = vadd.f32 %v6773_v20, %v4885_v10  ;;  %v14934_v10 = vpop.permute.xlu0 %5296  ;;  %v16705_v20 = vld [vmem:[#allocation27_spill] sm:$0xff] }
 0x785   : > { %5164 = vrot.lane.b32.xlu0 %v16694_v31, %s16686_s19  ;;  %16701 = vst [vmem:[#allocation7_spill] sm:$0xff] %v14934_v10 }
 0x786   : > { %v14938_v47 = vpop.permute.xlu1 %5092 }
 0x787   : > { %v5024_v59 = vpop.f32.mrf.mxu1 }
 0x788   : > { %v5025_v55 = vadd.f32 %v5024_v59, %v4955_v1  ;;  %v1609_v59 = vld [vmem:[%s15490_s4 + $0x8] sm:$0xff] }
 0x789   : > { %v6831_v15 = vpop.f32.mrf.mxu1  ;;  %5330 = vrot.lane.b32.xlu0 %v16698_v6, %s16697_s20  ;;  %v14940_v6 = vpop.permute.xlu0 %5256 }
 0x78a   : > { %5142 = vrot.lane.b32.xlu1 %v5025_v55, %s7718_s30  ;;  %16702 = vst [vmem:[#allocation50_spill] sm:$0xff] %v14940_v6  ;;  %v14946_v8 = vpop.permute.xlu1 %5052 }
 0x78d   : > { %5422 = vrot.lane.b32.xlu0 %v5025_v55, %s7711_s23  ;;  %v14949_v35 = vpop.permute.xlu0 %5416 }
 0x78e   : > { %5362 = vrot.lane.b32.xlu1 %v16700_v32, %s16615_s18  ;;  %v14954_v17 = vpop.permute.xlu1 %5292 }
 0x78f   : > { %16703 = vst [vmem:[#allocation51_spill] sm:$0xff] %v14954_v17 }
 0x791   : > { %5222 = vrot.lane.b32.xlu0 %v5025_v55, %s7716_s28  ;;  %v14956_v12 = vpop.permute.xlu0 %5216  ;;  %s359_s28 = scalar_lea.vmem %s15496_s10, %s6195_s29 }
 0x792   : > { %5102 = vrot.lane.b32.xlu1 %v5025_v55, %s7719_s11  ;;  %16704 = vst [vmem:[#allocation52_spill] sm:$0xff] %v14956_v12  ;;  %v14964_v1 = vpop.permute.xlu1 %5252 }
 0x793   : > { %16706 = vst [vmem:[#allocation53_spill] sm:$0xff] %v14964_v1 }
 0x795   : > { %5382 = vrot.lane.b32.xlu0 %v5025_v55, %s16615_s18  ;;  %v14971_v15 = vpop.permute.xlu0 %5376 }
 0x796   : > { %5178 = vrot.lane.b32.xlu1 %v14812_v16, %s16686_s19  ;;  %v14974_v29 = vpop.permute.xlu1 %5212 }
 0x797   : > { %16707 = vst [vmem:[#allocation54_spill] sm:$0xff] %v14974_v29 }
 0x799   : > { %5182 = vrot.lane.b32.xlu0 %v5025_v55, %s16686_s19 }
 0x79a   : > { %5062 = vrot.lane.b32.xlu1 %v5025_v55, %s7720_s12  ;;  %v5135_v3 = vpop.permute.xlu1 %5134 }
 0x79d   : > { %5342 = vrot.lane.b32.xlu0 %v5025_v55, %s16697_s20 }
 0x79e   : > { %5174 = vrot.lane.b32.xlu1 %v14546_v45, %s16686_s19 }
 0x7a1   : > { %5326 = vrot.lane.b32.xlu0 %v16705_v20, %s16697_s20 }
 0x7a2   : > { %5340 = vrot.lane.b32.xlu1 %v14822_v40, %s16697_s20 }
 0x7a5   : > { %5324 = vrot.lane.b32.xlu0 %v16694_v31, %s16697_s20 }
 0x7a6   : > { %5172 = vrot.lane.b32.xlu1 %v14369_v37, %s16686_s19 }
 0x7a9   : > { %5447 = vperm.xlu0 %6864, %v1609_v59   ;;  %v14987_v59 = vpop.permute.xlu1 %5094 }
 0x7aa   : > { %5302 = vrot.lane.b32.xlu1 %v5025_v55, %s7714_s26 }
 0x7ab   : > { %v5139_v12 = vpop.permute.xlu0 %5138 }
 0x7ad   : > { %v14996_v1 = vpop.permute.xlu1 %5054 }
 0x7ae   : > { %5168 = vrot.lane.b32.xlu1 %v16708_v58, %s16686_s19 }
 0x7af   : > { %v14978_v31 = vpop.permute.xlu0 %5098 }
 0x7b1   : > { %v15004_v61 = vpop.permute.xlu1 %5294 }
 0x7b2   : > { %5262 = vrot.lane.b32.xlu1 %v5025_v55, %s7715_s27  ;;  %16711 = vst [vmem:[#allocation57_spill] sm:$0xff] %v15004_v61 }
 0x7b3   : > { %v14981_v4 = vpop.permute.xlu0 %5058 }
 0x7b5   : > { %v15008_v5 = vpop.permute.xlu1 %5254 }
 0x7b6   : > { %5334 = vrot.lane.b32.xlu1 %v14546_v45, %s16697_s20  ;;  %16712 = vst [vmem:[#allocation58_spill] sm:$0xff] %v15008_v5 }
 0x7b7   : > { %v14985_v33 = vpop.permute.xlu0 %5298 }
 0x7b8   : > { %16709 = vst [vmem:[#allocation55_spill] sm:$0xff] %v14985_v33 }
 0x7b9   : > { %v5415_v43 = vpop.permute.xlu1 %5414 }
 0x7ba   : > { %5166 = vrot.lane.b32.xlu1 %v16705_v20, %s16686_s19 }
 0x7bb   : > { %v14991_v29 = vpop.permute.xlu0 %5258 }
 0x7bc   : > { %16710 = vst [vmem:[#allocation56_spill] sm:$0xff] %v14991_v29 }
 0x7bd   : > { %v15021_v17 = vpop.permute.xlu1 %5214 }
 0x7be   : > { %5162 = vrot.lane.b32.xlu1 %v16700_v32, %s16686_s19  ;;  %16714 = vst [vmem:[#allocation60_spill] sm:$0xff] %v15021_v17 }
 0x7bf   : > { %v5419_v55 = vpop.permute.xlu0 %5418 }
 0x7c1   : > { %v15027_v10 = vpop.permute.xlu1 %5374 }
 0x7c2   : > { %5328 = vrot.lane.b32.xlu1 %v16708_v58, %s16697_s20 }
 0x7c3   : > { %v15002_v6 = vpop.permute.xlu0 %5378 }
 0x7c6   : > { %5160 = vrot.lane.b32.xlu1 %v16695_v13, %s16686_s19 }
 0x7c7   : > { %v5141_v29 = vpop.permute.xlu0 %5140 }
 0x7ca   : > { %5322 = vrot.lane.b32.xlu1 %v16700_v32, %s16697_s20 }
 0x7cb   : > { %v5101_v28 = vpop.permute.xlu0 %5100 }
 0x7ce   : > { %5320 = vrot.lane.b32.xlu1 %v16695_v13, %s16697_s20  ;;  %v15031_v13 = vpop.permute.xlu1 %5218 }
 0x7cf   : > { %v15014_v26 = vpop.permute.xlu0 %5060  ;;  %16716 = vst [vmem:[#allocation62_spill] sm:$0xff] %v15031_v13 }
 0x7d2   : > { %5442 = vperm.xlu1 %6925, %v1608_v23   ;;  %v5421_v20 = vpop.permute.xlu1 %5420 }
 0x7d3   : > { %v15019_v53 = vpop.permute.xlu0 %5300 }
 0x7d4   : > { %16713 = vst [vmem:[#allocation59_spill] sm:$0xff] %v15019_v53 }
 0x7d6   : > { %v15039_v53 = vpop.permute.xlu1 %5220 }
 0x7d7   : > { %v15023_v5 = vpop.permute.xlu0 %5260  ;;  %16720 = vst [vmem:[#allocation66_spill] sm:$0xff] %v15039_v53 }
 0x7d8   : > { %16715 = vst [vmem:[#allocation61_spill] sm:$0xff] %v15023_v5 }
 0x7da   : > { %v5381_v5 = vpop.permute.xlu1 %5380 }
 0x7db   : > { %v15025_v61 = vpop.permute.xlu0 %5364 }
 0x7de   : > { %v15047_v16 = vpop.permute.xlu1 %5180 }
 0x7df   : > { %v15029_v33 = vpop.permute.xlu0 %5360  ;;  %16723 = vst [vmem:[#allocation69_spill] sm:$0xff] %v15047_v16 }
 0x7e3   : > { %v15033_v32 = vpop.permute.xlu0 %5176 }
 0x7e4   : > { %16717 = vst [vmem:[#allocation63_spill] sm:$0xff] %v15033_v32 }
 0x7e7   : > { %v15035_v58 = vpop.permute.xlu0 %5338 }
 0x7e8   : > { %16718 = vst [vmem:[#allocation64_spill] sm:$0xff] %v15035_v58  ;;  %v5150_v58 = vsel %vm479_vm12, %v5139_v12, %v5141_v29 }
 0x7eb   : > { %v15037_v23 = vpop.permute.xlu0 %5170 }
 0x7ec   : > { %16719 = vst [vmem:[#allocation65_spill] sm:$0xff] %v15037_v23  ;;  %v5149_v23 = vsel %vm479_vm12, %v5135_v3, %v14908_v34  ;;  %v5388_v34 = vsel %vm639_vm5, %v14904_v7, %v15027_v10  ;;  %v5386_v7 = vsel %vm639_vm5, %v14830_v63, %v14898_v38 }
 0x7ef   : > { %v15041_v17 = vpop.permute.xlu0 %5336 }
 0x7f0   : > { %16721 = vst [vmem:[#allocation67_spill] sm:$0xff] %v15041_v17 }
 0x7f3   : > { %v15043_v37 = vpop.permute.xlu0 %5332 }
 0x7f7   : > { %v15045_v45 = vpop.permute.xlu0 %5164 }
 0x7f8   : > { %16722 = vst [vmem:[#allocation68_spill] sm:$0xff] %v15045_v45  ;;  %v5148_v45 = vsel %vm479_vm12, %v14930_v42, %v5135_v3  ;;  %v5145_v3 = vsel %vm479_vm12, %v14804_v21, %v14774_v41  ;;  %v5426_v41 = vsel %vm666_vm4, %v14820_v36, %v14882_v9  ;;  %v5424_v36 = vsel %vm666_vm4, %v14772_v14, %v14848_v25 }
 0x7f9   : > { %v5106_v14 = vsel %vm452_vm13, %v14802_v57, %v14850_v0  ;;  %v5104_v57 = vsel %vm452_vm13, %v14784_v62, %v14808_v54  ;;  %v5070_v62 = vsel %vm425_vm14, %v14981_v4, %v15014_v26  ;;  %v5068_v4 = vsel %vm425_vm14, %v14946_v8, %v14996_v1  ;;  %v16728_v8 = vld [vmem:[#allocation28_spill] sm:$0xff] }
 0x7fb   : > { %v15049_v40 = vpop.permute.xlu0 %5330 }
 0x7fc   : > { %16724 = vst [vmem:[#allocation70_spill] sm:$0xff] %v15049_v40  ;;  %v5143_v13 = vpop.permute.xlu1 %5142  ;;  %v5430_v40 = vsel %vm666_vm4, %v5419_v55, %v5421_v20  ;;  %v16736_v55 = vld [vmem:[#allocation7_spill] sm:$0xff] }
 0x7fd   : > { %v5151_v32 = vsel %vm479_vm12, %v5141_v29, %v5143_v13  ;;  %v5147_v29 = vsel %vm479_vm12, %v14842_v11, %v14902_v18  ;;  %v5429_v13 = vsel %vm666_vm4, %v5415_v43, %v14949_v35  ;;  %v16729_v35 = vld [vmem:[#allocation30_spill] sm:$0xff] }
 0x7fe   : > { %5457 = vmatprep.subr.mxu0 %v5151_v32 }
 0x7ff   : > { %5458 = vmatpush1.msra.mxu0 %v5150_v58  ;;  %v5423_v53 = vpop.permute.xlu0 %5422  ;;  %v5146_v58 = vsel %vm479_vm12, %v14798_v30, %v14842_v11  ;;  %v5144_v30 = vsel %vm479_vm12, %v14780_v49, %v14804_v21  ;;  %v5425_v49 = vsel %vm666_vm4, %v14848_v25, %v14790_v2  ;;  %v5109_v21 = vsel %vm452_vm13, %v14987_v59, %v14916_v48 }
 0x800   : > { %5459 = vmatprep.subr.mxu0 %v5149_v23  ;;  %v15055_v17 = vpop.permute.xlu1 %5362  ;;  %v5431_v16 = vsel %vm666_vm4, %v5421_v20, %v5423_v53  ;;  %v5107_v48 = vsel %vm452_vm13, %v14850_v0, %v14912_v60  ;;  %v5389_v25 = vsel %vm639_vm5, %v15027_v10, %v14971_v15  ;;  %v5387_v53 = vsel %vm639_vm5, %v14898_v38, %v14892_v50  ;;  %v16733_v20 = vld [vmem:[#allocation281_spill] sm:$0xff] }
 0x801   : > { %5460 = vmatpush1.msra.mxu0 %v5148_v45  ;;  %5542 = vmatprep.subr.mxu1 %v5431_v16  ;;  %v5428_v16 = vsel %vm666_vm4, %v14896_v51, %v5415_v43  ;;  %v5110_v43 = vsel %vm452_vm13, %v14978_v31, %v5101_v28  ;;  %v5390_v51 = vsel %vm639_vm5, %v15002_v6, %v5381_v5  ;;  %v16726_v6 = vld [vmem:[#allocation64_spill] sm:$0xff]  ;;  %v16735_v31 = vld [vmem:[#allocation55_spill] sm:$0xff] }
 0x802   : > { %5461 = vmatprep.subr.mxu0 %v5147_v29  ;;  %5543 = vmatpush1.msra.mxu1 %v5430_v40  ;;  %v5427_v40 = vsel %vm666_vm4, %v14882_v9, %v14878_v56  ;;  %v5069_v50 = vsel %vm425_vm14, %v14996_v1, %v14922_v44  ;;  %v5384_v63 = vsel %vm639_vm5, %v15029_v33, %v15055_v17  ;;  %v16734_v1 = vld [vmem:[#allocation59_spill] sm:$0xff]  ;;  %vm5450_vm4 = vcmask 785408  }
 0x803   : > { %5462 = vmatpush1.msra.mxu0 %v5146_v58  ;;  %v15072_v45 = vpop.permute.xlu0 %5222  ;;  %5544 = vmatprep.subr.mxu1 %v5429_v13  ;;  %v5066_v44 = vsel %vm425_vm14, %v14806_v22, %v14858_v19  ;;  %v5065_v33 = vsel %vm425_vm14, %v14814_v24, %v14778_v27  ;;  %v5064_v10 = vsel %vm425_vm14, %v14788_v39, %v14814_v24  ;;  %v16731_v39 = vld [vmem:[#allocation27_spill] sm:$0xff] }
 0x804   : > { %5463 = vmatprep.subr.mxu0 %v5145_v3  ;;  %v5103_v18 = vpop.permute.xlu1 %5102  ;;  %5545 = vmatpush1.msra.mxu1 %v5428_v16  ;;  %v16732_v24 = vld [vmem:[#allocation327_spill] sm:$0xff]  ;;  %v16739_v3 = vld [vmem:[#allocation49_spill] sm:$0xff]  ;;  %v16740_v16 = vld [vmem:[#allocation44_spill] sm:$0xff] }
 0x805   : > { %5464 = vmatpush1.msra.mxu0 %v5144_v30  ;;  %v5111_v11 = vsel %vm452_vm13, %v5101_v28, %v5103_v18  ;;  %5546 = vmatprep.subr.mxu1 %v5427_v40  ;;  %v5108_v28 = vsel %vm452_vm13, %v14938_v47, %v14987_v59  ;;  %v16725_v47 = vld [vmem:[#allocation40_spill] sm:$0xff]  ;;  %v5310_v59 = vsel %vm585_vm7, %v16735_v31, %v16734_v1  ;;  %v16738_v58 = vld [vmem:[#allocation51_spill] sm:$0xff]  ;;  %v16741_v30 = vld [vmem:[#allocation33_spill] sm:$0xff] }
 0x806   : > { %5465 = vmatprep.subr.mxu0 %v5111_v11  ;;  %5547 = vmatpush1.msra.mxu1 %v5426_v41  ;;  %v5307_v18 = vsel %vm585_vm7, %v16740_v16, %v16739_v3  ;;  %v5306_v40 = vsel %vm585_vm7, %v16741_v30, %v16740_v16  ;;  %v16742_v41 = vld [vmem:[#allocation32_spill] sm:$0xff]  ;;  %v16769_v16 = vld [vmem:[#allocation70_spill] sm:$0xff] }
 0x807   : > { %5466 = vmatpush1.msra.mxu0 %v5110_v43  ;;  %v5383_v56 = vpop.permute.xlu0 %5382  ;;  %5548 = vmatprep.subr.mxu1 %v5425_v49  ;;  %v16743_v11 = vld [vmem:[#allocation36_spill] sm:$0xff] }
 0x808   : > { %5467 = vmatprep.subr.mxu0 %v5109_v21  ;;  %v15097_v9 = vpop.permute.xlu1 %5178  ;;  %5549 = vmatpush1.msra.mxu1 %v5424_v36  ;;  %v5391_v2 = vsel %vm639_vm5, %v5381_v5, %v5383_v56  ;;  %v5105_v5 = vsel %vm452_vm13, %v14808_v54, %v14776_v46  ;;  %v5385_v54 = vsel %vm639_vm5, %v15055_v17, %v15025_v61  ;;  %v16730_v17 = vld [vmem:[#allocation25_spill] sm:$0xff]  ;;  %v16744_v21 = vld [vmem:[#allocation34_spill] sm:$0xff]  ;;  %vm5779_vm5 = vcmask 15360  }
 0x809   : > { %5468 = vmatpush1.msra.mxu0 %v5108_v28  ;;  %5550 = vmatprep.subr.mxu1 %v5391_v2  ;;  %v5067_v61 = vsel %vm425_vm14, %v14858_v19, %v14918_v52  ;;  %v16727_v19 = vld [vmem:[#allocation38_spill] sm:$0xff]  ;;  %v5305_v43 = vsel %vm585_vm7, %v16743_v11, %v16742_v41  ;;  %v5304_v56 = vsel %vm585_vm7, %v16744_v21, %v16743_v11  ;;  %v16745_v36 = vld [vmem:[#allocation61_spill] sm:$0xff]  ;;  %v16746_v2 = vld [vmem:[#allocation56_spill] sm:$0xff] }
 0x80a   : > { %5469 = vmatprep.subr.mxu0 %v5107_v48  ;;  %5551 = vmatpush1.msra.mxu1 %v5390_v51  ;;  %v5270_v51 = vsel %vm560_vm9, %v16746_v2, %v16745_v36  ;;  %v16747_v48 = vld [vmem:[#allocation50_spill] sm:$0xff]  ;;  %v16772_v21 = vld [vmem:[#allocation68_spill] sm:$0xff] }
 0x80b   : > { %5470 = vmatpush1.msra.mxu0 %v5106_v14  ;;  %5552 = vmatprep.subr.mxu1 %v5389_v25  ;;  %v15123_v0 = vpop.permute.xlu0 %5182  ;;  %v16748_v14 = vld [vmem:[#allocation58_spill] sm:$0xff] }
 0x80c   : > { %5471 = vmatprep.subr.mxu0 %v5105_v5  ;;  %v5063_v60 = vpop.permute.xlu1 %5062  ;;  %5553 = vmatpush1.msra.mxu1 %v5388_v34  ;;  %v5269_v25 = vsel %vm560_vm9, %v16748_v14, %v16747_v48  ;;  %v16749_v34 = vld [vmem:[#allocation53_spill] sm:$0xff]  ;;  %v1606_v2 = vld [vmem:[%s15489_s3 + $0x20] sm:$0xff] }
 0x80d   : > { %5472 = vmatpush1.msra.mxu0 %v5104_v57  ;;  %v5071_v46 = vsel %vm425_vm14, %v15014_v26, %v5063_v60  ;;  %5554 = vmatprep.subr.mxu1 %v5387_v53  ;;  %v16737_v26 = vld [vmem:[#allocation57_spill] sm:$0xff]  ;;  %v5268_v60 = vsel %vm560_vm9, %v16749_v34, %v16748_v14  ;;  %v16750_v53 = vld [vmem:[#allocation42_spill] sm:$0xff]  ;;  %v1604_v14 = vld [vmem:[%s15489_s3 + $0x10] sm:$0xff] }
 0x80e   : > { %5473 = vmatprep.subr.mxu0 %v5071_v46  ;;  %5555 = vmatpush1.msra.mxu1 %v5386_v7  ;;  %v5309_v23 = vsel %vm585_vm7, %v16737_v26, %v16736_v55  ;;  %v5308_v13 = vsel %vm585_vm7, %v16738_v58, %v16737_v26  ;;  %v16751_v46 = vld [vmem:[#allocation46_spill] sm:$0xff]  ;;  %v16767_v26 = vld [vmem:[#allocation37_spill] sm:$0xff]  ;;  %v1607_v34 = vld [vmem:[%s15489_s3 + $0x28] sm:$0xff] }
 0x80f   : > { %5474 = vmatpush1.msra.mxu0 %v5070_v62  ;;  %5556 = vmatprep.subr.mxu1 %v5385_v54  ;;  %v5343_v42 = vpop.permute.xlu0 %5342  ;;  %v5267_v7 = vsel %vm560_vm9, %v16751_v46, %v16750_v53  ;;  %v16752_v62 = vld [vmem:[#allocation67_spill] sm:$0xff] }
 0x810   : > { %5475 = vmatprep.subr.mxu0 %v5069_v50  ;;  %v15145_v38 = vpop.permute.xlu1 %5174  ;;  %5557 = vmatpush1.msra.mxu1 %v5384_v63  ;;  %v16753_v50 = vld [vmem:[#allocation39_spill] sm:$0xff] }
 0x811   : > { %5476 = vmatpush1.msra.mxu0 %v5068_v4  ;;  %v5266_v63 = vsel %vm560_vm9, %v16753_v50, %v16751_v46  ;;  %v16754_v4 = vld [vmem:[#allocation6_spill] sm:$0xff] }
 0x812   : > { %5477 = vmatprep.subr.mxu0 %v5067_v61  ;;  %v16755_v61 = vld [vmem:[#allocation41_spill] sm:$0xff] }
 0x813   : > { %5478 = vmatpush1.msra.mxu0 %v5066_v44 }
 0x814   : > { %5479 = vmatprep.subr.mxu0 %v5065_v33  ;;  %v5341_v32 = vpop.permute.xlu1 %5340 }
 0x815   : > { %5480 = vmatpush1.msra.mxu0 %v5064_v10  ;;  %v5351_v52 = vsel %vm612_vm6, %v5341_v32, %v5343_v42  ;;  %v5350_v22 = vsel %vm612_vm6, %v16726_v6, %v5341_v32  ;;  %v16756_v42 = vld [vmem:[#allocation35_spill] sm:$0xff]  ;;  %v16757_v32 = vld [vmem:[#allocation66_spill] sm:$0xff]  ;;  %v16759_v6 = vld [vmem:[#allocation52_spill] sm:$0xff] }
 0x816   : > { %5481 = vmatprep.subr.mxu0 %v16725_v47  ;;  %5558 = vmatprep.subr.mxu1 %v5351_v52  ;;  %v5264_v33 = vsel %vm560_vm9, %v16756_v42, %v16755_v61  ;;  %v5231_v10 = vsel %vm533_vm10, %v16757_v32, %v15072_v45  ;;  %v16758_v52 = vld [vmem:[#allocation62_spill] sm:$0xff] }
 0x817   : > { %5482 = vmatpush1.msra.mxu0 %v16727_v19  ;;  %5559 = vmatpush1.msra.mxu1 %v5350_v22  ;;  %v5230_v47 = vsel %vm533_vm10, %v16758_v52, %v16757_v32  ;;  %v16760_v22 = vld [vmem:[#allocation60_spill] sm:$0xff] }
 0x818   : > { %5483 = vmatprep.subr.mxu0 %v16728_v8  ;;  %v15168_v27 = vpop.permute.xlu1 %5172  ;;  %v5229_v19 = vsel %vm533_vm10, %v16760_v22, %v16759_v6 }
 0x819   : > { %5484 = vmatpush1.msra.mxu0 %v16729_v35  ;;  %v16761_v35 = vld [vmem:[#allocation54_spill] sm:$0xff]  ;;  %v5188_v11 = vsel %vm506_vm11, %v15168_v27, %v15145_v38 }
 0x81a   : > { %5485 = vmatprep.subr.mxu0 %v16730_v17  ;;  %v5228_v17 = vsel %vm533_vm10, %v16761_v35, %v16760_v22 }
 0x81b   : > { %5486 = vmatpush1.msra.mxu0 %v16731_v39  ;;  %v16762_v39 = vld [vmem:[#allocation47_spill] sm:$0xff] }
 0x81c   : > { %5487 = vmatprep.subr.mxu0 %v16732_v24  ;;  %v5303_v12 = vpop.permute.xlu1 %5302  ;;  %v16763_v24 = vld [vmem:[#allocation48_spill] sm:$0xff] }
 0x81d   : > { %5488 = vmatpush1.msra.mxu0 %v16733_v20  ;;  %v5311_v15 = vsel %vm585_vm7, %v16734_v1, %v5303_v12  ;;  %v5227_v45 = vsel %vm533_vm10, %v16763_v24, %v16762_v39  ;;  %v16764_v12 = vld [vmem:[#allocation45_spill] sm:$0xff]  ;;  %v16765_v1 = vld [vmem:[#allocation31_spill] sm:$0xff]  ;;  %vm6009_vm7 = vcmask 7168  }
 0x81e   : > { %5489 = vmatprep.subr.mxu0 %v5311_v15  ;;  %v5226_v20 = vsel %vm533_vm10, %v16764_v12, %v16763_v24  ;;  %v16766_v15 = vld [vmem:[#allocation43_spill] sm:$0xff] }
 0x81f   : > { %5490 = vmatpush2.msra.mxu0 %v5310_v59  ;;  %v5225_v31 = vsel %vm533_vm10, %v16766_v15, %v16765_v1  ;;  %v5327_v59 = vpop.permute.xlu0 %5326 }
 0x820   : > { %5491 = vmatprep.subr.mxu0 %v5309_v23  ;;  %v15183_v29 = vpop.permute.xlu1 %5168  ;;  %v5224_v23 = vsel %vm533_vm10, %v16767_v26, %v16766_v15 }
 0x821   : > { %5492 = vmatpush2.msra.mxu0 %v5308_v13  ;;  %v16768_v13 = vld [vmem:[#allocation69_spill] sm:$0xff] }
 0x822   : > { %5493 = vmatprep.subr.mxu0 %v5307_v18  ;;  %v5191_v3 = vsel %vm506_vm11, %v16768_v13, %v15123_v0  ;;  %v5190_v30 = vsel %vm506_vm11, %v15097_v9, %v16768_v13 }
 0x823   : > { %5494 = vmatpush2.msra.mxu0 %v5306_v40  ;;  %v16770_v40 = vld [vmem:[#allocation63_spill] sm:$0xff] }
 0x824   : > { %5495 = vmatprep.subr.mxu0 %v5305_v43  ;;  %v5263_v49 = vpop.permute.xlu1 %5262  ;;  %v5189_v41 = vsel %vm506_vm11, %v15145_v38, %v16770_v40  ;;  %v16771_v43 = vld [vmem:[#allocation65_spill] sm:$0xff]  ;;  %v5325_v38 = vpop.permute.xlu0 %5324 }
 0x825   : > { %5496 = vmatpush2.msra.mxu0 %v5304_v56  ;;  %v5271_v28 = vsel %vm560_vm9, %v16745_v36, %v5263_v49  ;;  %v5187_v49 = vsel %vm506_vm11, %v15183_v29, %v16771_v43  ;;  %v1602_v36 = vld [vmem:[%s15489_s3] sm:$0xff] }
 0x826   : > { %5497 = vmatprep.subr.mxu0 %v5271_v28 }
 0x827   : > { %5498 = vmatpush2.msra.mxu0 %v5270_v51  ;;  %v1605_v51 = vld [vmem:[%s15489_s3 + $0x18] sm:$0xff] }
 0x828   : > { %5499 = vmatprep.subr.mxu0 %v5269_v25  ;;  %v5335_v5 = vpop.permute.xlu1 %5334  ;;  %v5448_v42 = vpop.permute.xlu0 %5447 }
 0x829   : > { %v5348_v57 = vsel %vm612_vm6, %v15043_v37, %v5335_v5  ;;  %5500 = vmatpush2.msra.mxu0 %v5268_v60  ;;  %v5349_v54 = vsel %vm612_vm6, %v5335_v5, %v16752_v62  ;;  %v5265_v37 = vsel %vm560_vm9, %v16755_v61, %v16754_v4  ;;  %v16773_v5 = vmov 0.0  }
 0x82a   : > { %5501 = vmatprep.subr.mxu0 %v5267_v7  ;;  %5560 = vmatprep.subr.mxu1 %v5349_v54  ;;  %vm6034_vm9 = vcmask 392192  }
 0x82b   : > { %5502 = vmatpush2.msra.mxu0 %v5266_v63  ;;  %5561 = vmatpush1.msra.mxu1 %v5348_v57 }
 0x82c   : > { %5503 = vmatprep.subr.mxu0 %v5265_v37  ;;  %v5167_v44 = vpop.permute.xlu1 %5166  ;;  %6927 = vrot.lane.b32.xlu0 %v16773_v5, %s16686_s19 }
 0x82d   : > { %5504 = vmatpush2.msra.mxu0 %v5264_v33  ;;  %v5186_v9 = vsel %vm506_vm11, %v5167_v44, %v15183_v29  ;;  %6932 = vrot.lane.b32.xlu1 %v16773_v5, %s7718_s30 }
 0x82e   : > { %5505 = vmatprep.subr.mxu0 %v5231_v10 }
 0x82f   : > { %5506 = vmatpush2.msra.mxu0 %v5230_v47 }
 0x830   : > { %5507 = vmatprep.subr.mxu0 %v5229_v19  ;;  %v5163_v8 = vpop.permute.xlu1 %5162 }
 0x831   : > { %5508 = vmatpush2.msra.mxu0 %v5228_v17  ;;  %v5185_v56 = vsel %vm506_vm11, %v5163_v8, %v16772_v21 }
 0x832   : > { %5509 = vmatprep.subr.mxu0 %v5227_v45 }
 0x833   : > { %5510 = vmatpush2.msra.mxu0 %v5226_v20 }
 0x834   : > { %5511 = vmatprep.subr.mxu0 %v5225_v31  ;;  %v5329_v55 = vpop.permute.xlu1 %5328 }
 0x835   : > { %v5346_v58 = vsel %vm612_vm6, %v5327_v59, %v5329_v55  ;;  %5512 = vmatpush2.msra.mxu0 %v5224_v23  ;;  %v5347_v18 = vsel %vm612_vm6, %v5329_v55, %v16769_v16 }
 0x836   : > { %5513 = vmatprep.subr.mxu0 %v5191_v3  ;;  %5562 = vmatprep.subr.mxu1 %v5347_v18 }
 0x837   : > { %5514 = vmatpush2.msra.mxu0 %v5190_v30  ;;  %5563 = vmatpush1.msra.mxu1 %v5346_v58 }
 0x838   : > { %5515 = vmatprep.subr.mxu0 %v5189_v41  ;;  %v5161_v0 = vpop.permute.xlu1 %5160 }
 0x839   : > { %5516 = vmatpush2.msra.mxu0 %v5188_v11  ;;  %v5184_v27 = vsel %vm506_vm11, %v5161_v0, %v5163_v8 }
 0x83a   : > { %5517 = vmatprep.subr.mxu0 %v5187_v49 }
 0x83b   : > { %5518 = vmatpush2.msra.mxu0 %v5186_v9 }
 0x83c   : > { %5519 = vmatprep.subr.mxu0 %v5185_v56  ;;  %v5323_v28 = vpop.permute.xlu1 %5322 }
 0x83d   : > { %5520 = vmatpush2.msra.mxu0 %v5184_v27  ;;  %v5345_v29 = vsel %vm612_vm6, %v5323_v28, %v5325_v38 }
 0x83e   : > { %5522 = vmatmul.mubr.f32.vlgmr.msra.gmra.mxu0 %v1602_v36  ;;  %5564 = vmatprep.subr.mxu1 %v5345_v29 }
 0x83f   : > { %5527 = vmatprep.mubr.f32.mxu0 %v1606_v2 }
 0x840   : > { %v5321_v48 = vpop.permute.xlu1 %5320 }
 0x841   : > { %v5344_v25 = vsel %vm612_vm6, %v5321_v48, %v5323_v28  ;;  %vm5820_vm6 = vcmask 654336  }
 0x842   : > { %5528 = vmatmul.mubr.f32.gmra.mxu0 %v1605_v51  ;;  %5565 = vmatpush1.msra.mxu1 %v5344_v25 }
 0x843   : > { %6187 = vmatmul.mubr.msk.f32.vlgmr.msra.gmra.mxu1 %vm5450_vm4, %v1604_v14 }
 0x844   : > { %5604 = vmatprep.mubr.f32.mxu1 %v16773_v5 }
 0x847   : > { %6188 = vmatmul.mubr.msk.f32.gmra.mxu1 %vm5450_vm4, %v1607_v34  ;;  %v5621_v34 = vld [vmem:[%s15493_s7] sm:$0xff] }
 0x848   : > { %5891 = vmatprep.mubr.f32.mxu1 %v16773_v5 }
 0x84d   : > { %v5443_v60 = vpop.permute.xlu1 %5442 }
 0x89e   : > { %v6928_v24 = vpop.permute.xlu0 %6927 }
 0x89f   : > { %v6933_v45 = vpop.permute.xlu1 %6932  ;;  %v6930_v43 = vunpack.i.h.bf16 %v6928_v24  ;;  %v6929_v38 = vunpack.i.l.bf16 %v6928_v24 }
 0x8a0   : > { %v6935_v9 = vunpack.i.h.bf16 %v6933_v45  ;;  %v6934_v28 = vunpack.i.l.bf16 %v6933_v45 }
 0x8fe   : > { %v5523_v57 = vpop.f32.mrf.mxu0 }
 0x8ff   : > { %v5524_v53 = vadd.f32 %v5523_v57, %v5443_v60 }
 0x900   : > { %v5525_v46 = vpop.f32.mrf.mxu0 }
 0x901   : > { %v5526_v62 = vadd.f32 %v5525_v46, %v5443_v60 }
 0x902   : > { %v5529_v61 = vpop.f32.mrf.mxu0 }
 0x903   : > { %v5600_v7 = vpop.f32.mrf.mxu1  ;;  %v5530_v32 = vadd.f32 %v5529_v61, %v5448_v42 }
 0x904   : > { %v5601_v54 = vadd.f32 %v5600_v7, %v5524_v53  ;;  %v5531_v10 = vpop.f32.mrf.mxu0  ;;  %v5622_v53 = vld [vmem:[%s15493_s7 + $0x8] sm:$0xff] }
 0x905   : > { %v5602_v50 = vpop.f32.mrf.mxu1  ;;  %v5532_v22 = vadd.f32 %v5531_v10, %v5448_v42 }
 0x906   : > { %v5611_v63 = vmul.f32 0.1, %v5601_v54  ;;  %v5603_v4 = vadd.f32 %v5602_v50, %v5526_v62 }
 0x907   : > { %v5606_v33 = vpop.f32.mrf.mxu1 }
 0x908   : > { %v15297_v37 = vmax.f32 %v5601_v54, %v5611_v63  ;;  %v5612_v44 = vmul.f32 0.1, %v5603_v4  ;;  %v5607_v47 = vadd.f32 %v5606_v33, %v5530_v32 }
 0x909   : > { %v5608_v6 = vpop.f32.mrf.mxu1 }
 0x90a   : > { %5677 = vrot.lane.b32.xlu0 %v15297_v37, %s7718_s30  ;;  %5693 = vrot.lane.b32.xlu1 %v15297_v37, %s16686_s19  ;;  %v15303_v52 = vmax.f32 %v5603_v4, %v5612_v44  ;;  %v5613_v19 = vmul.f32 0.1, %v5607_v47  ;;  %v5609_v8 = vadd.f32 %v5608_v6, %v5532_v22 }
 0x90c   : > { %v15313_v35 = vmax.f32 %v5607_v47, %v5613_v19  ;;  %v5614_v17 = vmul.f32 0.1, %v5609_v8 }
 0x90e   : > { %5665 = vrot.lane.b32.xlu0 %v15297_v37, %s7719_s11  ;;  %5679 = vrot.lane.b32.xlu1 %v15303_v52, %s7718_s30  ;;  %v15319_v39 = vmax.f32 %v5609_v8, %v5614_v17 }
 0x912   : > { %5695 = vrot.lane.b32.xlu0 %v15303_v52, %s16686_s19  ;;  %5667 = vrot.lane.b32.xlu1 %v15303_v52, %s7719_s11 }
 0x916   : > { %5699 = vrot.lane.b32.xlu0 %v15313_v35, %s16686_s19  ;;  %5683 = vrot.lane.b32.xlu1 %v15313_v35, %s7718_s30 }
 0x91a   : > { %5669 = vrot.lane.b32.xlu0 %v15313_v35, %s7719_s11  ;;  %5701 = vrot.lane.b32.xlu1 %v15319_v39, %s16686_s19 }
 0x91e   : > { %5685 = vrot.lane.b32.xlu0 %v15319_v39, %s7718_s30  ;;  %5651 = vrot.lane.b32.xlu1 %v15297_v37, %s7720_s12  ;;  %s7728_s30 = smov 2  }
 0x922   : > { %5657 = vrot.lane.b32.xlu0 %v15313_v35, %s7720_s12  ;;  %5671 = vrot.lane.b32.xlu1 %v15319_v39, %s7719_s11 }
 0x926   : > { %5655 = vrot.lane.b32.xlu0 %v16773_v5, %s7720_s12  ;;  %5659 = vrot.lane.b32.xlu1 %v15319_v39, %s7720_s12 }
 0x92a   : > { %5653 = vrot.lane.b32.xlu0 %v15303_v52, %s7720_s12  ;;  %5649 = vrot.lane.b32.xlu1 %v16773_v5, %s7720_s12 }
 0x97c   : > { %v5678_v12 = vpop.permute.xlu0 %5677  ;;  %v5694_v20 = vpop.permute.xlu1 %5693 }
 0x97d   : > { %5767 = vrot.lane.b32.xlu1 %v5694_v20, %s7728_s30 }
 0x980   : > { %v5666_v1 = vpop.permute.xlu0 %5665  ;;  %v5680_v15 = vpop.permute.xlu1 %5679 }
 0x981   : > { %5755 = vrot.lane.b32.xlu1 %v5678_v12, %s7728_s30  ;;  %v5689_v23 = vsel %vm479_vm12, %v5678_v12, %v5680_v15  ;;  %v5690_v56 = vsel %vm479_vm12, %v5680_v15, %v6935_v9 }
 0x984   : > { %v5696_v31 = vpop.permute.xlu0 %5695  ;;  %v5668_v59 = vpop.permute.xlu1 %5667 }
 0x985   : > { %5743 = vrot.lane.b32.xlu1 %v5666_v1, %s7728_s30  ;;  %5747 = vrot.lane.b32.xlu0 %v5668_v59, %s7728_s30  ;;  %v5705_v55 = vsel %vm506_vm11, %v5694_v20, %v5696_v31  ;;  %v5673_v3 = vsel %vm452_vm13, %v5666_v1, %v5668_v59  ;;  %v5706_v21 = vsel %vm506_vm11, %v5696_v31, %v6930_v43 }
 0x988   : > { %v5700_v26 = vpop.permute.xlu0 %5699  ;;  %v5684_v13 = vpop.permute.xlu1 %5683 }
 0x989   : > { %5769 = vrot.lane.b32.xlu1 %v5705_v55, %s7728_s30 }
 0x98c   : > { %v5670_v58 = vpop.permute.xlu0 %5669  ;;  %v5702_v18 = vpop.permute.xlu1 %5701 }
 0x98d   : > { %5757 = vrot.lane.b32.xlu1 %v5689_v23, %s7728_s30  ;;  %v5708_v27 = vsel %vm506_vm11, %v5702_v18, %v6929_v38  ;;  %v5707_v14 = vsel %vm506_vm11, %v5700_v26, %v5702_v18 }
 0x990   : > { %v5686_v16 = vpop.permute.xlu0 %5685  ;;  %v5652_v41 = vpop.permute.xlu1 %5651 }
 0x991   : > { %5745 = vrot.lane.b32.xlu1 %v5673_v3, %s7728_s30  ;;  %v5692_v2 = vsel %vm479_vm12, %v5686_v16, %v6934_v28  ;;  %v5691_v25 = vsel %vm479_vm12, %v5684_v13, %v5686_v16 }
 0x994   : > { %v5658_v30 = vpop.permute.xlu0 %5657  ;;  %v5672_v49 = vpop.permute.xlu1 %5671 }
 0x995   : > { %v5674_v60 = vsel %vm452_vm13, %v5670_v58, %v5672_v49 }
 0x998   : > { %v5656_v40 = vpop.permute.xlu0 %5655  ;;  %v5660_v36 = vpop.permute.xlu1 %5659 }
 0x999   : > { %v5663_v48 = vsel %vm425_vm14, %v5656_v40, %v5658_v30  ;;  %v5664_v57 = vsel %vm425_vm14, %v5658_v30, %v5660_v36 }
 0x99c   : > { %v5654_v11 = vpop.permute.xlu0 %5653  ;;  %v5650_v29 = vpop.permute.xlu1 %5649 }
 0x99d   : > { %v5662_v0 = vsel %vm425_vm14, %v5652_v41, %v5654_v11  ;;  %5735 = vrot.lane.b32.xlu0 %v5654_v11, %s7728_s30  ;;  %v5661_v51 = vsel %vm425_vm14, %v5650_v29, %v5652_v41 }
 0x99e   : > { %5733 = vrot.lane.b32.xlu1 %v5662_v0, %s7728_s30 }
 0x9a1   : > { %5771 = vrot.lane.b32.xlu0 %v5706_v21, %s7728_s30 }
 0x9a2   : > { %5753 = vrot.lane.b32.xlu1 %v5672_v49, %s7728_s30 }
 0x9a5   : > { %5759 = vrot.lane.b32.xlu0 %v5690_v56, %s7728_s30 }
 0x9a6   : > { %5741 = vrot.lane.b32.xlu1 %v5660_v36, %s7728_s30  ;;  %v5619_v36 = vld [vmem:[%s15492_s6] sm:$0xff] }
 0x9a9   : > { %5773 = vrot.lane.b32.xlu0 %v5700_v26, %s7728_s30 }
 0x9aa   : > { %5777 = vrot.lane.b32.xlu1 %v5708_v27, %s7728_s30  ;;  %v5620_v27 = vld [vmem:[%s15492_s6 + $0x8] sm:$0xff] }
 0x9ad   : > { %5761 = vrot.lane.b32.xlu0 %v5684_v13, %s7728_s30 }
 0x9ae   : > { %5765 = vrot.lane.b32.xlu1 %v5692_v2, %s7728_s30 }
 0x9b1   : > { %5749 = vrot.lane.b32.xlu0 %v5670_v58, %s7728_s30 }
 0x9b2   : > { %5731 = vrot.lane.b32.xlu1 %v5661_v51, %s7728_s30 }
 0x9b5   : > { %5737 = vrot.lane.b32.xlu0 %v5663_v48, %s7728_s30 }
 0x9b6   : > { %5729 = vrot.lane.b32.xlu1 %v15319_v39, %s7728_s30 }
 0x9b9   : > { %5775 = vrot.lane.b32.xlu0 %v5707_v14, %s7728_s30 }
 0x9ba   : > { %5721 = vrot.lane.b32.xlu1 %v15297_v37, %s7728_s30 }
 0x9bd   : > { %5763 = vrot.lane.b32.xlu0 %v5691_v25, %s7728_s30 }
 0x9be   : > { %5719 = vrot.lane.b32.xlu1 %v16773_v5, %s7728_s30 }
 0x9c1   : > { %5727 = vrot.lane.b32.xlu0 %v15313_v35, %s7728_s30 }
 0x9c2   : > { %5711 = vperm.xlu1 %6925, %v5621_v34  }
 0x9c5   : > { %5751 = vrot.lane.b32.xlu0 %v5674_v60, %s7728_s30 }
 0x9c9   : > { %5739 = vrot.lane.b32.xlu0 %v5664_v57, %s7728_s30 }
 0x9cd   : > { %5725 = vrot.lane.b32.xlu0 %v16773_v5, %s7728_s30 }
 0x9d1   : > { %5723 = vrot.lane.b32.xlu0 %v15303_v52, %s7728_s30 }
 0x9d5   : > { %5716 = vperm.xlu0 %6864, %v5622_v53  }
 0x9d9   : > { %6937 = vrot.lane.b32.xlu0 %v16773_v5, %s7719_s11 }
 0x9ef   : > { %v5768_v46 = vpop.permute.xlu1 %5767 }
 0x9f3   : > { %v5756_v7 = vpop.permute.xlu1 %5755 }
 0x9f7   : > { %v5744_v62 = vpop.permute.xlu1 %5743  ;;  %v5748_v63 = vpop.permute.xlu0 %5747 }
 0x9fb   : > { %v5770_v54 = vpop.permute.xlu1 %5769 }
 0x9fc   : > { %v5796_v24 = vsel %vm5779_vm5, %v5768_v46, %v5770_v54 }
 0x9ff   : > { %v5758_v50 = vpop.permute.xlu1 %5757 }
 0xa00   : > { %v5792_v31 = vsel %vm5779_vm5, %v5756_v7, %v5758_v50 }
 0xa03   : > { %v5746_v4 = vpop.permute.xlu1 %5745 }
 0xa04   : > { %v5789_v13 = vsel %vm5779_vm5, %v5746_v4, %v5748_v63  ;;  %v5788_v3 = vsel %vm5779_vm5, %v5744_v62, %v5746_v4 }
 0xa0f   : > { %v5736_v61 = vpop.permute.xlu0 %5735 }
 0xa10   : > { %v5734_v37 = vpop.permute.xlu1 %5733 }
 0xa11   : > { %v5785_v41 = vsel %vm5779_vm5, %v5734_v37, %v5736_v61 }
 0xa13   : > { %v5772_v44 = vpop.permute.xlu0 %5771 }
 0xa14   : > { %v5754_v33 = vpop.permute.xlu1 %5753  ;;  %v5797_v39 = vsel %vm5779_vm5, %v5770_v54, %v5772_v44 }
 0xa17   : > { %v5760_v42 = vpop.permute.xlu0 %5759 }
 0xa18   : > { %v5742_v10 = vpop.permute.xlu1 %5741  ;;  %v5793_v15 = vsel %vm5779_vm5, %v5758_v50, %v5760_v42 }
 0xa1b   : > { %v5774_v32 = vpop.permute.xlu0 %5773 }
 0xa1c   : > { %v5778_v6 = vpop.permute.xlu1 %5777 }
 0xa1f   : > { %v5762_v52 = vpop.permute.xlu0 %5761 }
 0xa20   : > { %v5766_v19 = vpop.permute.xlu1 %5765 }
 0xa23   : > { %v5750_v47 = vpop.permute.xlu0 %5749 }
 0xa24   : > { %v5732_v12 = vpop.permute.xlu1 %5731 }
 0xa25   : > { %v5784_v11 = vsel %vm5779_vm5, %v5732_v12, %v5734_v37 }
 0xa27   : > { %v5738_v22 = vpop.permute.xlu0 %5737 }
 0xa28   : > { %v5730_v55 = vpop.permute.xlu1 %5729 }
 0xa2b   : > { %v5776_v8 = vpop.permute.xlu0 %5775 }
 0xa2c   : > { %v5798_v35 = vsel %vm5779_vm5, %v5774_v32, %v5776_v8  ;;  %v5799_v17 = vsel %vm5779_vm5, %v5776_v8, %v5778_v6  ;;  %v5722_v18 = vpop.permute.xlu1 %5721 }
 0xa2d   : > { %5839 = vmatprep.subr.mxu1 %v5799_v17 }
 0xa2e   : > { %5840 = vmatpush1.msra.mxu1 %v5798_v35 }
 0xa2f   : > { %5841 = vmatprep.subr.mxu1 %v5797_v39  ;;  %v5764_v45 = vpop.permute.xlu0 %5763 }
 0xa30   : > { %v5794_v20 = vsel %vm5779_vm5, %v5762_v52, %v5764_v45  ;;  %5842 = vmatpush1.msra.mxu1 %v5796_v24  ;;  %v5795_v1 = vsel %vm5779_vm5, %v5764_v45, %v5766_v19  ;;  %v5720_v9 = vpop.permute.xlu1 %5719  ;;  %v5913_v45 = vld [vmem:[%s15495_s9] sm:$0xff] }
 0xa31   : > { %5843 = vmatprep.subr.mxu1 %v5795_v1  ;;  %v5780_v38 = vsel %vm5779_vm5, %v5720_v9, %v5722_v18 }
 0xa32   : > { %5844 = vmatpush1.msra.mxu1 %v5794_v20 }
 0xa33   : > { %v5728_v59 = vpop.permute.xlu0 %5727  ;;  %5845 = vmatprep.subr.mxu1 %v5793_v15 }
 0xa34   : > { %5846 = vmatpush1.msra.mxu1 %v5792_v31  ;;  %v5783_v49 = vsel %vm5779_vm5, %v5728_v59, %v5730_v55 }
 0xa37   : > { %v5752_v26 = vpop.permute.xlu0 %5751 }
 0xa38   : > { %v5790_v23 = vsel %vm5779_vm5, %v5750_v47, %v5752_v26  ;;  %v5791_v58 = vsel %vm5779_vm5, %v5752_v26, %v5754_v33 }
 0xa39   : > { %5847 = vmatprep.subr.mxu1 %v5791_v58 }
 0xa3a   : > { %5848 = vmatpush1.msra.mxu1 %v5790_v23 }
 0xa3b   : > { %v5740_v16 = vpop.permute.xlu0 %5739  ;;  %5849 = vmatprep.subr.mxu1 %v5789_v13 }
 0xa3c   : > { %v5786_v30 = vsel %vm5779_vm5, %v5738_v22, %v5740_v16  ;;  %5850 = vmatpush1.msra.mxu1 %v5788_v3  ;;  %v5787_v40 = vsel %vm5779_vm5, %v5740_v16, %v5742_v10 }
 0xa3d   : > { %5851 = vmatprep.subr.mxu1 %v5787_v40  ;;  %v5712_v28 = vpop.permute.xlu1 %5711 }
 0xa3e   : > { %5852 = vmatpush1.msra.mxu1 %v5786_v30 }
 0xa3f   : > { %v5726_v0 = vpop.permute.xlu0 %5725  ;;  %5853 = vmatprep.subr.mxu1 %v5785_v41 }
 0xa40   : > { %v5782_v43 = vsel %vm5779_vm5, %v5726_v0, %v5728_v59  ;;  %5854 = vmatpush1.msra.mxu1 %v5784_v11 }
 0xa41   : > { %5855 = vmatprep.subr.mxu1 %v5783_v49 }
 0xa42   : > { %5856 = vmatpush1.msra.mxu1 %v5782_v43 }
 0xa43   : > { %v5724_v21 = vpop.permute.xlu0 %5723 }
 0xa44   : > { %v5781_v56 = vsel %vm5779_vm5, %v5722_v18, %v5724_v21 }
 0xa45   : > { %5857 = vmatprep.subr.mxu1 %v5781_v56 }
 0xa46   : > { %5858 = vmatpush1.msra.mxu1 %v5780_v38 }
 0xa47   : > { %6189 = vmatmul.mubr.msk.f32.vlgmr.msra.gmra.mxu1 %vm5820_vm6, %v5619_v36 }
 0xa48   : > { %5897 = vmatprep.mubr.f32.mxu1 %v16773_v5 }
 0xa4b   : > { %6190 = vmatmul.mubr.msk.f32.gmra.mxu1 %vm5820_vm6, %v5620_v27 }
 0xa4c   : > { %6102 = vmatprep.mubr.f32.mxu1 %v16773_v5 }
 0xa50   : > { %v5717_v25 = vpop.permute.xlu0 %5716 }
 0xa54   : > { %v6938_v61 = vpop.permute.xlu0 %6937 }
 0xa55   : > { %v6940_v6 = vunpack.i.h.bf16 %v6938_v61  ;;  %v6939_v35 = vunpack.i.l.bf16 %v6938_v61 }
 0xb07   : > { %v5893_v2 = vpop.f32.mrf.mxu1 }
 0xb08   : > { %v5894_v29 = vadd.f32 %v5893_v2, %v5712_v28 }
 0xb09   : > { %v5895_v51 = vpop.f32.mrf.mxu1 }
 0xb0a   : > { %v5904_v48 = vmul.f32 0.1, %v5894_v29  ;;  %v5896_v14 = vadd.f32 %v5895_v51, %v5712_v28 }
 0xb0b   : > { %v5899_v34 = vpop.f32.mrf.mxu1 }
 0xb0c   : > { %v5908_v60 = vmax.f32 %v5894_v29, %v5904_v48  ;;  %v5905_v57 = vmul.f32 0.1, %v5896_v14  ;;  %v5900_v53 = vadd.f32 %v5899_v34, %v5717_v25  ;;  %v5912_v29 = vld [vmem:[%s15494_s8] sm:$0xff] }
 0xb0d   : > { %v5901_v46 = vpop.f32.mrf.mxu1 }
 0xb0e   : > { %v5909_v7 = vmax.f32 %v5896_v14, %v5905_v57  ;;  %v5906_v62 = vmul.f32 0.1, %v5900_v53  ;;  %v5902_v54 = vadd.f32 %v5901_v46, %v5717_v25  ;;  %5950 = vrot.lane.b32.xlu1 %v5908_v60, %s7719_s11 }
 0xb10   : > { %v5907_v50 = vmul.f32 0.1, %v5902_v54  ;;  %5952 = vrot.lane.b32.xlu0 %v5909_v7, %s7719_s11  ;;  %v5910_v63 = vmax.f32 %v5900_v53, %v5906_v62 }
 0xb12   : > { %v5911_v4 = vmax.f32 %v5902_v54, %v5907_v50 }
 0xb14   : > { %5956 = vrot.lane.b32.xlu0 %v5910_v63, %s7719_s11  ;;  %5958 = vrot.lane.b32.xlu1 %v5911_v4, %s7719_s11 }
 0xb18   : > { %5944 = vrot.lane.b32.xlu0 %v5911_v4, %s7720_s12  ;;  %5942 = vrot.lane.b32.xlu1 %v5910_v63, %s7720_s12 }
 0xb1c   : > { %5940 = vrot.lane.b32.xlu0 %v5909_v7, %s7720_s12  ;;  %5938 = vrot.lane.b32.xlu1 %v5908_v60, %s7720_s12 }
 0xb20   : > { %5981 = vrot.lane.b32.xlu1 %v5910_v63, %s7729_s25 }
 0xb80   : > { %v5951_v37 = vpop.permute.xlu1 %5950 }
 0xb81   : > { %5997 = vrot.lane.b32.xlu0 %v5951_v37, %s7729_s25 }
 0xb82   : > { %v5953_v44 = vpop.permute.xlu0 %5952 }
 0xb83   : > { %v5962_v22 = vsel %vm452_vm13, %v5951_v37, %v5953_v44  ;;  %v5963_v19 = vsel %vm452_vm13, %v5953_v44, %v6940_v6 }
 0xb86   : > { %v5957_v42 = vpop.permute.xlu0 %5956  ;;  %v5959_v33 = vpop.permute.xlu1 %5958 }
 0xb87   : > { %v5964_v17 = vsel %vm452_vm13, %v5957_v42, %v5959_v33  ;;  %v5965_v39 = vsel %vm452_vm13, %v5959_v33, %v6939_v35 }
 0xb8a   : > { %v5945_v32 = vpop.permute.xlu0 %5944  ;;  %v5943_v10 = vpop.permute.xlu1 %5942 }
 0xb8b   : > { %v5947_v24 = vsel %vm425_vm14, %v5943_v10, %v5945_v32 }
 0xb8e   : > { %v5941_v52 = vpop.permute.xlu0 %5940  ;;  %v5939_v47 = vpop.permute.xlu1 %5938 }
 0xb8f   : > { %5989 = vrot.lane.b32.xlu1 %v5941_v52, %s7729_s25  ;;  %5985 = vrot.lane.b32.xlu0 %v5939_v47, %s7729_s25  ;;  %v5946_v8 = vsel %vm425_vm14, %v5939_v47, %v5941_v52 }
 0xb92   : > { %v5982_v12 = vpop.permute.xlu1 %5981 }
 0xb93   : > { %6001 = vrot.lane.b32.xlu1 %v5963_v19, %s7729_s25  ;;  %5999 = vrot.lane.b32.xlu0 %v5962_v22, %s7729_s25 }
 0xb97   : > { %6003 = vrot.lane.b32.xlu1 %v5957_v42, %s7729_s25  ;;  %5987 = vrot.lane.b32.xlu0 %v5946_v8, %s7729_s25 }
 0xb9b   : > { %5991 = vrot.lane.b32.xlu1 %v5943_v10, %s7729_s25  ;;  %5995 = vrot.lane.b32.xlu0 %v5945_v32, %s7729_s25 }
 0xb9f   : > { %6005 = vrot.lane.b32.xlu1 %v5964_v17, %s7729_s25  ;;  %6007 = vrot.lane.b32.xlu0 %v5965_v39, %s7729_s25 }
 0xba3   : > { %5993 = vrot.lane.b32.xlu1 %v5947_v24, %s7729_s25  ;;  %5983 = vrot.lane.b32.xlu0 %v5911_v4, %s7729_s25 }
 0xba7   : > { %5979 = vrot.lane.b32.xlu1 %v16773_v5, %s7729_s25  ;;  %5975 = vrot.lane.b32.xlu0 %v5908_v60, %s7729_s25 }
 0xbab   : > { %5977 = vrot.lane.b32.xlu1 %v5909_v7, %s7729_s25  ;;  %5973 = vrot.lane.b32.xlu0 %v16773_v5, %s7729_s25 }
 0xbaf   : > { %5968 = vperm.xlu1 %6925, %v5913_v45  }
 0xbf3   : > { %v5998_v20 = vpop.permute.xlu0 %5997 }
 0xc01   : > { %v5986_v1 = vpop.permute.xlu0 %5985  ;;  %v5990_v15 = vpop.permute.xlu1 %5989 }
 0xc05   : > { %v6000_v31 = vpop.permute.xlu0 %5999  ;;  %v6002_v59 = vpop.permute.xlu1 %6001 }
 0xc06   : > { %v6019_v18 = vsel %vm6009_vm7, %v6000_v31, %v6002_v59  ;;  %v6018_v30 = vsel %vm6009_vm7, %v5998_v20, %v6000_v31 }
 0xc09   : > { %v5988_v55 = vpop.permute.xlu0 %5987  ;;  %v6004_v26 = vpop.permute.xlu1 %6003 }
 0xc0a   : > { %v6015_v43 = vsel %vm6009_vm7, %v5988_v55, %v5990_v15  ;;  %v6014_v49 = vsel %vm6009_vm7, %v5986_v1, %v5988_v55 }
 0xc0d   : > { %v5996_v23 = vpop.permute.xlu0 %5995  ;;  %v5992_v58 = vpop.permute.xlu1 %5991 }
 0xc11   : > { %v6008_v13 = vpop.permute.xlu0 %6007  ;;  %v6006_v3 = vpop.permute.xlu1 %6005 }
 0xc12   : > { %v6020_v5 = vsel %vm6009_vm7, %v6004_v26, %v6006_v3  ;;  %v6021_v16 = vsel %vm6009_vm7, %v6006_v3, %v6008_v13 }
 0xc13   : > { %6058 = vmatprep.subr.mxu1 %v6021_v16 }
 0xc14   : > { %6059 = vmatpush1.msra.mxu1 %v6020_v5 }
 0xc15   : > { %v5984_v40 = vpop.permute.xlu0 %5983  ;;  %6060 = vmatprep.subr.mxu1 %v6019_v18  ;;  %v5994_v41 = vpop.permute.xlu1 %5993 }
 0xc16   : > { %v6016_v11 = vsel %vm6009_vm7, %v5992_v58, %v5994_v41  ;;  %6061 = vmatpush1.msra.mxu1 %v6018_v30  ;;  %v6017_v0 = vsel %vm6009_vm7, %v5994_v41, %v5996_v23  ;;  %v6013_v36 = vsel %vm6009_vm7, %v5982_v12, %v5984_v40 }
 0xc17   : > { %6062 = vmatprep.subr.mxu1 %v6017_v0 }
 0xc18   : > { %6063 = vmatpush1.msra.mxu1 %v6016_v11 }
 0xc19   : > { %v5976_v9 = vpop.permute.xlu0 %5975  ;;  %6064 = vmatprep.subr.mxu1 %v6015_v43  ;;  %v5980_v21 = vpop.permute.xlu1 %5979 }
 0xc1a   : > { %v6012_v56 = vsel %vm6009_vm7, %v5980_v21, %v5982_v12  ;;  %6065 = vmatpush1.msra.mxu1 %v6014_v49 }
 0xc1b   : > { %6066 = vmatprep.subr.mxu1 %v6013_v36 }
 0xc1c   : > { %6067 = vmatpush1.msra.mxu1 %v6012_v56 }
 0xc1d   : > { %v5974_v38 = vpop.permute.xlu0 %5973  ;;  %v5978_v27 = vpop.permute.xlu1 %5977 }
 0xc1e   : > { %v6010_v28 = vsel %vm6009_vm7, %v5974_v38, %v5976_v9  ;;  %v6011_v2 = vsel %vm6009_vm7, %v5976_v9, %v5978_v27 }
 0xc1f   : > { %6068 = vmatprep.subr.mxu1 %v6011_v2 }
 0xc20   : > { %6069 = vmatpush1.msra.mxu1 %v6010_v28 }
 0xc21   : > { %6191 = vmatmul.mubr.msk.f32.vlgmr.msra.gmra.mxu1 %vm6034_vm9, %v5912_v29 }
 0xc2a   : > { %v5969_v51 = vpop.permute.xlu1 %5968 }
 0xce1   : > { %v6104_v48 = vpop.f32.mrf.mxu1 }
 0xce2   : > { %v6105_v14 = vadd.f32 %v6104_v48, %v5969_v51 }
 0xce3   : > { %v6106_v25 = vpop.f32.mrf.mxu1 }
 0xce4   : > { %6109 = vst [vmem:[%s359_s28] sm:$0xff] %v6105_v14  ;;  %v6107_v34 = vadd.f32 %v6106_v25, %v5969_v51 }
 0xce6   : > { %6110 = vst [vmem:[%s359_s28 + $0x8] sm:$0xff] %v6107_v34 }
 0xce7 PF: > { %s20_s13 = sadd.s32 1, %s7704_s13  }
 0xce8   : > { %p17_p4 = scmp.ge.s32.totalorder %s20_s13, 4  }
 0xcea   :  { %19 = sbr.rel (!%p17_p4) target bundleno = 1 (0x1), region = 90 }

</bundles_post_ra>
